<compile_context>
chip_gen: v7x
topology: tpu7x:2x2x1
jax: 0.10.0
libtpu: 0.0.40
codegen_flags: <defaults>
</compile_context>

<pallas_src>
import jax
import jax.numpy as jnp
from jax.experimental import pallas as pl
from jax.experimental.pallas import tpu as pltpu

EPS = 1e-5  # nn.BatchNorm2d default eps
VMEM = pltpu.MemorySpace.VMEM


# ----------------------------------------------------------------------------
# Kernel 1: fused conv(as matmul) + bias + ReLU + 2x2 maxpool + BatchNorm
#           (lane-dense transposed layout, all 4 pool taps unrolled in-body)
# ----------------------------------------------------------------------------
def _conv_pool_bn_kernel(c0, c1, c2, c3, w_ref, b_ref, g_ref, be_ref, o_ref):
    """cX : (K, Np) bf16 im2col columns for pool tap X (Np = N*Hp*Wp)
       w  : (Cout, K) bf16 conv weight, K in (kh, kw, ci) order
       b/g/be : (Cout, 1) f32 conv bias / BN gamma / BN beta
       o  : (Cout, Np) f32 pooled + batch-normalized output."""
    w = w_ref[...]
    b = b_ref[...]
    m = None
    for c in (c0, c1, c2, c3):                       # unrolled 2x2 pool taps
        y = jnp.dot(w, c[...], preferred_element_type=jnp.float32)
        y = jnp.maximum(y + b, 0.0)                  # conv bias + ReLU
        m = y if m is None else jnp.maximum(m, y)    # max-pool accumulate
    # BatchNorm2d (training mode: batch stats, biased variance) over (N,Hp,Wp)
    mean = jnp.mean(m, axis=-1, keepdims=True)                     # (Cout, 1)
    var = jnp.mean(jnp.square(m - mean), axis=-1, keepdims=True)   # biased
    o_ref[...] = (m - mean) * jax.lax.rsqrt(var + EPS) * g_ref[...] + be_ref[...]


def conv_relu_pool_bn(a, wmat, b, gamma, beta, k=5):
    """a: (Cin, N, H, W) f32 -> (Cout, N, Hp, Wp) f32  with Hp=(H-k+1)//2."""
    C, N, H, W = a.shape
    Ho, Wo = H - k + 1, W - k + 1
    Hp, Wp = Ho // 2, Wo // 2
    Np = N * Hp * Wp
    Cout = wmat.shape[0]

    # --- XLA glue: per-pool-tap im2col via stride-2 slices (no 6-D transpose,
    # no intermediate (N,Ho,Wo,K) tensor); K rows ordered (kh, kw, ci).
    taps = []
    for eh in range(2):
        for ew in range(2):
            rows = [
                a[:, :,
                  eh + dh: eh + dh + 2 * Hp: 2,
                  ew + dw: ew + dw + 2 * Wp: 2].reshape(C, Np)
                for dh in range(k) for dw in range(k)
            ]
            taps.append(jnp.concatenate(rows, axis=0).astype(jnp.bfloat16))

    out = pl.pallas_call(
        _conv_pool_bn_kernel,
        out_shape=jax.ShapeDtypeStruct((Cout, Np), jnp.float32),
        in_specs=[pl.BlockSpec(memory_space=VMEM)] * 8,
        out_specs=pl.BlockSpec(memory_space=VMEM),
        compiler_params=pltpu.CompilerParams(
            vmem_limit_bytes=32 * 1024 * 1024,   # safe within v7x's 64 MiB
        ),
    )(taps[0], taps[1], taps[2], taps[3], wmat, b, gamma, beta)
    return out.reshape(Cout, N, Hp, Wp)


# ----------------------------------------------------------------------------
# Kernel 2: fused fc1 + ReLU + fc2 + ReLU + fc3
# ----------------------------------------------------------------------------
def _mlp_kernel(x_ref, w1_ref, b1_ref, w2_ref, b2_ref, w3_ref, b3_ref, o_ref):
    h = jnp.dot(x_ref[...], w1_ref[...], preferred_element_type=jnp.float32)
    h = jnp.maximum(h + b1_ref[...], 0.0)
    h = jnp.dot(h, w2_ref[...], preferred_element_type=jnp.float32)
    h = jnp.maximum(h + b2_ref[...], 0.0)
    o_ref[...] = jnp.dot(h, w3_ref[...],
                         preferred_element_type=jnp.float32) + b3_ref[...]


def mlp(x, w1, b1, w2, b2, w3, b3):
    N = x.shape[0]
    return pl.pallas_call(
        _mlp_kernel,
        out_shape=jax.ShapeDtypeStruct((N, w3.shape[1]), jnp.float32),
        in_specs=[pl.BlockSpec(memory_space=VMEM)] * 7,
        out_specs=pl.BlockSpec(memory_space=VMEM),
        compiler_params=pltpu.CompilerParams(
            vmem_limit_bytes=32 * 1024 * 1024,
        ),
    )(x, w1, b1, w2, b2, w3, b3)


# ----------------------------------------------------------------------------
# Parameters (deterministic, PyTorch-default-style uniform init)
# ----------------------------------------------------------------------------
def init_params(key):
    def u(k, shape, fan_in):
        bound = 1.0 / jnp.sqrt(float(fan_in))
        return jax.random.uniform(k, shape, jnp.float32, -bound, bound)

    ks = jax.random.split(key, 12)
    p = {}
    p["w1"], p["b1"] = u(ks[0], (5, 5, 1, 16), 1 * 25), u(ks[1], (16,), 1 * 25)
    p["w2"], p["b2"] = u(ks[2], (5, 5, 16, 32), 16 * 25), u(ks[3], (32,), 16 * 25)
    p["w3"], p["b3"] = u(ks[4], (5, 5, 32, 64), 32 * 25), u(ks[5], (64,), 32 * 25)
    # fc1 rows are in torch's NCHW flatten order (c, h, w) and are used as-is.
    p["fw1"], p["fb1"] = u(ks[6], (64 * 8 * 8, 120), 4096), u(ks[7], (120,), 4096)
    p["fw2"], p["fb2"] = u(ks[8], (120, 60), 120), u(ks[9], (60,), 120)
    p["fw3"], p["fb3"] = u(ks[10], (60, 1), 60), u(ks[11], (1,), 60)
    # BatchNorm2d defaults: gamma = 1, beta = 0
    p["g1"], p["be1"] = jnp.ones((16,), jnp.float32), jnp.zeros((16,), jnp.float32)
    p["g2"], p["be2"] = jnp.ones((32,), jnp.float32), jnp.zeros((32,), jnp.float32)
    p["g3"], p["be3"] = jnp.ones((64,), jnp.float32), jnp.zeros((64,), jnp.float32)
    return p


def prepare_params(p):
    """One-time layout prep: conv weights to (Cout, K) bf16 matmul form (K rows
    in (kh, kw, ci) order, matching the im2col glue); fc1 weight to bf16;
    per-channel vectors to (Cout, 1) / (1, F) column/row form."""
    def conv_mat(w_hwio):
        kh, kw, cin, cout = w_hwio.shape
        return jnp.transpose(w_hwio.reshape(kh * kw * cin, cout)).astype(jnp.bfloat16)

    kp = {}
    kp["w1m"], kp["w2m"], kp["w3m"] = conv_mat(p["w1"]), conv_mat(p["w2"]), conv_mat(p["w3"])
    for i in (1, 2, 3):
        kp[f"b{i}"] = p[f"b{i}"].reshape(-1, 1)
        kp[f"g{i}"] = p[f"g{i}"].reshape(-1, 1)
        kp[f"be{i}"] = p[f"be{i}"].reshape(-1, 1)
    kp["fw1"] = p["fw1"].astype(jnp.bfloat16)     # the only big FC weight (2MB->1MB)
    kp["fb1"] = p["fb1"].reshape(1, -1)
    kp["fw2"], kp["fb2"] = p["fw2"], p["fb2"].reshape(1, -1)
    kp["fw3"], kp["fb3"] = p["fw3"], p["fb3"].reshape(1, -1)
    return kp


# ----------------------------------------------------------------------------
# Forward pass (mirrors Net.forward)
# ----------------------------------------------------------------------------
def net_forward(x_nchw, kp):
    N = x_nchw.shape[0]
    x = jnp.transpose(x_nchw.astype(jnp.float32), (1, 0, 2, 3))          # NCHW -> CNHW
    x = conv_relu_pool_bn(x, kp["w1m"], kp["b1"], kp["g1"], kp["be1"])   # (16, N, 44, 44)
    x = conv_relu_pool_bn(x, kp["w2m"], kp["b2"], kp["g2"], kp["be2"])   # (32, N, 20, 20)
    x = conv_relu_pool_bn(x, kp["w3m"], kp["b3"], kp["g3"], kp["be3"])   # (64, N,  8,  8)
    # torch's x.view(-1, 64*8*8): tiny (C,N,8,8)->(N,C,8,8) transpose, then flatten
    xf = jnp.transpose(x, (1, 0, 2, 3)).reshape(N, 64 * 8 * 8).astype(jnp.bfloat16)
    return mlp(xf, kp["fw1"], kp["fb1"], kp["fw2"], kp["fb2"],
               kp["fw3"], kp["fb3"])


if __name__ == "__main__":
    key = jax.random.PRNGKey(0)
    k_params, k_x = jax.random.split(key)
    params = prepare_params(init_params(k_params))

    # Input spatial size 92 is implied by fc1 = Linear(64*8*8, 120):
    # 92 -conv5-> 88 -pool-> 44 -conv5-> 40 -pool-> 20 -conv5-> 16 -pool-> 8.
    x = jax.random.normal(k_x, (2, 1, 92, 92), dtype=jnp.float32)

    out = jax.jit(net_forward)(x, params)
    out = jax.block_until_ready(out)
    assert out.shape == (2, 1), out.shape
    assert out.dtype == jnp.float32
    print("KERNEL_OK")
</pallas_src>

<mosaic_0001>
module attributes {stable_mosaic.version = 11 : i64} {
  func.func @_conv_pool_bn_kernel(%arg0: memref<25x3872xbf16, #tpu.memory_space<vmem>>, %arg1: memref<25x3872xbf16, #tpu.memory_space<vmem>>, %arg2: memref<25x3872xbf16, #tpu.memory_space<vmem>>, %arg3: memref<25x3872xbf16, #tpu.memory_space<vmem>>, %arg4: memref<16x25xbf16, #tpu.memory_space<vmem>>, %arg5: memref<16x1xf32, #tpu.memory_space<vmem>>, %arg6: memref<16x1xf32, #tpu.memory_space<vmem>>, %arg7: memref<16x1xf32, #tpu.memory_space<vmem>>, %arg8: memref<16x3872xf32, #tpu.memory_space<vmem>>) attributes {dimension_semantics = [], scalar_prefetch = 0 : i64, scratch_operands = 0 : i64, tpu.core_type = #tpu.core_type<tc>} {
    %c0 = arith.constant 0 : index
    %c0_0 = arith.constant 0 : index
    %0 = vector.load %arg4[%c0, %c0_0] : memref<16x25xbf16, #tpu.memory_space<vmem>>, vector<16x25xbf16>
    %c0_1 = arith.constant 0 : index
    %c0_2 = arith.constant 0 : index
    %1 = vector.load %arg5[%c0_1, %c0_2] : memref<16x1xf32, #tpu.memory_space<vmem>>, vector<16x1xf32>
    %c0_3 = arith.constant 0 : index
    %c0_4 = arith.constant 0 : index
    %2 = vector.load %arg0[%c0_3, %c0_4] : memref<25x3872xbf16, #tpu.memory_space<vmem>>, vector<25x3872xbf16>
    %cst = arith.constant dense<0.000000e+00> : vector<16x3872xf32>
    %3 = tpu.matmul %0, %2, %cst {dimension_numbers = #tpu.dot_dimension_numbers<[1], [0], [0], [1], [0, 0, 1, 1], [], []>} : vector<16x25xbf16>, vector<25x3872xbf16>, vector<16x3872xf32> -> vector<16x3872xf32>
    %4 = vector.broadcast %1 : vector<16x1xf32> to vector<16x3872xf32>
    %5 = arith.addf %3, %4 : vector<16x3872xf32>
    %cst_5 = arith.constant 0.000000e+00 : f32
    %6 = vector.broadcast %cst_5 : f32 to vector<16x3872xf32>
    %7 = arith.maximumf %5, %6 : vector<16x3872xf32>
    %c0_6 = arith.constant 0 : index
    %c0_7 = arith.constant 0 : index
    %8 = vector.load %arg1[%c0_6, %c0_7] : memref<25x3872xbf16, #tpu.memory_space<vmem>>, vector<25x3872xbf16>
    %cst_8 = arith.constant dense<0.000000e+00> : vector<16x3872xf32>
    %9 = tpu.matmul %0, %8, %cst_8 {dimension_numbers = #tpu.dot_dimension_numbers<[1], [0], [0], [1], [0, 0, 1, 1], [], []>} : vector<16x25xbf16>, vector<25x3872xbf16>, vector<16x3872xf32> -> vector<16x3872xf32>
    %10 = vector.broadcast %1 : vector<16x1xf32> to vector<16x3872xf32>
    %11 = arith.addf %9, %10 : vector<16x3872xf32>
    %cst_9 = arith.constant 0.000000e+00 : f32
    %12 = vector.broadcast %cst_9 : f32 to vector<16x3872xf32>
    %13 = arith.maximumf %11, %12 : vector<16x3872xf32>
    %14 = arith.maximumf %7, %13 : vector<16x3872xf32>
    %c0_10 = arith.constant 0 : index
    %c0_11 = arith.constant 0 : index
    %15 = vector.load %arg2[%c0_10, %c0_11] : memref<25x3872xbf16, #tpu.memory_space<vmem>>, vector<25x3872xbf16>
    %cst_12 = arith.constant dense<0.000000e+00> : vector<16x3872xf32>
    %16 = tpu.matmul %0, %15, %cst_12 {dimension_numbers = #tpu.dot_dimension_numbers<[1], [0], [0], [1], [0, 0, 1, 1], [], []>} : vector<16x25xbf16>, vector<25x3872xbf16>, vector<16x3872xf32> -> vector<16x3872xf32>
    %17 = vector.broadcast %1 : vector<16x1xf32> to vector<16x3872xf32>
    %18 = arith.addf %16, %17 : vector<16x3872xf32>
    %cst_13 = arith.constant 0.000000e+00 : f32
    %19 = vector.broadcast %cst_13 : f32 to vector<16x3872xf32>
    %20 = arith.maximumf %18, %19 : vector<16x3872xf32>
    %21 = arith.maximumf %14, %20 : vector<16x3872xf32>
    %c0_14 = arith.constant 0 : index
    %c0_15 = arith.constant 0 : index
    %22 = vector.load %arg3[%c0_14, %c0_15] : memref<25x3872xbf16, #tpu.memory_space<vmem>>, vector<25x3872xbf16>
    %cst_16 = arith.constant dense<0.000000e+00> : vector<16x3872xf32>
    %23 = tpu.matmul %0, %22, %cst_16 {dimension_numbers = #tpu.dot_dimension_numbers<[1], [0], [0], [1], [0, 0, 1, 1], [], []>} : vector<16x25xbf16>, vector<25x3872xbf16>, vector<16x3872xf32> -> vector<16x3872xf32>
    %24 = vector.broadcast %1 : vector<16x1xf32> to vector<16x3872xf32>
    %25 = arith.addf %23, %24 : vector<16x3872xf32>
    %cst_17 = arith.constant 0.000000e+00 : f32
    %26 = vector.broadcast %cst_17 : f32 to vector<16x3872xf32>
    %27 = arith.maximumf %25, %26 : vector<16x3872xf32>
    %28 = arith.maximumf %21, %27 : vector<16x3872xf32>
    %cst_18 = arith.constant dense<0.000000e+00> : vector<16xf32>
    %29 = vector.multi_reduction <add>, %28, %cst_18 [1] : vector<16x3872xf32> to vector<16xf32>
    %30 = vector.shape_cast %29 : vector<16xf32> to vector<16x1xf32>
    %cst_19 = arith.constant 3.872000e+03 : f32
    %31 = vector.broadcast %cst_19 : f32 to vector<16x1xf32>
    %32 = arith.divf %30, %31 : vector<16x1xf32>
    %33 = vector.broadcast %32 : vector<16x1xf32> to vector<16x3872xf32>
    %34 = arith.subf %28, %33 : vector<16x3872xf32>
    %35 = arith.mulf %34, %34 : vector<16x3872xf32>
    %cst_20 = arith.constant dense<0.000000e+00> : vector<16xf32>
    %36 = vector.multi_reduction <add>, %35, %cst_20 [1] : vector<16x3872xf32> to vector<16xf32>
    %37 = vector.shape_cast %36 : vector<16xf32> to vector<16x1xf32>
    %cst_21 = arith.constant 3.872000e+03 : f32
    %38 = vector.broadcast %cst_21 : f32 to vector<16x1xf32>
    %39 = arith.divf %37, %38 : vector<16x1xf32>
    %40 = vector.broadcast %32 : vector<16x1xf32> to vector<16x3872xf32>
    %41 = arith.subf %28, %40 : vector<16x3872xf32>
    %cst_22 = arith.constant 9.99999974E-6 : f32
    %42 = vector.broadcast %cst_22 : f32 to vector<16x1xf32>
    %43 = arith.addf %39, %42 : vector<16x1xf32>
    %44 = math.rsqrt %43 : vector<16x1xf32>
    %45 = vector.broadcast %44 : vector<16x1xf32> to vector<16x3872xf32>
    %46 = arith.mulf %41, %45 : vector<16x3872xf32>
    %c0_23 = arith.constant 0 : index
    %c0_24 = arith.constant 0 : index
    %47 = vector.load %arg6[%c0_23, %c0_24] : memref<16x1xf32, #tpu.memory_space<vmem>>, vector<16x1xf32>
    %48 = vector.broadcast %47 : vector<16x1xf32> to vector<16x3872xf32>
    %49 = arith.mulf %46, %48 : vector<16x3872xf32>
    %c0_25 = arith.constant 0 : index
    %c0_26 = arith.constant 0 : index
    %50 = vector.load %arg7[%c0_25, %c0_26] : memref<16x1xf32, #tpu.memory_space<vmem>>, vector<16x1xf32>
    %51 = vector.broadcast %50 : vector<16x1xf32> to vector<16x3872xf32>
    %52 = arith.addf %49, %51 : vector<16x3872xf32>
    %c0_27 = arith.constant 0 : index
    %c0_28 = arith.constant 0 : index
    %53 = vector.load %arg8[%c0_27, %c0_28] : memref<16x3872xf32, #tpu.memory_space<vmem>>, vector<16x3872xf32>
    tpu.vector_store %arg8[%c0_27, %c0_28], %52 {strides = array<i32>} : memref<16x3872xf32, #tpu.memory_space<vmem>>, vector<16x3872xf32>,
    return
  }
}

module attributes {stable_mosaic.version = 11 : i64} {
  func.func @_conv_pool_bn_kernel(%arg0: memref<400x800xbf16, #tpu.memory_space<vmem>>, %arg1: memref<400x800xbf16, #tpu.memory_space<vmem>>, %arg2: memref<400x800xbf16, #tpu.memory_space<vmem>>, %arg3: memref<400x800xbf16, #tpu.memory_space<vmem>>, %arg4: memref<32x400xbf16, #tpu.memory_space<vmem>>, %arg5: memref<32x1xf32, #tpu.memory_space<vmem>>, %arg6: memref<32x1xf32, #tpu.memory_space<vmem>>, %arg7: memref<32x1xf32, #tpu.memory_space<vmem>>, %arg8: memref<32x800xf32, #tpu.memory_space<vmem>>) attributes {dimension_semantics = [], scalar_prefetch = 0 : i64, scratch_operands = 0 : i64, tpu.core_type = #tpu.core_type<tc>} {
    %c0 = arith.constant 0 : index
    %c0_0 = arith.constant 0 : index
    %0 = vector.load %arg4[%c0, %c0_0] : memref<32x400xbf16, #tpu.memory_space<vmem>>, vector<32x400xbf16>
    %c0_1 = arith.constant 0 : index
    %c0_2 = arith.constant 0 : index
    %1 = vector.load %arg5[%c0_1, %c0_2] : memref<32x1xf32, #tpu.memory_space<vmem>>, vector<32x1xf32>
    %c0_3 = arith.constant 0 : index
    %c0_4 = arith.constant 0 : index
    %2 = vector.load %arg0[%c0_3, %c0_4] : memref<400x800xbf16, #tpu.memory_space<vmem>>, vector<400x800xbf16>
    %cst = arith.constant dense<0.000000e+00> : vector<32x800xf32>
    %3 = tpu.matmul %0, %2, %cst {dimension_numbers = #tpu.dot_dimension_numbers<[1], [0], [0], [1], [0, 0, 1, 1], [], []>} : vector<32x400xbf16>, vector<400x800xbf16>, vector<32x800xf32> -> vector<32x800xf32>
    %4 = vector.broadcast %1 : vector<32x1xf32> to vector<32x800xf32>
    %5 = arith.addf %3, %4 : vector<32x800xf32>
    %cst_5 = arith.constant 0.000000e+00 : f32
    %6 = vector.broadcast %cst_5 : f32 to vector<32x800xf32>
    %7 = arith.maximumf %5, %6 : vector<32x800xf32>
    %c0_6 = arith.constant 0 : index
    %c0_7 = arith.constant 0 : index
    %8 = vector.load %arg1[%c0_6, %c0_7] : memref<400x800xbf16, #tpu.memory_space<vmem>>, vector<400x800xbf16>
    %cst_8 = arith.constant dense<0.000000e+00> : vector<32x800xf32>
    %9 = tpu.matmul %0, %8, %cst_8 {dimension_numbers = #tpu.dot_dimension_numbers<[1], [0], [0], [1], [0, 0, 1, 1], [], []>} : vector<32x400xbf16>, vector<400x800xbf16>, vector<32x800xf32> -> vector<32x800xf32>
    %10 = vector.broadcast %1 : vector<32x1xf32> to vector<32x800xf32>
    %11 = arith.addf %9, %10 : vector<32x800xf32>
    %cst_9 = arith.constant 0.000000e+00 : f32
    %12 = vector.broadcast %cst_9 : f32 to vector<32x800xf32>
    %13 = arith.maximumf %11, %12 : vector<32x800xf32>
    %14 = arith.maximumf %7, %13 : vector<32x800xf32>
    %c0_10 = arith.constant 0 : index
    %c0_11 = arith.constant 0 : index
    %15 = vector.load %arg2[%c0_10, %c0_11] : memref<400x800xbf16, #tpu.memory_space<vmem>>, vector<400x800xbf16>
    %cst_12 = arith.constant dense<0.000000e+00> : vector<32x800xf32>
    %16 = tpu.matmul %0, %15, %cst_12 {dimension_numbers = #tpu.dot_dimension_numbers<[1], [0], [0], [1], [0, 0, 1, 1], [], []>} : vector<32x400xbf16>, vector<400x800xbf16>, vector<32x800xf32> -> vector<32x800xf32>
    %17 = vector.broadcast %1 : vector<32x1xf32> to vector<32x800xf32>
    %18 = arith.addf %16, %17 : vector<32x800xf32>
    %cst_13 = arith.constant 0.000000e+00 : f32
    %19 = vector.broadcast %cst_13 : f32 to vector<32x800xf32>
    %20 = arith.maximumf %18, %19 : vector<32x800xf32>
    %21 = arith.maximumf %14, %20 : vector<32x800xf32>
    %c0_14 = arith.constant 0 : index
    %c0_15 = arith.constant 0 : index
    %22 = vector.load %arg3[%c0_14, %c0_15] : memref<400x800xbf16, #tpu.memory_space<vmem>>, vector<400x800xbf16>
    %cst_16 = arith.constant dense<0.000000e+00> : vector<32x800xf32>
    %23 = tpu.matmul %0, %22, %cst_16 {dimension_numbers = #tpu.dot_dimension_numbers<[1], [0], [0], [1], [0, 0, 1, 1], [], []>} : vector<32x400xbf16>, vector<400x800xbf16>, vector<32x800xf32> -> vector<32x800xf32>
    %24 = vector.broadcast %1 : vector<32x1xf32> to vector<32x800xf32>
    %25 = arith.addf %23, %24 : vector<32x800xf32>
    %cst_17 = arith.constant 0.000000e+00 : f32
    %26 = vector.broadcast %cst_17 : f32 to vector<32x800xf32>
    %27 = arith.maximumf %25, %26 : vector<32x800xf32>
    %28 = arith.maximumf %21, %27 : vector<32x800xf32>
    %cst_18 = arith.constant dense<0.000000e+00> : vector<32xf32>
    %29 = vector.multi_reduction <add>, %28, %cst_18 [1] : vector<32x800xf32> to vector<32xf32>
    %30 = vector.shape_cast %29 : vector<32xf32> to vector<32x1xf32>
    %cst_19 = arith.constant 8.000000e+02 : f32
    %31 = vector.broadcast %cst_19 : f32 to vector<32x1xf32>
    %32 = arith.divf %30, %31 : vector<32x1xf32>
    %33 = vector.broadcast %32 : vector<32x1xf32> to vector<32x800xf32>
    %34 = arith.subf %28, %33 : vector<32x800xf32>
    %35 = arith.mulf %34, %34 : vector<32x800xf32>
    %cst_20 = arith.constant dense<0.000000e+00> : vector<32xf32>
    %36 = vector.multi_reduction <add>, %35, %cst_20 [1] : vector<32x800xf32> to vector<32xf32>
    %37 = vector.shape_cast %36 : vector<32xf32> to vector<32x1xf32>
    %cst_21 = arith.constant 8.000000e+02 : f32
    %38 = vector.broadcast %cst_21 : f32 to vector<32x1xf32>
    %39 = arith.divf %37, %38 : vector<32x1xf32>
    %40 = vector.broadcast %32 : vector<32x1xf32> to vector<32x800xf32>
    %41 = arith.subf %28, %40 : vector<32x800xf32>
    %cst_22 = arith.constant 9.99999974E-6 : f32
    %42 = vector.broadcast %cst_22 : f32 to vector<32x1xf32>
    %43 = arith.addf %39, %42 : vector<32x1xf32>
    %44 = math.rsqrt %43 : vector<32x1xf32>
    %45 = vector.broadcast %44 : vector<32x1xf32> to vector<32x800xf32>
    %46 = arith.mulf %41, %45 : vector<32x800xf32>
    %c0_23 = arith.constant 0 : index
    %c0_24 = arith.constant 0 : index
    %47 = vector.load %arg6[%c0_23, %c0_24] : memref<32x1xf32, #tpu.memory_space<vmem>>, vector<32x1xf32>
    %48 = vector.broadcast %47 : vector<32x1xf32> to vector<32x800xf32>
    %49 = arith.mulf %46, %48 : vector<32x800xf32>
    %c0_25 = arith.constant 0 : index
    %c0_26 = arith.constant 0 : index
    %50 = vector.load %arg7[%c0_25, %c0_26] : memref<32x1xf32, #tpu.memory_space<vmem>>, vector<32x1xf32>
    %51 = vector.broadcast %50 : vector<32x1xf32> to vector<32x800xf32>
    %52 = arith.addf %49, %51 : vector<32x800xf32>
    %c0_27 = arith.constant 0 : index
    %c0_28 = arith.constant 0 : index
    %53 = vector.load %arg8[%c0_27, %c0_28] : memref<32x800xf32, #tpu.memory_space<vmem>>, vector<32x800xf32>
    tpu.vector_store %arg8[%c0_27, %c0_28], %52 {strides = array<i32>} : memref<32x800xf32, #tpu.memory_space<vmem>>, vector<32x800xf32>,
    return
  }
}

module attributes {stable_mosaic.version = 11 : i64} {
  func.func @_conv_pool_bn_kernel(%arg0: memref<800x128xbf16, #tpu.memory_space<vmem>>, %arg1: memref<800x128xbf16, #tpu.memory_space<vmem>>, %arg2: memref<800x128xbf16, #tpu.memory_space<vmem>>, %arg3: memref<800x128xbf16, #tpu.memory_space<vmem>>, %arg4: memref<64x800xbf16, #tpu.memory_space<vmem>>, %arg5: memref<64x1xf32, #tpu.memory_space<vmem>>, %arg6: memref<64x1xf32, #tpu.memory_space<vmem>>, %arg7: memref<64x1xf32, #tpu.memory_space<vmem>>, %arg8: memref<64x128xf32, #tpu.memory_space<vmem>>) attributes {dimension_semantics = [], scalar_prefetch = 0 : i64, scratch_operands = 0 : i64, tpu.core_type = #tpu.core_type<tc>} {
    %c0 = arith.constant 0 : index
    %c0_0 = arith.constant 0 : index
    %0 = vector.load %arg4[%c0, %c0_0] : memref<64x800xbf16, #tpu.memory_space<vmem>>, vector<64x800xbf16>
    %c0_1 = arith.constant 0 : index
    %c0_2 = arith.constant 0 : index
    %1 = vector.load %arg5[%c0_1, %c0_2] : memref<64x1xf32, #tpu.memory_space<vmem>>, vector<64x1xf32>
    %c0_3 = arith.constant 0 : index
    %c0_4 = arith.constant 0 : index
    %2 = vector.load %arg0[%c0_3, %c0_4] : memref<800x128xbf16, #tpu.memory_space<vmem>>, vector<800x128xbf16>
    %cst = arith.constant dense<0.000000e+00> : vector<64x128xf32>
    %3 = tpu.matmul %0, %2, %cst {dimension_numbers = #tpu.dot_dimension_numbers<[1], [0], [0], [1], [0, 0, 1, 1], [], []>} : vector<64x800xbf16>, vector<800x128xbf16>, vector<64x128xf32> -> vector<64x128xf32>
    %4 = vector.broadcast %1 : vector<64x1xf32> to vector<64x128xf32>
    %5 = arith.addf %3, %4 : vector<64x128xf32>
    %cst_5 = arith.constant 0.000000e+00 : f32
    %6 = vector.broadcast %cst_5 : f32 to vector<64x128xf32>
    %7 = arith.maximumf %5, %6 : vector<64x128xf32>
    %c0_6 = arith.constant 0 : index
    %c0_7 = arith.constant 0 : index
    %8 = vector.load %arg1[%c0_6, %c0_7] : memref<800x128xbf16, #tpu.memory_space<vmem>>, vector<800x128xbf16>
    %cst_8 = arith.constant dense<0.000000e+00> : vector<64x128xf32>
    %9 = tpu.matmul %0, %8, %cst_8 {dimension_numbers = #tpu.dot_dimension_numbers<[1], [0], [0], [1], [0, 0, 1, 1], [], []>} : vector<64x800xbf16>, vector<800x128xbf16>, vector<64x128xf32> -> vector<64x128xf32>
    %10 = vector.broadcast %1 : vector<64x1xf32> to vector<64x128xf32>
    %11 = arith.addf %9, %10 : vector<64x128xf32>
    %cst_9 = arith.constant 0.000000e+00 : f32
    %12 = vector.broadcast %cst_9 : f32 to vector<64x128xf32>
    %13 = arith.maximumf %11, %12 : vector<64x128xf32>
    %14 = arith.maximumf %7, %13 : vector<64x128xf32>
    %c0_10 = arith.constant 0 : index
    %c0_11 = arith.constant 0 : index
    %15 = vector.load %arg2[%c0_10, %c0_11] : memref<800x128xbf16, #tpu.memory_space<vmem>>, vector<800x128xbf16>
    %cst_12 = arith.constant dense<0.000000e+00> : vector<64x128xf32>
    %16 = tpu.matmul %0, %15, %cst_12 {dimension_numbers = #tpu.dot_dimension_numbers<[1], [0], [0], [1], [0, 0, 1, 1], [], []>} : vector<64x800xbf16>, vector<800x128xbf16>, vector<64x128xf32> -> vector<64x128xf32>
    %17 = vector.broadcast %1 : vector<64x1xf32> to vector<64x128xf32>
    %18 = arith.addf %16, %17 : vector<64x128xf32>
    %cst_13 = arith.constant 0.000000e+00 : f32
    %19 = vector.broadcast %cst_13 : f32 to vector<64x128xf32>
    %20 = arith.maximumf %18, %19 : vector<64x128xf32>
    %21 = arith.maximumf %14, %20 : vector<64x128xf32>
    %c0_14 = arith.constant 0 : index
    %c0_15 = arith.constant 0 : index
    %22 = vector.load %arg3[%c0_14, %c0_15] : memref<800x128xbf16, #tpu.memory_space<vmem>>, vector<800x128xbf16>
    %cst_16 = arith.constant dense<0.000000e+00> : vector<64x128xf32>
    %23 = tpu.matmul %0, %22, %cst_16 {dimension_numbers = #tpu.dot_dimension_numbers<[1], [0], [0], [1], [0, 0, 1, 1], [], []>} : vector<64x800xbf16>, vector<800x128xbf16>, vector<64x128xf32> -> vector<64x128xf32>
    %24 = vector.broadcast %1 : vector<64x1xf32> to vector<64x128xf32>
    %25 = arith.addf %23, %24 : vector<64x128xf32>
    %cst_17 = arith.constant 0.000000e+00 : f32
    %26 = vector.broadcast %cst_17 : f32 to vector<64x128xf32>
    %27 = arith.maximumf %25, %26 : vector<64x128xf32>
    %28 = arith.maximumf %21, %27 : vector<64x128xf32>
    %cst_18 = arith.constant dense<0.000000e+00> : vector<64xf32>
    %29 = vector.multi_reduction <add>, %28, %cst_18 [1] : vector<64x128xf32> to vector<64xf32>
    %30 = vector.shape_cast %29 : vector<64xf32> to vector<64x1xf32>
    %cst_19 = arith.constant 1.280000e+02 : f32
    %31 = vector.broadcast %cst_19 : f32 to vector<64x1xf32>
    %32 = arith.divf %30, %31 : vector<64x1xf32>
    %33 = vector.broadcast %32 : vector<64x1xf32> to vector<64x128xf32>
    %34 = arith.subf %28, %33 : vector<64x128xf32>
    %35 = arith.mulf %34, %34 : vector<64x128xf32>
    %cst_20 = arith.constant dense<0.000000e+00> : vector<64xf32>
    %36 = vector.multi_reduction <add>, %35, %cst_20 [1] : vector<64x128xf32> to vector<64xf32>
    %37 = vector.shape_cast %36 : vector<64xf32> to vector<64x1xf32>
    %cst_21 = arith.constant 1.280000e+02 : f32
    %38 = vector.broadcast %cst_21 : f32 to vector<64x1xf32>
    %39 = arith.divf %37, %38 : vector<64x1xf32>
    %40 = vector.broadcast %32 : vector<64x1xf32> to vector<64x128xf32>
    %41 = arith.subf %28, %40 : vector<64x128xf32>
    %cst_22 = arith.constant 9.99999974E-6 : f32
    %42 = vector.broadcast %cst_22 : f32 to vector<64x1xf32>
    %43 = arith.addf %39, %42 : vector<64x1xf32>
    %44 = math.rsqrt %43 : vector<64x1xf32>
    %45 = vector.broadcast %44 : vector<64x1xf32> to vector<64x128xf32>
    %46 = arith.mulf %41, %45 : vector<64x128xf32>
    %c0_23 = arith.constant 0 : index
    %c0_24 = arith.constant 0 : index
    %47 = vector.load %arg6[%c0_23, %c0_24] : memref<64x1xf32, #tpu.memory_space<vmem>>, vector<64x1xf32>
    %48 = vector.broadcast %47 : vector<64x1xf32> to vector<64x128xf32>
    %49 = arith.mulf %46, %48 : vector<64x128xf32>
    %c0_25 = arith.constant 0 : index
    %c0_26 = arith.constant 0 : index
    %50 = vector.load %arg7[%c0_25, %c0_26] : memref<64x1xf32, #tpu.memory_space<vmem>>, vector<64x1xf32>
    %51 = vector.broadcast %50 : vector<64x1xf32> to vector<64x128xf32>
    %52 = arith.addf %49, %51 : vector<64x128xf32>
    %c0_27 = arith.constant 0 : index
    %c0_28 = arith.constant 0 : index
    %53 = vector.load %arg8[%c0_27, %c0_28] : memref<64x128xf32, #tpu.memory_space<vmem>>, vector<64x128xf32>
    tpu.vector_store %arg8[%c0_27, %c0_28], %52 {strides = array<i32>} : memref<64x128xf32, #tpu.memory_space<vmem>>, vector<64x128xf32>,
    return
  }
}

module attributes {stable_mosaic.version = 11 : i64} {
  func.func @_mlp_kernel(%arg0: memref<2x4096xbf16, #tpu.memory_space<vmem>>, %arg1: memref<4096x120xbf16, #tpu.memory_space<vmem>>, %arg2: memref<1x120xf32, #tpu.memory_space<vmem>>, %arg3: memref<120x60xf32, #tpu.memory_space<vmem>>, %arg4: memref<1x60xf32, #tpu.memory_space<vmem>>, %arg5: memref<60x1xf32, #tpu.memory_space<vmem>>, %arg6: memref<1x1xf32, #tpu.memory_space<vmem>>, %arg7: memref<2x1xf32, #tpu.memory_space<vmem>>) attributes {dimension_semantics = [], scalar_prefetch = 0 : i64, scratch_operands = 0 : i64, tpu.core_type = #tpu.core_type<tc>} {
    %c0 = arith.constant 0 : index
    %c0_0 = arith.constant 0 : index
    %0 = vector.load %arg0[%c0, %c0_0] : memref<2x4096xbf16, #tpu.memory_space<vmem>>, vector<2x4096xbf16>
    %c0_1 = arith.constant 0 : index
    %c0_2 = arith.constant 0 : index
    %1 = vector.load %arg1[%c0_1, %c0_2] : memref<4096x120xbf16, #tpu.memory_space<vmem>>, vector<4096x120xbf16>
    %cst = arith.constant dense<0.000000e+00> : vector<2x120xf32>
    %2 = tpu.matmul %0, %1, %cst {dimension_numbers = #tpu.dot_dimension_numbers<[1], [0], [0], [1], [0, 0, 1, 1], [], []>} : vector<2x4096xbf16>, vector<4096x120xbf16>, vector<2x120xf32> -> vector<2x120xf32>
    %c0_3 = arith.constant 0 : index
    %c0_4 = arith.constant 0 : index
    %3 = vector.load %arg2[%c0_3, %c0_4] : memref<1x120xf32, #tpu.memory_space<vmem>>, vector<1x120xf32>
    %4 = vector.broadcast %3 : vector<1x120xf32> to vector<2x120xf32>
    %5 = arith.addf %2, %4 : vector<2x120xf32>
    %cst_5 = arith.constant 0.000000e+00 : f32
    %6 = vector.broadcast %cst_5 : f32 to vector<2x120xf32>
    %7 = arith.maximumf %5, %6 : vector<2x120xf32>
    %c0_6 = arith.constant 0 : index
    %c0_7 = arith.constant 0 : index
    %8 = vector.load %arg3[%c0_6, %c0_7] : memref<120x60xf32, #tpu.memory_space<vmem>>, vector<120x60xf32>
    %cst_8 = arith.constant dense<0.000000e+00> : vector<2x60xf32>
    %9 = tpu.matmul %7, %8, %cst_8 {dimension_numbers = #tpu.dot_dimension_numbers<[1], [0], [0], [1], [0, 0, 1, 1], [], []>} : vector<2x120xf32>, vector<120x60xf32>, vector<2x60xf32> -> vector<2x60xf32>
    %c0_9 = arith.constant 0 : index
    %c0_10 = arith.constant 0 : index
    %10 = vector.load %arg4[%c0_9, %c0_10] : memref<1x60xf32, #tpu.memory_space<vmem>>, vector<1x60xf32>
    %11 = vector.broadcast %10 : vector<1x60xf32> to vector<2x60xf32>
    %12 = arith.addf %9, %11 : vector<2x60xf32>
    %cst_11 = arith.constant 0.000000e+00 : f32
    %13 = vector.broadcast %cst_11 : f32 to vector<2x60xf32>
    %14 = arith.maximumf %12, %13 : vector<2x60xf32>
    %c0_12 = arith.constant 0 : index
    %c0_13 = arith.constant 0 : index
    %15 = vector.load %arg5[%c0_12, %c0_13] : memref<60x1xf32, #tpu.memory_space<vmem>>, vector<60x1xf32>
    %cst_14 = arith.constant dense<0.000000e+00> : vector<2x1xf32>
    %16 = tpu.matmul %14, %15, %cst_14 {dimension_numbers = #tpu.dot_dimension_numbers<[1], [0], [0], [1], [0, 0, 1, 1], [], []>} : vector<2x60xf32>, vector<60x1xf32>, vector<2x1xf32> -> vector<2x1xf32>
    %c0_15 = arith.constant 0 : index
    %c0_16 = arith.constant 0 : index
    %17 = vector.load %arg6[%c0_15, %c0_16] : memref<1x1xf32, #tpu.memory_space<vmem>>, vector<1x1xf32>
    %18 = vector.broadcast %17 : vector<1x1xf32> to vector<2x1xf32>
    %19 = arith.addf %16, %18 : vector<2x1xf32>
    %c0_17 = arith.constant 0 : index
    %c0_18 = arith.constant 0 : index
    %20 = vector.load %arg7[%c0_17, %c0_18] : memref<2x1xf32, #tpu.memory_space<vmem>>, vector<2x1xf32>
    tpu.vector_store %arg7[%c0_17, %c0_18], %19 {strides = array<i32>} : memref<2x1xf32, #tpu.memory_space<vmem>>, vector<2x1xf32>,
    return
  }
}

</mosaic_0001>

<bundles_post_ra>
// kernel: net_forward.4
= control target key start
LH: loop header
LB: loop body
LE: loop exit
PB: predicated region body
PF: predicated region fallthrough
CT: control target
= control target key end

     0   :  { %vm398_vm0 = vcmask 1043456   ;;  %vm399_vm1 = vcmask 1044480   ;;  %v6267_v1 = vmov 65535   ;;  %v6268_v3 = vmov 0   ;;  %s9351_s0 = inlined_call_operand.vmem [shape: bf16[25,3872], index: 0, kind: input, shape index: {}]   ;;  %s9352_s4 = inlined_call_operand.vmem [shape: bf16[16,25], index: 4, kind: input, shape index: {}]   ;;  %s9353_s1 = inlined_call_operand.vmem [shape: bf16[25,3872], index: 1, kind: input, shape index: {}]   ;;  %s9354_s5 = inlined_call_operand.vmem [shape: f32[16,1], index: 5, kind: input, shape index: {}]   ;;  %s9355_s2 = inlined_call_operand.vmem [shape: bf16[25,3872], index: 2, kind: input, shape index: {}]   ;;  %s9356_s3 = inlined_call_operand.vmem [shape: bf16[25,3872], index: 3, kind: input, shape index: {}]   ;;  %s9357_s6 = inlined_call_operand.vmem [shape: f32[16,1], index: 6, kind: input, shape index: {}]   ;;  %s9358_s7 = inlined_call_operand.vmem [shape: f32[16,1], index: 7, kind: input, shape index: {}]   ;;  %s9359_s8 = inlined_call_operand.vmem [shape: f32[16,3872], index: 8, kind: output, shape index: {}]  }
   0x1   :  { %v5892_v0 = vld [vmem:[%s9351_s0 + $0x4] ss:$124 sps:$4 sm:$0xff]   ;;  %v400_v2 = vsel %vm398_vm0, 4294967295, %v6267_v1  ;;  %527 = vmatprep.mubr.bf16.mxu0 %v6268_v3  ;;  %570 = vmatprep.mubr.bf16.mxu1 %v6268_v3  ;;  %v5894_v4 = vld [vmem:[%s9351_s0 + $0xc] ss:$124 sps:$4 sm:$0xff]   ;;  %vm394_vm2 = vcmask 203776  }
   0x2   :  { %5890 = vset.pattern.permute.xlu0 %v6268_v3  ;;  %5891 = vset.pattern.permute.xlu1 %v6268_v3  ;;  %v5896_v5 = vld [vmem:[%s9351_s0] ss:$124 sps:$4 sm:$0xff]   ;;  %v5897_v6 = vld [vmem:[%s9351_s0 + $0x8] ss:$124 sps:$4 sm:$0xff]   ;;  %v6332_v7 = vsel %vm399_vm1, %v400_v2, 0  ;;  %vm6270_vm3 = vmmov 0  }
   0x3   :  { %495 = vmatprep.subr.bf16.mxu0 %v5892_v0  ;;  %538 = vmatprep.subr.bf16.mxu1 %v5894_v4  ;;  %v5898_v8 = vld [vmem:[%s9351_s0 + $0xfc] ss:$124 sps:$4 sm:$0x1f]   ;;  %v5900_v9 = vld [vmem:[%s9351_s0 + $0x104] ss:$124 sps:$4 sm:$0x1f]  }
   0x4   :  { %496 = vmatpush1.bf16.msra.mxu0 %v5896_v5  ;;  %539 = vmatpush1.bf16.msra.mxu1 %v5897_v6  ;;  %v406_v10 = vand.u32 %v5898_v8, %v6332_v7  ;;  %v5902_v11 = vld [vmem:[%s9351_s0 + $0xf8] ss:$124 sps:$4 sm:$0x1f]   ;;  %v5903_v12 = vld [vmem:[%s9351_s0 + $0x100] ss:$124 sps:$4 sm:$0x1f]   ;;  %v412_v13 = vand.u32 %v5900_v9, %v6332_v7 }
   0x5   :  { %v6351_v14 = vld [vmem:[%s9352_s4] sm:$0xff]   ;;  %v403_v15 = vand.u32 %v5902_v11, %v6332_v7  ;;  %v409_v16 = vand.u32 %v5903_v12, %v6332_v7  ;;  %v5905_v17 = vld [vmem:[%s9351_s0 + $0x10] ss:$124 sps:$4 sm:$0xff]   ;;  %v5908_v19 = vld [vmem:[%s9351_s0 + $0x18] ss:$124 sps:$4 sm:$0xff]   ;;  %vm5016_vm4 = vcmask 261120  }
   0x6   :  { %497 = vmatprep.subr.bf16.mxu0 %v406_v10  ;;  %v5907_v18 = vld [vmem:[%s9351_s0 + $0x14] ss:$124 sps:$4 sm:$0xff]   ;;  %540 = vmatprep.subr.bf16.mxu1 %v412_v13  ;;  %v5910_v20 = vld [vmem:[%s9351_s0 + $0x1c] ss:$124 sps:$4 sm:$0xff]   ;;  %v5919_v29 = vld [vmem:[%s9351_s0 + $0x24] ss:$124 sps:$4 sm:$0xff]  }
   0x7   :  { %v5911_v21 = vld [vmem:[%s9351_s0 + $0x108] ss:$124 sps:$4 sm:$0x1f]   ;;  %v5914_v23 = vld [vmem:[%s9351_s0 + $0x110] ss:$124 sps:$4 sm:$0x1f]  }
   0x8   :  { %498 = vmatpush1.bf16.msra.mxu0 %v403_v15  ;;  %541 = vmatpush1.bf16.msra.mxu1 %v409_v16  ;;  %v5913_v22 = vld [vmem:[%s9351_s0 + $0x10c] ss:$124 sps:$4 sm:$0x1f]   ;;  %v5916_v25 = vld [vmem:[%s9351_s0 + $0x114] ss:$124 sps:$4 sm:$0x1f]   ;;  %v415_v26 = vand.u32 %v5911_v21, %v6332_v7  ;;  %v421_v27 = vand.u32 %v5914_v23, %v6332_v7 }
   0x9   :  { %581 = vmatprep.subr.bf16.mxu0 %v5907_v18  ;;  %624 = vmatprep.subr.bf16.mxu1 %v5910_v20  ;;  %v418_v24 = vand.u32 %v5913_v22, %v6332_v7  ;;  %v424_v28 = vand.u32 %v5916_v25, %v6332_v7  ;;  %v5922_v30 = vld [vmem:[%s9351_s0 + $0x2c] ss:$124 sps:$4 sm:$0xff]   ;;  %v5917_v31 = vld [vmem:[%s9351_s0 + $0x20] ss:$124 sps:$4 sm:$0xff]   ;;  %v5931_v39 = vld [vmem:[%s9351_s0 + $0x34] ss:$124 sps:$4 sm:$0xff]  }
   0xa   :  { %v5920_v32 = vld [vmem:[%s9351_s0 + $0x28] ss:$124 sps:$4 sm:$0xff]   ;;  %v5923_v33 = vld [vmem:[%s9351_s0 + $0x118] ss:$124 sps:$4 sm:$0x1f]  }
   0xb   :  { %5592 = vmatmul.mubr.msk.bf16.vlgmr.msra.gmra.mrb[0].mxu0 %vm394_vm2, %v6351_v14  ;;  %5593 = vmatmul.mubr.msk.bf16.vlgmr.msra.gmra.mrb[0].mxu1 %vm394_vm2, %v6351_v14  ;;  %v5925_v34 = vld [vmem:[%s9351_s0 + $0x11c] ss:$124 sps:$4 sm:$0x1f]   ;;  %v5928_v36 = vld [vmem:[%s9351_s0 + $0x124] ss:$124 sps:$4 sm:$0x1f]   ;;  %v427_v40 = vand.u32 %v5923_v33, %v6332_v7 }
   0xc   :  { %582 = vmatpush1.bf16.msra.mxu0 %v5905_v17  ;;  %625 = vmatpush1.bf16.msra.mxu1 %v5908_v19  ;;  %v5926_v35 = vld [vmem:[%s9351_s0 + $0x120] ss:$124 sps:$4 sm:$0x1f]   ;;  %v430_v37 = vand.u32 %v5925_v34, %v6332_v7  ;;  %v436_v38 = vand.u32 %v5928_v36, %v6332_v7  ;;  %v5937_v43 = vld [vmem:[%s9351_s0 + $0x12c] ss:$124 sps:$4 sm:$0x1f]  }
   0xd   :  { %583 = vmatprep.subr.bf16.mxu0 %v418_v24  ;;  %613 = vmatprep.mubr.bf16.mxu0 %v6268_v3  ;;  %v433_v41 = vand.u32 %v5926_v35, %v6332_v7  ;;  %v5934_v42 = vld [vmem:[%s9351_s0 + $0x3c] ss:$124 sps:$4 sm:$0xff]   ;;  %v5929_v44 = vld [vmem:[%s9351_s0 + $0x30] ss:$124 sps:$4 sm:$0xff]   ;;  %v442_v49 = vand.u32 %v5937_v43, %v6332_v7  ;;  %v5943_v51 = vld [vmem:[%s9351_s0 + $0x44] ss:$124 sps:$4 sm:$0xff]  }
   0xe   :  { %656 = vmatprep.mubr.bf16.mxu1 %v6268_v3  ;;  %626 = vmatprep.subr.bf16.mxu1 %v424_v28  ;;  %v5940_v45 = vld [vmem:[%s9351_s0 + $0x134] ss:$124 sps:$4 sm:$0x1f]   ;;  %v5935_v47 = vld [vmem:[%s9351_s0 + $0x128] ss:$124 sps:$4 sm:$0x1f]  }
   0xf   :  { %v5932_v46 = vld [vmem:[%s9351_s0 + $0x38] ss:$124 sps:$4 sm:$0xff]   ;;  %v5938_v48 = vld [vmem:[%s9351_s0 + $0x130] ss:$124 sps:$4 sm:$0x1f]   ;;  %v448_v50 = vand.u32 %v5940_v45, %v6332_v7  ;;  %v439_v52 = vand.u32 %v5935_v47, %v6332_v7  ;;  %v6269_v34 = vmov 0.0  }
  0x10   :  { %584 = vmatpush1.bf16.msra.mxu0 %v415_v26  ;;  %627 = vmatpush1.bf16.msra.mxu1 %v421_v27  ;;  %v445_v53 = vand.u32 %v5938_v48, %v6332_v7  ;;  %v5949_v54 = vld [vmem:[%s9351_s0 + $0x13c] ss:$124 sps:$4 sm:$0x1f]   ;;  %v5946_v55 = vld [vmem:[%s9351_s0 + $0x4c] ss:$124 sps:$4 sm:$0xff]  }
  0x11   :  { %667 = vmatprep.subr.bf16.mxu0 %v5919_v29  ;;  %710 = vmatprep.subr.bf16.mxu1 %v5922_v30  ;;  %v5952_v56 = vld [vmem:[%s9351_s0 + $0x144] ss:$124 sps:$4 sm:$0x1f]   ;;  %v5947_v59 = vld [vmem:[%s9351_s0 + $0x138] ss:$124 sps:$4 sm:$0x1f]   ;;  %v454_v61 = vand.u32 %v5949_v54, %v6332_v7 }
  0x12   :  { %v5941_v57 = vld [vmem:[%s9351_s0 + $0x40] ss:$124 sps:$4 sm:$0xff]   ;;  %v5944_v58 = vld [vmem:[%s9351_s0 + $0x48] ss:$124 sps:$4 sm:$0xff]   ;;  %v460_v62 = vand.u32 %v5952_v56, %v6332_v7  ;;  %v5955_v63 = vld [vmem:[%s9351_s0 + $0x54] ss:$124 sps:$4 sm:$0xff]   ;;  %v451_v0 = vand.u32 %v5947_v59, %v6332_v7 }
  0x13   :  { %5594 = vmatmul.mubr.msk.bf16.vlgmr.msra.gmra.mrb[4].mxu0 %vm394_vm2, %v6351_v14  ;;  %5595 = vmatmul.mubr.msk.bf16.vlgmr.msra.gmra.mrb[4].mxu1 %vm394_vm2, %v6351_v14  ;;  %v5950_v60 = vld [vmem:[%s9351_s0 + $0x140] ss:$124 sps:$4 sm:$0x1f]   ;;  %v5961_v4 = vld [vmem:[%s9351_s0 + $0x14c] ss:$124 sps:$4 sm:$0x1f]  }
  0x14   :  { %668 = vmatpush1.bf16.msra.mxu0 %v5917_v31  ;;  %711 = vmatpush1.bf16.msra.mxu1 %v5920_v32  ;;  %v457_v1 = vand.u32 %v5950_v60, %v6332_v7  ;;  %v5958_v2 = vld [vmem:[%s9351_s0 + $0x5c] ss:$124 sps:$4 sm:$0xff]   ;;  %v5964_v5 = vld [vmem:[%s9351_s0 + $0x154] ss:$124 sps:$4 sm:$0x1f]   ;;  %v466_v11 = vand.u32 %v5961_v4, %v6332_v7  ;;  %v33_v54 = vld [vmem:[%s9354_s5 + $0x8] sm:$0xff] }
  0x15   :  { %669 = vmatprep.subr.bf16.mxu0 %v430_v37  ;;  %712 = vmatprep.subr.bf16.mxu1 %v436_v38  ;;  %v5953_v6 = vld [vmem:[%s9351_s0 + $0x50] ss:$124 sps:$4 sm:$0xff]   ;;  %v5959_v8 = vld [vmem:[%s9351_s0 + $0x148] ss:$124 sps:$4 sm:$0x1f]   ;;  %v472_v12 = vand.u32 %v5964_v5, %v6332_v7 }
  0x16   :  { %699 = vmatprep.mubr.bf16.mxu0 %v6268_v3  ;;  %742 = vmatprep.mubr.bf16.mxu1 %v6268_v3  ;;  %v5956_v9 = vld [vmem:[%s9351_s0 + $0x58] ss:$124 sps:$4 sm:$0xff]   ;;  %v5962_v10 = vld [vmem:[%s9351_s0 + $0x150] ss:$124 sps:$4 sm:$0x1f]   ;;  %v463_v15 = vand.u32 %v5959_v8, %v6332_v7 }
  0x17   :  { %v5967_v13 = vld [vmem:[%s9351_s0 + $0x64] ss:$124 sps:$4 sm:$0xff]   ;;  %v469_v16 = vand.u32 %v5962_v10, %v6332_v7  ;;  %v5973_v17 = vld [vmem:[%s9351_s0 + $0x15c] ss:$124 sps:$4 sm:$0x1f]  }
  0x18   :  { %670 = vmatpush1.bf16.msra.mxu0 %v427_v40  ;;  %713 = vmatpush1.bf16.msra.mxu1 %v433_v41  ;;  %v5970_v18 = vld [vmem:[%s9351_s0 + $0x6c] ss:$124 sps:$4 sm:$0xff]   ;;  %v5976_v19 = vld [vmem:[%s9351_s0 + $0x164] ss:$124 sps:$4 sm:$0x1f]   ;;  %v478_v24 = vand.u32 %v5973_v17, %v6332_v7 }
  0x19   :  { %753 = vmatprep.subr.bf16.mxu0 %v5931_v39  ;;  %796 = vmatprep.subr.bf16.mxu1 %v5934_v42  ;;  %v5965_v20 = vld [vmem:[%s9351_s0 + $0x60] ss:$124 sps:$4 sm:$0xff]   ;;  %v5968_v21 = vld [vmem:[%s9351_s0 + $0x68] ss:$124 sps:$4 sm:$0xff]   ;;  %v484_v25 = vand.u32 %v5976_v19, %v6332_v7  ;;  %v5979_v28 = vld [vmem:[%s9351_s0 + $0x74] ss:$124 sps:$4 sm:$0xff]  }
  0x1a   :  { %v5971_v22 = vld [vmem:[%s9351_s0 + $0x158] ss:$124 sps:$4 sm:$0x1f]   ;;  %v5974_v23 = vld [vmem:[%s9351_s0 + $0x160] ss:$124 sps:$4 sm:$0x1f]  }
  0x1b   :  { %5596 = vmatmul.mubr.msk.bf16.vlgmr.msra.gmra.mrb[8].mxu0 %vm394_vm2, %v6351_v14  ;;  %5597 = vmatmul.mubr.msk.bf16.vlgmr.msra.gmra.mrb[8].mxu1 %vm394_vm2, %v6351_v14  ;;  %v475_v26 = vand.u32 %v5971_v22, %v6332_v7  ;;  %v481_v27 = vand.u32 %v5974_v23, %v6332_v7  ;;  %v5983_v29 = vld [vmem:[%s9351_s0 + $0x16c] ss:$124 sps:$4 sm:$0x1f]   ;;  %v5980_v32 = vld [vmem:[%s9351_s0 + $0x78] ss:$124 sps:$4 sm:$0xff]  }
  0x1c   :  { %754 = vmatpush1.bf16.msra.mxu0 %v5929_v44  ;;  %797 = vmatpush1.bf16.msra.mxu1 %v5932_v46  ;;  %v5977_v30 = vld [vmem:[%s9351_s0 + $0x70] ss:$124 sps:$4 sm:$0xff]   ;;  %v5981_v31 = vld [vmem:[%s9351_s0 + $0x168] ss:$124 sps:$4 sm:$0x1f]   ;;  %v490_v35 = vand.u32 %v5983_v29, %v6332_v7 }
  0x1d   :  { %755 = vmatprep.subr.bf16.mxu0 %v442_v49  ;;  %798 = vmatprep.subr.bf16.mxu1 %v448_v50  ;;  %v5984_v33 = vld [vmem:[%s9351_s0 + $0x170] ss:$124 sps:$4 sm:$0x1f]   ;;  %v5987_v36 = vld [vmem:[%s9353_s1 + $0x4] ss:$124 sps:$4 sm:$0xff]   ;;  %v487_v38 = vand.u32 %v5981_v31, %v6332_v7 }
  0x1e   :  { %785 = vmatprep.mubr.bf16.mxu0 %v6268_v3  ;;  %828 = vmatprep.mubr.bf16.mxu1 %v6268_v3  ;;  %v5990_v37 = vld [vmem:[%s9353_s1 + $0xc] ss:$124 sps:$4 sm:$0xff]   ;;  %v493_v39 = vand.u32 %v5984_v33, %v6332_v7  ;;  %v5993_v40 = vld [vmem:[%s9353_s1 + $0xfc] ss:$124 sps:$4 sm:$0x1f]   ;;  %v32_v46 = vld [vmem:[%s9354_s5] sm:$0xff] }
  0x1f   :  { %v5996_v41 = vld [vmem:[%s9353_s1 + $0x104] ss:$124 sps:$4 sm:$0x1f]   ;;  %v5991_v43 = vld [vmem:[%s9353_s1 + $0xf8] ss:$124 sps:$4 sm:$0x1f]   ;;  %v1592_v47 = vand.u32 %v5993_v40, %v6332_v7  ;;  %100 = vperm.xlu0 %5890, %v32_v46  }
  0x20   :  { %756 = vmatpush1.bf16.msra.mxu0 %v439_v52  ;;  %799 = vmatpush1.bf16.msra.mxu1 %v445_v53  ;;  %v5985_v42 = vld [vmem:[%s9353_s1] ss:$124 sps:$4 sm:$0xff]   ;;  %v5988_v44 = vld [vmem:[%s9353_s1 + $0x8] ss:$124 sps:$4 sm:$0xff]   ;;  %v1598_v48 = vand.u32 %v5996_v41, %v6332_v7  ;;  %v5999_v49 = vld [vmem:[%s9353_s1 + $0x14] ss:$124 sps:$4 sm:$0xff]  }
  0x21   :  { %839 = vmatprep.subr.bf16.mxu0 %v5943_v51  ;;  %882 = vmatprep.subr.bf16.mxu1 %v5946_v55  ;;  %v5994_v45 = vld [vmem:[%s9353_s1 + $0x100] ss:$124 sps:$4 sm:$0x1f]   ;;  %v1589_v51 = vand.u32 %v5991_v43, %v6332_v7  ;;  %v6005_v53 = vld [vmem:[%s9353_s1 + $0x10c] ss:$124 sps:$4 sm:$0x1f]  }
  0x22   :  { %v6002_v50 = vld [vmem:[%s9353_s1 + $0x1c] ss:$124 sps:$4 sm:$0xff]   ;;  %v1595_v52 = vand.u32 %v5994_v45, %v6332_v7  ;;  %v6008_v55 = vld [vmem:[%s9353_s1 + $0x114] ss:$124 sps:$4 sm:$0x1f]   ;;  %v1604_v60 = vand.u32 %v6005_v53, %v6332_v7 }
  0x23   :  { %5598 = vmatmul.mubr.msk.bf16.vlgmr.msra.gmra.mrb[12].mxu0 %vm394_vm2, %v6351_v14  ;;  %5599 = vmatmul.mubr.msk.bf16.vlgmr.msra.gmra.mrb[12].mxu1 %vm394_vm2, %v6351_v14  ;;  %v5997_v56 = vld [vmem:[%s9353_s1 + $0x10] ss:$124 sps:$4 sm:$0xff]   ;;  %v6020_v4 = vld [vmem:[%s9353_s1 + $0x124] ss:$124 sps:$4 sm:$0x1f]  }
  0x24   :  { %840 = vmatpush1.bf16.msra.mxu0 %v5941_v57  ;;  %883 = vmatpush1.bf16.msra.mxu1 %v5944_v58  ;;  %v6000_v57 = vld [vmem:[%s9353_s1 + $0x18] ss:$124 sps:$4 sm:$0xff]   ;;  %v6003_v58 = vld [vmem:[%s9353_s1 + $0x108] ss:$124 sps:$4 sm:$0x1f]  }
  0x25   :  { %841 = vmatprep.subr.bf16.mxu0 %v454_v61  ;;  %884 = vmatprep.subr.bf16.mxu1 %v460_v62  ;;  %v6006_v59 = vld [vmem:[%s9353_s1 + $0x110] ss:$124 sps:$4 sm:$0x1f]   ;;  %v1610_v61 = vand.u32 %v6008_v55, %v6332_v7  ;;  %v6011_v62 = vld [vmem:[%s9353_s1 + $0x24] ss:$124 sps:$4 sm:$0xff]  }
  0x26   :  { %871 = vmatprep.mubr.bf16.mxu0 %v6268_v3  ;;  %914 = vmatprep.mubr.bf16.mxu1 %v6268_v3  ;;  %v6009_v5 = vld [vmem:[%s9353_s1 + $0x20] ss:$124 sps:$4 sm:$0xff]   ;;  %v6015_v8 = vld [vmem:[%s9353_s1 + $0x118] ss:$124 sps:$4 sm:$0x1f]  }
  0x27   :  { %105 = vperm.xlu0 %5890, %v33_v54   ;;  %v6026_v17 = vld [vmem:[%s9353_s1 + $0x3c] ss:$124 sps:$4 sm:$0xff]   ;;  %v6021_v19 = vld [vmem:[%s9353_s1 + $0x30] ss:$124 sps:$4 sm:$0xff]  }
  0x28   :  { %842 = vmatpush1.bf16.msra.mxu0 %v451_v0  ;;  %885 = vmatpush1.bf16.msra.mxu1 %v457_v1  ;;  %v1601_v0 = vand.u32 %v6003_v58, %v6332_v7  ;;  %v1607_v1 = vand.u32 %v6006_v59, %v6332_v7  ;;  %v6030_v22 = vld [vmem:[%s9353_s1 + $0x130] ss:$124 sps:$4 sm:$0x1f]   ;;  %v6041_v29 = vld [vmem:[%s9353_s1 + $0x13c] ss:$124 sps:$4 sm:$0x1f]  }
  0x29   :  { %925 = vmatprep.subr.bf16.mxu0 %v5955_v63  ;;  %968 = vmatprep.subr.bf16.mxu1 %v5958_v2  ;;  %v6014_v63 = vld [vmem:[%s9353_s1 + $0x2c] ss:$124 sps:$4 sm:$0xff]   ;;  %v6017_v2 = vld [vmem:[%s9353_s1 + $0x11c] ss:$124 sps:$4 sm:$0x1f]  }
  0x2a   :  { %v1616_v10 = vand.u32 %v6017_v2, %v6332_v7  ;;  %v6033_v31 = vld [vmem:[%s9353_s1 + $0x40] ss:$124 sps:$4 sm:$0xff]   ;;  %v6039_v33 = vld [vmem:[%s9353_s1 + $0x138] ss:$124 sps:$4 sm:$0x1f]  }
  0x2b   :  { %5600 = vmatmul.mubr.msk.bf16.vlgmr.msra.gmra.mrb[16].mxu0 %vm394_vm2, %v6351_v14  ;;  %5601 = vmatmul.mubr.msk.bf16.vlgmr.msra.gmra.mrb[16].mxu1 %vm394_vm2, %v6351_v14  ;;  %v6047_v40 = vld [vmem:[%s9353_s1 + $0x54] ss:$124 sps:$4 sm:$0xff]   ;;  %v6053_v41 = vld [vmem:[%s9353_s1 + $0x14c] ss:$124 sps:$4 sm:$0x1f]  }
  0x2c   :  { %926 = vmatpush1.bf16.msra.mxu0 %v5953_v6  ;;  %969 = vmatpush1.bf16.msra.mxu1 %v5956_v9  ;;  %v6012_v6 = vld [vmem:[%s9353_s1 + $0x28] ss:$124 sps:$4 sm:$0xff]   ;;  %v6018_v9 = vld [vmem:[%s9353_s1 + $0x120] ss:$124 sps:$4 sm:$0x1f]  }
  0x2d   :  { %927 = vmatprep.subr.bf16.mxu0 %v466_v11  ;;  %970 = vmatprep.subr.bf16.mxu1 %v472_v12  ;;  %v1622_v11 = vand.u32 %v6020_v4, %v6332_v7  ;;  %v1613_v12 = vand.u32 %v6015_v8, %v6332_v7  ;;  %v6056_v43 = vld [vmem:[%s9353_s1 + $0x154] ss:$124 sps:$4 sm:$0x1f]   ;;  %v6051_v46 = vld [vmem:[%s9353_s1 + $0x148] ss:$124 sps:$4 sm:$0x1f]  }
  0x2e   :  { %957 = vmatprep.mubr.bf16.mxu0 %v6268_v3  ;;  %1000 = vmatprep.mubr.bf16.mxu1 %v6268_v3  ;;  %v6048_v45 = vld [vmem:[%s9353_s1 + $0x58] ss:$124 sps:$4 sm:$0xff]   ;;  %v6062_v53 = vld [vmem:[%s9353_s1 + $0x6c] ss:$124 sps:$4 sm:$0xff]   ;;  %v6856_v8 = vld [vmem:[%s9352_s4] sm:$0xff]  }
  0x2f   :  { %v6065_v54 = vld [vmem:[%s9353_s1 + $0x15c] ss:$124 sps:$4 sm:$0x1f]   ;;  %v6068_v55 = vld [vmem:[%s9353_s1 + $0x164] ss:$124 sps:$4 sm:$0x1f]  }
  0x30   :  { %928 = vmatpush1.bf16.msra.mxu0 %v463_v15  ;;  %971 = vmatpush1.bf16.msra.mxu1 %v469_v16  ;;  %v6023_v15 = vld [vmem:[%s9353_s1 + $0x34] ss:$124 sps:$4 sm:$0xff]   ;;  %v6029_v16 = vld [vmem:[%s9353_s1 + $0x12c] ss:$124 sps:$4 sm:$0x1f]  }
  0x31   :  { %1011 = vmatprep.subr.bf16.mxu0 %v5967_v13  ;;  %1054 = vmatprep.subr.bf16.mxu1 %v5970_v18  ;;  %v1619_v13 = vand.u32 %v6018_v9, %v6332_v7  ;;  %v6032_v18 = vld [vmem:[%s9353_s1 + $0x134] ss:$124 sps:$4 sm:$0x1f]   ;;  %v1628_v23 = vand.u32 %v6029_v16, %v6332_v7  ;;  %v6066_v59 = vld [vmem:[%s9353_s1 + $0x160] ss:$124 sps:$4 sm:$0x1f]  }
  0x32   :  { %v6063_v58 = vld [vmem:[%s9353_s1 + $0x158] ss:$124 sps:$4 sm:$0x1f]   ;;  %v6073_v4 = vld [vmem:[%s9353_s1 + $0x168] ss:$124 sps:$4 sm:$0x1f]  }
  0x33   :  { %5602 = vmatmul.mubr.msk.bf16.vlgmr.msra.gmra.mrb[20].mxu0 %vm394_vm2, %v6351_v14  ;;  %5603 = vmatmul.mubr.msk.bf16.vlgmr.msra.gmra.mrb[20].mxu1 %vm394_vm2, %v6351_v14  ;;  %v6072_v2 = vld [vmem:[%s9353_s1 + $0x78] ss:$124 sps:$4 sm:$0xff]   ;;  %v1673_v9 = vand.u32 %v6073_v4, %v6332_v7  ;;  %v6077_v16 = vld [vmem:[%s9355_s2] ss:$124 sps:$4 sm:$0xff]  }
  0x34   :  { %1012 = vmatpush1.bf16.msra.mxu0 %v5965_v20  ;;  %1055 = vmatpush1.bf16.msra.mxu1 %v5968_v21  ;;  %v6024_v20 = vld [vmem:[%s9353_s1 + $0x38] ss:$124 sps:$4 sm:$0xff]   ;;  %v6027_v21 = vld [vmem:[%s9353_s1 + $0x128] ss:$124 sps:$4 sm:$0x1f]  }
  0x35   :  { %1013 = vmatprep.subr.bf16.mxu0 %v478_v24  ;;  %1056 = vmatprep.subr.bf16.mxu1 %v484_v25  ;;  %v1634_v24 = vand.u32 %v6032_v18, %v6332_v7  ;;  %v6035_v25 = vld [vmem:[%s9353_s1 + $0x44] ss:$124 sps:$4 sm:$0xff]   ;;  %v6083_v18 = vld [vmem:[%s9355_s2 + $0xf8] ss:$124 sps:$4 sm:$0x1f]  }
  0x36   :  { %1043 = vmatprep.mubr.bf16.mxu0 %v6268_v3  ;;  %1086 = vmatprep.mubr.bf16.mxu1 %v6268_v3  ;;  %v6134_v4 = vld [vmem:[%s9355_s2 + $0x140] ss:$124 sps:$4 sm:$0x1f]  }
  0x38   :  { %1014 = vmatpush1.bf16.msra.mxu0 %v475_v26  ;;  %1057 = vmatpush1.bf16.msra.mxu1 %v481_v27  ;;  %v6038_v26 = vld [vmem:[%s9353_s1 + $0x4c] ss:$124 sps:$4 sm:$0xff]   ;;  %v1625_v27 = vand.u32 %v6027_v21, %v6332_v7 }
  0x39   :  { %1097 = vmatprep.subr.bf16.mxu0 %v5979_v28  ;;  %5854 = vmatprep.subr.bf16.mxu1 %v6269_v34  ;;  %v1631_v28 = vand.u32 %v6030_v22, %v6332_v7  ;;  %v6091_v22 = vld [vmem:[%s9355_s2 + $0x14] ss:$124 sps:$4 sm:$0xff]  }
  0x3b   :  { %5604 = vmatmul.mubr.msk.bf16.vlgmr.msra.gmra.mrb[24].mxu0 %vm394_vm2, %v6351_v14  ;;  %5605 = vmatmul.mubr.msk.bf16.vlgmr.msra.gmra.mrb[24].mxu1 %vm394_vm2, %v6351_v14 }
  0x3c   :  { %1098 = vmatpush1.bf16.msra.mxu0 %v5977_v30  ;;  %5855 = vmatpush3.bf16.msra.mxu1 %v5980_v32  ;;  %v6044_v30 = vld [vmem:[%s9353_s1 + $0x144] ss:$124 sps:$4 sm:$0x1f]  }
  0x3d   :  { %1099 = vmatprep.subr.bf16.mxu0 %v490_v35  ;;  %5856 = vmatprep.subr.bf16.mxu1 %v6269_v34  ;;  %v6036_v32 = vld [vmem:[%s9353_s1 + $0x48] ss:$124 sps:$4 sm:$0xff]   ;;  %v6042_v35 = vld [vmem:[%s9353_s1 + $0x140] ss:$124 sps:$4 sm:$0x1f]  }
  0x3e   :  { %1129 = vmatprep.mubr.bf16.mxu0 %v6268_v3  ;;  %5858 = vmatprep.mubr.msk.bf16.mxu1 %vm6270_vm3, %v6269_v34 }
  0x40   :  { %1100 = vmatpush1.bf16.msra.mxu0 %v487_v38  ;;  %5857 = vmatpush3.bf16.msra.mxu1 %v493_v39  ;;  %v1637_v38 = vand.u32 %v6039_v33, %v6332_v7  ;;  %v1643_v39 = vand.u32 %v6042_v35, %v6332_v7  ;;  %v6103_v35 = vld [vmem:[%s9355_s2 + $0x24] ss:$124 sps:$4 sm:$0xff]  }
  0x41   :  { %1681 = vmatprep.subr.bf16.mxu0 %v5987_v36  ;;  %1724 = vmatprep.subr.bf16.mxu1 %v5990_v37  ;;  %v1640_v36 = vand.u32 %v6041_v29, %v6332_v7  ;;  %v1646_v37 = vand.u32 %v6044_v30, %v6332_v7  ;;  %v6095_v29 = vld [vmem:[%s9355_s2 + $0x108] ss:$124 sps:$4 sm:$0x1f]   ;;  %v6092_v30 = vld [vmem:[%s9355_s2 + $0x18] ss:$124 sps:$4 sm:$0xff]  }
  0x43   :  { %5606 = vmatmul.mubr.msk.bf16.vlgmr.msra.gmra.mrb[28].mxu0 %vm394_vm2, %v6351_v14  ;;  %5859 = vmatmul.mubr.msk.bf16.vlgmr.msra.gmra.mrb[28].mxu1 %vm394_vm2, %v6351_v14 }
  0x44   :  { %1682 = vmatpush1.bf16.msra.mxu0 %v5985_v42  ;;  %1725 = vmatpush1.bf16.msra.mxu1 %v5988_v44  ;;  %v6050_v42 = vld [vmem:[%s9353_s1 + $0x5c] ss:$124 sps:$4 sm:$0xff]   ;;  %v6045_v44 = vld [vmem:[%s9353_s1 + $0x50] ss:$124 sps:$4 sm:$0xff]  }
  0x45   :  { %1683 = vmatprep.subr.bf16.mxu0 %v1592_v47  ;;  %1726 = vmatprep.subr.bf16.mxu1 %v1598_v48  ;;  %v6054_v47 = vld [vmem:[%s9353_s1 + $0x150] ss:$124 sps:$4 sm:$0x1f]   ;;  %v1652_v48 = vand.u32 %v6053_v41, %v6332_v7  ;;  %v6101_v41 = vld [vmem:[%s9355_s2 + $0x20] ss:$124 sps:$4 sm:$0xff]  }
  0x46   :  { %1713 = vmatprep.mubr.bf16.mxu0 %v6268_v3  ;;  %1756 = vmatprep.mubr.bf16.mxu1 %v6268_v3 }
  0x48   :  { %1684 = vmatpush1.bf16.msra.mxu0 %v1589_v51  ;;  %1727 = vmatpush1.bf16.msra.mxu1 %v1595_v52  ;;  %v1649_v51 = vand.u32 %v6051_v46, %v6332_v7  ;;  %v1655_v52 = vand.u32 %v6054_v47, %v6332_v7  ;;  %v6115_v47 = vld [vmem:[%s9355_s2 + $0x34] ss:$124 sps:$4 sm:$0xff]  }
  0x49   :  { %1767 = vmatprep.subr.bf16.mxu0 %v5999_v49  ;;  %1810 = vmatprep.subr.bf16.mxu1 %v6002_v50  ;;  %v1658_v49 = vand.u32 %v6056_v43, %v6332_v7  ;;  %v6059_v50 = vld [vmem:[%s9353_s1 + $0x64] ss:$124 sps:$4 sm:$0xff]   ;;  %v6107_v43 = vld [vmem:[%s9355_s2 + $0x118] ss:$124 sps:$4 sm:$0x1f]  }
  0x4b   :  { %5670 = vmatmul.mubr.msk.bf16.vlgmr.msra.gmra.mrb[32].mxu0 %vm394_vm2, %v6351_v14  ;;  %5671 = vmatmul.mubr.msk.bf16.vlgmr.msra.gmra.mrb[32].mxu1 %vm394_vm2, %v6351_v14 }
  0x4c   :  { %1768 = vmatpush1.bf16.msra.mxu0 %v5997_v56  ;;  %1811 = vmatpush1.bf16.msra.mxu1 %v6000_v57  ;;  %v6057_v56 = vld [vmem:[%s9353_s1 + $0x60] ss:$124 sps:$4 sm:$0xff]   ;;  %v6060_v57 = vld [vmem:[%s9353_s1 + $0x68] ss:$124 sps:$4 sm:$0xff]  }
  0x4d   :  { %1769 = vmatprep.subr.bf16.mxu0 %v1604_v60  ;;  %1812 = vmatprep.subr.bf16.mxu1 %v1610_v61  ;;  %v1664_v60 = vand.u32 %v6065_v54, %v6332_v7  ;;  %v1670_v61 = vand.u32 %v6068_v55, %v6332_v7  ;;  %v6116_v54 = vld [vmem:[%s9355_s2 + $0x38] ss:$124 sps:$4 sm:$0xff]   ;;  %v6119_v55 = vld [vmem:[%s9355_s2 + $0x128] ss:$124 sps:$4 sm:$0x1f]  }
  0x4e   :  { %1799 = vmatprep.mubr.bf16.mxu0 %v6268_v3  ;;  %1842 = vmatprep.mubr.bf16.mxu1 %v6268_v3 }
  0x50   :  { %1770 = vmatpush1.bf16.msra.mxu0 %v1601_v0  ;;  %1813 = vmatpush1.bf16.msra.mxu1 %v1607_v1  ;;  %v6071_v0 = vld [vmem:[%s9353_s1 + $0x74] ss:$124 sps:$4 sm:$0xff]   ;;  %v6075_v1 = vld [vmem:[%s9353_s1 + $0x16c] ss:$124 sps:$4 sm:$0x1f]  }
  0x51   :  { %1853 = vmatprep.subr.bf16.mxu0 %v6011_v62  ;;  %1896 = vmatprep.subr.bf16.mxu1 %v6014_v63  ;;  %v1661_v62 = vand.u32 %v6063_v58, %v6332_v7  ;;  %v1667_v63 = vand.u32 %v6066_v59, %v6332_v7  ;;  %v2873_v59 = vand.u32 %v6119_v55, %v6332_v7 }
  0x53   :  { %5672 = vmatmul.mubr.msk.bf16.vlgmr.msra.gmra.mrb[36].mxu0 %vm394_vm2, %v6351_v14  ;;  %5673 = vmatmul.mubr.msk.bf16.vlgmr.msra.gmra.mrb[36].mxu1 %vm394_vm2, %v6351_v14 }
  0x54   :  { %1854 = vmatpush1.bf16.msra.mxu0 %v6009_v5  ;;  %1897 = vmatpush1.bf16.msra.mxu1 %v6012_v6  ;;  %v6076_v5 = vld [vmem:[%s9353_s1 + $0x170] ss:$124 sps:$4 sm:$0x1f]   ;;  %v1676_v6 = vand.u32 %v6075_v1, %v6332_v7  ;;  %v6125_v1 = vld [vmem:[%s9355_s2 + $0x40] ss:$124 sps:$4 sm:$0xff]  }
  0x55   :  { %1855 = vmatprep.subr.bf16.mxu0 %v1616_v10  ;;  %1898 = vmatprep.subr.bf16.mxu1 %v1622_v11  ;;  %v1679_v10 = vand.u32 %v6076_v5, %v6332_v7  ;;  %v6079_v11 = vld [vmem:[%s9355_s2 + $0x4] ss:$124 sps:$4 sm:$0xff]  }
  0x56   :  { %1885 = vmatprep.mubr.bf16.mxu0 %v6268_v3  ;;  %1928 = vmatprep.mubr.bf16.mxu1 %v6268_v3 }
  0x58   :  { %1856 = vmatpush1.bf16.msra.mxu0 %v1613_v12  ;;  %1899 = vmatpush1.bf16.msra.mxu1 %v1619_v13  ;;  %v6085_v12 = vld [vmem:[%s9355_s2 + $0xfc] ss:$124 sps:$4 sm:$0x1f]   ;;  %v6082_v13 = vld [vmem:[%s9355_s2 + $0xc] ss:$124 sps:$4 sm:$0xff]  }
  0x59   :  { %1939 = vmatprep.subr.bf16.mxu0 %v6023_v15  ;;  %1982 = vmatprep.subr.bf16.mxu1 %v6026_v17  ;;  %v6088_v15 = vld [vmem:[%s9355_s2 + $0x104] ss:$124 sps:$4 sm:$0x1f]  }
  0x5a   :  { %v6080_v17 = vld [vmem:[%s9355_s2 + $0x8] ss:$124 sps:$4 sm:$0xff]   ;;  %v2846_v21 = vand.u32 %v6088_v15, %v6332_v7  ;;  %v6148_v15 = vld [vmem:[%s9355_s2 + $0x154] ss:$124 sps:$4 sm:$0x1f]  }
  0x5b   :  { %5674 = vmatmul.mubr.msk.bf16.vlgmr.msra.gmra.mrb[40].mxu0 %vm394_vm2, %v6351_v14  ;;  %5675 = vmatmul.mubr.msk.bf16.vlgmr.msra.gmra.mrb[40].mxu1 %vm394_vm2, %v6351_v14 }
  0x5c   :  { %1940 = vmatpush1.bf16.msra.mxu0 %v6021_v19  ;;  %1983 = vmatpush1.bf16.msra.mxu1 %v6024_v20  ;;  %v6086_v19 = vld [vmem:[%s9355_s2 + $0x100] ss:$124 sps:$4 sm:$0x1f]   ;;  %v2840_v20 = vand.u32 %v6085_v12, %v6332_v7 }
  0x5d   :  { %1941 = vmatprep.subr.bf16.mxu0 %v1628_v23  ;;  %1984 = vmatprep.subr.bf16.mxu1 %v1634_v24  ;;  %v6094_v23 = vld [vmem:[%s9355_s2 + $0x1c] ss:$124 sps:$4 sm:$0xff]   ;;  %v2837_v24 = vand.u32 %v6083_v18, %v6332_v7  ;;  %v6143_v18 = vld [vmem:[%s9355_s2 + $0x148] ss:$124 sps:$4 sm:$0x1f]  }
  0x5e   :  { %1971 = vmatprep.mubr.bf16.mxu0 %v6268_v3  ;;  %2014 = vmatprep.mubr.bf16.mxu1 %v6268_v3  ;;  %v6142_v12 = vld [vmem:[%s9355_s2 + $0x5c] ss:$124 sps:$4 sm:$0xff]  }
  0x60   :  { %1942 = vmatpush1.bf16.msra.mxu0 %v1625_v27  ;;  %1985 = vmatpush1.bf16.msra.mxu1 %v1631_v28  ;;  %v6100_v27 = vld [vmem:[%s9355_s2 + $0x114] ss:$124 sps:$4 sm:$0x1f]  }
  0x61   :  { %2025 = vmatprep.subr.bf16.mxu0 %v6035_v25  ;;  %2068 = vmatprep.subr.bf16.mxu1 %v6038_v26  ;;  %v2843_v25 = vand.u32 %v6086_v19, %v6332_v7  ;;  %v6097_v26 = vld [vmem:[%s9355_s2 + $0x10c] ss:$124 sps:$4 sm:$0x1f]   ;;  %v2858_v33 = vand.u32 %v6100_v27, %v6332_v7  ;;  %v6160_v27 = vld [vmem:[%s9355_s2 + $0x164] ss:$124 sps:$4 sm:$0x1f]  }
  0x62   :  { %v6089_v28 = vld [vmem:[%s9355_s2 + $0x10] ss:$124 sps:$4 sm:$0xff]  }
  0x63   :  { %5676 = vmatmul.mubr.msk.bf16.vlgmr.msra.gmra.mrb[44].mxu0 %vm394_vm2, %v6351_v14  ;;  %5677 = vmatmul.mubr.msk.bf16.vlgmr.msra.gmra.mrb[44].mxu1 %vm394_vm2, %v6351_v14  ;;  %v6146_v19 = vld [vmem:[%s9355_s2 + $0x150] ss:$124 sps:$4 sm:$0x1f]  }
  0x64   :  { %2026 = vmatpush1.bf16.msra.mxu0 %v6033_v31  ;;  %2069 = vmatpush1.bf16.msra.mxu1 %v6036_v32  ;;  %v6098_v31 = vld [vmem:[%s9355_s2 + $0x110] ss:$124 sps:$4 sm:$0x1f]   ;;  %v2852_v32 = vand.u32 %v6097_v26, %v6332_v7  ;;  %v6157_v26 = vld [vmem:[%s9355_s2 + $0x15c] ss:$124 sps:$4 sm:$0x1f]  }
  0x65   :  { %2027 = vmatprep.subr.bf16.mxu0 %v1640_v36  ;;  %2070 = vmatprep.subr.bf16.mxu1 %v1646_v37  ;;  %v2849_v36 = vand.u32 %v6095_v29, %v6332_v7  ;;  %v2855_v37 = vand.u32 %v6098_v31, %v6332_v7  ;;  %v6155_v29 = vld [vmem:[%s9355_s2 + $0x158] ss:$124 sps:$4 sm:$0x1f]   ;;  %v6158_v31 = vld [vmem:[%s9355_s2 + $0x160] ss:$124 sps:$4 sm:$0x1f]  }
  0x66   :  { %2057 = vmatprep.mubr.bf16.mxu0 %v6268_v3  ;;  %2100 = vmatprep.mubr.bf16.mxu1 %v6268_v3 }
  0x68   :  { %2028 = vmatpush1.bf16.msra.mxu0 %v1637_v38  ;;  %2071 = vmatpush1.bf16.msra.mxu1 %v1643_v39  ;;  %v6106_v38 = vld [vmem:[%s9355_s2 + $0x2c] ss:$124 sps:$4 sm:$0xff]   ;;  %v6109_v39 = vld [vmem:[%s9355_s2 + $0x11c] ss:$124 sps:$4 sm:$0x1f]  }
  0x69   :  { %2111 = vmatprep.subr.bf16.mxu0 %v6047_v40  ;;  %2154 = vmatprep.subr.bf16.mxu1 %v6050_v42  ;;  %v6112_v40 = vld [vmem:[%s9355_s2 + $0x124] ss:$124 sps:$4 sm:$0x1f]  }
  0x6a   :  { %v6104_v42 = vld [vmem:[%s9355_s2 + $0x28] ss:$124 sps:$4 sm:$0xff]   ;;  %v2870_v46 = vand.u32 %v6112_v40, %v6332_v7  ;;  %v6164_v40 = vld [vmem:[%s9355_s2 + $0x78] ss:$124 sps:$4 sm:$0xff]  }
  0x6b   :  { %5678 = vmatmul.mubr.msk.bf16.vlgmr.msra.gmra.mrb[48].mxu0 %vm394_vm2, %v6351_v14  ;;  %5679 = vmatmul.mubr.msk.bf16.vlgmr.msra.gmra.mrb[48].mxu1 %vm394_vm2, %v6351_v14 }
  0x6c   :  { %2112 = vmatpush1.bf16.msra.mxu0 %v6045_v44  ;;  %2155 = vmatpush1.bf16.msra.mxu1 %v6048_v45  ;;  %v6110_v44 = vld [vmem:[%s9355_s2 + $0x120] ss:$124 sps:$4 sm:$0x1f]   ;;  %v2864_v45 = vand.u32 %v6109_v39, %v6332_v7  ;;  %v6161_v39 = vld [vmem:[%s9355_s2 + $0x70] ss:$124 sps:$4 sm:$0xff]  }
  0x6d   :  { %2113 = vmatprep.subr.bf16.mxu0 %v1652_v48  ;;  %2156 = vmatprep.subr.bf16.mxu1 %v1658_v49  ;;  %v6118_v48 = vld [vmem:[%s9355_s2 + $0x3c] ss:$124 sps:$4 sm:$0xff]   ;;  %v2861_v49 = vand.u32 %v6107_v43, %v6332_v7 }
  0x6e   :  { %2143 = vmatprep.mubr.bf16.mxu0 %v6268_v3  ;;  %2186 = vmatprep.mubr.bf16.mxu1 %v6268_v3 }
  0x70   :  { %2114 = vmatpush1.bf16.msra.mxu0 %v1649_v51  ;;  %2157 = vmatpush1.bf16.msra.mxu1 %v1655_v52  ;;  %v6121_v51 = vld [vmem:[%s9355_s2 + $0x12c] ss:$124 sps:$4 sm:$0x1f]   ;;  %v6124_v52 = vld [vmem:[%s9355_s2 + $0x134] ss:$124 sps:$4 sm:$0x1f]  }
  0x71   :  { %2197 = vmatprep.subr.bf16.mxu0 %v6059_v50  ;;  %2240 = vmatprep.subr.bf16.mxu1 %v6062_v53  ;;  %v2867_v50 = vand.u32 %v6110_v44, %v6332_v7  ;;  %v6113_v53 = vld [vmem:[%s9355_s2 + $0x30] ss:$124 sps:$4 sm:$0xff]   ;;  %v2882_v58 = vand.u32 %v6124_v52, %v6332_v7  ;;  %v6175_v52 = vld [vmem:[%s9356_s3 + $0xf8] ss:$124 sps:$4 sm:$0x1f]  }
  0x73   :  { %5680 = vmatmul.mubr.msk.bf16.vlgmr.msra.gmra.mrb[52].mxu0 %vm394_vm2, %v6351_v14  ;;  %5681 = vmatmul.mubr.msk.bf16.vlgmr.msra.gmra.mrb[52].mxu1 %vm394_vm2, %v6351_v14  ;;  %v6069_v14 = vld [vmem:[%s9353_s1 + $0x70] ss:$124 sps:$4 sm:$0xff]  }
  0x74   :  { %2198 = vmatpush1.bf16.msra.mxu0 %v6057_v56  ;;  %2241 = vmatpush1.bf16.msra.mxu1 %v6060_v57  ;;  %v6122_v56 = vld [vmem:[%s9355_s2 + $0x130] ss:$124 sps:$4 sm:$0x1f]   ;;  %v2876_v57 = vand.u32 %v6121_v51, %v6332_v7  ;;  %v6172_v51 = vld [vmem:[%s9356_s3 + $0x8] ss:$124 sps:$4 sm:$0xff]  }
  0x75   :  { %2199 = vmatprep.subr.bf16.mxu0 %v1664_v60  ;;  %2242 = vmatprep.subr.bf16.mxu1 %v1670_v61  ;;  %v2879_v60 = vand.u32 %v6122_v56, %v6332_v7  ;;  %v6127_v61 = vld [vmem:[%s9355_s2 + $0x44] ss:$124 sps:$4 sm:$0xff]   ;;  %v4085_v56 = vand.u32 %v6175_v52, %v6332_v7 }
  0x76   :  { %2229 = vmatprep.mubr.bf16.mxu0 %v6268_v3  ;;  %2272 = vmatprep.mubr.bf16.mxu1 %v6268_v3 }
  0x78   :  { %2200 = vmatpush1.bf16.msra.mxu0 %v1661_v62  ;;  %2243 = vmatpush1.bf16.msra.mxu1 %v1667_v63  ;;  %v6133_v62 = vld [vmem:[%s9355_s2 + $0x13c] ss:$124 sps:$4 sm:$0x1f]   ;;  %v6130_v63 = vld [vmem:[%s9355_s2 + $0x4c] ss:$124 sps:$4 sm:$0xff]  }
  0x79   :  { %2283 = vmatprep.subr.bf16.mxu0 %v6071_v0  ;;  %5862 = vmatprep.subr.bf16.mxu1 %v6269_v34  ;;  %v6136_v0 = vld [vmem:[%s9355_s2 + $0x144] ss:$124 sps:$4 sm:$0x1f]   ;;  %v2888_v5 = vand.u32 %v6133_v62, %v6332_v7  ;;  %v6181_v62 = vld [vmem:[%s9356_s3 + $0x10] ss:$124 sps:$4 sm:$0xff]  }
  0x7b   :  { %5682 = vmatmul.mubr.msk.bf16.vlgmr.msra.gmra.mrb[56].mxu0 %vm394_vm2, %v6856_v8  ;;  %5683 = vmatmul.mubr.msk.bf16.vlgmr.msra.gmra.mrb[56].mxu1 %vm394_vm2, %v6856_v8 }
  0x7c   :  { %2284 = vmatpush1.bf16.msra.mxu0 %v6069_v14  ;;  %5863 = vmatpush3.bf16.msra.mxu1 %v6072_v2  ;;  %v6128_v14 = vld [vmem:[%s9355_s2 + $0x48] ss:$124 sps:$4 sm:$0xff]   ;;  %v6131_v2 = vld [vmem:[%s9355_s2 + $0x138] ss:$124 sps:$4 sm:$0x1f]  }
  0x7d   :  { %2285 = vmatprep.subr.bf16.mxu0 %v1676_v6  ;;  %5864 = vmatprep.subr.bf16.mxu1 %v6269_v34  ;;  %v2894_v6 = vand.u32 %v6136_v0, %v6332_v7  ;;  %v6187_v0 = vld [vmem:[%s9356_s3 + $0x108] ss:$124 sps:$4 sm:$0x1f]  }
  0x7e   :  { %2315 = vmatprep.mubr.bf16.mxu0 %v6268_v3  ;;  %5866 = vmatprep.mubr.msk.bf16.mxu1 %vm6270_vm3, %v6269_v34 }
  0x80   :  { %2286 = vmatpush1.bf16.msra.mxu0 %v1673_v9  ;;  %5865 = vmatpush3.bf16.msra.mxu1 %v1679_v10  ;;  %v6139_v9 = vld [vmem:[%s9355_s2 + $0x54] ss:$124 sps:$4 sm:$0xff]   ;;  %v2885_v10 = vand.u32 %v6131_v2, %v6332_v7 }
  0x81   :  { %2929 = vmatprep.subr.bf16.mxu0 %v6079_v11  ;;  %2972 = vmatprep.subr.bf16.mxu1 %v6082_v13  ;;  %v2891_v11 = vand.u32 %v6134_v4, %v6332_v7  ;;  %v6145_v13 = vld [vmem:[%s9355_s2 + $0x14c] ss:$124 sps:$4 sm:$0x1f]   ;;  %v4097_v4 = vand.u32 %v6187_v0, %v6332_v7 }
  0x82   :  { %v6235_v0 = vld [vmem:[%s9356_s3 + $0x148] ss:$124 sps:$4 sm:$0x1f]  }
  0x83   :  { %5684 = vmatmul.mubr.msk.bf16.vlgmr.msra.gmra.mrb[60].mxu0 %vm394_vm2, %v6856_v8  ;;  %5867 = vmatmul.mubr.msk.bf16.vlgmr.msra.gmra.mrb[60].mxu1 %vm394_vm2, %v6856_v8 }
  0x84   :  { %2930 = vmatpush1.bf16.msra.mxu0 %v6077_v16  ;;  %2973 = vmatpush1.bf16.msra.mxu1 %v6080_v17  ;;  %v6137_v16 = vld [vmem:[%s9355_s2 + $0x50] ss:$124 sps:$4 sm:$0xff]   ;;  %v6140_v17 = vld [vmem:[%s9355_s2 + $0x58] ss:$124 sps:$4 sm:$0xff]  }
  0x85   :  { %2931 = vmatprep.subr.bf16.mxu0 %v2840_v20  ;;  %2974 = vmatprep.subr.bf16.mxu1 %v2846_v21  ;;  %v2900_v20 = vand.u32 %v6145_v13, %v6332_v7  ;;  %v2906_v21 = vand.u32 %v6148_v15, %v6332_v7  ;;  %v6196_v13 = vld [vmem:[%s9356_s3 + $0x28] ss:$124 sps:$4 sm:$0xff]   ;;  %v6199_v15 = vld [vmem:[%s9356_s3 + $0x118] ss:$124 sps:$4 sm:$0x1f]  }
  0x86   :  { %2961 = vmatprep.mubr.bf16.mxu0 %v6268_v3  ;;  %3004 = vmatprep.mubr.bf16.mxu1 %v6268_v3 }
  0x88   :  { %2932 = vmatpush1.bf16.msra.mxu0 %v2837_v24  ;;  %2975 = vmatpush1.bf16.msra.mxu1 %v2843_v25  ;;  %v2903_v24 = vand.u32 %v6146_v19, %v6332_v7  ;;  %v6154_v25 = vld [vmem:[%s9355_s2 + $0x6c] ss:$124 sps:$4 sm:$0xff]   ;;  %v4109_v19 = vand.u32 %v6199_v15, %v6332_v7  ;;  %v6249_v15 = vld [vmem:[%s9356_s3 + $0x15c] ss:$124 sps:$4 sm:$0x1f]  }
  0x89   :  { %3015 = vmatprep.subr.bf16.mxu0 %v6091_v22  ;;  %3058 = vmatprep.subr.bf16.mxu1 %v6094_v23  ;;  %v6151_v22 = vld [vmem:[%s9355_s2 + $0x64] ss:$124 sps:$4 sm:$0xff]   ;;  %v2897_v23 = vand.u32 %v6143_v18, %v6332_v7 }
  0x8b   :  { %5748 = vmatmul.mubr.msk.bf16.vlgmr.msra.gmra.mrb[64].mxu0 %vm394_vm2, %v6856_v8  ;;  %5749 = vmatmul.mubr.msk.bf16.vlgmr.msra.gmra.mrb[64].mxu1 %vm394_vm2, %v6856_v8 }
  0x8c   :  { %3016 = vmatpush1.bf16.msra.mxu0 %v6089_v28  ;;  %3059 = vmatpush1.bf16.msra.mxu1 %v6092_v30  ;;  %v6149_v28 = vld [vmem:[%s9355_s2 + $0x60] ss:$124 sps:$4 sm:$0xff]   ;;  %v6152_v30 = vld [vmem:[%s9355_s2 + $0x68] ss:$124 sps:$4 sm:$0xff]  }
  0x8d   :  { %3017 = vmatprep.subr.bf16.mxu0 %v2852_v32  ;;  %3060 = vmatprep.subr.bf16.mxu1 %v2858_v33  ;;  %v2912_v32 = vand.u32 %v6157_v26, %v6332_v7  ;;  %v2918_v33 = vand.u32 %v6160_v27, %v6332_v7  ;;  %v6208_v26 = vld [vmem:[%s9356_s3 + $0x38] ss:$124 sps:$4 sm:$0xff]   ;;  %v6211_v27 = vld [vmem:[%s9356_s3 + $0x128] ss:$124 sps:$4 sm:$0x1f]  }
  0x8e   :  { %3047 = vmatprep.mubr.bf16.mxu0 %v6268_v3  ;;  %3090 = vmatprep.mubr.bf16.mxu1 %v6268_v3 }
  0x90   :  { %3018 = vmatpush1.bf16.msra.mxu0 %v2849_v36  ;;  %3061 = vmatpush1.bf16.msra.mxu1 %v2855_v37  ;;  %v2915_v36 = vand.u32 %v6158_v31, %v6332_v7  ;;  %v6163_v37 = vld [vmem:[%s9355_s2 + $0x74] ss:$124 sps:$4 sm:$0xff]   ;;  %v4121_v31 = vand.u32 %v6211_v27, %v6332_v7 }
  0x91   :  { %3101 = vmatprep.subr.bf16.mxu0 %v6103_v35  ;;  %3144 = vmatprep.subr.bf16.mxu1 %v6106_v38  ;;  %v2909_v35 = vand.u32 %v6155_v29, %v6332_v7  ;;  %v6167_v38 = vld [vmem:[%s9355_s2 + $0x16c] ss:$124 sps:$4 sm:$0x1f]  }
  0x92   :  { %v2924_v43 = vand.u32 %v6167_v38, %v6332_v7 }
  0x93   :  { %5750 = vmatmul.mubr.msk.bf16.vlgmr.msra.gmra.mrb[68].mxu0 %vm394_vm2, %v6856_v8  ;;  %5751 = vmatmul.mubr.msk.bf16.vlgmr.msra.gmra.mrb[68].mxu1 %vm394_vm2, %v6856_v8 }
  0x94   :  { %3102 = vmatpush1.bf16.msra.mxu0 %v6101_v41  ;;  %3145 = vmatpush1.bf16.msra.mxu1 %v6104_v42  ;;  %v6165_v41 = vld [vmem:[%s9355_s2 + $0x168] ss:$124 sps:$4 sm:$0x1f]   ;;  %v6168_v42 = vld [vmem:[%s9355_s2 + $0x170] ss:$124 sps:$4 sm:$0x1f]  }
  0x95   :  { %3103 = vmatprep.subr.bf16.mxu0 %v2864_v45  ;;  %3146 = vmatprep.subr.bf16.mxu1 %v2870_v46  ;;  %v2921_v44 = vand.u32 %v6165_v41, %v6332_v7  ;;  %v2927_v45 = vand.u32 %v6168_v42, %v6332_v7  ;;  %v6171_v46 = vld [vmem:[%s9356_s3 + $0x4] ss:$124 sps:$4 sm:$0xff]  }
  0x96   :  { %3133 = vmatprep.mubr.bf16.mxu0 %v6268_v3  ;;  %3176 = vmatprep.mubr.bf16.mxu1 %v6268_v3  ;;  %v6220_v41 = vld [vmem:[%s9356_s3 + $0x48] ss:$124 sps:$4 sm:$0xff]  }
  0x98   :  { %3104 = vmatpush1.bf16.msra.mxu0 %v2861_v49  ;;  %3147 = vmatpush1.bf16.msra.mxu1 %v2867_v50  ;;  %v6180_v49 = vld [vmem:[%s9356_s3 + $0x104] ss:$124 sps:$4 sm:$0x1f]  }
  0x99   :  { %3187 = vmatprep.subr.bf16.mxu0 %v6115_v47  ;;  %3230 = vmatprep.subr.bf16.mxu1 %v6118_v48  ;;  %v6174_v47 = vld [vmem:[%s9356_s3 + $0xc] ss:$124 sps:$4 sm:$0xff]   ;;  %v6177_v48 = vld [vmem:[%s9356_s3 + $0xfc] ss:$124 sps:$4 sm:$0x1f]   ;;  %v4094_v55 = vand.u32 %v6180_v49, %v6332_v7 }
  0x9a   :  { %v6169_v50 = vld [vmem:[%s9356_s3] ss:$124 sps:$4 sm:$0xff]  }
  0x9b   :  { %5752 = vmatmul.mubr.msk.bf16.vlgmr.msra.gmra.mrb[72].mxu0 %vm394_vm2, %v6856_v8  ;;  %5753 = vmatmul.mubr.msk.bf16.vlgmr.msra.gmra.mrb[72].mxu1 %vm394_vm2, %v6856_v8 }
  0x9c   :  { %3188 = vmatpush1.bf16.msra.mxu0 %v6113_v53  ;;  %3231 = vmatpush1.bf16.msra.mxu1 %v6116_v54  ;;  %v6178_v53 = vld [vmem:[%s9356_s3 + $0x100] ss:$124 sps:$4 sm:$0x1f]   ;;  %v4088_v54 = vand.u32 %v6177_v48, %v6332_v7 }
  0x9d   :  { %3189 = vmatprep.subr.bf16.mxu0 %v2876_v57  ;;  %3232 = vmatprep.subr.bf16.mxu1 %v2882_v58  ;;  %v4091_v57 = vand.u32 %v6178_v53, %v6332_v7  ;;  %v6183_v58 = vld [vmem:[%s9356_s3 + $0x14] ss:$124 sps:$4 sm:$0xff]  }
  0x9e   :  { %3219 = vmatprep.mubr.bf16.mxu0 %v6268_v3  ;;  %3262 = vmatprep.mubr.bf16.mxu1 %v6268_v3 }
  0xa0   :  { %3190 = vmatpush1.bf16.msra.mxu0 %v2873_v59  ;;  %3233 = vmatpush1.bf16.msra.mxu1 %v2879_v60  ;;  %v6186_v59 = vld [vmem:[%s9356_s3 + $0x1c] ss:$124 sps:$4 sm:$0xff]   ;;  %v6189_v60 = vld [vmem:[%s9356_s3 + $0x10c] ss:$124 sps:$4 sm:$0x1f]  }
  0xa1   :  { %3273 = vmatprep.subr.bf16.mxu0 %v6127_v61  ;;  %3316 = vmatprep.subr.bf16.mxu1 %v6130_v63  ;;  %v6192_v61 = vld [vmem:[%s9356_s3 + $0x114] ss:$124 sps:$4 sm:$0x1f]  }
  0xa2   :  { %v6184_v63 = vld [vmem:[%s9356_s3 + $0x18] ss:$124 sps:$4 sm:$0xff]   ;;  %v4106_v2 = vand.u32 %v6192_v61, %v6332_v7 }
  0xa3   :  { %5754 = vmatmul.mubr.msk.bf16.vlgmr.msra.gmra.mrb[76].mxu0 %vm394_vm2, %v6856_v8  ;;  %5755 = vmatmul.mubr.msk.bf16.vlgmr.msra.gmra.mrb[76].mxu1 %vm394_vm2, %v6856_v8  ;;  %v6232_v61 = vld [vmem:[%s9356_s3 + $0x58] ss:$124 sps:$4 sm:$0xff]  }
  0xa4   :  { %3274 = vmatpush1.bf16.msra.mxu0 %v6125_v1  ;;  %3317 = vmatpush1.bf16.msra.mxu1 %v6128_v14  ;;  %v6190_v1 = vld [vmem:[%s9356_s3 + $0x110] ss:$124 sps:$4 sm:$0x1f]   ;;  %v4100_v14 = vand.u32 %v6189_v60, %v6332_v7 }
  0xa5   :  { %3275 = vmatprep.subr.bf16.mxu0 %v2888_v5  ;;  %3318 = vmatprep.subr.bf16.mxu1 %v2894_v6  ;;  %v4103_v5 = vand.u32 %v6190_v1, %v6332_v7  ;;  %v6195_v6 = vld [vmem:[%s9356_s3 + $0x24] ss:$124 sps:$4 sm:$0xff]   ;;  %v6229_v60 = vld [vmem:[%s9356_s3 + $0x50] ss:$124 sps:$4 sm:$0xff]  }
  0xa6   :  { %3305 = vmatprep.mubr.bf16.mxu0 %v6268_v3  ;;  %3348 = vmatprep.mubr.bf16.mxu1 %v6268_v3 }
  0xa8   :  { %3276 = vmatpush1.bf16.msra.mxu0 %v2885_v10  ;;  %3319 = vmatpush1.bf16.msra.mxu1 %v2891_v11  ;;  %v6201_v10 = vld [vmem:[%s9356_s3 + $0x11c] ss:$124 sps:$4 sm:$0x1f]   ;;  %v6204_v11 = vld [vmem:[%s9356_s3 + $0x124] ss:$124 sps:$4 sm:$0x1f]  }
  0xa9   :  { %3359 = vmatprep.subr.bf16.mxu0 %v6139_v9  ;;  %3402 = vmatprep.subr.bf16.mxu1 %v6142_v12  ;;  %v6198_v9 = vld [vmem:[%s9356_s3 + $0x2c] ss:$124 sps:$4 sm:$0xff]   ;;  %v6193_v12 = vld [vmem:[%s9356_s3 + $0x20] ss:$124 sps:$4 sm:$0xff]   ;;  %v4118_v18 = vand.u32 %v6204_v11, %v6332_v7 }
  0xab   :  { %5756 = vmatmul.mubr.msk.bf16.vlgmr.msra.gmra.mrb[80].mxu0 %vm394_vm2, %v6856_v8  ;;  %5757 = vmatmul.mubr.msk.bf16.vlgmr.msra.gmra.mrb[80].mxu1 %vm394_vm2, %v6856_v8 }
  0xac   :  { %3360 = vmatpush1.bf16.msra.mxu0 %v6137_v16  ;;  %3403 = vmatpush1.bf16.msra.mxu1 %v6140_v17  ;;  %v6202_v16 = vld [vmem:[%s9356_s3 + $0x120] ss:$124 sps:$4 sm:$0x1f]   ;;  %v4112_v17 = vand.u32 %v6201_v10, %v6332_v7  ;;  %v4145_v10 = vand.u32 %v6235_v0, %v6332_v7 }
  0xad   :  { %3361 = vmatprep.subr.bf16.mxu0 %v2900_v20  ;;  %3404 = vmatprep.subr.bf16.mxu1 %v2906_v21  ;;  %v4115_v20 = vand.u32 %v6202_v16, %v6332_v7  ;;  %v6207_v21 = vld [vmem:[%s9356_s3 + $0x34] ss:$124 sps:$4 sm:$0xff]   ;;  %v6252_v16 = vld [vmem:[%s9356_s3 + $0x164] ss:$124 sps:$4 sm:$0x1f]  }
  0xae   :  { %3391 = vmatprep.mubr.bf16.mxu0 %v6268_v3  ;;  %3434 = vmatprep.mubr.bf16.mxu1 %v6268_v3 }
  0xb0   :  { %3362 = vmatpush1.bf16.msra.mxu0 %v2897_v23  ;;  %3405 = vmatpush1.bf16.msra.mxu1 %v2903_v24  ;;  %v6213_v23 = vld [vmem:[%s9356_s3 + $0x12c] ss:$124 sps:$4 sm:$0x1f]   ;;  %v6216_v24 = vld [vmem:[%s9356_s3 + $0x134] ss:$124 sps:$4 sm:$0x1f]  }
  0xb1   :  { %3445 = vmatprep.subr.bf16.mxu0 %v6151_v22  ;;  %3488 = vmatprep.subr.bf16.mxu1 %v6154_v25  ;;  %v6210_v22 = vld [vmem:[%s9356_s3 + $0x3c] ss:$124 sps:$4 sm:$0xff]   ;;  %v6205_v25 = vld [vmem:[%s9356_s3 + $0x30] ss:$124 sps:$4 sm:$0xff]   ;;  %v4124_v29 = vand.u32 %v6213_v23, %v6332_v7 }
  0xb2   :  { %v6247_v23 = vld [vmem:[%s9356_s3 + $0x158] ss:$124 sps:$4 sm:$0x1f]  }
  0xb3   :  { %5758 = vmatmul.mubr.msk.bf16.vlgmr.msra.gmra.mrb[84].mxu0 %vm394_vm2, %v6856_v8  ;;  %5759 = vmatmul.mubr.msk.bf16.vlgmr.msra.gmra.mrb[84].mxu1 %vm394_vm2, %v6856_v8 }
  0xb4   :  { %3446 = vmatpush1.bf16.msra.mxu0 %v6149_v28  ;;  %3489 = vmatpush1.bf16.msra.mxu1 %v6152_v30  ;;  %v6214_v28 = vld [vmem:[%s9356_s3 + $0x130] ss:$124 sps:$4 sm:$0x1f]   ;;  %v4130_v30 = vand.u32 %v6216_v24, %v6332_v7 }
  0xb5   :  { %3447 = vmatprep.subr.bf16.mxu0 %v2912_v32  ;;  %3490 = vmatprep.subr.bf16.mxu1 %v2918_v33  ;;  %v4127_v32 = vand.u32 %v6214_v28, %v6332_v7  ;;  %v6219_v33 = vld [vmem:[%s9356_s3 + $0x44] ss:$124 sps:$4 sm:$0xff]  }
  0xb6   :  { %3477 = vmatprep.mubr.bf16.mxu0 %v6268_v3  ;;  %3520 = vmatprep.mubr.bf16.mxu1 %v6268_v3 }
  0xb8   :  { %3448 = vmatpush1.bf16.msra.mxu0 %v2909_v35  ;;  %3491 = vmatpush1.bf16.msra.mxu1 %v2915_v36  ;;  %v6222_v35 = vld [vmem:[%s9356_s3 + $0x4c] ss:$124 sps:$4 sm:$0xff]   ;;  %v6225_v36 = vld [vmem:[%s9356_s3 + $0x13c] ss:$124 sps:$4 sm:$0x1f]  }
  0xb9   :  { %3531 = vmatprep.subr.bf16.mxu0 %v6163_v37  ;;  %5870 = vmatprep.subr.bf16.mxu1 %v6269_v34  ;;  %v6228_v37 = vld [vmem:[%s9356_s3 + $0x144] ss:$124 sps:$4 sm:$0x1f]  }
  0xbb   :  { %5760 = vmatmul.mubr.msk.bf16.vlgmr.msra.gmra.mrb[88].mxu0 %vm394_vm2, %v6856_v8  ;;  %5761 = vmatmul.mubr.msk.bf16.vlgmr.msra.gmra.mrb[88].mxu1 %vm394_vm2, %v6856_v8 }
  0xbc   :  { %3532 = vmatpush1.bf16.msra.mxu0 %v6161_v39  ;;  %5871 = vmatpush3.bf16.msra.mxu1 %v6164_v40  ;;  %v6217_v40 = vld [vmem:[%s9356_s3 + $0x40] ss:$124 sps:$4 sm:$0xff]  }
  0xbd   :  { %3533 = vmatprep.subr.bf16.mxu0 %v2924_v43  ;;  %5872 = vmatprep.subr.bf16.mxu1 %v6269_v34 }
  0xbe   :  { %3563 = vmatprep.mubr.bf16.mxu0 %v6268_v3  ;;  %5874 = vmatprep.mubr.msk.bf16.mxu1 %vm6270_vm3, %v6269_v34 }
  0xc0   :  { %3534 = vmatpush1.bf16.msra.mxu0 %v2921_v44  ;;  %5873 = vmatpush3.bf16.msra.mxu1 %v2927_v45  ;;  %v6223_v44 = vld [vmem:[%s9356_s3 + $0x138] ss:$124 sps:$4 sm:$0x1f]  }
  0xc1   :  { %4177 = vmatprep.subr.bf16.mxu0 %v6171_v46  ;;  %4220 = vmatprep.subr.bf16.mxu1 %v6174_v47  ;;  %v6226_v47 = vld [vmem:[%s9356_s3 + $0x140] ss:$124 sps:$4 sm:$0x1f]   ;;  %v4133_v52 = vand.u32 %v6223_v44, %v6332_v7 }
  0xc2   :  { %v4139_v53 = vand.u32 %v6226_v47, %v6332_v7 }
  0xc3   :  { %5762 = vmatmul.mubr.msk.bf16.vlgmr.msra.gmra.mrb[92].mxu0 %vm394_vm2, %v6856_v8  ;;  %5875 = vmatmul.mubr.msk.bf16.vlgmr.msra.gmra.mrb[92].mxu1 %vm394_vm2, %v6856_v8 }
  0xc4   :  { %4178 = vmatpush1.bf16.msra.mxu0 %v6169_v50  ;;  %4221 = vmatpush1.bf16.msra.mxu1 %v6172_v51  ;;  %v4136_v50 = vand.u32 %v6225_v36, %v6332_v7  ;;  %v4142_v51 = vand.u32 %v6228_v37, %v6332_v7 }
  0xc5   :  { %4179 = vmatprep.subr.bf16.mxu0 %v4088_v54  ;;  %4222 = vmatprep.subr.bf16.mxu1 %v4094_v55  ;;  %v6231_v54 = vld [vmem:[%s9356_s3 + $0x54] ss:$124 sps:$4 sm:$0xff]   ;;  %v6234_v55 = vld [vmem:[%s9356_s3 + $0x5c] ss:$124 sps:$4 sm:$0xff]  }
  0xc6   :  { %4209 = vmatprep.mubr.bf16.mxu0 %v6268_v3  ;;  %4252 = vmatprep.mubr.bf16.mxu1 %v6268_v3 }
  0xc8   :  { %4180 = vmatpush1.bf16.msra.mxu0 %v4085_v56  ;;  %4223 = vmatpush1.bf16.msra.mxu1 %v4091_v57  ;;  %v6237_v56 = vld [vmem:[%s9356_s3 + $0x14c] ss:$124 sps:$4 sm:$0x1f]   ;;  %v6240_v57 = vld [vmem:[%s9356_s3 + $0x154] ss:$124 sps:$4 sm:$0x1f]  }
  0xc9   :  { %4263 = vmatprep.subr.bf16.mxu0 %v6183_v58  ;;  %4306 = vmatprep.subr.bf16.mxu1 %v6186_v59 }
  0xcb   :  { %5826 = vmatmul.mubr.msk.bf16.vlgmr.msra.gmra.mrb[96].mxu0 %vm394_vm2, %v6856_v8  ;;  %5827 = vmatmul.mubr.msk.bf16.vlgmr.msra.gmra.mrb[96].mxu1 %vm394_vm2, %v6856_v8 }
  0xcc   :  { %4264 = vmatpush1.bf16.msra.mxu0 %v6181_v62  ;;  %4307 = vmatpush1.bf16.msra.mxu1 %v6184_v63 }
  0xcd   :  { %4265 = vmatprep.subr.bf16.mxu0 %v4100_v14  ;;  %4308 = vmatprep.subr.bf16.mxu1 %v4106_v2  ;;  %v6238_v2 = vld [vmem:[%s9356_s3 + $0x150] ss:$124 sps:$4 sm:$0x1f]  }
  0xce   :  { %4295 = vmatprep.mubr.bf16.mxu0 %v6268_v3  ;;  %4338 = vmatprep.mubr.bf16.mxu1 %v6268_v3  ;;  %v4151_v11 = vand.u32 %v6238_v2, %v6332_v7 }
  0xd0   :  { %4266 = vmatpush1.bf16.msra.mxu0 %v4097_v4  ;;  %4309 = vmatpush1.bf16.msra.mxu1 %v4103_v5 }
  0xd1   :  { %4349 = vmatprep.subr.bf16.mxu0 %v6195_v6  ;;  %4392 = vmatprep.subr.bf16.mxu1 %v6198_v9  ;;  %v4148_v6 = vand.u32 %v6237_v56, %v6332_v7  ;;  %v4154_v9 = vand.u32 %v6240_v57, %v6332_v7 }
  0xd3   :  { %5828 = vmatmul.mubr.msk.bf16.vlgmr.msra.gmra.mrb[100].mxu0 %vm394_vm2, %v6856_v8  ;;  %5829 = vmatmul.mubr.msk.bf16.vlgmr.msra.gmra.mrb[100].mxu1 %vm394_vm2, %v6856_v8 }
  0xd4   :  { %4350 = vmatpush1.bf16.msra.mxu0 %v6193_v12  ;;  %4393 = vmatpush1.bf16.msra.mxu1 %v6196_v13  ;;  %v6243_v12 = vld [vmem:[%s9356_s3 + $0x64] ss:$124 sps:$4 sm:$0xff]   ;;  %v6246_v13 = vld [vmem:[%s9356_s3 + $0x6c] ss:$124 sps:$4 sm:$0xff]  }
  0xd5   :  { %4351 = vmatprep.subr.bf16.mxu0 %v4112_v17  ;;  %4394 = vmatprep.subr.bf16.mxu1 %v4118_v18 }
  0xd6   :  { %4381 = vmatprep.mubr.bf16.mxu0 %v6268_v3  ;;  %4424 = vmatprep.mubr.bf16.mxu1 %v6268_v3 }
  0xd8   :  { %4352 = vmatpush1.bf16.msra.mxu0 %v4109_v19  ;;  %4395 = vmatpush1.bf16.msra.mxu1 %v4115_v20  ;;  %v6241_v19 = vld [vmem:[%s9356_s3 + $0x60] ss:$124 sps:$4 sm:$0xff]   ;;  %v6244_v20 = vld [vmem:[%s9356_s3 + $0x68] ss:$124 sps:$4 sm:$0xff]  }
  0xd9   :  { %4435 = vmatprep.subr.bf16.mxu0 %v6207_v21  ;;  %4478 = vmatprep.subr.bf16.mxu1 %v6210_v22 }
  0xdb   :  { %5830 = vmatmul.mubr.msk.bf16.vlgmr.msra.gmra.mrb[104].mxu0 %vm394_vm2, %v6856_v8  ;;  %5831 = vmatmul.mubr.msk.bf16.vlgmr.msra.gmra.mrb[104].mxu1 %vm394_vm2, %v6856_v8 }
  0xdc   :  { %4436 = vmatpush1.bf16.msra.mxu0 %v6205_v25  ;;  %4479 = vmatpush1.bf16.msra.mxu1 %v6208_v26  ;;  %v6250_v26 = vld [vmem:[%s9356_s3 + $0x160] ss:$124 sps:$4 sm:$0x1f]  }
  0xdd   :  { %4437 = vmatprep.subr.bf16.mxu0 %v4124_v29  ;;  %4480 = vmatprep.subr.bf16.mxu1 %v4130_v30  ;;  %v4160_v29 = vand.u32 %v6249_v15, %v6332_v7  ;;  %v4166_v30 = vand.u32 %v6252_v16, %v6332_v7 }
  0xde   :  { %v7282_v38 = vpop.f32.mrb[0].mxu0  ;;  %v7284_v39 = vpop.f32.mrb[0].mxu1  ;;  %4467 = vmatprep.mubr.bf16.mxu0 %v6268_v3  ;;  %4510 = vmatprep.mubr.bf16.mxu1 %v6268_v3 }
  0xdf   :  { %v7294_v42 = vpop.f32.mrb[1].mxu0  ;;  %v7296_v43 = vpop.f32.mrb[1].mxu1 }
  0xe0   :  { %v7301_v45 = vpop.f32.mrb[2].mxu0  ;;  %4438 = vmatpush1.bf16.msra.mxu0 %v4121_v31  ;;  %4481 = vmatpush1.bf16.msra.mxu1 %v4127_v32  ;;  %v7303_v46 = vpop.f32.mrb[2].mxu1  ;;  %v4157_v31 = vand.u32 %v6247_v23, %v6332_v7  ;;  %v4163_v32 = vand.u32 %v6250_v26, %v6332_v7 }
  0xe1   :  { %v7308_v48 = vpop.f32.mrb[3].mxu0  ;;  %v7310_v49 = vpop.f32.mrb[3].mxu1  ;;  %4521 = vmatprep.subr.bf16.mxu0 %v6219_v33  ;;  %4564 = vmatprep.subr.bf16.mxu1 %v6222_v35  ;;  %v6255_v33 = vld [vmem:[%s9356_s3 + $0x74] ss:$124 sps:$4 sm:$0xff]  }
  0xe2   :  { %v6259_v35 = vld [vmem:[%s9356_s3 + $0x16c] ss:$124 sps:$4 sm:$0x1f]  }
  0xe3   :  { %5832 = vmatmul.mubr.msk.bf16.vlgmr.msra.gmra.mrb[108].mxu0 %vm394_vm2, %v6856_v8  ;;  %5833 = vmatmul.mubr.msk.bf16.vlgmr.msra.gmra.mrb[108].mxu1 %vm394_vm2, %v6856_v8  ;;  %v4172_v56 = vand.u32 %v6259_v35, %v6332_v7 }
  0xe4   :  { %4522 = vmatpush1.bf16.msra.mxu0 %v6217_v40  ;;  %4565 = vmatpush1.bf16.msra.mxu1 %v6220_v41  ;;  %v6253_v40 = vld [vmem:[%s9356_s3 + $0x70] ss:$124 sps:$4 sm:$0xff]   ;;  %v6256_v41 = vld [vmem:[%s9356_s3 + $0x78] ss:$124 sps:$4 sm:$0xff]  }
  0xe5   :  { %4523 = vmatprep.subr.bf16.mxu0 %v4136_v50  ;;  %4566 = vmatprep.subr.bf16.mxu1 %v4142_v51  ;;  %v6257_v50 = vld [vmem:[%s9356_s3 + $0x168] ss:$124 sps:$4 sm:$0x1f]  }
  0xe6   :  { %v7332_v58 = vpop.f32.mrb[4].mxu0  ;;  %v7334_v59 = vpop.f32.mrb[4].mxu1  ;;  %4553 = vmatprep.mubr.bf16.mxu0 %v6268_v3  ;;  %4596 = vmatprep.mubr.bf16.mxu1 %v6268_v3  ;;  %v4169_v57 = vand.u32 %v6257_v50, %v6332_v7 }
  0xe7   :  { %v7344_v62 = vpop.f32.mrb[5].mxu0  ;;  %v7346_v63 = vpop.f32.mrb[5].mxu1 }
  0xe8   :  { %v7351_v1 = vpop.f32.mrb[6].mxu0  ;;  %4524 = vmatpush1.bf16.msra.mxu0 %v4133_v52  ;;  %4567 = vmatpush1.bf16.msra.mxu1 %v4139_v53  ;;  %v7353_v14 = vpop.f32.mrb[6].mxu1  ;;  %v6260_v53 = vld [vmem:[%s9356_s3 + $0x170] ss:$124 sps:$4 sm:$0x1f]  }
  0xe9   :  { %v7358_v4 = vpop.f32.mrb[7].mxu0  ;;  %v7360_v5 = vpop.f32.mrb[7].mxu1  ;;  %4607 = vmatprep.subr.bf16.mxu0 %v6231_v54  ;;  %4650 = vmatprep.subr.bf16.mxu1 %v6234_v55 }
  0xeb   :  { %5834 = vmatmul.mubr.msk.bf16.vlgmr.msra.gmra.mrb[112].mxu0 %vm394_vm2, %v6856_v8  ;;  %5835 = vmatmul.mubr.msk.bf16.vlgmr.msra.gmra.mrb[112].mxu1 %vm394_vm2, %v6856_v8 }
  0xec   :  { %4608 = vmatpush1.bf16.msra.mxu0 %v6229_v60  ;;  %4651 = vmatpush1.bf16.msra.mxu1 %v6232_v61  ;;  %v4175_v60 = vand.u32 %v6260_v53, %v6332_v7 }
  0xed   :  { %4609 = vmatprep.subr.bf16.mxu0 %v4148_v6  ;;  %4652 = vmatprep.subr.bf16.mxu1 %v4154_v9 }
  0xee   :  { %v7382_v17 = vpop.f32.mrb[8].mxu0  ;;  %v7384_v18 = vpop.f32.mrb[8].mxu1  ;;  %4639 = vmatprep.mubr.bf16.mxu0 %v6268_v3  ;;  %4682 = vmatprep.mubr.bf16.mxu1 %v6268_v3 }
  0xef   :  { %v7394_v21 = vpop.f32.mrb[9].mxu0  ;;  %v7396_v22 = vpop.f32.mrb[9].mxu1 }
  0xf0   :  { %v7401_v24 = vpop.f32.mrb[10].mxu0  ;;  %4610 = vmatpush1.bf16.msra.mxu0 %v4145_v10  ;;  %4653 = vmatpush1.bf16.msra.mxu1 %v4151_v11  ;;  %v7403_v25 = vpop.f32.mrb[10].mxu1 }
  0xf1   :  { %v7408_v27 = vpop.f32.mrb[11].mxu0  ;;  %v7410_v28 = vpop.f32.mrb[11].mxu1  ;;  %4693 = vmatprep.subr.bf16.mxu0 %v6243_v12  ;;  %4736 = vmatprep.subr.bf16.mxu1 %v6246_v13 }
  0xf3   :  { %5836 = vmatmul.mubr.msk.bf16.vlgmr.msra.gmra.mrb[116].mxu0 %vm394_vm2, %v6856_v8  ;;  %5837 = vmatmul.mubr.msk.bf16.vlgmr.msra.gmra.mrb[116].mxu1 %vm394_vm2, %v6856_v8 }
  0xf4   :  { %4694 = vmatpush1.bf16.msra.mxu0 %v6241_v19  ;;  %4737 = vmatpush1.bf16.msra.mxu1 %v6244_v20 }
  0xf5   :  { %4695 = vmatprep.subr.bf16.mxu0 %v4160_v29  ;;  %4738 = vmatprep.subr.bf16.mxu1 %v4166_v30 }
  0xf6   :  { %v7426_v36 = vpop.f32.mrb[12].mxu0  ;;  %v7428_v37 = vpop.f32.mrb[12].mxu1  ;;  %4725 = vmatprep.mubr.bf16.mxu0 %v6268_v3  ;;  %4768 = vmatprep.mubr.bf16.mxu1 %v6268_v3 }
  0xf7   :  { %v7438_v44 = vpop.f32.mrb[13].mxu0  ;;  %v7440_v47 = vpop.f32.mrb[13].mxu1 }
  0xf8   :  { %v7445_v51 = vpop.f32.mrb[14].mxu0  ;;  %4696 = vmatpush1.bf16.msra.mxu0 %v4157_v31  ;;  %4739 = vmatpush1.bf16.msra.mxu1 %v4163_v32  ;;  %v7447_v52 = vpop.f32.mrb[14].mxu1 }
  0xf9   :  { %v7452_v54 = vpop.f32.mrb[15].mxu0  ;;  %v7454_v55 = vpop.f32.mrb[15].mxu1  ;;  %4779 = vmatprep.subr.bf16.mxu0 %v6255_v33  ;;  %5878 = vmatprep.subr.bf16.mxu1 %v6269_v34 }
  0xfb   :  { %5838 = vmatmul.mubr.msk.bf16.vlgmr.msra.gmra.mrb[120].mxu0 %vm394_vm2, %v6856_v8  ;;  %5839 = vmatmul.mubr.msk.bf16.vlgmr.msra.gmra.mrb[120].mxu1 %vm394_vm2, %v6856_v8 }
  0xfc   :  { %4780 = vmatpush1.bf16.msra.mxu0 %v6253_v40  ;;  %5879 = vmatpush3.bf16.msra.mxu1 %v6256_v41 }
  0xfd   :  { %4781 = vmatprep.subr.bf16.mxu0 %v4172_v56  ;;  %5880 = vmatprep.subr.bf16.mxu1 %v6269_v34 }
  0xfe   :  { %v7465_v61 = vpop.f32.mrb[16].mxu0  ;;  %v7467_v0 = vpop.f32.mrb[16].mxu1  ;;  %4811 = vmatprep.mubr.bf16.mxu0 %v6268_v3  ;;  %5882 = vmatprep.mubr.msk.bf16.mxu1 %vm6270_vm3, %v6269_v34  ;;  %v6266_v3 = vld [vmem:[%s9352_s4] sm:$0xff]  }
  0xff   :  { %v7472_v2 = vpop.f32.mrb[17].mxu0  ;;  %v7474_v6 = vpop.f32.mrb[17].mxu1 }
 0x100   :  { %v7476_v9 = vpop.f32.mrb[18].mxu0  ;;  %4782 = vmatpush1.bf16.msra.mxu0 %v4169_v57  ;;  %5881 = vmatpush3.bf16.msra.mxu1 %v4175_v60  ;;  %v7478_v7 = vpop.f32.mrb[18].mxu1 }
 0x101   :  { %v7480_v10 = vpop.f32.mrb[19].mxu0  ;;  %v7482_v11 = vpop.f32.mrb[19].mxu1 }
 0x102   :  { %v7490_v34 = vpop.permute.xlu0 %100 }
 0x103   :  { %5840 = vmatmul.mubr.msk.bf16.vlgmr.msra.gmra.mrb[124].mxu0 %vm394_vm2, %v6856_v8  ;;  %5883 = vmatmul.mubr.msk.bf16.vlgmr.msra.gmra.mrb[124].mxu1 %vm394_vm2, %v6266_v3  ;;  %v7516_v31 = vadd.f32 %v7282_v38, %v7490_v34  ;;  %v7520_v32 = vadd.f32 %v7294_v42, %v7490_v34  ;;  %v7524_v33 = vadd.f32 %v7284_v39, %v7490_v34 }
 0x104   :  { %v7536_v38 = vadd.f32 %v7296_v43, %v7490_v34  ;;  %v7556_v43 = vadd.f32 %v7332_v58, %v7490_v34  ;;  %v7576_v58 = vadd.f32 %v7346_v63, %v7490_v34  ;;  %v7612_v60 = vadd.f32 %v7382_v17, %v7490_v34 }
 0x105   :  { %v7616_v3 = vadd.f32 %v7394_v21, %v7490_v34 }
 0x106   :  { %v7492_v12 = vpop.f32.mrb[20].mxu0  ;;  %v7494_v13 = vpop.f32.mrb[20].mxu1 }
 0x107   :  { %v7496_v15 = vpop.f32.mrb[21].mxu0  ;;  %v7498_v16 = vpop.f32.mrb[21].mxu1 }
 0x108   :  { %v7500_v19 = vpop.f32.mrb[22].mxu0  ;;  %v7502_v20 = vpop.f32.mrb[22].mxu1 }
 0x109   :  { %v7504_v8 = vpop.f32.mrb[23].mxu0  ;;  %v7506_v23 = vpop.f32.mrb[23].mxu1 }
 0x10a   :  { %v7508_v26 = vpop.permute.xlu0 %105 }
 0x10b   :  { %v7532_v41 = vadd.f32 %v7301_v45, %v7508_v26  ;;  %v7540_v42 = vadd.f32 %v7308_v48, %v7508_v26  ;;  %v7544_v39 = vadd.f32 %v7303_v46, %v7508_v26  ;;  %v7552_v45 = vadd.f32 %v7310_v49, %v7508_v26 }
 0x10c   :  { %v7560_v48 = vadd.f32 %v7344_v62, %v7490_v34  ;;  %v7564_v46 = vadd.f32 %v7334_v59, %v7490_v34  ;;  %v7572_v49 = vadd.f32 %v7351_v1, %v7508_v26  ;;  %v7580_v62 = vadd.f32 %v7358_v4, %v7508_v26 }
 0x10d   :  { %v7584_v59 = vadd.f32 %v7353_v14, %v7508_v26  ;;  %v7591_v1 = vadd.f32 %v7360_v5, %v7508_v26  ;;  %v7626_v5 = vadd.f32 %v7401_v24, %v7508_v26  ;;  %v7630_v14 = vadd.f32 %v7396_v22, %v7490_v34 }
 0x10e   :  { %v7510_v29 = vpop.f32.mrb[24].mxu0  ;;  %v7512_v30 = vpop.f32.mrb[24].mxu1  ;;  %v7634_v17 = vadd.f32 %v7408_v27, %v7508_v26  ;;  %v7638_v21 = vadd.f32 %v7403_v25, %v7508_v26  ;;  %v7646_v24 = vadd.f32 %v7410_v28, %v7508_v26  ;;  %v7650_v22 = vadd.f32 %v7426_v36, %v7490_v34 }
 0x10f   :  { %9405 = vst [vmem:[#allocation2_spill] sm:$0xff] %v7510_v29  ;;  %9406 = vst [vmem:[#allocation3_spill] sm:$0xff] %v7512_v30  ;;  %v7526_v35 = vpop.f32.mrb[25].mxu0  ;;  %v7528_v40 = vpop.f32.mrb[25].mxu1  ;;  %v7654_v27 = vadd.f32 %v7438_v44, %v7490_v34  ;;  %v7658_v25 = vadd.f32 %v7428_v37, %v7490_v34  ;;  %v7668_v28 = vadd.f32 %v7440_v47, %v7490_v34 }
 0x110   :  { %9407 = vst [vmem:[#allocation4_spill] sm:$0xff] %v7526_v35  ;;  %9408 = vst [vmem:[#allocation5_spill] sm:$0xff] %v7528_v40  ;;  %v7546_v50 = vpop.f32.mrb[26].mxu0  ;;  %v7548_v53 = vpop.f32.mrb[26].mxu1  ;;  %v7672_v36 = vadd.f32 %v7452_v54, %v7508_v26  ;;  %v7676_v44 = vadd.f32 %v7447_v52, %v7508_v26  ;;  %v7700_v52 = vadd.f32 %v7465_v61, %v7490_v34 }
 0x111   :  { %9409 = vst [vmem:[#allocation6_spill] sm:$0xff] %v7546_v50  ;;  %9410 = vst [vmem:[#allocation7_spill] sm:$0xff] %v7548_v53  ;;  %v7566_v56 = vpop.f32.mrb[27].mxu0  ;;  %v7568_v57 = vpop.f32.mrb[27].mxu1  ;;  %v7620_v50 = vadd.f32 %v7384_v18, %v7490_v34  ;;  %v7710_v47 = vadd.f32 %v7467_v0, %v7490_v34 }
 0x112   :  { %9411 = vst [vmem:[#allocation8_spill] sm:$0xff] %v7566_v56  ;;  %9412 = vst [vmem:[#allocation9_spill] sm:$0xff] %v7568_v57 }
 0x113   :  { %9418 = vst [vmem:[#allocation15_spill] sm:$0xff] %v7654_v27  ;;  %9421 = vst [vmem:[#allocation18_spill] sm:$0xff] %v7668_v28 }
 0x114   :  { %9422 = vst [vmem:[#allocation19_spill] sm:$0xff] %v7672_v36  ;;  %9423 = vst [vmem:[#allocation20_spill] sm:$0xff] %v7676_v44 }
 0x116   :  { %v7605_v40 = vpop.f32.mrb[28].mxu0  ;;  %v7607_v4 = vpop.f32.mrb[28].mxu1 }
 0x117   :  { %9413 = vst [vmem:[#allocation10_spill] sm:$0xff] %v7605_v40  ;;  %9414 = vst [vmem:[#allocation11_spill] sm:$0xff] %v7607_v4  ;;  %v7622_v63 = vpop.f32.mrb[29].mxu0  ;;  %v5860_v56 = vpop.f32.mrb[29].mxu1 }
 0x118   :  { %9415 = vst [vmem:[#allocation12_spill] sm:$0xff] %v7622_v63  ;;  %v7640_v18 = vpop.f32.mrb[30].mxu0  ;;  %v7642_v57 = vpop.f32.mrb[30].mxu1 }
 0x119   :  { %9416 = vst [vmem:[#allocation13_spill] sm:$0xff] %v7640_v18  ;;  %9417 = vst [vmem:[#allocation14_spill] sm:$0xff] %v7642_v57  ;;  %v7660_v56 = vpop.f32.mrb[31].mxu0  ;;  %v5861_v53 = vpop.f32.mrb[31].mxu1  ;;  %v7664_v57 = vadd.f32 %v7445_v51, %v7508_v26  ;;  %v7683_v51 = vadd.f32 %v7454_v55, %v7508_v26  ;;  %v7706_v55 = vadd.f32 %v7472_v2, %v7490_v34 }
 0x11a   :  { %9419 = vst [vmem:[#allocation16_spill] sm:$0xff] %v7660_v56 }
 0x11b   :  { %9420 = vst [vmem:[#allocation17_spill] sm:$0xff] %v7664_v57  ;;  %9424 = vst [vmem:[#allocation21_spill] sm:$0xff] %v7683_v51 }
 0x11e   :  { %v1715_v40 = vpop.f32.mrb[32].mxu0  ;;  %v1758_v54 = vpop.f32.mrb[32].mxu1 }
 0x11f   :  { %v1716_v53 = vadd.f32 %v1715_v40, %v7490_v34  ;;  %v1759_v56 = vadd.f32 %v1758_v54, %v7490_v34  ;;  %v1717_v37 = vpop.f32.mrb[33].mxu0  ;;  %v1760_v63 = vpop.f32.mrb[33].mxu1 }
 0x120   :  { %v1718_v4 = vadd.f32 %v1717_v37, %v7490_v34  ;;  %v1761_v18 = vadd.f32 %v1760_v63, %v7490_v34  ;;  %v1719_v61 = vpop.f32.mrb[34].mxu0  ;;  %v1762_v30 = vpop.f32.mrb[34].mxu1  ;;  %v9425_v37 = vmax.f32 %v7516_v31, 0.0  ;;  %v9426_v63 = vmax.f32 %v7524_v33, 0.0 }
 0x121   :  { %v2367_v35 = vmax.f32 %v1716_v53, 0.0  ;;  %v2369_v40 = vmax.f32 %v1759_v56, 0.0  ;;  %v1720_v54 = vadd.f32 %v1719_v61, %v7508_v26  ;;  %v1763_v29 = vadd.f32 %v1762_v30, %v7508_v26  ;;  %v1721_v51 = vpop.f32.mrb[35].mxu0  ;;  %v1764_v36 = vpop.f32.mrb[35].mxu1 }
 0x122   :  { %v2368_v2 = vmax.f32 %v1718_v4, 0.0  ;;  %v2370_v44 = vmax.f32 %v1761_v18, 0.0  ;;  %v1722_v57 = vadd.f32 %v1721_v51, %v7508_v26  ;;  %v1765_v0 = vadd.f32 %v1764_v36, %v7508_v26 }
 0x123   :  { %v7720_v28 = vmax.f32 %v9425_v37, %v2367_v35  ;;  %v7724_v53 = vmax.f32 %v9426_v63, %v2369_v40  ;;  %v2398_v56 = vmax.f32 %v1720_v54, 0.0  ;;  %v2400_v61 = vmax.f32 %v1763_v29, 0.0 }
 0x124   :  { %v9427_v30 = vmax.f32 %v7520_v32, 0.0  ;;  %v9428_v4 = vmax.f32 %v7536_v38, 0.0  ;;  %v2399_v51 = vmax.f32 %v1722_v57, 0.0  ;;  %v2401_v36 = vmax.f32 %v1765_v0, 0.0 }
 0x125   :  { %v7737_v35 = vadd.f32 %v7474_v6, %v7490_v34  ;;  %v9429_v33 = vmax.f32 %v7532_v41, 0.0  ;;  %v9430_v29 = vmax.f32 %v7544_v39, 0.0  ;;  %v7750_v57 = vadd.f32 %v7476_v9, %v7508_v26 }
 0x126   :  { %v7728_v27 = vmax.f32 %v9427_v30, %v2368_v2  ;;  %v7732_v18 = vmax.f32 %v9428_v4, %v2370_v44  ;;  %v9431_v44 = vmax.f32 %v7540_v42, 0.0  ;;  %v9432_v6 = vmax.f32 %v7552_v45, 0.0  ;;  %v1801_v41 = vpop.f32.mrb[36].mxu0  ;;  %v1844_v0 = vpop.f32.mrb[36].mxu1 }
 0x127   :  { %v7741_v40 = vmax.f32 %v9429_v33, %v2398_v56  ;;  %v7745_v32 = vmax.f32 %v9430_v29, %v2400_v61  ;;  %v7763_v37 = vadd.f32 %v7478_v7, %v7508_v26  ;;  %v1802_v63 = vadd.f32 %v1801_v41, %v7490_v34  ;;  %v1803_v56 = vpop.f32.mrb[37].mxu0  ;;  %v1846_v42 = vpop.f32.mrb[37].mxu1 }
 0x128   :  { %v7754_v54 = vmax.f32 %v9431_v44, %v2399_v51  ;;  %v7758_v2 = vmax.f32 %v9432_v6, %v2401_v36  ;;  %v1845_v9 = vadd.f32 %v1844_v0, %v7490_v34  ;;  %v7769_v61 = vadd.f32 %v7480_v10, %v7508_v26  ;;  %v1805_v7 = vpop.f32.mrb[38].mxu0  ;;  %v1848_v51 = vpop.f32.mrb[38].mxu1 }
 0x129   :  { %v7773_v45 = vadd.f32 %v7482_v11, %v7508_v26  ;;  %v1804_v30 = vadd.f32 %v1803_v56, %v7490_v34  ;;  %v1847_v4 = vadd.f32 %v1846_v42, %v7490_v34  ;;  %v2371_v36 = vmax.f32 %v1802_v63, 0.0  ;;  %v1807_v6 = vpop.f32.mrb[39].mxu0  ;;  %v1850_v41 = vpop.f32.mrb[39].mxu1 }
 0x12a   :  { %v2373_v33 = vmax.f32 %v1845_v9, 0.0  ;;  %v1806_v29 = vadd.f32 %v1805_v7, %v7508_v26  ;;  %v1849_v44 = vadd.f32 %v1848_v51, %v7508_v26  ;;  %v1808_v39 = vadd.f32 %v1807_v6, %v7508_v26 }
 0x12b   :  { %v2372_v10 = vmax.f32 %v1804_v30, 0.0  ;;  %v2374_v0 = vmax.f32 %v1847_v4, 0.0  ;;  %v1851_v11 = vadd.f32 %v1850_v41, %v7508_v26  ;;  %v9433_v56 = vmax.f32 %v7556_v43, 0.0 }
 0x12c   :  { %v9434_v42 = vmax.f32 %v7564_v46, 0.0  ;;  %v2402_v9 = vmax.f32 %v1806_v29, 0.0  ;;  %v2404_v7 = vmax.f32 %v1849_v44, 0.0  ;;  %v9435_v51 = vmax.f32 %v7560_v48, 0.0 }
 0x12d   :  { %v7783_v38 = vmax.f32 %v9433_v56, %v2371_v36  ;;  %v9436_v30 = vmax.f32 %v7576_v58, 0.0  ;;  %v2403_v6 = vmax.f32 %v1808_v39, 0.0  ;;  %v2405_v41 = vmax.f32 %v1851_v11, 0.0 }
 0x12e   :  { %v7787_v63 = vmax.f32 %v9434_v42, %v2373_v33  ;;  %v7791_v31 = vmax.f32 %v9435_v51, %v2372_v10  ;;  %v9437_v46 = vmax.f32 %v7572_v49, 0.0  ;;  %v9438_v29 = vmax.f32 %v7584_v59, 0.0  ;;  %v1887_v56 = vpop.f32.mrb[40].mxu0  ;;  %v1930_v49 = vpop.f32.mrb[40].mxu1 }
 0x12f   :  { %v7795_v4 = vmax.f32 %v9436_v30, %v2374_v0  ;;  %v9439_v10 = vmax.f32 %v7580_v62, 0.0  ;;  %v9440_v0 = vmax.f32 %v7591_v1, 0.0  ;;  %v7820_v59 = vadd.f32 %v7492_v12, %v7490_v34  ;;  %v1889_v51 = vpop.f32.mrb[41].mxu0  ;;  %v1932_v62 = vpop.f32.mrb[41].mxu1 }
 0x130   :  { %v7801_v33 = vmax.f32 %v9437_v46, %v2402_v9  ;;  %v7805_v44 = vmax.f32 %v9438_v29, %v2404_v7  ;;  %v1888_v9 = vadd.f32 %v1887_v56, %v7490_v34  ;;  %v1931_v7 = vadd.f32 %v1930_v49, %v7490_v34  ;;  %v1891_v12 = vpop.f32.mrb[42].mxu0  ;;  %v1934_v46 = vpop.f32.mrb[42].mxu1 }
 0x131   :  { %v7811_v39 = vmax.f32 %v9439_v10, %v2403_v6  ;;  %v7815_v11 = vmax.f32 %v9440_v0, %v2405_v41  ;;  %v7826_v30 = vadd.f32 %v7496_v15, %v7490_v34  ;;  %v7830_v1 = vadd.f32 %v7494_v13, %v7490_v34  ;;  %v1893_v49 = vpop.f32.mrb[43].mxu0  ;;  %v1936_v42 = vpop.f32.mrb[43].mxu1 }
 0x132   :  { %v1890_v6 = vadd.f32 %v1889_v51, %v7490_v34  ;;  %v1933_v41 = vadd.f32 %v1932_v62, %v7490_v34  ;;  %v2375_v29 = vmax.f32 %v1888_v9, 0.0  ;;  %v2377_v10 = vmax.f32 %v1931_v7, 0.0 }
 0x133   :  { %v1892_v0 = vadd.f32 %v1891_v12, %v7508_v26  ;;  %v1935_v56 = vadd.f32 %v1934_v46, %v7508_v26  ;;  %v1894_v58 = vadd.f32 %v1893_v49, %v7508_v26  ;;  %v1937_v13 = vadd.f32 %v1936_v42, %v7508_v26 }
 0x134   :  { %v2376_v15 = vmax.f32 %v1890_v6, 0.0  ;;  %v2378_v48 = vmax.f32 %v1933_v41, 0.0  ;;  %v9441_v51 = vmax.f32 %v7612_v60, 0.0  ;;  %v9442_v62 = vmax.f32 %v7620_v50, 0.0  ;;  %v9454_v60 = vld [vmem:[#allocation15_spill] sm:$0xff] }
 0x135   :  { %v2406_v7 = vmax.f32 %v1892_v0, 0.0  ;;  %v2408_v12 = vmax.f32 %v1935_v56, 0.0  ;;  %v9443_v46 = vmax.f32 %v7616_v3, 0.0  ;;  %v9444_v6 = vmax.f32 %v7630_v14, 0.0 }
 0x136   :  { %v7840_v43 = vmax.f32 %v9441_v51, %v2375_v29  ;;  %v7844_v9 = vmax.f32 %v9442_v62, %v2377_v10  ;;  %v2407_v49 = vmax.f32 %v1894_v58, 0.0  ;;  %v2409_v42 = vmax.f32 %v1937_v13, 0.0  ;;  %v2016_v13 = vpop.f32.mrb[44].mxu1 }
 0x137   :  { %v7848_v36 = vmax.f32 %v9443_v46, %v2376_v15  ;;  %v7852_v41 = vmax.f32 %v9444_v6, %v2378_v48  ;;  %v7857_v29 = vadd.f32 %v7498_v16, %v7490_v34  ;;  %v9445_v50 = vmax.f32 %v7626_v5, 0.0  ;;  %v1973_v5 = vpop.f32.mrb[44].mxu0 }
 0x138   :  { %v9446_v3 = vmax.f32 %v7638_v21, 0.0  ;;  %v7870_v48 = vadd.f32 %v7500_v19, %v7508_v26  ;;  %v9447_v58 = vmax.f32 %v7634_v17, 0.0  ;;  %v9449_v16 = vmax.f32 %v7646_v24, 0.0  ;;  %v2018_v17 = vpop.f32.mrb[45].mxu1 }
 0x139   :  { %v7861_v10 = vmax.f32 %v9445_v50, %v2406_v7  ;;  %v7883_v51 = vadd.f32 %v7502_v20, %v7508_v26  ;;  %v1974_v62 = vadd.f32 %v1973_v5, %v7490_v34  ;;  %v2017_v19 = vadd.f32 %v2016_v13, %v7490_v34  ;;  %v1975_v7 = vpop.f32.mrb[45].mxu0 }
 0x13a   :  { %v7865_v0 = vmax.f32 %v9446_v3, %v2408_v12  ;;  %v7874_v56 = vmax.f32 %v9447_v58, %v2407_v49  ;;  %v7878_v15 = vmax.f32 %v9449_v16, %v2409_v42  ;;  %v7889_v12 = vadd.f32 %v7504_v8, %v7508_v26  ;;  %v1977_v20 = vpop.f32.mrb[46].mxu0  ;;  %v2020_v49 = vpop.f32.mrb[46].mxu1 }
 0x13b   :  { %v7893_v24 = vadd.f32 %v7506_v23, %v7508_v26  ;;  %v1976_v46 = vadd.f32 %v1975_v7, %v7490_v34  ;;  %v2019_v6 = vadd.f32 %v2018_v17, %v7490_v34  ;;  %v2379_v42 = vmax.f32 %v1974_v62, 0.0  ;;  %v1979_v16 = vpop.f32.mrb[47].mxu0  ;;  %v2022_v5 = vpop.f32.mrb[47].mxu1 }
 0x13c   :  { %9448 = vst [vmem:[#allocation22_spill] sm:$0xff] %v7874_v56  ;;  %9450 = vst [vmem:[#allocation23_spill] sm:$0xff] %v7878_v15  ;;  %v2381_v50 = vmax.f32 %v2017_v19, 0.0  ;;  %v1978_v3 = vadd.f32 %v1977_v20, %v7508_v26  ;;  %v2021_v58 = vadd.f32 %v2020_v49, %v7508_v26  ;;  %v1980_v21 = vadd.f32 %v1979_v16, %v7508_v26 }
 0x13d   :  { %v2380_v8 = vmax.f32 %v1976_v46, 0.0  ;;  %v2382_v13 = vmax.f32 %v2019_v6, 0.0  ;;  %v2023_v23 = vadd.f32 %v2022_v5, %v7508_v26  ;;  %v9451_v7 = vmax.f32 %v7650_v22, 0.0  ;;  %v9457_v46 = vld [vmem:[#allocation18_spill] sm:$0xff] }
 0x13e   :  { %v9452_v17 = vmax.f32 %v7658_v25, 0.0  ;;  %v2410_v19 = vmax.f32 %v1978_v3, 0.0  ;;  %v2412_v20 = vmax.f32 %v2021_v58, 0.0  ;;  %v9455_v49 = vmax.f32 %v9454_v60, 0.0  ;;  %v9463_v3 = vld [vmem:[#allocation20_spill] sm:$0xff]  ;;  %v2059_v22 = vpop.f32.mrb[48].mxu0 }
 0x13f   :  { %v7903_v14 = vmax.f32 %v9451_v7, %v2379_v42  ;;  %v9458_v6 = vmax.f32 %v9457_v46, 0.0  ;;  %v2411_v16 = vmax.f32 %v1980_v21, 0.0  ;;  %v2413_v5 = vmax.f32 %v2023_v23, 0.0  ;;  %v9460_v7 = vld [vmem:[#allocation17_spill] sm:$0xff]  ;;  %v2061_v60 = vpop.f32.mrb[49].mxu0 }
 0x140   :  { %v7907_v62 = vmax.f32 %v9452_v17, %v2381_v50  ;;  %v7911_v15 = vmax.f32 %v9455_v49, %v2380_v8  ;;  %v9461_v25 = vmax.f32 %v9460_v7, 0.0  ;;  %v9464_v58 = vmax.f32 %v9463_v3, 0.0  ;;  %v9469_v23 = vld [vmem:[#allocation21_spill] sm:$0xff]  ;;  %v2102_v7 = vpop.f32.mrb[48].mxu1 }
 0x141   :  { %v7915_v56 = vmax.f32 %v9458_v6, %v2382_v13  ;;  %v9466_v13 = vld [vmem:[#allocation19_spill] sm:$0xff]  ;;  %v9470_v46 = vmax.f32 %v9469_v23, 0.0  ;;  %v2060_v3 = vadd.f32 %v2059_v22, %v7490_v34 }
 0x142   :  { %9453 = vst [vmem:[#allocation24_spill] sm:$0xff] %v7907_v62  ;;  %9456 = vst [vmem:[#allocation15_spill] sm:$0xff] %v7911_v15  ;;  %v7921_v50 = vmax.f32 %v9461_v25, %v2410_v19  ;;  %v7925_v17 = vmax.f32 %v9464_v58, %v2412_v20  ;;  %v9467_v49 = vmax.f32 %v9466_v13, 0.0  ;;  %v9472_v25 = vld [vmem:[#allocation2_spill] sm:$0xff]  ;;  %v2103_v58 = vadd.f32 %v2102_v7, %v7490_v34  ;;  %v2104_v13 = vpop.f32.mrb[49].mxu1 }
 0x143   :  { %9459 = vst [vmem:[#allocation18_spill] sm:$0xff] %v7915_v56  ;;  %v7935_v6 = vmax.f32 %v9470_v46, %v2413_v5  ;;  %v7940_v20 = vadd.f32 %v9472_v25, %v7490_v34  ;;  %v9474_v5 = vld [vmem:[#allocation3_spill] sm:$0xff]  ;;  %v2062_v46 = vadd.f32 %v2061_v60, %v7490_v34  ;;  %v2105_v19 = vadd.f32 %v2104_v13, %v7490_v34  ;;  %v2063_v25 = vpop.f32.mrb[50].mxu0  ;;  %v2106_v8 = vpop.f32.mrb[50].mxu1 }
 0x144   :  { %9462 = vst [vmem:[#allocation17_spill] sm:$0xff] %v7921_v50  ;;  %9465 = vst [vmem:[#allocation20_spill] sm:$0xff] %v7925_v17  ;;  %v7931_v21 = vmax.f32 %v9467_v49, %v2411_v16  ;;  %v9473_v16 = vld [vmem:[#allocation4_spill] sm:$0xff]  ;;  %v7950_v23 = vadd.f32 %v9474_v5, %v7490_v34  ;;  %v2383_v42 = vmax.f32 %v2060_v3, 0.0  ;;  %v2385_v22 = vmax.f32 %v2103_v58, 0.0  ;;  %v2108_v17 = vpop.f32.mrb[51].mxu1 }
 0x145   :  { %9471 = vst [vmem:[#allocation21_spill] sm:$0xff] %v7935_v6  ;;  %v7946_v49 = vadd.f32 %v9473_v16, %v7490_v34  ;;  %v2064_v7 = vadd.f32 %v2063_v25, %v7508_v26  ;;  %v2107_v6 = vadd.f32 %v2106_v8, %v7508_v26  ;;  %v2384_v16 = vmax.f32 %v2062_v46, 0.0 }
 0x146   :  { %9468 = vst [vmem:[#allocation19_spill] sm:$0xff] %v7931_v21  ;;  %v2065_v21 = vpop.f32.mrb[51].mxu0  ;;  %v2386_v50 = vmax.f32 %v2105_v19, 0.0  ;;  %v2109_v5 = vadd.f32 %v2108_v17, %v7508_v26  ;;  %v9475_v60 = vmax.f32 %v7700_v52, 0.0  ;;  %v9476_v13 = vmax.f32 %v7710_v47, 0.0 }
 0x147   :  { %v2066_v56 = vadd.f32 %v2065_v21, %v7508_v26  ;;  %v2414_v58 = vmax.f32 %v2064_v7, 0.0  ;;  %v2416_v25 = vmax.f32 %v2107_v6, 0.0  ;;  %v9477_v8 = vmax.f32 %v7706_v55, 0.0 }
 0x148   :  { %v7960_v15 = vmax.f32 %v9475_v60, %v2383_v42  ;;  %v7964_v3 = vmax.f32 %v9476_v13, %v2385_v22  ;;  %v9478_v19 = vmax.f32 %v7737_v35, 0.0  ;;  %v2417_v17 = vmax.f32 %v2109_v5, 0.0  ;;  %v9480_v42 = vld [vmem:[#allocation5_spill] sm:$0xff] }
 0x149   :  { %v7968_v62 = vmax.f32 %v9477_v8, %v2384_v16  ;;  %v2415_v21 = vmax.f32 %v2066_v56, 0.0  ;;  %v7977_v60 = vadd.f32 %v9480_v42, %v7490_v34  ;;  %v9481_v47 = vmax.f32 %v7750_v57, 0.0  ;;  %v2145_v57 = vpop.f32.mrb[52].mxu0 }
 0x14a   :  { %v7972_v46 = vmax.f32 %v9478_v19, %v2386_v50  ;;  %v9483_v55 = vmax.f32 %v7763_v37, 0.0  ;;  %v9485_v50 = vld [vmem:[#allocation6_spill] sm:$0xff]  ;;  %v9486_v7 = vmax.f32 %v7769_v61, 0.0  ;;  %v9488_v5 = vmax.f32 %v7773_v45, 0.0  ;;  %v9492_v45 = vld [vmem:[#allocation9_spill] sm:$0xff] }
 0x14b   :  { %v7981_v22 = vmax.f32 %v9481_v47, %v2414_v58  ;;  %v7990_v56 = vadd.f32 %v9485_v50, %v7508_v26  ;;  %v2188_v58 = vpop.f32.mrb[52].mxu1  ;;  %v2146_v19 = vadd.f32 %v2145_v57, %v7490_v34  ;;  %v2147_v47 = vpop.f32.mrb[53].mxu0 }
 0x14c   :  { %9479 = vst [vmem:[#allocation2_spill] sm:$0xff] %v7972_v46  ;;  %v7985_v6 = vmax.f32 %v9483_v55, %v2416_v25  ;;  %v7994_v16 = vmax.f32 %v9486_v7, %v2415_v21  ;;  %v7998_v13 = vmax.f32 %v9488_v5, %v2417_v17  ;;  %v9490_v25 = vld [vmem:[#allocation7_spill] sm:$0xff]  ;;  %v2189_v42 = vadd.f32 %v2188_v58, %v7490_v34  ;;  %v2190_v61 = vpop.f32.mrb[53].mxu1  ;;  %v9491_v21 = vld [vmem:[#allocation8_spill] sm:$0xff]  ;;  %v2149_v5 = vpop.f32.mrb[54].mxu0 }
 0x14d   :  { %9482 = vst [vmem:[#allocation4_spill] sm:$0xff] %v7981_v22  ;;  %v8003_v8 = vadd.f32 %v9490_v25, %v7508_v26  ;;  %v8009_v55 = vadd.f32 %v9491_v21, %v7508_v26  ;;  %v8013_v17 = vadd.f32 %v9492_v45, %v7508_v26  ;;  %v2148_v50 = vadd.f32 %v2147_v47, %v7490_v34  ;;  %v2192_v25 = vpop.f32.mrb[54].mxu1  ;;  %v2151_v52 = vpop.f32.mrb[55].mxu0 }
 0x14e   :  { %9484 = vst [vmem:[#allocation3_spill] sm:$0xff] %v7985_v6  ;;  %9487 = vst [vmem:[#allocation5_spill] sm:$0xff] %v7994_v16  ;;  %v2191_v7 = vadd.f32 %v2190_v61, %v7490_v34  ;;  %v2387_v37 = vmax.f32 %v2146_v19, 0.0  ;;  %v2389_v57 = vmax.f32 %v2189_v42, 0.0  ;;  %v2150_v58 = vadd.f32 %v2149_v5, %v7508_v26 }
 0x14f   :  { %9489 = vst [vmem:[#allocation6_spill] sm:$0xff] %v7998_v13  ;;  %v2193_v35 = vadd.f32 %v2192_v25, %v7508_v26  ;;  %v2194_v13 = vpop.f32.mrb[55].mxu1  ;;  %v2388_v21 = vmax.f32 %v2148_v50, 0.0  ;;  %v2152_v6 = vadd.f32 %v2151_v52, %v7508_v26  ;;  %v9493_v47 = vmax.f32 %v7820_v59, 0.0 }
 0x150   :  { %v2390_v16 = vmax.f32 %v2191_v7, 0.0  ;;  %v2195_v45 = vadd.f32 %v2194_v13, %v7508_v26  ;;  %v9494_v61 = vmax.f32 %v7830_v1, 0.0  ;;  %v2418_v42 = vmax.f32 %v2150_v58, 0.0 }
 0x151   :  { %v8023_v22 = vmax.f32 %v9493_v47, %v2387_v37  ;;  %v2420_v5 = vmax.f32 %v2193_v35, 0.0  ;;  %v9495_v25 = vmax.f32 %v7826_v30, 0.0  ;;  %v9496_v50 = vmax.f32 %v7857_v29, 0.0 }
 0x152   :  { %v8027_v19 = vmax.f32 %v9494_v61, %v2389_v57  ;;  %v2419_v52 = vmax.f32 %v2152_v6, 0.0  ;;  %v2421_v13 = vmax.f32 %v2195_v45, 0.0  ;;  %v1236_v59 = vmax.f32 %v7990_v56, 0.0 }
 0x153   :  { %v8031_v46 = vmax.f32 %v9495_v25, %v2388_v21  ;;  %v8035_v7 = vmax.f32 %v9496_v50, %v2390_v16  ;;  %v1208_v37 = vmax.f32 %v7977_v60, 0.0  ;;  %v9497_v1 = vmax.f32 %v7870_v48, 0.0  ;;  %v2231_v60 = vpop.f32.mrb[56].mxu0  ;;  %v2274_v48 = vpop.f32.mrb[56].mxu1 }
 0x154   :  { %v9499_v35 = vmax.f32 %v7883_v51, 0.0  ;;  %v1237_v30 = vmax.f32 %v8009_v55, 0.0  ;;  %v1238_v29 = vmax.f32 %v8003_v8, 0.0  ;;  %v9501_v16 = vmax.f32 %v7889_v12, 0.0  ;;  %v9505_v51 = vld [vmem:[#allocation10_spill] sm:$0xff]  ;;  %v2233_v8 = vpop.f32.mrb[57].mxu0 }
 0x155   :  { %v8041_v57 = vmax.f32 %v9497_v1, %v2418_v42  ;;  %v9503_v56 = vmax.f32 %v7893_v24, 0.0  ;;  %v1239_v45 = vmax.f32 %v8013_v17, 0.0  ;;  %v1132_v47 = vadd.f32 %v9505_v51, %v7490_v34  ;;  %v2276_v42 = vpop.f32.mrb[57].mxu1  ;;  %v9506_v12 = vld [vmem:[#allocation12_spill] sm:$0xff]  ;;  %v9507_v24 = vld [vmem:[#allocation11_spill] sm:$0xff]  ;;  %v2235_v17 = vpop.f32.mrb[58].mxu0 }
 0x156   :  { %v8045_v58 = vmax.f32 %v9499_v35, %v2420_v5  ;;  %v8051_v6 = vmax.f32 %v9501_v16, %v2419_v52  ;;  %v2232_v61 = vadd.f32 %v2231_v60, %v7490_v34  ;;  %v2275_v55 = vadd.f32 %v2274_v48, %v7490_v34  ;;  %v2237_v60 = vpop.f32.mrb[59].mxu0 }
 0x157   :  { %9498 = vst [vmem:[#allocation7_spill] sm:$0xff] %v8041_v57  ;;  %v8055_v21 = vmax.f32 %v9503_v56, %v2421_v13  ;;  %v1134_v5 = vadd.f32 %v9506_v12, %v7490_v34  ;;  %v1175_v25 = vadd.f32 %v9507_v24, %v7490_v34  ;;  %v2234_v50 = vadd.f32 %v2233_v8, %v7490_v34  ;;  %v2278_v13 = vpop.f32.mrb[58].mxu1 }
 0x158   :  { %9500 = vst [vmem:[#allocation8_spill] sm:$0xff] %v8045_v58  ;;  %9502 = vst [vmem:[#allocation9_spill] sm:$0xff] %v8051_v6  ;;  %v2277_v52 = vadd.f32 %v2276_v42, %v7490_v34  ;;  %v2391_v1 = vmax.f32 %v2232_v61, 0.0  ;;  %v2393_v35 = vmax.f32 %v2275_v55, 0.0  ;;  %v2236_v16 = vadd.f32 %v2235_v17, %v7508_v26  ;;  %v2280_v48 = vpop.f32.mrb[59].mxu1 }
 0x159   :  { %9504 = vst [vmem:[#allocation25_spill] sm:$0xff] %v8055_v21  ;;  %v2279_v56 = vadd.f32 %v2278_v13, %v7508_v26  ;;  %v2392_v51 = vmax.f32 %v2234_v50, 0.0  ;;  %v2238_v12 = vadd.f32 %v2237_v60, %v7508_v26  ;;  %v2281_v24 = vadd.f32 %v2280_v48, %v7508_v26 }
 0x15a   :  { %v2394_v21 = vmax.f32 %v2277_v52, 0.0  ;;  %v9508_v8 = vmax.f32 %v7940_v20, 0.0  ;;  %v9509_v42 = vmax.f32 %v7950_v23, 0.0  ;;  %v2422_v55 = vmax.f32 %v2236_v16, 0.0  ;;  %v9511_v20 = vld [vmem:[#allocation13_spill] sm:$0xff]  ;;  %v9512_v23 = vld [vmem:[#allocation14_spill] sm:$0xff] }
 0x15b   :  { %v2424_v17 = vmax.f32 %v2279_v56, 0.0  ;;  %v9510_v13 = vmax.f32 %v7946_v49, 0.0  ;;  %v2423_v52 = vmax.f32 %v2238_v12, 0.0  ;;  %v2425_v60 = vmax.f32 %v2281_v24, 0.0  ;;  %v2317_v49 = vpop.f32.mrb[60].mxu0 }
 0x15c   :  { %v8074_v6 = vmax.f32 %v9508_v8, %v2391_v1  ;;  %v8078_v61 = vmax.f32 %v9509_v42, %v2393_v35  ;;  %v8084_v50 = vmax.f32 %v1208_v37, %v2394_v21  ;;  %v8086_v57 = vmax.f32 %v1236_v59, %v2422_v55  ;;  %v2319_v12 = vpop.f32.mrb[61].mxu0  ;;  %v9515_v42 = vld [vmem:[#allocation16_spill] sm:$0xff] }
 0x15d   :  { %v8082_v58 = vmax.f32 %v9510_v13, %v2392_v51  ;;  %v8088_v48 = vmax.f32 %v1238_v29, %v2424_v17  ;;  %v1136_v1 = vadd.f32 %v9511_v20, %v7508_v26  ;;  %v1178_v35 = vadd.f32 %v9512_v23, %v7508_v26  ;;  %v2360_v51 = vpop.f32.mrb[60].mxu1 }
 0x15e   :  { %v8094_v16 = vmax.f32 %v1237_v30, %v2423_v52  ;;  %v8096_v56 = vmax.f32 %v1239_v45, %v2425_v60  ;;  %v1209_v37 = vmax.f32 %v1132_v47, 0.0  ;;  %v2318_v21 = vadd.f32 %v2317_v49, %v7490_v34  ;;  %v5868_v29 = vpop.f32.mrb[61].mxu1  ;;  %v2321_v30 = vpop.f32.mrb[62].mxu0 }
 0x15f   :  { %v2361_v59 = vadd.f32 %v2360_v51, %v7490_v34  ;;  %v1210_v24 = vmax.f32 %v1134_v5, 0.0  ;;  %v1211_v8 = vmax.f32 %v1175_v25, 0.0  ;;  %v1138_v55 = vadd.f32 %v9515_v42, %v7508_v26  ;;  %v2363_v13 = vpop.f32.mrb[62].mxu1  ;;  %v2323_v20 = vpop.f32.mrb[63].mxu0 }
 0x160   :  { %9513 = vst [vmem:[#allocation10_spill] sm:$0xff] %v8094_v16  ;;  %9514 = vst [vmem:[#allocation12_spill] sm:$0xff] %v8096_v56  ;;  %v2320_v17 = vadd.f32 %v2319_v12, %v7490_v34  ;;  %v2395_v45 = vmax.f32 %v2318_v21, 0.0  ;;  %v2322_v60 = vadd.f32 %v2321_v30, %v7508_v26  ;;  %v2364_v47 = vadd.f32 %v2363_v13, %v7508_v26  ;;  %v5869_v23 = vpop.f32.mrb[63].mxu1 }
 0x161   :  { %v2397_v52 = vmax.f32 %v2361_v59, 0.0  ;;  %v1240_v49 = vmax.f32 %v1136_v1, 0.0  ;;  %v1242_v51 = vmax.f32 %v1178_v35, 0.0  ;;  %v2324_v5 = vadd.f32 %v2323_v20, %v7508_v26  ;;  %v2963_v1 = vpop.f32.mrb[64].mxu0  ;;  %v3006_v35 = vpop.f32.mrb[64].mxu1 }
 0x162   :  { %v2396_v29 = vmax.f32 %v2320_v17, 0.0  ;;  %v8106_v25 = vmax.f32 %v1209_v37, %v2395_v45  ;;  %v2426_v12 = vmax.f32 %v2322_v60, 0.0  ;;  %v2428_v56 = vmax.f32 %v2364_v47, 0.0  ;;  %v3008_v45 = vpop.f32.mrb[65].mxu1 }
 0x163   :  { %v8108_v42 = vmax.f32 %v1211_v8, %v2397_v52  ;;  %v1241_v16 = vmax.f32 %v1138_v55, 0.0  ;;  %v2427_v59 = vmax.f32 %v2324_v5, 0.0  ;;  %v2964_v17 = vadd.f32 %v2963_v1, %v7490_v34  ;;  %v2965_v8 = vpop.f32.mrb[65].mxu0  ;;  %v3010_v60 = vpop.f32.mrb[66].mxu1 }
 0x164   :  { %v8110_v21 = vmax.f32 %v1210_v24, %v2396_v29  ;;  %v8112_v30 = vmax.f32 %v1240_v49, %v2426_v12  ;;  %v8114_v13 = vmax.f32 %v1242_v51, %v2428_v56  ;;  %v3007_v37 = vadd.f32 %v3006_v35, %v7490_v34  ;;  %v2967_v55 = vpop.f32.mrb[66].mxu0  ;;  %v3012_v51 = vpop.f32.mrb[67].mxu1 }
 0x165   :  { %v8116_v23 = vmax.f32 %v1241_v16, %v2427_v59  ;;  %v2966_v52 = vadd.f32 %v2965_v8, %v7490_v34  ;;  %v3009_v24 = vadd.f32 %v3008_v45, %v7490_v34  ;;  %v3615_v47 = vmax.f32 %v2964_v17, 0.0  ;;  %v2969_v49 = vpop.f32.mrb[67].mxu0 }
 0x166   :  { %v3617_v20 = vmax.f32 %v3007_v37, 0.0  ;;  %v2968_v56 = vadd.f32 %v2967_v55, %v7508_v26  ;;  %v3011_v16 = vadd.f32 %v3010_v60, %v7508_v26  ;;  %v2970_v12 = vadd.f32 %v2969_v49, %v7508_v26 }
 0x167   :  { %v3616_v29 = vmax.f32 %v2966_v52, 0.0  ;;  %v3618_v5 = vmax.f32 %v3009_v24, 0.0  ;;  %v3013_v59 = vadd.f32 %v3012_v51, %v7508_v26  ;;  %v8127_v1 = vmax.f32 %v7720_v28, %v3615_v47  ;;  %v3049_v47 = vpop.f32.mrb[68].mxu0 }
 0x168   :  { %v8130_v35 = vmax.f32 %v7724_v53, %v3617_v20  ;;  %v3646_v17 = vmax.f32 %v2968_v56, 0.0  ;;  %v3648_v37 = vmax.f32 %v3011_v16, 0.0  ;;  %v3647_v52 = vmax.f32 %v2970_v12, 0.0  ;;  %v3051_v56 = vpop.f32.mrb[69].mxu0 }
 0x169   :  { %v8133_v8 = vmax.f32 %v7728_v27, %v3616_v29  ;;  %v8136_v45 = vmax.f32 %v7732_v18, %v3618_v5  ;;  %v3649_v24 = vmax.f32 %v3013_v59, 0.0  ;;  %v3092_v27 = vpop.f32.mrb[68].mxu1  ;;  %v3050_v20 = vadd.f32 %v3049_v47, %v7490_v34 }
 0x16a   :  { %v8139_v55 = vmax.f32 %v7741_v40, %v3646_v17  ;;  %v8142_v60 = vmax.f32 %v7745_v32, %v3648_v37  ;;  %v8145_v28 = vmax.f32 %v7754_v54, %v3647_v52  ;;  %v3093_v18 = vadd.f32 %v3092_v27, %v7490_v34  ;;  %v3094_v16 = vpop.f32.mrb[69].mxu1  ;;  %v3053_v32 = vpop.f32.mrb[70].mxu0 }
 0x16b   :  { %v8148_v53 = vmax.f32 %v7758_v2, %v3649_v24  ;;  %v3052_v40 = vadd.f32 %v3051_v56, %v7490_v34  ;;  %v3095_v49 = vadd.f32 %v3094_v16, %v7490_v34  ;;  %v3096_v51 = vpop.f32.mrb[70].mxu1  ;;  %v3619_v29 = vmax.f32 %v3050_v20, 0.0  ;;  %v3055_v12 = vpop.f32.mrb[71].mxu0 }
 0x16c   :  { %v3621_v54 = vmax.f32 %v3093_v18, 0.0  ;;  %v3054_v5 = vadd.f32 %v3053_v32, %v7508_v26  ;;  %v3097_v2 = vadd.f32 %v3096_v51, %v7508_v26  ;;  %v3098_v59 = vpop.f32.mrb[71].mxu1  ;;  %v3056_v52 = vadd.f32 %v3055_v12, %v7508_v26 }
 0x16d   :  { %v3620_v17 = vmax.f32 %v3052_v40, 0.0  ;;  %v3622_v37 = vmax.f32 %v3095_v49, 0.0  ;;  %v3099_v24 = vadd.f32 %v3098_v59, %v7508_v26  ;;  %v8159_v47 = vmax.f32 %v7783_v38, %v3619_v29 }
 0x16e   :  { %v8162_v27 = vmax.f32 %v7787_v63, %v3621_v54  ;;  %v3650_v20 = vmax.f32 %v3054_v5, 0.0  ;;  %v3652_v18 = vmax.f32 %v3097_v2, 0.0  ;;  %v3651_v40 = vmax.f32 %v3056_v52, 0.0  ;;  %v3135_v29 = vpop.f32.mrb[72].mxu0 }
 0x16f   :  { %v8165_v56 = vmax.f32 %v7791_v31, %v3620_v17  ;;  %v8168_v16 = vmax.f32 %v7795_v4, %v3622_v37  ;;  %v3653_v49 = vmax.f32 %v3099_v24, 0.0  ;;  %v3178_v31 = vpop.f32.mrb[72].mxu1  ;;  %v3136_v54 = vadd.f32 %v3135_v29, %v7490_v34  ;;  %v3137_v5 = vpop.f32.mrb[73].mxu0 }
 0x170   :  { %v8171_v32 = vmax.f32 %v7801_v33, %v3650_v20  ;;  %v8174_v51 = vmax.f32 %v7805_v44, %v3652_v18  ;;  %v8177_v38 = vmax.f32 %v7811_v39, %v3651_v40  ;;  %v3179_v4 = vadd.f32 %v3178_v31, %v7490_v34  ;;  %v3180_v2 = vpop.f32.mrb[73].mxu1  ;;  %v3139_v44 = vpop.f32.mrb[74].mxu0 }
 0x171   :  { %v8180_v63 = vmax.f32 %v7815_v11, %v3653_v49  ;;  %v3138_v33 = vadd.f32 %v3137_v5, %v7490_v34  ;;  %v3181_v12 = vadd.f32 %v3180_v2, %v7490_v34  ;;  %v3182_v59 = vpop.f32.mrb[74].mxu1  ;;  %v3623_v17 = vmax.f32 %v3136_v54, 0.0  ;;  %v3141_v52 = vpop.f32.mrb[75].mxu0 }
 0x172   :  { %v3625_v39 = vmax.f32 %v3179_v4, 0.0  ;;  %v3140_v37 = vadd.f32 %v3139_v44, %v7508_v26  ;;  %v3183_v11 = vadd.f32 %v3182_v59, %v7508_v26  ;;  %v3184_v24 = vpop.f32.mrb[75].mxu1  ;;  %v3142_v40 = vadd.f32 %v3141_v52, %v7508_v26 }
 0x173   :  { %v3624_v20 = vmax.f32 %v3138_v33, 0.0  ;;  %v3626_v18 = vmax.f32 %v3181_v12, 0.0  ;;  %v3185_v49 = vadd.f32 %v3184_v24, %v7508_v26  ;;  %v8191_v29 = vmax.f32 %v7840_v43, %v3623_v17  ;;  %v9519_v43 = vld [vmem:[#allocation22_spill] sm:$0xff] }
 0x174   :  { %v8194_v31 = vmax.f32 %v7844_v9, %v3625_v39  ;;  %v3654_v54 = vmax.f32 %v3140_v37, 0.0  ;;  %v3656_v4 = vmax.f32 %v3183_v11, 0.0  ;;  %v3655_v33 = vmax.f32 %v3142_v40, 0.0  ;;  %v9521_v9 = vld [vmem:[#allocation23_spill] sm:$0xff] }
 0x175   :  { %v8197_v5 = vmax.f32 %v7848_v36, %v3624_v20  ;;  %v8200_v2 = vmax.f32 %v7852_v41, %v3626_v18  ;;  %v3657_v12 = vmax.f32 %v3185_v49, 0.0 }
 0x176   :  { %v8203_v44 = vmax.f32 %v7861_v10, %v3654_v54  ;;  %v8206_v59 = vmax.f32 %v7865_v0, %v3656_v4  ;;  %v8209_v17 = vmax.f32 %v9519_v43, %v3655_v33  ;;  %v3221_v37 = vpop.f32.mrb[76].mxu0  ;;  %v3264_v36 = vpop.f32.mrb[76].mxu1 }
 0x177   :  { %9516 = vst [vmem:[#allocation11_spill] sm:$0xff] %v8200_v2  ;;  %v8212_v39 = vmax.f32 %v9521_v9, %v3657_v12  ;;  %v3222_v11 = vadd.f32 %v3221_v37, %v7490_v34  ;;  %v3265_v41 = vadd.f32 %v3264_v36, %v7490_v34  ;;  %v3223_v52 = vpop.f32.mrb[77].mxu0  ;;  %v3266_v24 = vpop.f32.mrb[77].mxu1 }
 0x178   :  { %9517 = vst [vmem:[#allocation13_spill] sm:$0xff] %v8203_v44  ;;  %9518 = vst [vmem:[#allocation14_spill] sm:$0xff] %v8206_v59  ;;  %v3224_v10 = vadd.f32 %v3223_v52, %v7490_v34  ;;  %v3267_v20 = vadd.f32 %v3266_v24, %v7490_v34  ;;  %v3225_v0 = vpop.f32.mrb[78].mxu0  ;;  %v3268_v18 = vpop.f32.mrb[78].mxu1  ;;  %v9523_v24 = vld [vmem:[#allocation24_spill] sm:$0xff]  ;;  %v9527_v44 = vld [vmem:[#allocation17_spill] sm:$0xff] }
 0x179   :  { %9520 = vst [vmem:[#allocation16_spill] sm:$0xff] %v8209_v17  ;;  %9522 = vst [vmem:[#allocation22_spill] sm:$0xff] %v8212_v39  ;;  %v3627_v40 = vmax.f32 %v3222_v11, 0.0  ;;  %v3629_v49 = vmax.f32 %v3265_v41, 0.0  ;;  %v3226_v54 = vadd.f32 %v3225_v0, %v7508_v26  ;;  %v3269_v4 = vadd.f32 %v3268_v18, %v7508_v26  ;;  %v3227_v33 = vpop.f32.mrb[79].mxu0  ;;  %v3270_v12 = vpop.f32.mrb[79].mxu1 }
 0x17a   :  { %v3628_v43 = vmax.f32 %v3224_v10, 0.0  ;;  %v3630_v9 = vmax.f32 %v3267_v20, 0.0  ;;  %v3228_v37 = vadd.f32 %v3227_v33, %v7508_v26  ;;  %v3271_v36 = vadd.f32 %v3270_v12, %v7508_v26  ;;  %v9524_v17 = vld [vmem:[#allocation15_spill] sm:$0xff]  ;;  %v9525_v18 = vld [vmem:[#allocation18_spill] sm:$0xff]  ;;  %v9529_v12 = vld [vmem:[#allocation20_spill] sm:$0xff] }
 0x17b   :  { %v8223_v52 = vmax.f32 %v7903_v14, %v3627_v40  ;;  %v8226_v39 = vmax.f32 %v9523_v24, %v3629_v49  ;;  %v3658_v11 = vmax.f32 %v3226_v54, 0.0  ;;  %v3660_v41 = vmax.f32 %v3269_v4, 0.0  ;;  %v9531_v14 = vld [vmem:[#allocation19_spill] sm:$0xff]  ;;  %v9533_v49 = vld [vmem:[#allocation21_spill] sm:$0xff] }
 0x17c   :  { %v8229_v0 = vmax.f32 %v9524_v17, %v3628_v43  ;;  %v8232_v59 = vmax.f32 %v9525_v18, %v3630_v9  ;;  %v3659_v10 = vmax.f32 %v3228_v37, 0.0  ;;  %v3661_v20 = vmax.f32 %v3271_v36, 0.0 }
 0x17d   :  { %v8235_v33 = vmax.f32 %v9527_v44, %v3658_v11  ;;  %v8238_v2 = vmax.f32 %v9529_v12, %v3660_v41 }
 0x17e   :  { %9526 = vst [vmem:[#allocation23_spill] sm:$0xff] %v8232_v59  ;;  %v8241_v40 = vmax.f32 %v9531_v14, %v3659_v10  ;;  %v8244_v54 = vmax.f32 %v9533_v49, %v3661_v20  ;;  %v3307_v4 = vpop.f32.mrb[80].mxu0  ;;  %v3350_v17 = vpop.f32.mrb[80].mxu1 }
 0x17f   :  { %9528 = vst [vmem:[#allocation24_spill] sm:$0xff] %v8235_v33  ;;  %9530 = vst [vmem:[#allocation15_spill] sm:$0xff] %v8238_v2  ;;  %v3308_v43 = vadd.f32 %v3307_v4, %v7490_v34  ;;  %v3351_v9 = vadd.f32 %v3350_v17, %v7490_v34  ;;  %v3309_v37 = vpop.f32.mrb[81].mxu0  ;;  %v3352_v36 = vpop.f32.mrb[81].mxu1  ;;  %v9536_v33 = vld [vmem:[#allocation4_spill] sm:$0xff] }
 0x180   :  { %9532 = vst [vmem:[#allocation18_spill] sm:$0xff] %v8241_v40  ;;  %9534 = vst [vmem:[#allocation17_spill] sm:$0xff] %v8244_v54  ;;  %v3310_v44 = vadd.f32 %v3309_v37, %v7490_v34  ;;  %v3353_v24 = vadd.f32 %v3352_v36, %v7490_v34  ;;  %v3311_v11 = vpop.f32.mrb[82].mxu0  ;;  %v3354_v41 = vpop.f32.mrb[82].mxu1 }
 0x181   :  { %v3631_v18 = vmax.f32 %v3308_v43, 0.0  ;;  %v3633_v10 = vmax.f32 %v3351_v9, 0.0  ;;  %v3312_v12 = vadd.f32 %v3311_v11, %v7508_v26  ;;  %v3355_v20 = vadd.f32 %v3354_v41, %v7508_v26  ;;  %v3313_v14 = vpop.f32.mrb[83].mxu0  ;;  %v3356_v49 = vpop.f32.mrb[83].mxu1  ;;  %v9535_v41 = vld [vmem:[#allocation2_spill] sm:$0xff] }
 0x182   :  { %v3632_v54 = vmax.f32 %v3310_v44, 0.0  ;;  %v3634_v4 = vmax.f32 %v3353_v24, 0.0  ;;  %v3314_v17 = vadd.f32 %v3313_v14, %v7508_v26  ;;  %v3357_v40 = vadd.f32 %v3356_v49, %v7508_v26  ;;  %v9538_v49 = vld [vmem:[#allocation3_spill] sm:$0xff] }
 0x183   :  { %v8255_v37 = vmax.f32 %v7960_v15, %v3631_v18  ;;  %v8258_v36 = vmax.f32 %v7964_v3, %v3633_v10  ;;  %v3662_v43 = vmax.f32 %v3312_v12, 0.0  ;;  %v3664_v9 = vmax.f32 %v3355_v20, 0.0  ;;  %v9540_v15 = vld [vmem:[#allocation5_spill] sm:$0xff]  ;;  %v9542_v3 = vld [vmem:[#allocation6_spill] sm:$0xff] }
 0x184   :  { %v8261_v11 = vmax.f32 %v7968_v62, %v3632_v54  ;;  %v8264_v2 = vmax.f32 %v9535_v41, %v3634_v4  ;;  %v3663_v44 = vmax.f32 %v3314_v17, 0.0  ;;  %v3665_v24 = vmax.f32 %v3357_v40, 0.0 }
 0x185   :  { %v8267_v14 = vmax.f32 %v9536_v33, %v3662_v43  ;;  %v8270_v59 = vmax.f32 %v9538_v49, %v3664_v9 }
 0x186   :  { %v8273_v18 = vmax.f32 %v9540_v15, %v3663_v44  ;;  %v8276_v10 = vmax.f32 %v9542_v3, %v3665_v24  ;;  %v3393_v12 = vpop.f32.mrb[84].mxu0  ;;  %v3436_v62 = vpop.f32.mrb[84].mxu1 }
 0x187   :  { %9537 = vst [vmem:[#allocation20_spill] sm:$0xff] %v8267_v14  ;;  %9539 = vst [vmem:[#allocation19_spill] sm:$0xff] %v8270_v59  ;;  %v3394_v54 = vadd.f32 %v3393_v12, %v7490_v34  ;;  %v3437_v20 = vadd.f32 %v3436_v62, %v7490_v34  ;;  %v3395_v4 = vpop.f32.mrb[85].mxu0  ;;  %v3438_v40 = vpop.f32.mrb[85].mxu1  ;;  %v9544_v59 = vld [vmem:[#allocation7_spill] sm:$0xff] }
 0x188   :  { %9541 = vst [vmem:[#allocation21_spill] sm:$0xff] %v8273_v18  ;;  %9543 = vst [vmem:[#allocation2_spill] sm:$0xff] %v8276_v10  ;;  %v3396_v33 = vadd.f32 %v3395_v4, %v7490_v34  ;;  %v3439_v17 = vadd.f32 %v3438_v40, %v7490_v34  ;;  %v3397_v43 = vpop.f32.mrb[86].mxu0  ;;  %v3440_v9 = vpop.f32.mrb[86].mxu1 }
 0x189   :  { %v3635_v41 = vmax.f32 %v3394_v54, 0.0  ;;  %v3637_v44 = vmax.f32 %v3437_v20, 0.0  ;;  %v3398_v49 = vadd.f32 %v3397_v43, %v7508_v26  ;;  %v3441_v24 = vadd.f32 %v3440_v9, %v7508_v26  ;;  %v3399_v15 = vpop.f32.mrb[87].mxu0  ;;  %v3442_v3 = vpop.f32.mrb[87].mxu1 }
 0x18a   :  { %v3636_v10 = vmax.f32 %v3396_v33, 0.0  ;;  %v3638_v12 = vmax.f32 %v3439_v17, 0.0  ;;  %v3400_v62 = vadd.f32 %v3399_v15, %v7508_v26  ;;  %v3443_v18 = vadd.f32 %v3442_v3, %v7508_v26  ;;  %v9545_v3 = vld [vmem:[#allocation8_spill] sm:$0xff] }
 0x18b   :  { %v8287_v4 = vmax.f32 %v8023_v22, %v3635_v41  ;;  %v8290_v40 = vmax.f32 %v8027_v19, %v3637_v44  ;;  %v3666_v54 = vmax.f32 %v3398_v49, 0.0  ;;  %v3668_v20 = vmax.f32 %v3441_v24, 0.0  ;;  %v9546_v22 = vld [vmem:[#allocation9_spill] sm:$0xff] }
 0x18c   :  { %v8293_v43 = vmax.f32 %v8031_v46, %v3636_v10  ;;  %v8296_v9 = vmax.f32 %v8035_v7, %v3638_v12  ;;  %v3667_v33 = vmax.f32 %v3400_v62, 0.0  ;;  %v3669_v17 = vmax.f32 %v3443_v18, 0.0  ;;  %v9548_v19 = vld [vmem:[#allocation25_spill] sm:$0xff] }
 0x18d   :  { %v8299_v15 = vmax.f32 %v9544_v59, %v3666_v54  ;;  %v8302_v14 = vmax.f32 %v9545_v3, %v3668_v20 }
 0x18e   :  { %v8305_v41 = vmax.f32 %v9546_v22, %v3667_v33  ;;  %v8308_v44 = vmax.f32 %v9548_v19, %v3669_v17  ;;  %v3479_v49 = vpop.f32.mrb[88].mxu0  ;;  %v3522_v46 = vpop.f32.mrb[88].mxu1 }
 0x18f   :  { %v3480_v10 = vadd.f32 %v3479_v49, %v7490_v34  ;;  %v3523_v7 = vadd.f32 %v3522_v46, %v7490_v34  ;;  %v3481_v24 = vpop.f32.mrb[89].mxu0  ;;  %v3524_v18 = vpop.f32.mrb[89].mxu1 }
 0x190   :  { %9547 = vst [vmem:[#allocation4_spill] sm:$0xff] %v8305_v41  ;;  %9549 = vst [vmem:[#allocation3_spill] sm:$0xff] %v8308_v44  ;;  %v3482_v59 = vadd.f32 %v3481_v24, %v7490_v34  ;;  %v3525_v12 = vadd.f32 %v3524_v18, %v7490_v34  ;;  %v3483_v62 = vpop.f32.mrb[90].mxu0  ;;  %v3526_v54 = vpop.f32.mrb[90].mxu1 }
 0x191   :  { %v3639_v20 = vmax.f32 %v3480_v10, 0.0  ;;  %v3641_v33 = vmax.f32 %v3523_v7, 0.0  ;;  %v3484_v3 = vadd.f32 %v3483_v62, %v7508_v26  ;;  %v3527_v17 = vadd.f32 %v3526_v54, %v7508_v26  ;;  %v3485_v22 = vpop.f32.mrb[91].mxu0  ;;  %v3528_v19 = vpop.f32.mrb[91].mxu1 }
 0x192   :  { %v3640_v44 = vmax.f32 %v3482_v59, 0.0  ;;  %v3642_v49 = vmax.f32 %v3525_v12, 0.0  ;;  %v3486_v46 = vadd.f32 %v3485_v22, %v7508_v26  ;;  %v3529_v41 = vadd.f32 %v3528_v19, %v7508_v26 }
 0x193   :  { %v8319_v24 = vmax.f32 %v8074_v6, %v3639_v20  ;;  %v8322_v18 = vmax.f32 %v8078_v61, %v3641_v33  ;;  %v3670_v10 = vmax.f32 %v3484_v3, 0.0  ;;  %v3672_v7 = vmax.f32 %v3527_v17, 0.0  ;;  %v9550_v6 = vld [vmem:[#allocation10_spill] sm:$0xff]  ;;  %v9551_v61 = vld [vmem:[#allocation12_spill] sm:$0xff] }
 0x194   :  { %v8325_v62 = vmax.f32 %v8082_v58, %v3640_v44  ;;  %v8328_v54 = vmax.f32 %v8084_v50, %v3642_v49  ;;  %v3671_v59 = vmax.f32 %v3486_v46, 0.0  ;;  %v3673_v12 = vmax.f32 %v3529_v41, 0.0 }
 0x195   :  { %v8331_v22 = vmax.f32 %v8086_v57, %v3670_v10  ;;  %v8334_v19 = vmax.f32 %v8088_v48, %v3672_v7 }
 0x196   :  { %v8337_v20 = vmax.f32 %v9550_v6, %v3671_v59  ;;  %v8340_v33 = vmax.f32 %v9551_v61, %v3673_v12  ;;  %v3565_v3 = vpop.f32.mrb[92].mxu0  ;;  %v3608_v58 = vpop.f32.mrb[92].mxu1 }
 0x197   :  { %v3566_v44 = vadd.f32 %v3565_v3, %v7490_v34  ;;  %v3609_v50 = vadd.f32 %v3608_v58, %v7490_v34  ;;  %v3567_v17 = vpop.f32.mrb[93].mxu0  ;;  %v5876_v41 = vpop.f32.mrb[93].mxu1 }
 0x198   :  { %9552 = vst [vmem:[#allocation5_spill] sm:$0xff] %v8340_v33  ;;  %v3568_v57 = vadd.f32 %v3567_v17, %v7490_v34  ;;  %v3569_v49 = vpop.f32.mrb[94].mxu0  ;;  %v3611_v46 = vpop.f32.mrb[94].mxu1 }
 0x199   :  { %v3643_v48 = vmax.f32 %v3566_v44, 0.0  ;;  %v3645_v10 = vmax.f32 %v3609_v50, 0.0  ;;  %v3570_v7 = vadd.f32 %v3569_v49, %v7508_v26  ;;  %v3612_v59 = vadd.f32 %v3611_v46, %v7508_v26  ;;  %v3571_v12 = vpop.f32.mrb[95].mxu0  ;;  %v5877_v6 = vpop.f32.mrb[95].mxu1 }
 0x19a   :  { %v3644_v61 = vmax.f32 %v3568_v57, 0.0  ;;  %v3572_v33 = vadd.f32 %v3571_v12, %v7508_v26 }
 0x19b   :  { %v8349_v3 = vmax.f32 %v8106_v25, %v3643_v48  ;;  %v8352_v58 = vmax.f32 %v8108_v42, %v3645_v10  ;;  %v3674_v17 = vmax.f32 %v3570_v7, 0.0  ;;  %v3676_v41 = vmax.f32 %v3612_v59, 0.0 }
 0x19c   :  { %v8355_v44 = vmax.f32 %v8110_v21, %v3644_v61  ;;  %v3675_v50 = vmax.f32 %v3572_v33, 0.0 }
 0x19d   :  { %v8358_v49 = vmax.f32 %v8112_v30, %v3674_v17  ;;  %v8361_v46 = vmax.f32 %v8114_v13, %v3676_v41 }
 0x19e   :  { %v8364_v57 = vmax.f32 %v8116_v23, %v3675_v50  ;;  %v4211_v25 = vpop.f32.mrb[96].mxu0  ;;  %v4254_v48 = vpop.f32.mrb[96].mxu1 }
 0x19f   :  { %v4212_v42 = vadd.f32 %v4211_v25, %v7490_v34  ;;  %v4255_v10 = vadd.f32 %v4254_v48, %v7490_v34  ;;  %v4213_v7 = vpop.f32.mrb[97].mxu0  ;;  %v4256_v59 = vpop.f32.mrb[97].mxu1 }
 0x1a0   :  { %9553 = vst [vmem:[#allocation6_spill] sm:$0xff] %v8364_v57  ;;  %v4214_v21 = vadd.f32 %v4213_v7, %v7490_v34  ;;  %v4257_v33 = vadd.f32 %v4256_v59, %v7490_v34  ;;  %v4215_v30 = vpop.f32.mrb[98].mxu0  ;;  %v4258_v12 = vpop.f32.mrb[98].mxu1 }
 0x1a1   :  { %v4863_v6 = vmax.f32 %v4212_v42, 0.0  ;;  %v4865_v13 = vmax.f32 %v4255_v10, 0.0  ;;  %v4216_v61 = vadd.f32 %v4215_v30, %v7508_v26  ;;  %v4259_v23 = vadd.f32 %v4258_v12, %v7508_v26  ;;  %v4217_v17 = vpop.f32.mrb[99].mxu0  ;;  %v4260_v41 = vpop.f32.mrb[99].mxu1 }
 0x1a2   :  { %v4864_v50 = vmax.f32 %v4214_v21, 0.0  ;;  %v4866_v25 = vmax.f32 %v4257_v33, 0.0  ;;  %v4218_v48 = vadd.f32 %v4217_v17, %v7508_v26  ;;  %v4261_v57 = vadd.f32 %v4260_v41, %v7508_v26 }
 0x1a3   :  { %v8375_v7 = vmax.f32 %v8127_v1, %v4863_v6  ;;  %v8378_v59 = vmax.f32 %v8130_v35, %v4865_v13  ;;  %v4894_v42 = vmax.f32 %v4216_v61, 0.0  ;;  %v4896_v10 = vmax.f32 %v4259_v23, 0.0 }
 0x1a4   :  { %v8381_v30 = vmax.f32 %v8133_v8, %v4864_v50  ;;  %v8384_v12 = vmax.f32 %v8136_v45, %v4866_v25  ;;  %v4895_v21 = vmax.f32 %v4218_v48, 0.0  ;;  %v4897_v33 = vmax.f32 %v4261_v57, 0.0 }
 0x1a5   :  { %9554 = vst [vmem:[#allocation7_spill] sm:$0xff] %v8378_v59  ;;  %v8387_v17 = vmax.f32 %v8139_v55, %v4894_v42  ;;  %v8390_v41 = vmax.f32 %v8142_v60, %v4896_v10 }
 0x1a6   :  { %v4987_v1 = vadd.f32 %v8381_v30, %v8375_v7  ;;  %v8395_v35 = vmax.f32 %v8145_v28, %v4895_v21  ;;  %v8398_v8 = vmax.f32 %v8148_v53, %v4897_v33  ;;  %v4297_v6 = vpop.f32.mrb[100].mxu0  ;;  %v4340_v45 = vpop.f32.mrb[100].mxu1 }
 0x1a7   :  { %9555 = vst [vmem:[#allocation8_spill] sm:$0xff] %v8387_v17  ;;  %v4298_v13 = vadd.f32 %v4297_v6, %v7490_v34  ;;  %v4341_v57 = vadd.f32 %v4340_v45, %v7490_v34  ;;  %v4299_v55 = vpop.f32.mrb[101].mxu0  ;;  %v4342_v61 = vpop.f32.mrb[101].mxu1 }
 0x1a8   :  { %9556 = vst [vmem:[#allocation9_spill] sm:$0xff] %v8395_v35  ;;  %9557 = vst [vmem:[#allocation25_spill] sm:$0xff] %v8398_v8  ;;  %v4988_v60 = vadd.f32 %v4987_v1, %v8378_v59  ;;  %v5021_v23 = vadd.f32 %v8395_v35, %v8387_v17  ;;  %v4300_v50 = vadd.f32 %v4299_v55, %v7490_v34  ;;  %v4301_v25 = vpop.f32.mrb[102].mxu0  ;;  %v4344_v53 = vpop.f32.mrb[102].mxu1 }
 0x1a9   :  { %v4343_v28 = vadd.f32 %v4342_v61, %v7490_v34  ;;  %v4867_v48 = vmax.f32 %v4298_v13, 0.0  ;;  %v4869_v42 = vmax.f32 %v4341_v57, 0.0  ;;  %v4302_v10 = vadd.f32 %v4301_v25, %v7508_v26  ;;  %v4303_v33 = vpop.f32.mrb[103].mxu0  ;;  %v4346_v6 = vpop.f32.mrb[103].mxu1 }
 0x1aa   :  { %v4345_v21 = vadd.f32 %v4344_v53, %v7508_v26  ;;  %v4989_v45 = vadd.f32 %v4988_v60, %v8384_v12  ;;  %v5022_v1 = vadd.f32 %v5021_v23, %v8390_v41  ;;  %v4868_v59 = vmax.f32 %v4300_v50, 0.0 }
 0x1ab   :  { %v4870_v35 = vmax.f32 %v4343_v28, 0.0  ;;  %v8412_v55 = vmax.f32 %v8159_v47, %v4867_v48  ;;  %v8415_v61 = vmax.f32 %v8162_v27, %v4869_v42  ;;  %v4898_v13 = vmax.f32 %v4302_v10, 0.0 }
 0x1ac   :  { %v4900_v57 = vmax.f32 %v4345_v21, 0.0  ;;  %v5023_v25 = vadd.f32 %v5022_v1, %v8398_v8  ;;  %v8419_v53 = vmax.f32 %v8165_v56, %v4868_v59  ;;  %v4304_v60 = vadd.f32 %v4303_v33, %v7508_v26 }
 0x1ad   :  { %v8422_v17 = vmax.f32 %v8168_v16, %v4870_v35  ;;  %v4990_v23 = vadd.f32 %v4989_v45, %v8412_v55  ;;  %v8427_v47 = vmax.f32 %v8171_v32, %v4898_v13  ;;  %v4347_v50 = vadd.f32 %v4346_v6, %v7508_v26 }
 0x1ae   :  { %v8430_v27 = vmax.f32 %v8174_v51, %v4900_v57  ;;  %v4899_v28 = vmax.f32 %v4304_v60, 0.0  ;;  %v4383_v48 = vpop.f32.mrb[104].mxu0  ;;  %v4426_v42 = vpop.f32.mrb[104].mxu1 }
 0x1af   :  { %9558 = vst [vmem:[#allocation10_spill] sm:$0xff] %v8427_v47  ;;  %v4991_v56 = vadd.f32 %v4990_v23, %v8419_v53  ;;  %v5024_v16 = vadd.f32 %v5023_v25, %v8427_v47  ;;  %v4901_v59 = vmax.f32 %v4347_v50, 0.0  ;;  %v4384_v35 = vadd.f32 %v4383_v48, %v7490_v34  ;;  %v4385_v10 = vpop.f32.mrb[105].mxu0  ;;  %v4428_v21 = vpop.f32.mrb[105].mxu1 }
 0x1b0   :  { %9559 = vst [vmem:[#allocation12_spill] sm:$0xff] %v8430_v27  ;;  %v8437_v32 = vmax.f32 %v8177_v38, %v4899_v28  ;;  %v4427_v51 = vadd.f32 %v4426_v42, %v7490_v34  ;;  %v4386_v33 = vadd.f32 %v4385_v10, %v7490_v34  ;;  %v4429_v6 = vadd.f32 %v4428_v21, %v7490_v34  ;;  %v4387_v45 = vpop.f32.mrb[106].mxu0  ;;  %v4430_v1 = vpop.f32.mrb[106].mxu1 }
 0x1b1   :  { %v4992_v13 = vadd.f32 %v4991_v56, %v8415_v61  ;;  %v8444_v57 = vmax.f32 %v8180_v63, %v4901_v59  ;;  %v4871_v25 = vmax.f32 %v4384_v35, 0.0  ;;  %v4388_v60 = vadd.f32 %v4387_v45, %v7508_v26  ;;  %v4389_v23 = vpop.f32.mrb[107].mxu0  ;;  %v4432_v50 = vpop.f32.mrb[107].mxu1 }
 0x1b2   :  { %9560 = vst [vmem:[#allocation26_spill] sm:$0xff] %v8437_v32  ;;  %v5025_v38 = vadd.f32 %v5024_v16, %v8437_v32  ;;  %v4873_v28 = vmax.f32 %v4427_v51, 0.0  ;;  %v4872_v48 = vmax.f32 %v4386_v33, 0.0  ;;  %v4874_v42 = vmax.f32 %v4429_v6, 0.0  ;;  %v9562_v16 = vld [vmem:[#allocation11_spill] sm:$0xff]  ;;  %v9563_v6 = vld [vmem:[#allocation13_spill] sm:$0xff] }
 0x1b3   :  { %9561 = vst [vmem:[#allocation27_spill] sm:$0xff] %v8444_v57  ;;  %v4993_v10 = vadd.f32 %v4992_v13, %v8422_v17  ;;  %v8450_v21 = vmax.f32 %v8191_v29, %v4871_v25  ;;  %v4902_v47 = vmax.f32 %v4388_v60, 0.0  ;;  %v4431_v56 = vadd.f32 %v4430_v1, %v7508_v26  ;;  %v9569_v32 = vld [vmem:[#allocation22_spill] sm:$0xff] }
 0x1b4   :  { %v5026_v63 = vadd.f32 %v5025_v38, %v8430_v27  ;;  %v8455_v59 = vmax.f32 %v8194_v31, %v4873_v28  ;;  %v8458_v35 = vmax.f32 %v8197_v5, %v4872_v48  ;;  %v8461_v51 = vmax.f32 %v9562_v16, %v4874_v42  ;;  %v9565_v38 = vld [vmem:[#allocation14_spill] sm:$0xff] }
 0x1b5   :  { %v4994_v33 = vadd.f32 %v4993_v10, %v8450_v21  ;;  %v8465_v45 = vmax.f32 %v9563_v6, %v4902_v47  ;;  %v4904_v29 = vmax.f32 %v4431_v56, 0.0  ;;  %v4390_v13 = vadd.f32 %v4389_v23, %v7508_v26 }
 0x1b6   :  { %v5027_v1 = vadd.f32 %v5026_v63, %v8444_v57  ;;  %v4433_v25 = vadd.f32 %v4432_v50, %v7508_v26  ;;  %v4469_v31 = vpop.f32.mrb[108].mxu0  ;;  %v4512_v60 = vpop.f32.mrb[108].mxu1 }
 0x1b7   :  { %9564 = vst [vmem:[#allocation11_spill] sm:$0xff] %v8465_v45  ;;  %v4995_v5 = vadd.f32 %v4994_v33, %v8458_v35  ;;  %v8472_v28 = vmax.f32 %v9565_v38, %v4904_v29  ;;  %v4903_v48 = vmax.f32 %v4390_v13, 0.0  ;;  %v4470_v42 = vadd.f32 %v4469_v31, %v7490_v34  ;;  %v4471_v10 = vpop.f32.mrb[109].mxu0  ;;  %v4514_v47 = vpop.f32.mrb[109].mxu1  ;;  %v9567_v33 = vld [vmem:[#allocation16_spill] sm:$0xff] }
 0x1b8   :  { %v5028_v56 = vadd.f32 %v5027_v1, %v8465_v45  ;;  %v4905_v16 = vmax.f32 %v4433_v25, 0.0  ;;  %v4513_v23 = vadd.f32 %v4512_v60, %v7490_v34  ;;  %v4472_v63 = vadd.f32 %v4471_v10, %v7490_v34  ;;  %v4473_v50 = vpop.f32.mrb[110].mxu0  ;;  %v4516_v6 = vpop.f32.mrb[110].mxu1 }
 0x1b9   :  { %9566 = vst [vmem:[#allocation13_spill] sm:$0xff] %v8472_v28  ;;  %v4996_v57 = vadd.f32 %v4995_v5, %v8455_v59  ;;  %v8480_v27 = vmax.f32 %v9567_v33, %v4903_v48  ;;  %v4875_v29 = vmax.f32 %v4470_v42, 0.0  ;;  %v4515_v13 = vadd.f32 %v4514_v47, %v7490_v34  ;;  %v4475_v31 = vpop.f32.mrb[111].mxu0  ;;  %v4518_v38 = vpop.f32.mrb[111].mxu1 }
 0x1ba   :  { %v8484_v8 = vmax.f32 %v9569_v32, %v4905_v16  ;;  %v4877_v1 = vmax.f32 %v4513_v23, 0.0  ;;  %v4876_v25 = vmax.f32 %v4472_v63, 0.0  ;;  %v4474_v60 = vadd.f32 %v4473_v50, %v7508_v26 }
 0x1bb   :  { %9568 = vst [vmem:[#allocation14_spill] sm:$0xff] %v8480_v27  ;;  %v4997_v10 = vadd.f32 %v4996_v57, %v8461_v51  ;;  %v5029_v45 = vadd.f32 %v5028_v56, %v8480_v27  ;;  %v8490_v5 = vmax.f32 %v8223_v52, %v4875_v29  ;;  %v4878_v48 = vmax.f32 %v4515_v13, 0.0  ;;  %v9573_v57 = vld [vmem:[#allocation23_spill] sm:$0xff]  ;;  %v9574_v56 = vld [vmem:[#allocation24_spill] sm:$0xff] }
 0x1bc   :  { %9570 = vst [vmem:[#allocation16_spill] sm:$0xff] %v8484_v8  ;;  %v8493_v42 = vmax.f32 %v8226_v39, %v4877_v1  ;;  %v8496_v47 = vmax.f32 %v8229_v0, %v4876_v25  ;;  %v4906_v32 = vmax.f32 %v4474_v60, 0.0  ;;  %v4517_v16 = vadd.f32 %v4516_v6, %v7508_v26 }
 0x1bd   :  { %9571 = vst [vmem:[#allocation22_spill] sm:$0xff] %v8490_v5  ;;  %v5030_v23 = vadd.f32 %v5029_v45, %v8472_v28  ;;  %v4998_v63 = vadd.f32 %v4997_v10, %v8490_v5  ;;  %v8502_v50 = vmax.f32 %v9573_v57, %v4878_v48  ;;  %v4476_v52 = vadd.f32 %v4475_v31, %v7508_v26  ;;  %v9576_v48 = vld [vmem:[#allocation15_spill] sm:$0xff] }
 0x1be   :  { %9572 = vst [vmem:[#allocation28_spill] sm:$0xff] %v8496_v47  ;;  %v8506_v33 = vmax.f32 %v9574_v56, %v4906_v32  ;;  %v4908_v39 = vmax.f32 %v4517_v16, 0.0  ;;  %v4519_v29 = vadd.f32 %v4518_v38, %v7508_v26  ;;  %v4555_v0 = vpop.f32.mrb[112].mxu0  ;;  %v4598_v13 = vpop.f32.mrb[112].mxu1 }
 0x1bf   :  { %v5031_v1 = vadd.f32 %v5030_v23, %v8484_v8  ;;  %v4999_v6 = vadd.f32 %v4998_v63, %v8496_v47  ;;  %v4907_v45 = vmax.f32 %v4476_v52, 0.0  ;;  %v4556_v25 = vadd.f32 %v4555_v0, %v7490_v34  ;;  %v4557_v60 = vpop.f32.mrb[113].mxu0  ;;  %v4600_v10 = vpop.f32.mrb[113].mxu1  ;;  %v9578_v63 = vld [vmem:[#allocation18_spill] sm:$0xff]  ;;  %v9580_v47 = vld [vmem:[#allocation17_spill] sm:$0xff] }
 0x1c0   :  { %9575 = vst [vmem:[#allocation23_spill] sm:$0xff] %v8506_v33  ;;  %v8513_v57 = vmax.f32 %v9576_v48, %v4908_v39  ;;  %v4909_v31 = vmax.f32 %v4519_v29, 0.0  ;;  %v4599_v32 = vadd.f32 %v4598_v13, %v7490_v34  ;;  %v4558_v16 = vadd.f32 %v4557_v60, %v7490_v34  ;;  %v4559_v38 = vpop.f32.mrb[114].mxu0  ;;  %v4602_v56 = vpop.f32.mrb[114].mxu1 }
 0x1c1   :  { %v5000_v28 = vadd.f32 %v4999_v6, %v8493_v42  ;;  %v5032_v23 = vadd.f32 %v5031_v1, %v8506_v33  ;;  %v8520_v52 = vmax.f32 %v9578_v63, %v4907_v45  ;;  %v4879_v0 = vmax.f32 %v4556_v25, 0.0  ;;  %v4561_v8 = vpop.f32.mrb[115].mxu0  ;;  %v4604_v27 = vpop.f32.mrb[115].mxu1 }
 0x1c2   :  { %9577 = vst [vmem:[#allocation24_spill] sm:$0xff] %v8513_v57  ;;  %v8523_v39 = vmax.f32 %v9580_v47, %v4909_v31  ;;  %v4881_v29 = vmax.f32 %v4599_v32, 0.0  ;;  %v4880_v48 = vmax.f32 %v4558_v16, 0.0  ;;  %v4601_v13 = vadd.f32 %v4600_v10, %v7490_v34 }
 0x1c3   :  { %9579 = vst [vmem:[#allocation15_spill] sm:$0xff] %v8520_v52  ;;  %v5001_v60 = vadd.f32 %v5000_v28, %v8502_v50  ;;  %v5033_v5 = vadd.f32 %v5032_v23, %v8520_v52  ;;  %v8529_v6 = vmax.f32 %v8255_v37, %v4879_v0  ;;  %v4560_v1 = vadd.f32 %v4559_v38, %v7508_v26 }
 0x1c4   :  { %9581 = vst [vmem:[#allocation18_spill] sm:$0xff] %v8523_v39  ;;  %v8533_v45 = vmax.f32 %v8258_v36, %v4881_v29  ;;  %v8536_v25 = vmax.f32 %v8261_v11, %v4880_v48  ;;  %v4882_v47 = vmax.f32 %v4601_v13, 0.0  ;;  %v4603_v31 = vadd.f32 %v4602_v56, %v7508_v26  ;;  %v9582_v56 = vld [vmem:[#allocation20_spill] sm:$0xff] }
 0x1c5   :  { %v5034_v10 = vadd.f32 %v5033_v5, %v8513_v57  ;;  %v5002_v28 = vadd.f32 %v5001_v60, %v8529_v6  ;;  %v4910_v32 = vmax.f32 %v4560_v1, 0.0  ;;  %v4562_v16 = vadd.f32 %v4561_v8, %v7508_v26  ;;  %v9583_v60 = vld [vmem:[#allocation19_spill] sm:$0xff] }
 0x1c6   :  { %v8543_v37 = vmax.f32 %v8264_v2, %v4882_v47  ;;  %v4912_v38 = vmax.f32 %v4603_v31, 0.0  ;;  %v4605_v36 = vadd.f32 %v4604_v27, %v7508_v26  ;;  %v4641_v23 = vpop.f32.mrb[116].mxu0  ;;  %v4684_v63 = vpop.f32.mrb[116].mxu1 }
 0x1c7   :  { %v5035_v11 = vadd.f32 %v5034_v10, %v8523_v39  ;;  %v5003_v0 = vadd.f32 %v5002_v28, %v8536_v25  ;;  %v8549_v29 = vmax.f32 %v9582_v56, %v4910_v32  ;;  %v4911_v5 = vmax.f32 %v4562_v16, 0.0  ;;  %v4643_v48 = vpop.f32.mrb[117].mxu0  ;;  %v4686_v13 = vpop.f32.mrb[117].mxu1  ;;  %v9584_v39 = vld [vmem:[#allocation21_spill] sm:$0xff] }
 0x1c8   :  { %v8552_v8 = vmax.f32 %v9583_v60, %v4912_v38  ;;  %v4913_v2 = vmax.f32 %v4605_v36, 0.0  ;;  %v4642_v1 = vadd.f32 %v4641_v23, %v7490_v34  ;;  %v4685_v27 = vadd.f32 %v4684_v63, %v7490_v34  ;;  %v4645_v47 = vpop.f32.mrb[118].mxu0  ;;  %v4688_v31 = vpop.f32.mrb[118].mxu1  ;;  %v9585_v38 = vld [vmem:[#allocation2_spill] sm:$0xff] }
 0x1c9   :  { %v5004_v10 = vadd.f32 %v5003_v0, %v8533_v45  ;;  %v5036_v28 = vadd.f32 %v5035_v11, %v8549_v29  ;;  %v8559_v32 = vmax.f32 %v9584_v39, %v4911_v5  ;;  %v4644_v16 = vadd.f32 %v4643_v48, %v7490_v34  ;;  %v4647_v56 = vpop.f32.mrb[119].mxu0  ;;  %v4690_v57 = vpop.f32.mrb[119].mxu1 }
 0x1ca   :  { %v8563_v60 = vmax.f32 %v9585_v38, %v4913_v2  ;;  %v4883_v36 = vmax.f32 %v4642_v1, 0.0  ;;  %v4885_v23 = vmax.f32 %v4685_v27, 0.0  ;;  %v4687_v63 = vadd.f32 %v4686_v13, %v7490_v34 }
 0x1cb   :  { %v5005_v52 = vadd.f32 %v5004_v10, %v8543_v37  ;;  %v5037_v0 = vadd.f32 %v5036_v28, %v8559_v32  ;;  %v4884_v33 = vmax.f32 %v4644_v16, 0.0  ;;  %v4646_v11 = vadd.f32 %v4645_v47, %v7508_v26 }
 0x1cc   :  { %9586 = vst [vmem:[#allocation17_spill] sm:$0xff] %v8563_v60  ;;  %v8570_v39 = vmax.f32 %v8287_v4, %v4883_v36  ;;  %v8573_v5 = vmax.f32 %v8290_v40, %v4885_v23  ;;  %v4886_v48 = vmax.f32 %v4687_v63, 0.0  ;;  %v4689_v2 = vadd.f32 %v4688_v31, %v7508_v26 }
 0x1cd   :  { %v5038_v1 = vadd.f32 %v5037_v0, %v8552_v8  ;;  %v8578_v13 = vmax.f32 %v8293_v43, %v4884_v33  ;;  %v4914_v27 = vmax.f32 %v4646_v11, 0.0  ;;  %v4648_v10 = vadd.f32 %v4647_v56, %v7508_v26 }
 0x1ce   :  { %v5006_v28 = vadd.f32 %v5005_v52, %v8570_v39  ;;  %v8583_v47 = vmax.f32 %v8296_v9, %v4886_v48  ;;  %v4916_v4 = vmax.f32 %v4689_v2, 0.0  ;;  %v4691_v40 = vadd.f32 %v4690_v57, %v7508_v26  ;;  %v4727_v16 = vpop.f32.mrb[120].mxu0  ;;  %v4770_v38 = vpop.f32.mrb[120].mxu1  ;;  %v9587_v2 = vld [vmem:[#allocation4_spill] sm:$0xff] }
 0x1cf   :  { %v5039_v31 = vadd.f32 %v5038_v1, %v8563_v60  ;;  %v8588_v36 = vmax.f32 %v8299_v15, %v4914_v27  ;;  %v4915_v43 = vmax.f32 %v4648_v10, 0.0  ;;  %v4728_v33 = vadd.f32 %v4727_v16, %v7490_v34  ;;  %v4729_v23 = vpop.f32.mrb[121].mxu0  ;;  %v4772_v56 = vpop.f32.mrb[121].mxu1  ;;  %v9588_v60 = vld [vmem:[#allocation3_spill] sm:$0xff] }
 0x1d0   :  { %v5007_v52 = vadd.f32 %v5006_v28, %v8578_v13  ;;  %v8593_v9 = vmax.f32 %v8302_v14, %v4916_v4  ;;  %v4917_v63 = vmax.f32 %v4691_v40, 0.0  ;;  %v4771_v57 = vadd.f32 %v4770_v38, %v7490_v34  ;;  %v4731_v0 = vpop.f32.mrb[122].mxu0  ;;  %v4774_v11 = vpop.f32.mrb[122].mxu1 }
 0x1d1   :  { %v5040_v48 = vadd.f32 %v5039_v31, %v8588_v36  ;;  %v8598_v15 = vmax.f32 %v9587_v2, %v4915_v43  ;;  %v4887_v1 = vmax.f32 %v4728_v33, 0.0  ;;  %v4730_v27 = vadd.f32 %v4729_v23, %v7490_v34  ;;  %v4733_v10 = vpop.f32.mrb[123].mxu0  ;;  %v4776_v16 = vpop.f32.mrb[123].mxu1 }
 0x1d2   :  { %v5008_v28 = vadd.f32 %v5007_v52, %v8573_v5  ;;  %v8603_v14 = vmax.f32 %v9588_v60, %v4917_v63  ;;  %v4889_v4 = vmax.f32 %v4771_v57, 0.0  ;;  %v4773_v40 = vadd.f32 %v4772_v56, %v7490_v34 }
 0x1d3   :  { %v5041_v38 = vadd.f32 %v5040_v48, %v8598_v15  ;;  %v8608_v31 = vmax.f32 %v8319_v24, %v4887_v1  ;;  %v4888_v43 = vmax.f32 %v4730_v27, 0.0  ;;  %v4732_v33 = vadd.f32 %v4731_v0, %v7508_v26 }
 0x1d4   :  { %v5009_v23 = vadd.f32 %v5008_v28, %v8583_v47  ;;  %v8613_v2 = vmax.f32 %v8322_v18, %v4889_v4  ;;  %v4890_v52 = vmax.f32 %v4773_v40, 0.0  ;;  %v4775_v60 = vadd.f32 %v4774_v11, %v7508_v26 }
 0x1d5   :  { %v5042_v63 = vadd.f32 %v5041_v38, %v8593_v9  ;;  %v8618_v56 = vmax.f32 %v8325_v62, %v4888_v43  ;;  %v4918_v57 = vmax.f32 %v4732_v33, 0.0  ;;  %v4734_v24 = vadd.f32 %v4733_v10, %v7508_v26 }
 0x1d6   :  { %v5010_v48 = vadd.f32 %v5009_v23, %v8608_v31  ;;  %v8623_v0 = vmax.f32 %v8328_v54, %v4890_v52  ;;  %v4920_v1 = vmax.f32 %v4775_v60, 0.0  ;;  %v4777_v18 = vadd.f32 %v4776_v16, %v7508_v26  ;;  %v4813_v27 = vpop.f32.mrb[124].mxu0  ;;  %v4856_v28 = vpop.f32.mrb[124].mxu1 }
 0x1d7   :  { %v5043_v11 = vadd.f32 %v5042_v63, %v8603_v14  ;;  %v8628_v4 = vmax.f32 %v8331_v22, %v4918_v57  ;;  %v4919_v62 = vmax.f32 %v4734_v24, 0.0  ;;  %v4814_v40 = vadd.f32 %v4813_v27, %v7490_v34  ;;  %v4815_v38 = vpop.f32.mrb[125].mxu0  ;;  %v5884_v10 = vpop.f32.mrb[125].mxu1 }
 0x1d8   :  { %v5011_v43 = vadd.f32 %v5010_v48, %v8618_v56  ;;  %v8633_v54 = vmax.f32 %v8334_v19, %v4920_v1  ;;  %v4921_v33 = vmax.f32 %v4777_v18, 0.0  ;;  %v4857_v16 = vadd.f32 %v4856_v28, %v7490_v34  ;;  %v4817_v23 = vpop.f32.mrb[126].mxu0  ;;  %v4859_v52 = vpop.f32.mrb[126].mxu1  ;;  %v9589_v10 = vld [vmem:[#allocation5_spill] sm:$0xff] }
 0x1d9   :  { %v5044_v60 = vadd.f32 %v5043_v11, %v8628_v4  ;;  %v8638_v22 = vmax.f32 %v8337_v20, %v4919_v62  ;;  %v4891_v63 = vmax.f32 %v4814_v40, 0.0  ;;  %v4816_v57 = vadd.f32 %v4815_v38, %v7490_v34  ;;  %v4819_v24 = vpop.f32.mrb[127].mxu0  ;;  %v5885_v27 = vpop.f32.mrb[127].mxu1 }
 0x1da   :  { %v5012_v48 = vadd.f32 %v5011_v43, %v8613_v2  ;;  %v8643_v19 = vmax.f32 %v9589_v10, %v4921_v33  ;;  %v4893_v1 = vmax.f32 %v4857_v16, 0.0  ;;  %v4818_v18 = vadd.f32 %v4817_v23, %v7508_v26 }
 0x1db   :  { %v5045_v28 = vadd.f32 %v5044_v60, %v8638_v22  ;;  %v8648_v11 = vmax.f32 %v8349_v3, %v4891_v63  ;;  %v4892_v20 = vmax.f32 %v4816_v57, 0.0  ;;  %v4860_v62 = vadd.f32 %v4859_v52, %v7508_v26 }
 0x1dc   :  { %v5013_v34 = vadd.f32 %v5012_v48, %v8623_v0  ;;  %v4922_v40 = vmax.f32 %v4818_v18, 0.0  ;;  %v4820_v38 = vadd.f32 %v4819_v24, %v7508_v26  ;;  %v8654_v43 = vmax.f32 %v8352_v58, %v4893_v1  ;;  %v9590_v58 = vld [vmem:[#allocation6_spill] sm:$0xff]  ;;  %v5316_v18 = vld [vmem:[%s9357_s6 + $0x8] sm:$0xff] }
 0x1dd   :  { %v5046_v33 = vadd.f32 %v5045_v28, %v8633_v54  ;;  %v8658_v16 = vmax.f32 %v8355_v44, %v4892_v20  ;;  %v4924_v23 = vmax.f32 %v4860_v62, 0.0  ;;  %v5389_v28 = vld [vmem:[%s9358_s7] sm:$0xff] }
 0x1de   :  { %v8661_v3 = vmax.f32 %v8358_v49, %v4922_v40  ;;  %v4923_v60 = vmax.f32 %v4820_v38, 0.0  ;;  %v5014_v52 = vadd.f32 %v5013_v34, %v8648_v11  ;;  %v5017_v49 = vsel %vm5016_vm4, %v8654_v43, 0.0  ;;  %v9591_v38 = vld [vmem:[#allocation7_spill] sm:$0xff] }
 0x1df   :  { %v5047_v63 = vadd.f32 %v5046_v33, %v8643_v19  ;;  %v8666_v26 = vmax.f32 %v8361_v46, %v4924_v23  ;;  %v5315_v46 = vld [vmem:[%s9357_s6] sm:$0xff] }
 0x1e0   :  { %v8669_v57 = vmax.f32 %v9590_v58, %v4923_v60  ;;  %v5015_v24 = vadd.f32 %v5014_v52, %v8658_v16 }
 0x1e1   :  { %v5048_v44 = vadd.f32 %v5047_v63, %v8661_v3  ;;  %v5050_v10 = vsel %vm5016_vm4, %v8666_v26, 0.0 }
 0x1e2   :  { %v5018_v27 = vadd.f32 %v5017_v49, %v5015_v24 }
 0x1e3   :  { %v5049_v48 = vadd.f32 %v5048_v44, %v8669_v57 }
 0x1e4   :  { %5019 = vadd.xlane.f32.xlu1 %v5018_v27 }
 0x1e5   :  { %v5051_v1 = vadd.f32 %v5050_v10, %v5049_v48 }
 0x1e8   :  { %5052 = vadd.xlane.f32.xlu1 %v5051_v1 }
 0x1f9   :  { %5319 = vperm.xlu1 %5891, %v5315_v46  }
 0x1fd   :  { %5324 = vperm.xlu1 %5891, %v5316_v18  }
 0x201   :  { %5393 = vperm.xlu1 %5891, %v5389_v28  }
 0x271   :  { %v5020_v20 = vpop.xlane.xlu1 %5019 }
 0x272   :  { %v8687_v62 = vmul.f32 0.00025826445, %v5020_v20 }
 0x274   :  { %v8691_v34 = vsub.f32 %v8375_v7, %v8687_v62  ;;  %v8695_v40 = vsub.f32 %v8381_v30, %v8687_v62  ;;  %v8699_v33 = vsub.f32 %v9591_v38, %v8687_v62  ;;  %v8707_v52 = vsub.f32 %v8384_v12, %v8687_v62  ;;  %v9592_v38 = vld [vmem:[#allocation8_spill] sm:$0xff] }
 0x275   :  { %v8711_v7 = vsub.f32 %v8412_v55, %v8687_v62  ;;  %v8717_v58 = vsub.f32 %v8419_v53, %v8687_v62  ;;  %v5053_v49 = vpop.xlane.xlu1 %5052  ;;  %v8723_v12 = vsub.f32 %v8415_v61, %v8687_v62  ;;  %v8729_v48 = vsub.f32 %v8422_v17, %v8687_v62 }
 0x276   :  { %v5119_v23 = vmul.f32 %v8691_v34, %v8691_v34  ;;  %v5120_v60 = vmul.f32 %v8695_v40, %v8695_v40  ;;  %v5121_v30 = vmul.f32 %v8699_v33, %v8699_v33  ;;  %v5122_v24 = vmul.f32 %v8707_v52, %v8707_v52 }
 0x277   :  { %v5123_v55 = vmul.f32 %v8711_v7, %v8711_v7  ;;  %v5124_v53 = vmul.f32 %v8717_v58, %v8717_v58  ;;  %v8733_v1 = vmul.f32 0.00025826445, %v5053_v49  ;;  %v8737_v46 = vsub.f32 %v8450_v21, %v8687_v62 }
 0x278   :  { %v5181_v63 = vadd.f32 %v5120_v60, %v5119_v23  ;;  %v5125_v61 = vmul.f32 %v8723_v12, %v8723_v12  ;;  %v8743_v28 = vsub.f32 %v8458_v35, %v8687_v62  ;;  %v5126_v17 = vmul.f32 %v8729_v48, %v8729_v48  ;;  %v9594_v60 = vld [vmem:[#allocation9_spill] sm:$0xff] }
 0x279   :  { %v8749_v23 = vsub.f32 %v9592_v38, %v8733_v1  ;;  %v8753_v21 = vsub.f32 %v9594_v60, %v8733_v1  ;;  %v5127_v35 = vmul.f32 %v8737_v46, %v8737_v46 }
 0x27a   :  { %v5182_v44 = vadd.f32 %v5181_v63, %v5121_v30  ;;  %v8757_v30 = vsub.f32 %v8455_v59, %v8687_v62 }
 0x27b   :  { %9593 = vst [vmem:[#allocation20_spill] sm:$0xff] %v8749_v23  ;;  %9595 = vst [vmem:[#allocation19_spill] sm:$0xff] %v8753_v21  ;;  %v5150_v59 = vmul.f32 %v8749_v23, %v8749_v23 }
 0x27c   :  { %v5183_v27 = vadd.f32 %v5182_v44, %v5122_v24  ;;  %v8763_v24 = vsub.f32 %v8461_v51, %v8687_v62  ;;  %v5128_v44 = vmul.f32 %v8743_v28, %v8743_v28  ;;  %v5129_v51 = vmul.f32 %v8757_v30, %v8757_v30 }
 0x27e   :  { %v5184_v10 = vadd.f32 %v5183_v27, %v5123_v55  ;;  %v8769_v55 = vsub.f32 %v8390_v41, %v8733_v1  ;;  %v5151_v27 = vmul.f32 %v8753_v21, %v8753_v21  ;;  %v9600_v41 = vld [vmem:[#allocation28_spill] sm:$0xff]  ;;  %v5130_v38 = vmul.f32 %v8763_v24, %v8763_v24  ;;  %v9603_v21 = vld [vmem:[#allocation26_spill] sm:$0xff] }
 0x27f   :  { %v8805_v23 = vsub.f32 %v9603_v21, %v8733_v1 }
 0x280   :  { %v5185_v18 = vadd.f32 %v5184_v10, %v5124_v53  ;;  %9596 = vst [vmem:[#allocation21_spill] sm:$0xff] %v8769_v55  ;;  %v9597_v53 = vld [vmem:[#allocation22_spill] sm:$0xff] }
 0x281   :  { %v8777_v10 = vsub.f32 %v9597_v53, %v8687_v62  ;;  %v5152_v53 = vmul.f32 %v8769_v55, %v8769_v55  ;;  %9604 = vst [vmem:[#allocation3_spill] sm:$0xff] %v8805_v23 }
 0x282   :  { %v5186_v20 = vadd.f32 %v5185_v18, %v5125_v61  ;;  %v9598_v18 = vld [vmem:[#allocation25_spill] sm:$0xff] }
 0x284   :  { %v5187_v63 = vadd.f32 %v5186_v20, %v5126_v17  ;;  %v8783_v17 = vsub.f32 %v9598_v18, %v8733_v1  ;;  %v8787_v20 = vsub.f32 %v9600_v41, %v8687_v62  ;;  %v5131_v18 = vmul.f32 %v8777_v10, %v8777_v10 }
 0x286   :  { %v5188_v49 = vadd.f32 %v5187_v63, %v5127_v35  ;;  %9599 = vst [vmem:[#allocation2_spill] sm:$0xff] %v8783_v17  ;;  %v9601_v35 = vld [vmem:[#allocation10_spill] sm:$0xff] }
 0x287   :  { %v8793_v63 = vsub.f32 %v9601_v35, %v8733_v1  ;;  %v8811_v35 = vsub.f32 %v8502_v50, %v8687_v62 }
 0x288   :  { %v5189_v61 = vadd.f32 %v5188_v49, %v5128_v44  ;;  %v5214_v44 = vadd.f32 %v5151_v27, %v5150_v59  ;;  %v8799_v49 = vsub.f32 %v8493_v42, %v8687_v62  ;;  %v5132_v42 = vmul.f32 %v8787_v20, %v8787_v20  ;;  %v9605_v27 = vld [vmem:[#allocation12_spill] sm:$0xff] }
 0x289   :  { %9602 = vst [vmem:[#allocation4_spill] sm:$0xff] %v8793_v63  ;;  %v8817_v55 = vsub.f32 %v9605_v27, %v8733_v1  ;;  %v5154_v21 = vmul.f32 %v8793_v63, %v8793_v63  ;;  %v8835_v27 = vsub.f32 %v8536_v25, %v8687_v62 }
 0x28a   :  { %v5190_v60 = vadd.f32 %v5189_v61, %v5129_v51  ;;  %v5153_v51 = vmul.f32 %v8783_v17, %v8783_v17  ;;  %v5215_v61 = vadd.f32 %v5214_v44, %v5152_v53  ;;  %v5133_v50 = vmul.f32 %v8799_v49, %v8799_v49  ;;  %v9607_v44 = vld [vmem:[#allocation27_spill] sm:$0xff] }
 0x28b   :  { %9606 = vst [vmem:[#allocation5_spill] sm:$0xff] %v8817_v55  ;;  %v8829_v17 = vsub.f32 %v9607_v44, %v8733_v1  ;;  %v8847_v44 = vsub.f32 %v8533_v45, %v8687_v62  ;;  %v5136_v45 = vmul.f32 %v8835_v27, %v8835_v27 }
 0x28c   :  { %v5191_v41 = vadd.f32 %v5190_v60, %v5130_v38  ;;  %v5216_v38 = vadd.f32 %v5215_v61, %v5153_v51  ;;  %v8823_v60 = vsub.f32 %v8529_v6, %v8687_v62  ;;  %v5134_v6 = vmul.f32 %v8811_v35, %v8811_v35  ;;  %v9609_v61 = vld [vmem:[#allocation11_spill] sm:$0xff] }
 0x28d   :  { %9608 = vst [vmem:[#allocation6_spill] sm:$0xff] %v8829_v17  ;;  %v8841_v63 = vsub.f32 %v9609_v61, %v8733_v1  ;;  %v8859_v61 = vsub.f32 %v8543_v37, %v8687_v62  ;;  %v5137_v37 = vmul.f32 %v8847_v44, %v8847_v44 }
 0x28e   :  { %v5192_v59 = vadd.f32 %v5191_v41, %v5131_v18  ;;  %v5155_v18 = vmul.f32 %v8805_v23, %v8805_v23  ;;  %v5217_v41 = vadd.f32 %v5216_v38, %v5154_v21  ;;  %v5135_v25 = vmul.f32 %v8823_v60, %v8823_v60  ;;  %v9611_v38 = vld [vmem:[#allocation14_spill] sm:$0xff] }
 0x28f   :  { %9610 = vst [vmem:[#allocation7_spill] sm:$0xff] %v8841_v63  ;;  %v8853_v23 = vsub.f32 %v9611_v38, %v8733_v1  ;;  %v8871_v38 = vsub.f32 %v8570_v39, %v8687_v62  ;;  %v5138_v39 = vmul.f32 %v8859_v61, %v8859_v61 }
 0x290   :  { %v5193_v53 = vadd.f32 %v5192_v59, %v5132_v42  ;;  %v5156_v42 = vmul.f32 %v8817_v55, %v8817_v55  ;;  %v5218_v59 = vadd.f32 %v5217_v41, %v5155_v18  ;;  %v9613_v41 = vld [vmem:[#allocation13_spill] sm:$0xff] }
 0x291   :  { %9612 = vst [vmem:[#allocation8_spill] sm:$0xff] %v8853_v23  ;;  %v8865_v55 = vsub.f32 %v9613_v41, %v8733_v1  ;;  %v8883_v41 = vsub.f32 %v8578_v13, %v8687_v62  ;;  %v5139_v13 = vmul.f32 %v8871_v38, %v8871_v38 }
 0x292   :  { %v5194_v51 = vadd.f32 %v5193_v53, %v5133_v50  ;;  %v5157_v50 = vmul.f32 %v8829_v17, %v8829_v17  ;;  %v5219_v53 = vadd.f32 %v5218_v59, %v5156_v42  ;;  %v9615_v59 = vld [vmem:[#allocation16_spill] sm:$0xff] }
 0x293   :  { %9614 = vst [vmem:[#allocation9_spill] sm:$0xff] %v8865_v55  ;;  %v8877_v17 = vsub.f32 %v9615_v59, %v8733_v1  ;;  %v8895_v59 = vsub.f32 %v8573_v5, %v8687_v62  ;;  %v5140_v5 = vmul.f32 %v8883_v41, %v8883_v41 }
 0x294   :  { %v5195_v21 = vadd.f32 %v5194_v51, %v5134_v6  ;;  %v5158_v6 = vmul.f32 %v8841_v63, %v8841_v63  ;;  %v5220_v51 = vadd.f32 %v5219_v53, %v5157_v50  ;;  %v9617_v53 = vld [vmem:[#allocation23_spill] sm:$0xff] }
 0x295   :  { %9616 = vst [vmem:[#allocation22_spill] sm:$0xff] %v8877_v17  ;;  %v8889_v63 = vsub.f32 %v9617_v53, %v8733_v1  ;;  %v8907_v53 = vsub.f32 %v8583_v47, %v8687_v62  ;;  %v5141_v47 = vmul.f32 %v8895_v59, %v8895_v59 }
 0x296   :  { %v5196_v18 = vadd.f32 %v5195_v21, %v5135_v25  ;;  %v5159_v25 = vmul.f32 %v8853_v23, %v8853_v23  ;;  %v5221_v21 = vadd.f32 %v5220_v51, %v5158_v6  ;;  %v9618_v51 = vld [vmem:[#allocation15_spill] sm:$0xff] }
 0x297   :  { %v8901_v23 = vsub.f32 %v9618_v51, %v8733_v1  ;;  %v8919_v51 = vsub.f32 %v8608_v31, %v8687_v62  ;;  %v5142_v31 = vmul.f32 %v8907_v53, %v8907_v53 }
 0x298   :  { %v5197_v42 = vadd.f32 %v5196_v18, %v5136_v45  ;;  %v5160_v45 = vmul.f32 %v8865_v55, %v8865_v55  ;;  %v5222_v18 = vadd.f32 %v5221_v21, %v5159_v25  ;;  %v9619_v21 = vld [vmem:[#allocation24_spill] sm:$0xff] }
 0x299   :  { %v8913_v55 = vsub.f32 %v9619_v21, %v8733_v1  ;;  %v8931_v21 = vsub.f32 %v8618_v56, %v8687_v62  ;;  %v5143_v56 = vmul.f32 %v8919_v51, %v8919_v51 }
 0x29a   :  { %v5198_v50 = vadd.f32 %v5197_v42, %v5137_v37  ;;  %v5161_v37 = vmul.f32 %v8877_v17, %v8877_v17  ;;  %v5223_v42 = vadd.f32 %v5222_v18, %v5160_v45  ;;  %v9620_v18 = vld [vmem:[#allocation18_spill] sm:$0xff] }
 0x29b   :  { %v8925_v17 = vsub.f32 %v9620_v18, %v8733_v1  ;;  %v8943_v18 = vsub.f32 %v8613_v2, %v8687_v62  ;;  %v5144_v2 = vmul.f32 %v8931_v21, %v8931_v21 }
 0x29c   :  { %v5199_v6 = vadd.f32 %v5198_v50, %v5138_v39  ;;  %v5162_v39 = vmul.f32 %v8889_v63, %v8889_v63  ;;  %v5224_v50 = vadd.f32 %v5223_v42, %v5161_v37  ;;  %v8937_v42 = vsub.f32 %v8549_v29, %v8733_v1 }
 0x29d   :  { %v5165_v29 = vmul.f32 %v8925_v17, %v8925_v17 }
 0x29e   :  { %v5200_v25 = vadd.f32 %v5199_v6, %v5139_v13  ;;  %v5163_v13 = vmul.f32 %v8901_v23, %v8901_v23  ;;  %v5225_v6 = vadd.f32 %v5224_v50, %v5162_v39  ;;  %v8949_v50 = vsub.f32 %v8559_v32, %v8733_v1 }
 0x29f   :  { %v5166_v32 = vmul.f32 %v8937_v42, %v8937_v42 }
 0x2a0   :  { %v5201_v45 = vadd.f32 %v5200_v25, %v5140_v5  ;;  %v5164_v5 = vmul.f32 %v8913_v55, %v8913_v55  ;;  %v5226_v25 = vadd.f32 %v5225_v6, %v5163_v13  ;;  %9621 = vst [vmem:[#allocation25_spill] sm:$0xff] %v8949_v50  ;;  %v8961_v6 = vsub.f32 %v8552_v8, %v8733_v1 }
 0x2a2   :  { %v5202_v37 = vadd.f32 %v5201_v45, %v5141_v47  ;;  %v5227_v47 = vadd.f32 %v5226_v25, %v5164_v5  ;;  %v8955_v45 = vsub.f32 %v8623_v0, %v8687_v62  ;;  %9622 = vst [vmem:[#allocation28_spill] sm:$0xff] %v8961_v6  ;;  %v5145_v0 = vmul.f32 %v8943_v18, %v8943_v18 }
 0x2a3   :  { %v8973_v25 = vsub.f32 %v8654_v43, %v8687_v62  ;;  %v8989_v43 = vsub.f32 %v8588_v36, %v8733_v1 }
 0x2a4   :  { %v5203_v39 = vadd.f32 %v5202_v37, %v5142_v31  ;;  %v5228_v31 = vadd.f32 %v5227_v47, %v5165_v29  ;;  %v8967_v37 = vsub.f32 %v8648_v11, %v8687_v62  ;;  %v8983_v11 = vsub.f32 %v8658_v16, %v8687_v62 }
 0x2a5   :  { %v5146_v47 = vmul.f32 %v8955_v45, %v8955_v45  ;;  %v5149_v16 = vmul.f32 %v8973_v25, %v8973_v25  ;;  %v8999_v62 = vsub.f32 %v8598_v15, %v8733_v1 }
 0x2a6   :  { %v5204_v13 = vadd.f32 %v5203_v39, %v5143_v56  ;;  %v9623_v56 = vld [vmem:[#allocation17_spill] sm:$0xff]  ;;  %v5167_v39 = vmul.f32 %v8949_v50, %v8949_v50  ;;  %v5229_v29 = vadd.f32 %v5228_v31, %v5166_v32  ;;  %v5147_v50 = vmul.f32 %v8967_v37, %v8967_v37 }
 0x2a7   :  { %v8977_v8 = vsub.f32 %v9623_v56, %v8733_v1  ;;  %v5210_v15 = vsel %vm5016_vm4, %v5149_v16, 0.0  ;;  %v9026_v16 = vsub.f32 %v8638_v22, %v8733_v1 }
 0x2a8   :  { %v5205_v5 = vadd.f32 %v5204_v13, %v5144_v2  ;;  %v5168_v13 = vmul.f32 %v8961_v6, %v8961_v6  ;;  %v5230_v56 = vadd.f32 %v5229_v29, %v5167_v39  ;;  %v9007_v39 = vsub.f32 %v8593_v9, %v8733_v1 }
 0x2a9   :  { %v5169_v31 = vmul.f32 %v8977_v8, %v8977_v8  ;;  %v5170_v29 = vmul.f32 %v8989_v43, %v8989_v43  ;;  %v9014_v6 = vsub.f32 %v8603_v14, %v8733_v1  ;;  %v9020_v9 = vsub.f32 %v8628_v4, %v8733_v1 }
 0x2aa   :  { %v5206_v2 = vadd.f32 %v5205_v5, %v5145_v0  ;;  %v5231_v36 = vadd.f32 %v5230_v56, %v5168_v13  ;;  %v5148_v0 = vmul.f32 %v8983_v11, %v8983_v11  ;;  %v5171_v13 = vmul.f32 %v8999_v62, %v8999_v62 }
 0x2ab   :  { %v5173_v14 = vmul.f32 %v9014_v6, %v9014_v6  ;;  %v5174_v4 = vmul.f32 %v9020_v9, %v9020_v9  ;;  %v5175_v22 = vmul.f32 %v9026_v16, %v9026_v16 }
 0x2ac   :  { %v5207_v32 = vadd.f32 %v5206_v2, %v5146_v47  ;;  %v5232_v47 = vadd.f32 %v5231_v36, %v5169_v31 }
 0x2ae   :  { %v5208_v5 = vadd.f32 %v5207_v32, %v5147_v50  ;;  %v5233_v56 = vadd.f32 %v5232_v47, %v5170_v29  ;;  %v5172_v32 = vmul.f32 %v9007_v39, %v9007_v39  ;;  %v9038_v29 = vsub.f32 %v8643_v19, %v8733_v1 }
 0x2af   :  { %v9054_v19 = vsub.f32 %v8669_v57, %v8733_v1 }
 0x2b0   :  { %v5209_v2 = vadd.f32 %v5208_v5, %v5148_v0  ;;  %v5234_v31 = vadd.f32 %v5233_v56, %v5171_v13  ;;  %v9032_v0 = vsub.f32 %v8633_v54, %v8733_v1  ;;  %9625 = vst [vmem:[#allocation26_spill] sm:$0xff] %v9038_v29  ;;  %v9050_v13 = vsub.f32 %v8666_v26, %v8733_v1 }
 0x2b1   :  { %9628 = vst [vmem:[#allocation11_spill] sm:$0xff] %v9054_v19  ;;  %v5177_v56 = vmul.f32 %v9038_v29, %v9038_v29 }
 0x2b2   :  { %v5211_v50 = vadd.f32 %v5210_v15, %v5209_v2  ;;  %v5235_v36 = vadd.f32 %v5234_v31, %v5172_v32  ;;  %9624 = vst [vmem:[#allocation10_spill] sm:$0xff] %v9032_v0  ;;  %v9044_v2 = vsub.f32 %v8661_v3, %v8733_v1  ;;  %v5176_v54 = vmul.f32 %v9032_v0, %v9032_v0  ;;  %v5390_v1 = vld [vmem:[%s9358_s7 + $0x8] sm:$0xff] }
 0x2b3   :  { %9627 = vst [vmem:[#allocation27_spill] sm:$0xff] %v9050_v13  ;;  %v5180_v31 = vmul.f32 %v9050_v13, %v9050_v13 }
 0x2b4   :  { %5212 = vadd.xlane.f32.xlu0 %v5211_v50  ;;  %v5236_v5 = vadd.f32 %v5235_v36, %v5173_v14  ;;  %9626 = vst [vmem:[#allocation12_spill] sm:$0xff] %v9044_v2  ;;  %v5178_v3 = vmul.f32 %v9044_v2, %v9044_v2  ;;  %v5179_v14 = vmul.f32 %v9054_v19, %v9054_v19 }
 0x2b6   :  { %v5237_v47 = vadd.f32 %v5236_v5, %v5174_v4  ;;  %v5243_v4 = vsel %vm5016_vm4, %v5180_v31, 0.0 }
 0x2b8   :  { %v5238_v15 = vadd.f32 %v5237_v47, %v5175_v22 }
 0x2ba   :  { %v5239_v50 = vadd.f32 %v5238_v15, %v5176_v54 }
 0x2bc   :  { %v5240_v32 = vadd.f32 %v5239_v50, %v5177_v56 }
 0x2be   :  { %v5241_v26 = vadd.f32 %v5240_v32, %v5178_v3 }
 0x2c0   :  { %v5242_v36 = vadd.f32 %v5241_v26, %v5179_v14 }
 0x2c2   :  { %v5244_v57 = vadd.f32 %v5243_v4, %v5242_v36  ;;  %v5320_v36 = vpop.permute.xlu1 %5319 }
 0x2c4   :  { %5245 = vadd.xlane.f32.xlu1 %v5244_v57 }
 0x2d5   :  { %5398 = vperm.xlu1 %5891, %v5390_v1  }
 0x341   :  { %v5213_v5 = vpop.xlane.xlu0 %5212 }
 0x342   :  { %v5247_v22 = vmul.f32 0.00025826445, %v5213_v5 }
 0x344   :  { %v5249_v47 = vadd.f32 1e-05, %v5247_v22 }
 0x346   :  { %6261 = vrsqrt.f32 %v5249_v47 }
 0x350   :  { %v6262_v54 = vpop.eup %6261 }
 0x351   :  { %v5253_v15 = vmul.f32 %v6262_v54, %v8691_v34  ;;  %v5254_v56 = vmul.f32 %v6262_v54, %v8695_v40  ;;  %v5255_v50 = vmul.f32 %v6262_v54, %v8699_v33  ;;  %v5256_v3 = vmul.f32 %v6262_v54, %v8707_v52 }
 0x352   :  { %v5257_v32 = vmul.f32 %v6262_v54, %v8711_v7  ;;  %v5258_v31 = vmul.f32 %v6262_v54, %v8717_v58  ;;  %v5259_v14 = vmul.f32 %v6262_v54, %v8723_v12  ;;  %v5260_v26 = vmul.f32 %v6262_v54, %v8729_v48 }
 0x353   :  { %v5261_v4 = vmul.f32 %v6262_v54, %v8737_v46  ;;  %v5262_v57 = vmul.f32 %v6262_v54, %v8743_v28  ;;  %v5263_v34 = vmul.f32 %v6262_v54, %v8757_v30  ;;  %v5264_v40 = vmul.f32 %v6262_v54, %v8763_v24 }
 0x354   :  { %v5265_v33 = vmul.f32 %v6262_v54, %v8777_v10  ;;  %v5266_v52 = vmul.f32 %v6262_v54, %v8787_v20  ;;  %v5267_v7 = vmul.f32 %v6262_v54, %v8799_v49  ;;  %v5268_v58 = vmul.f32 %v6262_v54, %v8811_v35 }
 0x355   :  { %v5269_v12 = vmul.f32 %v6262_v54, %v8823_v60  ;;  %v5270_v48 = vmul.f32 %v6262_v54, %v8835_v27  ;;  %v5271_v46 = vmul.f32 %v6262_v54, %v8847_v44  ;;  %v5272_v28 = vmul.f32 %v6262_v54, %v8859_v61 }
 0x356   :  { %v5273_v30 = vmul.f32 %v6262_v54, %v8871_v38  ;;  %v5274_v24 = vmul.f32 %v6262_v54, %v8883_v41  ;;  %v5275_v10 = vmul.f32 %v6262_v54, %v8895_v59  ;;  %v5276_v20 = vmul.f32 %v6262_v54, %v8907_v53  ;;  %v9099_v41 = vpop.permute.xlu1 %5324 }
 0x357   :  { %v5277_v49 = vmul.f32 %v6262_v54, %v8919_v51  ;;  %v5278_v35 = vmul.f32 %v6262_v54, %v8931_v21  ;;  %v5279_v60 = vmul.f32 %v6262_v54, %v8943_v18  ;;  %v5280_v27 = vmul.f32 %v6262_v54, %v8955_v45  ;;  %9629 = vst [vmem:[#allocation14_spill] sm:$0xff] %v9099_v41 }
 0x358   :  { %v5281_v44 = vmul.f32 %v6262_v54, %v8967_v37  ;;  %v5282_v61 = vmul.f32 %v6262_v54, %v8983_v11  ;;  %v5283_v38 = vmul.f32 %v6262_v54, %v8973_v25  ;;  %v5327_v1 = vmul.f32 %v5320_v36, %v5253_v15 }
 0x359   :  { %v5328_v59 = vmul.f32 %v5320_v36, %v5254_v56  ;;  %v5329_v5 = vmul.f32 %v5320_v36, %v5255_v50  ;;  %v5330_v53 = vmul.f32 %v5320_v36, %v5256_v3  ;;  %v5331_v22 = vmul.f32 %v5320_v36, %v5257_v32 }
 0x35a   :  { %v5332_v51 = vmul.f32 %v5320_v36, %v5258_v31  ;;  %v5333_v47 = vmul.f32 %v5320_v36, %v5259_v14  ;;  %v5334_v21 = vmul.f32 %v5320_v36, %v5260_v26  ;;  %v5335_v13 = vmul.f32 %v5320_v36, %v5261_v4  ;;  %v5394_v31 = vpop.permute.xlu1 %5393 }
 0x35b   :  { %v5336_v18 = vmul.f32 %v5320_v36, %v5262_v57  ;;  %v5337_v19 = vmul.f32 %v5320_v36, %v5263_v34  ;;  %v5338_v45 = vmul.f32 %v5320_v36, %v5264_v40  ;;  %v5339_v2 = vmul.f32 %v5320_v36, %v5265_v33 }
 0x35c   :  { %v5340_v37 = vmul.f32 %v5320_v36, %v5266_v52  ;;  %v5341_v29 = vmul.f32 %v5320_v36, %v5267_v7  ;;  %v5342_v11 = vmul.f32 %v5320_v36, %v5268_v58  ;;  %v5343_v0 = vmul.f32 %v5320_v36, %v5269_v12 }
 0x35d   :  { %v5344_v25 = vmul.f32 %v5320_v36, %v5270_v48  ;;  %v5345_v54 = vmul.f32 %v5320_v36, %v5271_v46  ;;  %v5346_v15 = vmul.f32 %v5320_v36, %v5272_v28  ;;  %v5347_v41 = vmul.f32 %v5320_v36, %v5273_v30 }
 0x35e   :  { %v5348_v56 = vmul.f32 %v5320_v36, %v5274_v24  ;;  %v5349_v50 = vmul.f32 %v5320_v36, %v5275_v10  ;;  %v5350_v3 = vmul.f32 %v5320_v36, %v5276_v20  ;;  %v5351_v32 = vmul.f32 %v5320_v36, %v5277_v49 }
 0x35f   :  { %v5352_v14 = vmul.f32 %v5320_v36, %v5278_v35  ;;  %v5353_v26 = vmul.f32 %v5320_v36, %v5279_v60  ;;  %v5354_v4 = vmul.f32 %v5320_v36, %v5280_v27  ;;  %v5355_v57 = vmul.f32 %v5320_v36, %v5281_v44  ;;  %v5246_v44 = vpop.xlane.xlu1 %5245 }
 0x360   :  { %v5356_v34 = vmul.f32 %v5320_v36, %v5282_v61  ;;  %v5357_v40 = vmul.f32 %v5320_v36, %v5283_v38  ;;  %v5401_v33 = vadd.f32 %v5394_v31, %v5327_v1  ;;  %v5402_v52 = vadd.f32 %v5394_v31, %v5328_v59 }
 0x361   :  { %v5403_v7 = vadd.f32 %v5394_v31, %v5329_v5  ;;  %v5404_v58 = vadd.f32 %v5394_v31, %v5330_v53  ;;  %v5405_v12 = vadd.f32 %v5394_v31, %v5331_v22  ;;  %v5406_v48 = vadd.f32 %v5394_v31, %v5332_v51 }
 0x362   :  { %v5407_v46 = vadd.f32 %v5394_v31, %v5333_v47  ;;  %v5408_v28 = vadd.f32 %v5394_v31, %v5334_v21  ;;  %v5409_v30 = vadd.f32 %v5394_v31, %v5335_v13  ;;  %v5410_v24 = vadd.f32 %v5394_v31, %v5336_v18  ;;  %5463 = vst [vmem:[%s9359_s8] sm:$0xff] %v5401_v33 }
 0x363   :  { %5464 = vst [vmem:[%s9359_s8 + $0x8] sm:$0xff] %v5402_v52  ;;  %v5411_v10 = vadd.f32 %v5394_v31, %v5337_v19  ;;  %v5412_v36 = vadd.f32 %v5394_v31, %v5338_v45  ;;  %v5413_v20 = vadd.f32 %v5394_v31, %v5339_v2  ;;  %v5414_v49 = vadd.f32 %v5394_v31, %v5340_v37  ;;  %v9630_v45 = vld [vmem:[#allocation20_spill] sm:$0xff] }
 0x364   :  { %5465 = vst [vmem:[%s9359_s8 + $0x10] sm:$0xff] %v5403_v7  ;;  %5466 = vst [vmem:[%s9359_s8 + $0x18] sm:$0xff] %v5404_v58  ;;  %v5415_v13 = vadd.f32 %v5394_v31, %v5341_v29  ;;  %v5416_v19 = vadd.f32 %v5394_v31, %v5342_v11  ;;  %v5417_v2 = vadd.f32 %v5394_v31, %v5343_v0  ;;  %v5248_v47 = vmul.f32 0.00025826445, %v5246_v44  ;;  %v9631_v11 = vld [vmem:[#allocation19_spill] sm:$0xff]  ;;  %v9639_v52 = vld [vmem:[#allocation8_spill] sm:$0xff] }
 0x365   :  { %5467 = vst [vmem:[%s9359_s8 + $0x20] sm:$0xff] %v5405_v12  ;;  %5468 = vst [vmem:[%s9359_s8 + $0x28] sm:$0xff] %v5406_v48  ;;  %v5418_v35 = vadd.f32 %v5394_v31, %v5344_v25  ;;  %v5419_v29 = vadd.f32 %v5394_v31, %v5345_v54  ;;  %v5420_v60 = vadd.f32 %v5394_v31, %v5346_v15  ;;  %v9632_v54 = vld [vmem:[#allocation21_spill] sm:$0xff]  ;;  %v9641_v48 = vld [vmem:[#allocation22_spill] sm:$0xff] }
 0x366   :  { %5469 = vst [vmem:[%s9359_s8 + $0x30] sm:$0xff] %v5407_v46  ;;  %5470 = vst [vmem:[%s9359_s8 + $0x38] sm:$0xff] %v5408_v28  ;;  %v5421_v0 = vadd.f32 %v5394_v31, %v5347_v41  ;;  %v5422_v27 = vadd.f32 %v5394_v31, %v5348_v56  ;;  %v5423_v61 = vadd.f32 %v5394_v31, %v5349_v50  ;;  %v5250_v21 = vadd.f32 1e-05, %v5248_v47  ;;  %v9633_v56 = vld [vmem:[#allocation2_spill] sm:$0xff]  ;;  %v9640_v58 = vld [vmem:[#allocation9_spill] sm:$0xff] }
 0x367   :  { %5471 = vst [vmem:[%s9359_s8 + $0x40] sm:$0xff] %v5409_v30  ;;  %5472 = vst [vmem:[%s9359_s8 + $0x48] sm:$0xff] %v5410_v24  ;;  %v5424_v38 = vadd.f32 %v5394_v31, %v5350_v3  ;;  %v5425_v1 = vadd.f32 %v5394_v31, %v5351_v32  ;;  %v5426_v41 = vadd.f32 %v5394_v31, %v5352_v14  ;;  %v9634_v3 = vld [vmem:[#allocation4_spill] sm:$0xff] }
 0x368   :  { %5473 = vst [vmem:[%s9359_s8 + $0x50] sm:$0xff] %v5411_v10  ;;  %5474 = vst [vmem:[%s9359_s8 + $0x58] sm:$0xff] %v5412_v36  ;;  %v5427_v59 = vadd.f32 %v5394_v31, %v5353_v26  ;;  %v5428_v5 = vadd.f32 %v5394_v31, %v5354_v4  ;;  %v5429_v53 = vadd.f32 %v5394_v31, %v5355_v57  ;;  %6263 = vrsqrt.f32 %v5250_v21  ;;  %v9636_v26 = vld [vmem:[#allocation5_spill] sm:$0xff]  ;;  %v9637_v57 = vld [vmem:[#allocation6_spill] sm:$0xff] }
 0x369   :  { %5475 = vst [vmem:[%s9359_s8 + $0x60] sm:$0xff] %v5413_v20  ;;  %5476 = vst [vmem:[%s9359_s8 + $0x68] sm:$0xff] %v5414_v49  ;;  %v5430_v22 = vadd.f32 %v5394_v31, %v5356_v34  ;;  %v5431_v51 = vadd.f32 %v5394_v31, %v5357_v40  ;;  %v9635_v31 = vld [vmem:[#allocation3_spill] sm:$0xff]  ;;  %v9642_v20 = vld [vmem:[#allocation25_spill] sm:$0xff] }
 0x36a   :  { %5477 = vst [vmem:[%s9359_s8 + $0x70] sm:$0xff] %v5415_v13  ;;  %5478 = vst [vmem:[%s9359_s8 + $0x78] sm:$0xff] %v5416_v19  ;;  %v9638_v40 = vld [vmem:[#allocation7_spill] sm:$0xff]  ;;  %v9643_v13 = vld [vmem:[#allocation28_spill] sm:$0xff] }
 0x36b   :  { %5479 = vst [vmem:[%s9359_s8 + $0x80] sm:$0xff] %v5417_v2  ;;  %5480 = vst [vmem:[%s9359_s8 + $0x88] sm:$0xff] %v5418_v35  ;;  %v9646_v44 = vld [vmem:[#allocation12_spill] sm:$0xff] }
 0x36c   :  { %5481 = vst [vmem:[%s9359_s8 + $0x90] sm:$0xff] %v5419_v29  ;;  %5482 = vst [vmem:[%s9359_s8 + $0x98] sm:$0xff] %v5420_v60  ;;  %v9644_v60 = vld [vmem:[#allocation10_spill] sm:$0xff] }
 0x36d   :  { %5483 = vst [vmem:[%s9359_s8 + $0xa0] sm:$0xff] %v5421_v0  ;;  %5484 = vst [vmem:[%s9359_s8 + $0xa8] sm:$0xff] %v5422_v27  ;;  %v9645_v0 = vld [vmem:[#allocation26_spill] sm:$0xff] }
 0x36e   :  { %5485 = vst [vmem:[%s9359_s8 + $0xb0] sm:$0xff] %v5423_v61  ;;  %5486 = vst [vmem:[%s9359_s8 + $0xb8] sm:$0xff] %v5424_v38  ;;  %v9647_v38 = vld [vmem:[#allocation11_spill] sm:$0xff] }
 0x36f   :  { %5487 = vst [vmem:[%s9359_s8 + $0xc0] sm:$0xff] %v5425_v1  ;;  %5488 = vst [vmem:[%s9359_s8 + $0xc8] sm:$0xff] %v5426_v41  ;;  %v9648_v1 = vld [vmem:[#allocation27_spill] sm:$0xff]  ;;  %v9649_v41 = vld [vmem:[#allocation14_spill] sm:$0xff] }
 0x370   :  { %5489 = vst [vmem:[%s9359_s8 + $0xd0] sm:$0xff] %v5427_v59  ;;  %5490 = vst [vmem:[%s9359_s8 + $0xd8] sm:$0xff] %v5428_v5 }
 0x371   :  { %5491 = vst [vmem:[%s9359_s8 + $0xe0] sm:$0xff] %v5429_v53  ;;  %5492 = vst [vmem:[%s9359_s8 + $0xe8] sm:$0xff] %v5430_v22 }
 0x372   :  { %5493 = vst.msk [vmem:[%s9359_s8 + $0xf0] sm:$0xff] %vm5016_vm4, %v5431_v51  ;;  %v6264_v18 = vpop.eup %6263 }
 0x373   :  { %v5284_v37 = vmul.f32 %v6264_v18, %v9630_v45  ;;  %v5285_v25 = vmul.f32 %v6264_v18, %v9631_v11  ;;  %v5286_v15 = vmul.f32 %v6264_v18, %v9632_v54  ;;  %v5287_v50 = vmul.f32 %v6264_v18, %v9633_v56 }
 0x374   :  { %v5288_v32 = vmul.f32 %v6264_v18, %v9634_v3  ;;  %v5289_v14 = vmul.f32 %v6264_v18, %v9635_v31  ;;  %v5290_v4 = vmul.f32 %v6264_v18, %v9636_v26  ;;  %v5291_v34 = vmul.f32 %v6264_v18, %v9637_v57 }
 0x375   :  { %v5292_v33 = vmul.f32 %v6264_v18, %v9638_v40  ;;  %v5293_v7 = vmul.f32 %v6264_v18, %v9639_v52  ;;  %v5294_v12 = vmul.f32 %v6264_v18, %v9640_v58  ;;  %v5295_v46 = vmul.f32 %v6264_v18, %v9641_v48  ;;  %v5399_v40 = vpop.permute.xlu1 %5398 }
 0x376   :  { %v5296_v28 = vmul.f32 %v6264_v18, %v8889_v63  ;;  %v5297_v30 = vmul.f32 %v6264_v18, %v8901_v23  ;;  %v5298_v24 = vmul.f32 %v6264_v18, %v8913_v55  ;;  %v5299_v10 = vmul.f32 %v6264_v18, %v8925_v17 }
 0x377   :  { %v5300_v36 = vmul.f32 %v6264_v18, %v8937_v42  ;;  %v5301_v49 = vmul.f32 %v6264_v18, %v9642_v20  ;;  %v5302_v19 = vmul.f32 %v6264_v18, %v9643_v13  ;;  %v5303_v2 = vmul.f32 %v6264_v18, %v8977_v8 }
 0x378   :  { %v5304_v35 = vmul.f32 %v6264_v18, %v8989_v43  ;;  %v5305_v29 = vmul.f32 %v6264_v18, %v8999_v62  ;;  %v5306_v63 = vmul.f32 %v6264_v18, %v9007_v39  ;;  %v5307_v23 = vmul.f32 %v6264_v18, %v9014_v6 }
 0x379   :  { %v5308_v55 = vmul.f32 %v6264_v18, %v9020_v9  ;;  %v5309_v17 = vmul.f32 %v6264_v18, %v9026_v16  ;;  %v5310_v42 = vmul.f32 %v6264_v18, %v9644_v60  ;;  %v5311_v27 = vmul.f32 %v6264_v18, %v9645_v0 }
 0x37a   :  { %v5312_v61 = vmul.f32 %v6264_v18, %v9646_v44  ;;  %v5313_v8 = vmul.f32 %v6264_v18, %v9647_v38  ;;  %v5314_v43 = vmul.f32 %v6264_v18, %v9648_v1  ;;  %v5358_v62 = vmul.f32 %v9649_v41, %v5284_v37 }
 0x37b   :  { %v5359_v39 = vmul.f32 %v9649_v41, %v5285_v25  ;;  %v5360_v6 = vmul.f32 %v9649_v41, %v5286_v15  ;;  %v5361_v9 = vmul.f32 %v9649_v41, %v5287_v50  ;;  %v5362_v16 = vmul.f32 %v9649_v41, %v5288_v32 }
 0x37c   :  { %v5363_v59 = vmul.f32 %v9649_v41, %v5289_v14  ;;  %v5364_v5 = vmul.f32 %v9649_v41, %v5290_v4  ;;  %v5365_v53 = vmul.f32 %v9649_v41, %v5291_v34  ;;  %v5366_v22 = vmul.f32 %v9649_v41, %v5292_v33 }
 0x37d   :  { %v5367_v51 = vmul.f32 %v9649_v41, %v5293_v7  ;;  %v5368_v47 = vmul.f32 %v9649_v41, %v5294_v12  ;;  %v5369_v21 = vmul.f32 %v9649_v41, %v5295_v46  ;;  %v5370_v18 = vmul.f32 %v9649_v41, %v5296_v28 }
 0x37e   :  { %v5371_v45 = vmul.f32 %v9649_v41, %v5297_v30  ;;  %v5372_v37 = vmul.f32 %v9649_v41, %v5298_v24  ;;  %v5373_v11 = vmul.f32 %v9649_v41, %v5299_v10  ;;  %v5374_v25 = vmul.f32 %v9649_v41, %v5300_v36 }
 0x37f   :  { %v5375_v54 = vmul.f32 %v9649_v41, %v5301_v49  ;;  %v5376_v15 = vmul.f32 %v9649_v41, %v5302_v19  ;;  %v5377_v56 = vmul.f32 %v9649_v41, %v5303_v2  ;;  %v5378_v50 = vmul.f32 %v9649_v41, %v5304_v35 }
 0x380   :  { %v5379_v3 = vmul.f32 %v9649_v41, %v5305_v29  ;;  %v5380_v32 = vmul.f32 %v9649_v41, %v5306_v63  ;;  %v5381_v31 = vmul.f32 %v9649_v41, %v5307_v23  ;;  %v5382_v14 = vmul.f32 %v9649_v41, %v5308_v55 }
 0x381   :  { %v5383_v26 = vmul.f32 %v9649_v41, %v5309_v17  ;;  %v5384_v4 = vmul.f32 %v9649_v41, %v5310_v42  ;;  %v5385_v57 = vmul.f32 %v9649_v41, %v5311_v27  ;;  %v5386_v34 = vmul.f32 %v9649_v41, %v5312_v61 }
 0x382   :  { %v5387_v33 = vmul.f32 %v9649_v41, %v5313_v8  ;;  %v5388_v52 = vmul.f32 %v9649_v41, %v5314_v43  ;;  %v5432_v7 = vadd.f32 %v5399_v40, %v5358_v62  ;;  %v5433_v58 = vadd.f32 %v5399_v40, %v5359_v39 }
 0x383   :  { %v5434_v12 = vadd.f32 %v5399_v40, %v5360_v6  ;;  %v5435_v48 = vadd.f32 %v5399_v40, %v5361_v9  ;;  %v5436_v46 = vadd.f32 %v5399_v40, %v5362_v16  ;;  %v5437_v28 = vadd.f32 %v5399_v40, %v5363_v59 }
 0x384   :  { %v5438_v30 = vadd.f32 %v5399_v40, %v5364_v5  ;;  %v5439_v24 = vadd.f32 %v5399_v40, %v5365_v53  ;;  %v5440_v10 = vadd.f32 %v5399_v40, %v5366_v22  ;;  %v5441_v36 = vadd.f32 %v5399_v40, %v5367_v51  ;;  %5494 = vst [vmem:[%s9359_s8 + $0xf8] sm:$0xff] %v5432_v7 }
 0x385   :  { %5495 = vst [vmem:[%s9359_s8 + $0x100] sm:$0xff] %v5433_v58  ;;  %v5442_v20 = vadd.f32 %v5399_v40, %v5368_v47  ;;  %v5443_v49 = vadd.f32 %v5399_v40, %v5369_v21  ;;  %v5444_v13 = vadd.f32 %v5399_v40, %v5370_v18  ;;  %v5445_v19 = vadd.f32 %v5399_v40, %v5371_v45 }
 0x386   :  { %5496 = vst [vmem:[%s9359_s8 + $0x108] sm:$0xff] %v5434_v12  ;;  %5497 = vst [vmem:[%s9359_s8 + $0x110] sm:$0xff] %v5435_v48  ;;  %v5446_v2 = vadd.f32 %v5399_v40, %v5372_v37  ;;  %v5447_v35 = vadd.f32 %v5399_v40, %v5373_v11  ;;  %v5448_v29 = vadd.f32 %v5399_v40, %v5374_v25 }
 0x387   :  { %5498 = vst [vmem:[%s9359_s8 + $0x118] sm:$0xff] %v5436_v46  ;;  %5499 = vst [vmem:[%s9359_s8 + $0x120] sm:$0xff] %v5437_v28  ;;  %v5449_v63 = vadd.f32 %v5399_v40, %v5375_v54  ;;  %v5450_v23 = vadd.f32 %v5399_v40, %v5376_v15  ;;  %v5451_v55 = vadd.f32 %v5399_v40, %v5377_v56 }
 0x388   :  { %5500 = vst [vmem:[%s9359_s8 + $0x128] sm:$0xff] %v5438_v30  ;;  %5501 = vst [vmem:[%s9359_s8 + $0x130] sm:$0xff] %v5439_v24  ;;  %v5452_v17 = vadd.f32 %v5399_v40, %v5378_v50  ;;  %v5453_v60 = vadd.f32 %v5399_v40, %v5379_v3  ;;  %v5454_v42 = vadd.f32 %v5399_v40, %v5380_v32 }
 0x389   :  { %5502 = vst [vmem:[%s9359_s8 + $0x138] sm:$0xff] %v5440_v10  ;;  %5503 = vst [vmem:[%s9359_s8 + $0x140] sm:$0xff] %v5441_v36  ;;  %v5455_v0 = vadd.f32 %v5399_v40, %v5381_v31  ;;  %v5456_v27 = vadd.f32 %v5399_v40, %v5382_v14  ;;  %v5457_v44 = vadd.f32 %v5399_v40, %v5383_v26 }
 0x38a   :  { %5504 = vst [vmem:[%s9359_s8 + $0x148] sm:$0xff] %v5442_v20  ;;  %5505 = vst [vmem:[%s9359_s8 + $0x150] sm:$0xff] %v5443_v49  ;;  %v5458_v61 = vadd.f32 %v5399_v40, %v5384_v4  ;;  %v5459_v38 = vadd.f32 %v5399_v40, %v5385_v57  ;;  %v5460_v8 = vadd.f32 %v5399_v40, %v5386_v34 }
 0x38b   :  { %5506 = vst [vmem:[%s9359_s8 + $0x158] sm:$0xff] %v5444_v13  ;;  %5507 = vst [vmem:[%s9359_s8 + $0x160] sm:$0xff] %v5445_v19  ;;  %v5461_v1 = vadd.f32 %v5399_v40, %v5387_v33  ;;  %v5462_v43 = vadd.f32 %v5399_v40, %v5388_v52 }
 0x38c   :  { %5508 = vst [vmem:[%s9359_s8 + $0x168] sm:$0xff] %v5446_v2  ;;  %5509 = vst [vmem:[%s9359_s8 + $0x170] sm:$0xff] %v5447_v35 }
 0x38d   :  { %5510 = vst [vmem:[%s9359_s8 + $0x178] sm:$0xff] %v5448_v29  ;;  %5511 = vst [vmem:[%s9359_s8 + $0x180] sm:$0xff] %v5449_v63 }
 0x38e   :  { %5512 = vst [vmem:[%s9359_s8 + $0x188] sm:$0xff] %v5450_v23  ;;  %5513 = vst [vmem:[%s9359_s8 + $0x190] sm:$0xff] %v5451_v55 }
 0x38f   :  { %5514 = vst [vmem:[%s9359_s8 + $0x198] sm:$0xff] %v5452_v17  ;;  %5515 = vst [vmem:[%s9359_s8 + $0x1a0] sm:$0xff] %v5453_v60 }
 0x390   :  { %5516 = vst [vmem:[%s9359_s8 + $0x1a8] sm:$0xff] %v5454_v42  ;;  %5517 = vst [vmem:[%s9359_s8 + $0x1b0] sm:$0xff] %v5455_v0 }
 0x391   :  { %5518 = vst [vmem:[%s9359_s8 + $0x1b8] sm:$0xff] %v5456_v27  ;;  %5519 = vst [vmem:[%s9359_s8 + $0x1c0] sm:$0xff] %v5457_v44 }
 0x392   :  { %5520 = vst [vmem:[%s9359_s8 + $0x1c8] sm:$0xff] %v5458_v61  ;;  %5521 = vst [vmem:[%s9359_s8 + $0x1d0] sm:$0xff] %v5459_v38 }
 0x393   :  { %5522 = vst [vmem:[%s9359_s8 + $0x1d8] sm:$0xff] %v5460_v8  ;;  %5523 = vst [vmem:[%s9359_s8 + $0x1e0] sm:$0xff] %v5461_v1 }
 0x394   :  { %5524 = vst.msk [vmem:[%s9359_s8 + $0x1e8] sm:$0xff] %vm5016_vm4, %v5462_v43 }

// kernel: net_forward.5
= control target key start
LH: loop header
LB: loop body
LE: loop exit
PB: predicated region body
PF: predicated region fallthrough
CT: control target
= control target key end

     0   :  { %v8768_v12 = vmov 0   ;;  %vm1200_vm0 = vcmask 130048   ;;  %vm6372_vm1 = vcmask 261120   ;;  %s12126_s0 = inlined_call_operand.vmem [shape: bf16[400,800], index: 0, kind: input, shape index: {}]   ;;  %s12127_s4 = inlined_call_operand.vmem [shape: bf16[32,400], index: 4, kind: input, shape index: {}]   ;;  %s12128_s1 = inlined_call_operand.vmem [shape: bf16[400,800], index: 1, kind: input, shape index: {}]   ;;  %s12129_s5 = inlined_call_operand.vmem [shape: f32[32,1], index: 5, kind: input, shape index: {}]   ;;  %s12130_s2 = inlined_call_operand.vmem [shape: bf16[400,800], index: 2, kind: input, shape index: {}]   ;;  %s12131_s3 = inlined_call_operand.vmem [shape: bf16[400,800], index: 3, kind: input, shape index: {}]   ;;  %s12132_s6 = inlined_call_operand.vmem [shape: f32[32,1], index: 6, kind: input, shape index: {}]   ;;  %s12133_s7 = inlined_call_operand.vmem [shape: f32[32,1], index: 7, kind: input, shape index: {}]   ;;  %s12134_s8 = inlined_call_operand.vmem [shape: f32[32,800], index: 8, kind: output, shape index: {}]  }
   0x1   :  { %v7724_v0 = vld [vmem:[%s12126_s0 + $0x4] ss:$28 sps:$4 sm:$0xff]   ;;  %v7726_v1 = vld [vmem:[%s12126_s0 + $0xc] ss:$28 sps:$4 sm:$0xff]   ;;  %v7730_v4 = vld [vmem:[%s12126_s0 + $0x3c] ss:$28 sps:$4 sm:$0xff]   ;;  %7722 = vset.pattern.permute.xlu0 %v8768_v12  ;;  %7723 = vset.pattern.permute.xlu1 %v8768_v12 }
   0x2   :  { %1207 = vmatprep.subr.bf16.mxu0 %v7724_v0  ;;  %v7728_v2 = vld [vmem:[%s12126_s0] ss:$28 sps:$4 sm:$0xff]   ;;  %v7729_v3 = vld [vmem:[%s12126_s0 + $0x8] ss:$28 sps:$4 sm:$0xff]   ;;  %1313 = vmatprep.subr.bf16.mxu1 %v7726_v1  ;;  %v7734_v6 = vld [vmem:[%s12126_s0 + $0x38] ss:$28 sps:$4 sm:$0xff]  }
   0x3   :  { %1208 = vmatpush1.bf16.msra.mxu0 %v7728_v2  ;;  %1314 = vmatpush1.bf16.msra.mxu1 %v7729_v3  ;;  %v7732_v5 = vld [vmem:[%s12126_s0 + $0x44] ss:$28 sps:$4 sm:$0xff]   ;;  %v7736_v8 = vld [vmem:[%s12126_s0 + $0x74] ss:$28 sps:$4 sm:$0xff]   ;;  %v7738_v9 = vld [vmem:[%s12126_s0 + $0x7c] ss:$28 sps:$4 sm:$0xff]  }
   0x4   :  { %1209 = vmatprep.subr.bf16.mxu0 %v7730_v4  ;;  %v7735_v7 = vld [vmem:[%s12126_s0 + $0x40] ss:$28 sps:$4 sm:$0xff]   ;;  %1315 = vmatprep.subr.bf16.mxu1 %v7732_v5  ;;  %v7740_v10 = vld [vmem:[%s12126_s0 + $0x70] ss:$28 sps:$4 sm:$0xff]   ;;  %v7741_v11 = vld [vmem:[%s12126_s0 + $0x78] ss:$28 sps:$4 sm:$0xff]  }
   0x5   :  { %v7742_v13 = vld [vmem:[%s12126_s0 + $0xac] ss:$28 sps:$4 sm:$0xff]   ;;  %v7744_v14 = vld [vmem:[%s12126_s0 + $0xb4] ss:$28 sps:$4 sm:$0xff]   ;;  %v7748_v17 = vld [vmem:[%s12126_s0 + $0xe4] ss:$28 sps:$4 sm:$0xff]  }
   0x6   :  { %v7746_v15 = vld [vmem:[%s12126_s0 + $0xa8] ss:$28 sps:$4 sm:$0xff]   ;;  %v7747_v16 = vld [vmem:[%s12126_s0 + $0xb0] ss:$28 sps:$4 sm:$0xff]   ;;  %v7752_v19 = vld [vmem:[%s12126_s0 + $0xe0] ss:$28 sps:$4 sm:$0xff]  }
   0x7   :  { %1210 = vmatpush1.bf16.msra.mxu0 %v7734_v6  ;;  %1316 = vmatpush1.bf16.msra.mxu1 %v7735_v7  ;;  %v7750_v18 = vld [vmem:[%s12126_s0 + $0xec] ss:$28 sps:$4 sm:$0xff]   ;;  %v7754_v21 = vld [vmem:[%s12126_s0 + $0x11c] ss:$28 sps:$4 sm:$0xff]   ;;  %v7756_v22 = vld [vmem:[%s12126_s0 + $0x124] ss:$28 sps:$4 sm:$0xff]  }
   0x8   :  { %1211 = vmatprep.subr.bf16.mxu0 %v7736_v8  ;;  %1317 = vmatprep.subr.bf16.mxu1 %v7738_v9  ;;  %v7753_v20 = vld [vmem:[%s12126_s0 + $0xe8] ss:$28 sps:$4 sm:$0xff]   ;;  %v7758_v23 = vld [vmem:[%s12126_s0 + $0x118] ss:$28 sps:$4 sm:$0xff]   ;;  %v7759_v24 = vld [vmem:[%s12126_s0 + $0x120] ss:$28 sps:$4 sm:$0xff]  }
   0x9   :  { %v7760_v25 = vld [vmem:[%s12126_s0 + $0x154] ss:$28 sps:$4 sm:$0xff]   ;;  %v7762_v26 = vld [vmem:[%s12126_s0 + $0x15c] ss:$28 sps:$4 sm:$0xff]   ;;  %v7766_v29 = vld [vmem:[%s12126_s0 + $0x18c] ss:$28 sps:$4 sm:$0xff]  }
   0xa   :  { %v7764_v27 = vld [vmem:[%s12126_s0 + $0x150] ss:$28 sps:$4 sm:$0xff]   ;;  %v7765_v28 = vld [vmem:[%s12126_s0 + $0x158] ss:$28 sps:$4 sm:$0xff]   ;;  %v7770_v31 = vld [vmem:[%s12126_s0 + $0x188] ss:$28 sps:$4 sm:$0xff]  }
   0xb   :  { %1212 = vmatpush1.bf16.msra.mxu0 %v7740_v10  ;;  %1318 = vmatpush1.bf16.msra.mxu1 %v7741_v11  ;;  %v7768_v30 = vld [vmem:[%s12126_s0 + $0x194] ss:$28 sps:$4 sm:$0xff]   ;;  %v7772_v33 = vld [vmem:[%s12126_s0 + $0x1c4] ss:$28 sps:$4 sm:$0xff]   ;;  %v7774_v34 = vld [vmem:[%s12126_s0 + $0x1cc] ss:$28 sps:$4 sm:$0xff]  }
   0xc   :  { %1213 = vmatprep.subr.bf16.mxu0 %v7742_v13  ;;  %1319 = vmatprep.subr.bf16.mxu1 %v7744_v14  ;;  %v7771_v32 = vld [vmem:[%s12126_s0 + $0x190] ss:$28 sps:$4 sm:$0xff]   ;;  %v7776_v35 = vld [vmem:[%s12126_s0 + $0x1c0] ss:$28 sps:$4 sm:$0xff]   ;;  %v7777_v36 = vld [vmem:[%s12126_s0 + $0x1c8] ss:$28 sps:$4 sm:$0xff]  }
   0xd   :  { %v7778_v37 = vld [vmem:[%s12126_s0 + $0x1fc] ss:$28 sps:$4 sm:$0xff]   ;;  %v7780_v38 = vld [vmem:[%s12126_s0 + $0x204] ss:$28 sps:$4 sm:$0xff]   ;;  %v7784_v41 = vld [vmem:[%s12126_s0 + $0x234] ss:$28 sps:$4 sm:$0xff]  }
   0xe   :  { %v7782_v39 = vld [vmem:[%s12126_s0 + $0x1f8] ss:$28 sps:$4 sm:$0xff]   ;;  %v7783_v40 = vld [vmem:[%s12126_s0 + $0x200] ss:$28 sps:$4 sm:$0xff]   ;;  %v7788_v43 = vld [vmem:[%s12126_s0 + $0x230] ss:$28 sps:$4 sm:$0xff]  }
   0xf   :  { %1214 = vmatpush1.bf16.msra.mxu0 %v7746_v15  ;;  %1320 = vmatpush1.bf16.msra.mxu1 %v7747_v16  ;;  %v7786_v42 = vld [vmem:[%s12126_s0 + $0x23c] ss:$28 sps:$4 sm:$0xff]   ;;  %v7790_v45 = vld [vmem:[%s12126_s0 + $0x26c] ss:$28 sps:$4 sm:$0xff]   ;;  %v7792_v46 = vld [vmem:[%s12126_s0 + $0x274] ss:$28 sps:$4 sm:$0xff]  }
  0x10   :  { %1215 = vmatprep.subr.bf16.mxu0 %v7748_v17  ;;  %1321 = vmatprep.subr.bf16.mxu1 %v7750_v18  ;;  %v7789_v44 = vld [vmem:[%s12126_s0 + $0x238] ss:$28 sps:$4 sm:$0xff]   ;;  %v7794_v47 = vld [vmem:[%s12126_s0 + $0x268] ss:$28 sps:$4 sm:$0xff]   ;;  %v7795_v49 = vld [vmem:[%s12126_s0 + $0x270] ss:$28 sps:$4 sm:$0xff]  }
  0x11   :  { %v8960_v48 = vld [vmem:[%s12127_s4 + $0x4] ss:$16 sps:$4 sm:$0xff]   ;;  %v7798_v51 = vld [vmem:[%s12126_s0 + $0x2ac] ss:$28 sps:$4 sm:$0xff]   ;;  %v7800_v52 = vld [vmem:[%s12126_s0 + $0x2a0] ss:$28 sps:$4 sm:$0xff]  }
  0x12   :  { %v7796_v50 = vld [vmem:[%s12126_s0 + $0x2a4] ss:$28 sps:$4 sm:$0xff]   ;;  %1239 = vmatprep.mubr.bf16.mxu0 %v8960_v48  ;;  %1345 = vmatprep.mubr.bf16.mxu1 %v8960_v48  ;;  %v7802_v54 = vld [vmem:[%s12126_s0 + $0x2dc] ss:$28 sps:$4 sm:$0xff]   ;;  %v7808_v58 = vld [vmem:[%s12126_s0 + $0x314] ss:$28 sps:$4 sm:$0xff]  }
  0x13   :  { %1216 = vmatpush1.bf16.msra.mxu0 %v7752_v19  ;;  %1322 = vmatpush1.bf16.msra.mxu1 %v7753_v20  ;;  %v7801_v53 = vld [vmem:[%s12126_s0 + $0x2a8] ss:$28 sps:$4 sm:$0xff]   ;;  %v7806_v56 = vld [vmem:[%s12126_s0 + $0x2d8] ss:$28 sps:$4 sm:$0xff]   ;;  %v7807_v57 = vld [vmem:[%s12126_s0 + $0x2e0] ss:$28 sps:$4 sm:$0xff]  }
  0x14   :  { %1217 = vmatprep.subr.bf16.mxu0 %v7754_v21  ;;  %1323 = vmatprep.subr.bf16.mxu1 %v7756_v22  ;;  %v7804_v55 = vld [vmem:[%s12126_s0 + $0x2e4] ss:$28 sps:$4 sm:$0xff]   ;;  %v7810_v59 = vld [vmem:[%s12126_s0 + $0x31c] ss:$28 sps:$4 sm:$0xff]   ;;  %v7812_v60 = vld [vmem:[%s12126_s0 + $0x310] ss:$28 sps:$4 sm:$0xff]  }
  0x15   :  { %v7813_v61 = vld [vmem:[%s12126_s0 + $0x318] ss:$28 sps:$4 sm:$0xff]   ;;  %v7814_v62 = vld [vmem:[%s12126_s0 + $0x34c] ss:$28 sps:$4 sm:$0xff]   ;;  %v7824_v2 = vld [vmem:[%s12126_s0 + $0x384] ss:$28 sps:$4 sm:$0xff]  }
  0x16   :  { %v7816_v63 = vld [vmem:[%s12126_s0 + $0x354] ss:$28 sps:$4 sm:$0xff]   ;;  %v7818_v0 = vld [vmem:[%s12126_s0 + $0x348] ss:$28 sps:$4 sm:$0xff]   ;;  %v7822_v4 = vld [vmem:[%s12126_s0 + $0x380] ss:$28 sps:$4 sm:$0xff]  }
  0x17   :  { %1218 = vmatpush1.bf16.msra.mxu0 %v7758_v23  ;;  %1324 = vmatpush1.bf16.msra.mxu1 %v7759_v24  ;;  %v7819_v1 = vld [vmem:[%s12126_s0 + $0x350] ss:$28 sps:$4 sm:$0xff]   ;;  %v7825_v5 = vld [vmem:[%s12126_s0 + $0x388] ss:$28 sps:$4 sm:$0xff]   ;;  %v7831_v7 = vld [vmem:[%s12126_s0 + $0x3bc] ss:$28 sps:$4 sm:$0xff]  }
  0x18   :  { %1219 = vmatprep.subr.bf16.mxu0 %v7760_v25  ;;  %1325 = vmatprep.subr.bf16.mxu1 %v7762_v26  ;;  %v7827_v3 = vld [vmem:[%s12126_s0 + $0x38c] ss:$28 sps:$4 sm:$0xff]   ;;  %v9030_v6 = vld [vmem:[%s12127_s4] ss:$16 sps:$4 sm:$0xff]   ;;  %v9041_v9 = vld [vmem:[%s12127_s4 + $0x24] ss:$16 sps:$4 sm:$0xff]  }
  0x19   :  { %v7834_v8 = vld [vmem:[%s12126_s0 + $0x3c4] ss:$28 sps:$4 sm:$0xff]   ;;  %v7829_v10 = vld [vmem:[%s12126_s0 + $0x3b8] ss:$28 sps:$4 sm:$0xff]   ;;  %v7835_v15 = vld [vmem:[%s12126_s0 + $0x3f0] ss:$28 sps:$4 sm:$0xff]  }
  0x1a   :  { %v7832_v11 = vld [vmem:[%s12126_s0 + $0x3c0] ss:$28 sps:$4 sm:$0xff]   ;;  %v7837_v13 = vld [vmem:[%s12126_s0 + $0x3f4] ss:$28 sps:$4 sm:$0xff]   ;;  %v7843_v18 = vld [vmem:[%s12126_s0 + $0x42c] ss:$28 sps:$4 sm:$0xff]  }
  0x1b   :  { %1220 = vmatpush1.bf16.msra.mxu0 %v7764_v27  ;;  %1326 = vmatpush1.bf16.msra.mxu1 %v7765_v28  ;;  %v7840_v14 = vld [vmem:[%s12126_s0 + $0x3fc] ss:$28 sps:$4 sm:$0xff]   ;;  %v9068_v17 = vld [vmem:[%s12127_s4 + $0x20] ss:$16 sps:$4 sm:$0xff]   ;;  %v7841_v20 = vld [vmem:[%s12126_s0 + $0x428] ss:$28 sps:$4 sm:$0xff]  }
  0x1c   :  { %1221 = vmatprep.subr.bf16.mxu0 %v7766_v29  ;;  %1327 = vmatprep.subr.bf16.mxu1 %v7768_v30  ;;  %v7838_v16 = vld [vmem:[%s12126_s0 + $0x3f8] ss:$28 sps:$4 sm:$0xff]   ;;  %v9082_v21 = vld [vmem:[%s12127_s4 + $0xc] ss:$16 sps:$4 sm:$0xff]   ;;  %v7849_v23 = vld [vmem:[%s12126_s0 + $0x464] ss:$28 sps:$4 sm:$0xff]  }
  0x1d   :  { %v7846_v19 = vld [vmem:[%s12126_s0 + $0x434] ss:$28 sps:$4 sm:$0xff]   ;;  %v7852_v24 = vld [vmem:[%s12126_s0 + $0x46c] ss:$28 sps:$4 sm:$0xff]   ;;  %v7847_v25 = vld [vmem:[%s12126_s0 + $0x460] ss:$28 sps:$4 sm:$0xff]  }
  0x1e   :  { %v7844_v22 = vld [vmem:[%s12126_s0 + $0x430] ss:$28 sps:$4 sm:$0xff]   ;;  %v7850_v26 = vld [vmem:[%s12126_s0 + $0x468] ss:$28 sps:$4 sm:$0xff]   ;;  %v7855_v27 = vld [vmem:[%s12126_s0 + $0x49c] ss:$28 sps:$4 sm:$0xff]  }
  0x1f   :  { %1222 = vmatpush1.bf16.msra.mxu0 %v7770_v31  ;;  %1328 = vmatpush1.bf16.msra.mxu1 %v7771_v32  ;;  %v7858_v28 = vld [vmem:[%s12126_s0 + $0x4a4] ss:$28 sps:$4 sm:$0xff]   ;;  %v7853_v29 = vld [vmem:[%s12126_s0 + $0x498] ss:$28 sps:$4 sm:$0xff]  }
  0x20   :  { %1223 = vmatprep.subr.bf16.mxu0 %v7772_v33  ;;  %1329 = vmatprep.subr.bf16.mxu1 %v7774_v34  ;;  %v7856_v30 = vld [vmem:[%s12126_s0 + $0x4a0] ss:$28 sps:$4 sm:$0xff]   ;;  %v7861_v31 = vld [vmem:[%s12126_s0 + $0x4d4] ss:$28 sps:$4 sm:$0xff]  }
  0x21   :  { %v7864_v32 = vld [vmem:[%s12126_s0 + $0x4dc] ss:$28 sps:$4 sm:$0xff]   ;;  %v7859_v33 = vld [vmem:[%s12126_s0 + $0x4d0] ss:$28 sps:$4 sm:$0xff]  }
  0x22   :  { %v7862_v34 = vld [vmem:[%s12126_s0 + $0x4d8] ss:$28 sps:$4 sm:$0xff]  }
  0x23   :  { %1224 = vmatpush1.bf16.msra.mxu0 %v7776_v35  ;;  %1330 = vmatpush1.bf16.msra.mxu1 %v7777_v36  ;;  %v7870_v35 = vld [vmem:[%s12126_s0 + $0x50c] ss:$28 sps:$4 sm:$0xff]   ;;  %v7873_v36 = vld [vmem:[%s12126_s0 + $0x514] ss:$28 sps:$4 sm:$0xff]  }
  0x24   :  { %1225 = vmatprep.subr.bf16.mxu0 %v7778_v37  ;;  %1331 = vmatprep.subr.bf16.mxu1 %v7780_v38  ;;  %v7868_v37 = vld [vmem:[%s12126_s0 + $0x508] ss:$28 sps:$4 sm:$0xff]   ;;  %v7871_v38 = vld [vmem:[%s12126_s0 + $0x510] ss:$28 sps:$4 sm:$0xff]  }
  0x27   :  { %1226 = vmatpush1.bf16.msra.mxu0 %v7782_v39  ;;  %1332 = vmatpush1.bf16.msra.mxu1 %v7783_v40  ;;  %v7876_v39 = vld [vmem:[%s12126_s0 + $0x544] ss:$28 sps:$4 sm:$0xff]   ;;  %v7879_v40 = vld [vmem:[%s12126_s0 + $0x54c] ss:$28 sps:$4 sm:$0xff]  }
  0x28   :  { %1227 = vmatprep.subr.bf16.mxu0 %v7784_v41  ;;  %1333 = vmatprep.subr.bf16.mxu1 %v7786_v42  ;;  %v7874_v41 = vld [vmem:[%s12126_s0 + $0x540] ss:$28 sps:$4 sm:$0xff]   ;;  %v7877_v42 = vld [vmem:[%s12126_s0 + $0x548] ss:$28 sps:$4 sm:$0xff]  }
  0x2b   :  { %1228 = vmatpush1.bf16.msra.mxu0 %v7788_v43  ;;  %1334 = vmatpush1.bf16.msra.mxu1 %v7789_v44  ;;  %v7885_v43 = vld [vmem:[%s12126_s0 + $0x14] ss:$28 sps:$4 sm:$0xff]  }
  0x2c   :  { %1229 = vmatprep.subr.bf16.mxu0 %v7790_v45  ;;  %1335 = vmatprep.subr.bf16.mxu1 %v7792_v46  ;;  %v7886_v44 = vld [vmem:[%s12126_s0 + $0x1d8] ss:$28 sps:$4 sm:$0xff]   ;;  %v7883_v46 = vld [vmem:[%s12126_s0 + $0x10] ss:$28 sps:$4 sm:$0xff]  }
  0x2d   :  { %v9162_v45 = vld [vmem:[%s12127_s4 + $0x8] ss:$16 sps:$4 sm:$0xff]  }
  0x2f   :  { %1230 = vmatpush1.bf16.msra.mxu0 %v7794_v47  ;;  %1336 = vmatpush1.bf16.msra.mxu1 %v7795_v49  ;;  %v7887_v47 = vld [vmem:[%s12126_s0 + $0x18] ss:$28 sps:$4 sm:$0xff]   ;;  %v7890_v49 = vld [vmem:[%s12126_s0 + $0x4c] ss:$28 sps:$4 sm:$0xff]  }
  0x30   :  { %1231 = vmatprep.subr.bf16.mxu0 %v7796_v50  ;;  %1337 = vmatprep.subr.bf16.mxu1 %v7798_v51  ;;  %v7891_v50 = vld [vmem:[%s12126_s0 + $0x210] ss:$28 sps:$4 sm:$0xff]  }
  0x31   :  { %v9179_v51 = vld [vmem:[%s12127_s4 + $0x2c] ss:$16 sps:$4 sm:$0xff]  }
  0x33   :  { %1232 = vmatpush1.bf16.msra.mxu0 %v7800_v52  ;;  %1338 = vmatpush1.bf16.msra.mxu1 %v7801_v53  ;;  %v7888_v52 = vld [vmem:[%s12126_s0 + $0x48] ss:$28 sps:$4 sm:$0xff]   ;;  %v7892_v53 = vld [vmem:[%s12126_s0 + $0x50] ss:$28 sps:$4 sm:$0xff]  }
  0x34   :  { %1233 = vmatprep.subr.bf16.mxu0 %v7802_v54  ;;  %1339 = vmatprep.subr.bf16.mxu1 %v7804_v55  ;;  %v7898_v54 = vld [vmem:[%s12126_s0 + $0x84] ss:$28 sps:$4 sm:$0xff]  }
  0x35   :  { %v7899_v55 = vld [vmem:[%s12126_s0 + $0x248] ss:$28 sps:$4 sm:$0xff]  }
  0x37   :  { %1234 = vmatpush1.bf16.msra.mxu0 %v7806_v56  ;;  %1340 = vmatpush1.bf16.msra.mxu1 %v7807_v57  ;;  %v9202_v56 = vld [vmem:[%s12127_s4 + $0x28] ss:$16 sps:$4 sm:$0xff]   ;;  %v7896_v57 = vld [vmem:[%s12126_s0 + $0x80] ss:$28 sps:$4 sm:$0xff]  }
  0x38   :  { %1235 = vmatprep.subr.bf16.mxu0 %v7808_v58  ;;  %1341 = vmatprep.subr.bf16.mxu1 %v7810_v59  ;;  %v7900_v58 = vld [vmem:[%s12126_s0 + $0x88] ss:$28 sps:$4 sm:$0xff]   ;;  %v7903_v59 = vld [vmem:[%s12126_s0 + $0xbc] ss:$28 sps:$4 sm:$0xff]  }
  0x3b   :  { %1236 = vmatpush1.bf16.msra.mxu0 %v7812_v60  ;;  %1342 = vmatpush1.bf16.msra.mxu1 %v7813_v61  ;;  %v7904_v60 = vld [vmem:[%s12126_s0 + $0x280] ss:$28 sps:$4 sm:$0xff]   ;;  %v7901_v61 = vld [vmem:[%s12126_s0 + $0xb8] ss:$28 sps:$4 sm:$0xff]  }
  0x3c   :  { %1237 = vmatprep.subr.bf16.mxu0 %v7814_v62  ;;  %1343 = vmatprep.subr.bf16.mxu1 %v7816_v63  ;;  %v7905_v62 = vld [vmem:[%s12126_s0 + $0xc0] ss:$28 sps:$4 sm:$0xff]   ;;  %v7908_v63 = vld [vmem:[%s12126_s0 + $0xf4] ss:$28 sps:$4 sm:$0xff]  }
  0x3f   :  { %1238 = vmatpush1.bf16.msra.mxu0 %v7818_v0  ;;  %1344 = vmatpush1.bf16.msra.mxu1 %v7819_v1  ;;  %v7909_v0 = vld [vmem:[%s12126_s0 + $0x2b8] ss:$28 sps:$4 sm:$0xff]   ;;  %v7906_v1 = vld [vmem:[%s12126_s0 + $0xf0] ss:$28 sps:$4 sm:$0xff]  }
  0x40   :  { %1260 = vmatprep.subr.bf16.mxu0 %v7824_v2  ;;  %1366 = vmatprep.subr.bf16.mxu1 %v7827_v3  ;;  %v7910_v2 = vld [vmem:[%s12126_s0 + $0xf8] ss:$28 sps:$4 sm:$0xff]   ;;  %v7913_v3 = vld [vmem:[%s12126_s0 + $0x12c] ss:$28 sps:$4 sm:$0xff]  }
  0x42   :  { %1240 = vmatmul.mubr.bf16.vlgmr.msra.gmra.mrb[0].mxu0 %v9030_v6  ;;  %1346 = vmatmul.mubr.bf16.vlgmr.msra.gmra.mrb[0].mxu1 %v9030_v6 }
  0x43   :  { %1261 = vmatpush1.bf16.msra.mxu0 %v7822_v4  ;;  %1367 = vmatpush1.bf16.msra.mxu1 %v7825_v5  ;;  %v7914_v4 = vld [vmem:[%s12126_s0 + $0x2f0] ss:$28 sps:$4 sm:$0xff]  }
  0x44   :  { %1262 = vmatprep.subr.bf16.mxu0 %v7831_v7  ;;  %1368 = vmatprep.subr.bf16.mxu1 %v7834_v8  ;;  %v7915_v5 = vld [vmem:[%s12126_s0 + $0x130] ss:$28 sps:$4 sm:$0xff]   ;;  %v7918_v7 = vld [vmem:[%s12126_s0 + $0x164] ss:$28 sps:$4 sm:$0xff]  }
  0x45   :  { %1249 = vmatprep.mubr.bf16.mxu0 %v9041_v9  ;;  %1355 = vmatprep.mubr.bf16.mxu1 %v9041_v9  ;;  %v7919_v8 = vld [vmem:[%s12126_s0 + $0x328] ss:$28 sps:$4 sm:$0xff]  }
  0x47   :  { %1263 = vmatpush1.bf16.msra.mxu0 %v7829_v10  ;;  %1369 = vmatpush1.bf16.msra.mxu1 %v7832_v11  ;;  %v7916_v10 = vld [vmem:[%s12126_s0 + $0x160] ss:$28 sps:$4 sm:$0xff]   ;;  %v7920_v11 = vld [vmem:[%s12126_s0 + $0x168] ss:$28 sps:$4 sm:$0xff]  }
  0x48   :  { %1264 = vmatprep.subr.bf16.mxu0 %v7837_v13  ;;  %1370 = vmatprep.subr.bf16.mxu1 %v7840_v14  ;;  %v7923_v13 = vld [vmem:[%s12126_s0 + $0x19c] ss:$28 sps:$4 sm:$0xff]  }
  0x49   :  { %v7924_v14 = vld [vmem:[%s12126_s0 + $0x360] ss:$28 sps:$4 sm:$0xff]  }
  0x4a   :  { %1250 = vmatmul.mubr.bf16.gmra.mrb[4].mxu0 %v9068_v17  ;;  %1356 = vmatmul.mubr.bf16.gmra.mrb[4].mxu1 %v9068_v17 }
  0x4b   :  { %1265 = vmatpush1.bf16.msra.mxu0 %v7835_v15  ;;  %1371 = vmatpush1.bf16.msra.mxu1 %v7838_v16  ;;  %v7921_v15 = vld [vmem:[%s12126_s0 + $0x198] ss:$28 sps:$4 sm:$0xff]   ;;  %v7925_v16 = vld [vmem:[%s12126_s0 + $0x1a0] ss:$28 sps:$4 sm:$0xff]  }
  0x4c   :  { %1266 = vmatprep.subr.bf16.mxu0 %v7843_v18  ;;  %1372 = vmatprep.subr.bf16.mxu1 %v7846_v19  ;;  %v7928_v18 = vld [vmem:[%s12126_s0 + $0x1d4] ss:$28 sps:$4 sm:$0xff]   ;;  %v38_v19 = vld [vmem:[%s12129_s5] sm:$0xff] }
  0x4d   :  { %6860 = vmatprep.mubr.msk.bf16.mxu0 %vm1200_vm0, %v9082_v21  ;;  %6862 = vmatprep.mubr.msk.bf16.mxu1 %vm1200_vm0, %v9082_v21 }
  0x4e   :  { %244 = vperm.xlu0 %7722, %v38_v19   ;;  %v8009_v19 = vld [vmem:[%s12128_s1 + $0x18c] ss:$28 sps:$4 sm:$0xff]  }
  0x4f   :  { %1267 = vmatpush1.bf16.msra.mxu0 %v7841_v20  ;;  %1373 = vmatpush1.bf16.msra.mxu1 %v7844_v22  ;;  %v7926_v20 = vld [vmem:[%s12126_s0 + $0x1d0] ss:$28 sps:$4 sm:$0xff]   ;;  %v7929_v22 = vld [vmem:[%s12126_s0 + $0x398] ss:$28 sps:$4 sm:$0xff]  }
  0x50   :  { %1268 = vmatprep.subr.bf16.mxu0 %v7849_v23  ;;  %1374 = vmatprep.subr.bf16.mxu1 %v7852_v24  ;;  %v7932_v23 = vld [vmem:[%s12126_s0 + $0x20c] ss:$28 sps:$4 sm:$0xff]  }
  0x51   :  { %v39_v24 = vld [vmem:[%s12129_s5 + $0x8] sm:$0xff] }
  0x52   :  { %249 = vperm.xlu0 %7722, %v39_v24   ;;  %v8015_v24 = vld [vmem:[%s12128_s1 + $0xc] ss:$28 sps:$4 sm:$0xff]  }
  0x53   :  { %1269 = vmatpush1.bf16.msra.mxu0 %v7847_v25  ;;  %1375 = vmatpush1.bf16.msra.mxu1 %v7850_v26  ;;  %v7930_v25 = vld [vmem:[%s12126_s0 + $0x208] ss:$28 sps:$4 sm:$0xff]   ;;  %v7933_v26 = vld [vmem:[%s12126_s0 + $0x3d0] ss:$28 sps:$4 sm:$0xff]  }
  0x54   :  { %1270 = vmatprep.subr.bf16.mxu0 %v7855_v27  ;;  %1376 = vmatprep.subr.bf16.mxu1 %v7858_v28  ;;  %v40_v27 = vld [vmem:[%s12129_s5 + $0x10] sm:$0xff]  ;;  %v7936_v28 = vld [vmem:[%s12126_s0 + $0x244] ss:$28 sps:$4 sm:$0xff]  }
  0x55   :  { %254 = vperm.xlu1 %7723, %v40_v27   ;;  %v8018_v27 = vld [vmem:[%s12128_s1 + $0x1fc] ss:$28 sps:$4 sm:$0xff]  }
  0x57   :  { %1271 = vmatpush1.bf16.msra.mxu0 %v7853_v29  ;;  %1377 = vmatpush1.bf16.msra.mxu1 %v7856_v30  ;;  %v41_v29 = vld [vmem:[%s12129_s5 + $0x18] sm:$0xff] }
  0x58   :  { %1272 = vmatprep.subr.bf16.mxu0 %v7861_v31  ;;  %1378 = vmatprep.subr.bf16.mxu1 %v7864_v32  ;;  %v7934_v30 = vld [vmem:[%s12126_s0 + $0x240] ss:$28 sps:$4 sm:$0xff]   ;;  %v7937_v31 = vld [vmem:[%s12126_s0 + $0x408] ss:$28 sps:$4 sm:$0xff]  }
  0x59   :  { %v7940_v32 = vld [vmem:[%s12126_s0 + $0x27c] ss:$28 sps:$4 sm:$0xff]   ;;  %259 = vperm.xlu1 %7723, %v41_v29  }
  0x5a   :  { %v8016_v29 = vld [vmem:[%s12128_s1 + $0x1f8] ss:$28 sps:$4 sm:$0xff]  }
  0x5b   :  { %1273 = vmatpush1.bf16.msra.mxu0 %v7859_v33  ;;  %1379 = vmatpush1.bf16.msra.mxu1 %v7862_v34  ;;  %v7938_v33 = vld [vmem:[%s12126_s0 + $0x278] ss:$28 sps:$4 sm:$0xff]   ;;  %v7941_v34 = vld [vmem:[%s12126_s0 + $0x440] ss:$28 sps:$4 sm:$0xff]  }
  0x5c   :  { %1274 = vmatprep.subr.bf16.mxu0 %v7870_v35  ;;  %1380 = vmatprep.subr.bf16.mxu1 %v7873_v36  ;;  %v7944_v35 = vld [vmem:[%s12126_s0 + $0x2b4] ss:$28 sps:$4 sm:$0xff]  }
  0x5d   :  { %v7942_v36 = vld [vmem:[%s12126_s0 + $0x2b0] ss:$28 sps:$4 sm:$0xff]  }
  0x5f   :  { %1275 = vmatpush1.bf16.msra.mxu0 %v7868_v37  ;;  %1381 = vmatpush1.bf16.msra.mxu1 %v7871_v38  ;;  %v7945_v37 = vld [vmem:[%s12126_s0 + $0x478] ss:$28 sps:$4 sm:$0xff]   ;;  %v7948_v38 = vld [vmem:[%s12126_s0 + $0x2ec] ss:$28 sps:$4 sm:$0xff]  }
  0x60   :  { %1276 = vmatprep.subr.bf16.mxu0 %v7876_v39  ;;  %1382 = vmatprep.subr.bf16.mxu1 %v7879_v40  ;;  %v7946_v39 = vld [vmem:[%s12126_s0 + $0x2e8] ss:$28 sps:$4 sm:$0xff]   ;;  %v7949_v40 = vld [vmem:[%s12126_s0 + $0x4b0] ss:$28 sps:$4 sm:$0xff]  }
  0x63   :  { %1277 = vmatpush1.bf16.msra.mxu0 %v7874_v41  ;;  %1383 = vmatpush1.bf16.msra.mxu1 %v7877_v42  ;;  %v7952_v41 = vld [vmem:[%s12126_s0 + $0x324] ss:$28 sps:$4 sm:$0xff]  }
  0x64   :  { %1419 = vmatprep.subr.bf16.mxu0 %v7885_v43  ;;  %7417 = vmatprep.subr.bf16.mxu1 %v7886_v44  ;;  %v7950_v42 = vld [vmem:[%s12126_s0 + $0x320] ss:$28 sps:$4 sm:$0xff]   ;;  %v7953_v43 = vld [vmem:[%s12126_s0 + $0x4e8] ss:$28 sps:$4 sm:$0xff]  }
  0x65   :  { %v7956_v44 = vld [vmem:[%s12126_s0 + $0x35c] ss:$28 sps:$4 sm:$0xff]  }
  0x66   :  { %1293 = vmatmul.mubr.bf16.vlgmr.msra.gmra.mrb[0].mxu0 %v9162_v45  ;;  %1399 = vmatmul.mubr.bf16.vlgmr.msra.gmra.mrb[0].mxu1 %v9162_v45 }
  0x67   :  { %1420 = vmatpush1.bf16.msra.mxu0 %v7883_v46  ;;  %7418 = vmatpush3.bf16.msra.mxu1 %v7887_v47  ;;  %v7954_v46 = vld [vmem:[%s12126_s0 + $0x358] ss:$28 sps:$4 sm:$0xff]   ;;  %v7957_v47 = vld [vmem:[%s12126_s0 + $0x520] ss:$28 sps:$4 sm:$0xff]  }
  0x68   :  { %1421 = vmatprep.subr.bf16.mxu0 %v7890_v49  ;;  %7419 = vmatprep.subr.bf16.mxu1 %v7891_v50  ;;  %v7960_v49 = vld [vmem:[%s12126_s0 + $0x394] ss:$28 sps:$4 sm:$0xff]  }
  0x69   :  { %6861 = vmatprep.mubr.msk.bf16.mxu0 %vm1200_vm0, %v9179_v51  ;;  %6863 = vmatprep.mubr.msk.bf16.mxu1 %vm1200_vm0, %v9179_v51  ;;  %v7958_v50 = vld [vmem:[%s12126_s0 + $0x390] ss:$28 sps:$4 sm:$0xff]  }
  0x6b   :  { %1422 = vmatpush1.bf16.msra.mxu0 %v7888_v52  ;;  %7420 = vmatpush3.bf16.msra.mxu1 %v7892_v53  ;;  %v7961_v52 = vld [vmem:[%s12126_s0 + $0x558] ss:$28 sps:$4 sm:$0xff]   ;;  %v7964_v53 = vld [vmem:[%s12126_s0 + $0x3cc] ss:$28 sps:$4 sm:$0xff]  }
  0x6c   :  { %1423 = vmatprep.subr.bf16.mxu0 %v7898_v54  ;;  %7421 = vmatprep.subr.bf16.mxu1 %v7899_v55  ;;  %v7967_v54 = vld [vmem:[%s12128_s1 + $0x4] ss:$28 sps:$4 sm:$0xff]  }
  0x6d   :  { %v7962_v55 = vld [vmem:[%s12126_s0 + $0x3c8] ss:$28 sps:$4 sm:$0xff]  }
  0x6e   :  { %1303 = vmatmul.mubr.bf16.gmra.mrb[4].mxu0 %v9202_v56  ;;  %1409 = vmatmul.mubr.bf16.gmra.mrb[4].mxu1 %v9202_v56 }
  0x6f   :  { %1424 = vmatpush1.bf16.msra.mxu0 %v7896_v57  ;;  %7422 = vmatpush3.bf16.msra.mxu1 %v7900_v58  ;;  %v7965_v57 = vld [vmem:[%s12128_s1] ss:$28 sps:$4 sm:$0xff]  }
  0x70   :  { %1425 = vmatprep.subr.bf16.mxu0 %v7903_v59  ;;  %7423 = vmatprep.subr.bf16.mxu1 %v7904_v60  ;;  %v7970_v58 = vld [vmem:[%s12126_s0 + $0x404] ss:$28 sps:$4 sm:$0xff]   ;;  %v7971_v60 = vld [vmem:[%s12128_s1 + $0x38] ss:$28 sps:$4 sm:$0xff]  }
  0x71   :  { %1557 = vmatprep.mubr.bf16.mxu1 %v8960_v48  ;;  %1451 = vmatprep.mubr.bf16.mxu0 %v8960_v48  ;;  %v7911_v48 = vld [vmem:[%s12126_s0 + $0x128] ss:$28 sps:$4 sm:$0xff]   ;;  %v7968_v59 = vld [vmem:[%s12126_s0 + $0x400] ss:$28 sps:$4 sm:$0xff]  }
  0x73   :  { %1426 = vmatpush1.bf16.msra.mxu0 %v7901_v61  ;;  %7424 = vmatpush3.bf16.msra.mxu1 %v7905_v62  ;;  %v7976_v61 = vld [vmem:[%s12126_s0 + $0x43c] ss:$28 sps:$4 sm:$0xff]  }
  0x74   :  { %1427 = vmatprep.subr.bf16.mxu0 %v7908_v63  ;;  %7425 = vmatprep.subr.bf16.mxu1 %v7909_v0  ;;  %v7974_v62 = vld [vmem:[%s12126_s0 + $0x438] ss:$28 sps:$4 sm:$0xff]   ;;  %v7977_v63 = vld [vmem:[%s12128_s1 + $0x70] ss:$28 sps:$4 sm:$0xff]  }
  0x75   :  { %v7982_v0 = vld [vmem:[%s12126_s0 + $0x474] ss:$28 sps:$4 sm:$0xff]  }
  0x77   :  { %1428 = vmatpush1.bf16.msra.mxu0 %v7906_v1  ;;  %7426 = vmatpush3.bf16.msra.mxu1 %v7910_v2  ;;  %v7985_v1 = vld [vmem:[%s12128_s1 + $0xac] ss:$28 sps:$4 sm:$0xff]  }
  0x78   :  { %1429 = vmatprep.subr.bf16.mxu0 %v7913_v3  ;;  %7427 = vmatprep.subr.bf16.mxu1 %v7914_v4  ;;  %v7983_v2 = vld [vmem:[%s12128_s1 + $0xa8] ss:$28 sps:$4 sm:$0xff]  }
  0x79   :  { %v7988_v3 = vld [vmem:[%s12126_s0 + $0x4ac] ss:$28 sps:$4 sm:$0xff]   ;;  %v9447_v4 = vld [vmem:[%s12127_s4 + $0x4] ss:$16 sps:$4 sm:$0xff]  }
  0x7b   :  { %1430 = vmatpush1.bf16.msra.mxu0 %v7911_v48  ;;  %7428 = vmatpush3.bf16.msra.mxu1 %v7915_v5  ;;  %v7986_v48 = vld [vmem:[%s12126_s0 + $0x4a8] ss:$28 sps:$4 sm:$0xff]   ;;  %v7989_v5 = vld [vmem:[%s12128_s1 + $0xe0] ss:$28 sps:$4 sm:$0xff]  }
  0x7c   :  { %1431 = vmatprep.subr.bf16.mxu0 %v7918_v7  ;;  %7429 = vmatprep.subr.bf16.mxu1 %v7919_v8  ;;  %v7994_v7 = vld [vmem:[%s12126_s0 + $0x4e4] ss:$28 sps:$4 sm:$0xff]   ;;  %v7997_v8 = vld [vmem:[%s12128_s1 + $0x11c] ss:$28 sps:$4 sm:$0xff]  }
  0x7f   :  { %1432 = vmatpush1.bf16.msra.mxu0 %v7916_v10  ;;  %7430 = vmatpush3.bf16.msra.mxu1 %v7920_v11  ;;  %v7992_v10 = vld [vmem:[%s12126_s0 + $0x4e0] ss:$28 sps:$4 sm:$0xff]   ;;  %v7995_v11 = vld [vmem:[%s12128_s1 + $0x118] ss:$28 sps:$4 sm:$0xff]  }
  0x80   :  { %1433 = vmatprep.subr.bf16.mxu0 %v7923_v13  ;;  %7431 = vmatprep.subr.bf16.mxu1 %v7924_v14  ;;  %v8000_v13 = vld [vmem:[%s12126_s0 + $0x51c] ss:$28 sps:$4 sm:$0xff]   ;;  %v8003_v14 = vld [vmem:[%s12128_s1 + $0x154] ss:$28 sps:$4 sm:$0xff]  }
  0x83   :  { %1434 = vmatpush1.bf16.msra.mxu0 %v7921_v15  ;;  %7432 = vmatpush3.bf16.msra.mxu1 %v7925_v16  ;;  %v7998_v15 = vld [vmem:[%s12126_s0 + $0x518] ss:$28 sps:$4 sm:$0xff]   ;;  %v8001_v16 = vld [vmem:[%s12128_s1 + $0x150] ss:$28 sps:$4 sm:$0xff]  }
  0x84   :  { %1435 = vmatprep.subr.bf16.mxu0 %v7928_v18  ;;  %1574 = vmatprep.subr.bf16.mxu1 %v8768_v12  ;;  %v8006_v18 = vld [vmem:[%s12126_s0 + $0x554] ss:$28 sps:$4 sm:$0xff]  }
  0x86   :  { %1558 = vmatmul.mubr.bf16.vlgmr.msra.gmra.mrb[8].mxu1 %v9030_v6 }
  0x87   :  { %1436 = vmatpush1.bf16.msra.mxu0 %v7926_v20  ;;  %1575 = vmatpush1.bf16.msra.mxu1 %v7929_v22  ;;  %v8004_v20 = vld [vmem:[%s12126_s0 + $0x550] ss:$28 sps:$4 sm:$0xff]   ;;  %v8007_v22 = vld [vmem:[%s12128_s1 + $0x188] ss:$28 sps:$4 sm:$0xff]  }
  0x88   :  { %1437 = vmatprep.subr.bf16.mxu0 %v7932_v23  ;;  %1576 = vmatprep.subr.bf16.mxu1 %v8768_v12  ;;  %v8012_v23 = vld [vmem:[%s12128_s1 + $0x1c4] ss:$28 sps:$4 sm:$0xff]  }
  0x89   :  { %1565 = vmatprep.mubr.bf16.mxu1 %v9041_v9 }
  0x8b   :  { %1438 = vmatpush1.bf16.msra.mxu0 %v7930_v25  ;;  %1577 = vmatpush1.bf16.msra.mxu1 %v7933_v26  ;;  %v8010_v25 = vld [vmem:[%s12128_s1 + $0x1c0] ss:$28 sps:$4 sm:$0xff]   ;;  %v8013_v26 = vld [vmem:[%s12128_s1 + $0x8] ss:$28 sps:$4 sm:$0xff]  }
  0x8c   :  { %1439 = vmatprep.subr.bf16.mxu0 %v7936_v28  ;;  %1578 = vmatprep.subr.bf16.mxu1 %v8768_v12  ;;  %v8021_v28 = vld [vmem:[%s12128_s1 + $0x44] ss:$28 sps:$4 sm:$0xff]  }
  0x8e   :  { %1566 = vmatmul.mubr.bf16.gmra.mrb[12].mxu1 %v9068_v17 }
  0x8f   :  { %1440 = vmatpush1.bf16.msra.mxu0 %v7934_v30  ;;  %1579 = vmatpush1.bf16.msra.mxu1 %v7937_v31  ;;  %v8019_v30 = vld [vmem:[%s12128_s1 + $0x40] ss:$28 sps:$4 sm:$0xff]   ;;  %v8024_v31 = vld [vmem:[%s12128_s1 + $0x234] ss:$28 sps:$4 sm:$0xff]  }
  0x90   :  { %1441 = vmatprep.subr.bf16.mxu0 %v7940_v32  ;;  %1580 = vmatprep.subr.bf16.mxu1 %v8768_v12  ;;  %v8022_v32 = vld [vmem:[%s12128_s1 + $0x230] ss:$28 sps:$4 sm:$0xff]  }
  0x91   :  { %6866 = vmatprep.mubr.msk.bf16.mxu1 %vm1200_vm0, %v9082_v21 }
  0x93   :  { %1442 = vmatpush1.bf16.msra.mxu0 %v7938_v33  ;;  %1581 = vmatpush1.bf16.msra.mxu1 %v7941_v34  ;;  %v8025_v33 = vld [vmem:[%s12128_s1 + $0x78] ss:$28 sps:$4 sm:$0xff]   ;;  %v8030_v34 = vld [vmem:[%s12128_s1 + $0x26c] ss:$28 sps:$4 sm:$0xff]  }
  0x94   :  { %1443 = vmatprep.subr.bf16.mxu0 %v7944_v35  ;;  %1582 = vmatprep.subr.bf16.mxu1 %v8768_v12  ;;  %v8028_v35 = vld [vmem:[%s12128_s1 + $0x268] ss:$28 sps:$4 sm:$0xff]  }
  0x97   :  { %1444 = vmatpush1.bf16.msra.mxu0 %v7942_v36  ;;  %1583 = vmatpush1.bf16.msra.mxu1 %v7945_v37  ;;  %v8031_v36 = vld [vmem:[%s12128_s1 + $0xb0] ss:$28 sps:$4 sm:$0xff]   ;;  %v8036_v37 = vld [vmem:[%s12128_s1 + $0x2a4] ss:$28 sps:$4 sm:$0xff]  }
  0x98   :  { %1445 = vmatprep.subr.bf16.mxu0 %v7948_v38  ;;  %1584 = vmatprep.subr.bf16.mxu1 %v8768_v12  ;;  %v8034_v38 = vld [vmem:[%s12128_s1 + $0x2a0] ss:$28 sps:$4 sm:$0xff]  }
  0x9b   :  { %1446 = vmatpush1.bf16.msra.mxu0 %v7946_v39  ;;  %1585 = vmatpush1.bf16.msra.mxu1 %v7949_v40  ;;  %v8037_v39 = vld [vmem:[%s12128_s1 + $0xe8] ss:$28 sps:$4 sm:$0xff]   ;;  %v8042_v40 = vld [vmem:[%s12128_s1 + $0x2dc] ss:$28 sps:$4 sm:$0xff]  }
  0x9c   :  { %1447 = vmatprep.subr.bf16.mxu0 %v7952_v41  ;;  %1586 = vmatprep.subr.bf16.mxu1 %v8768_v12  ;;  %v8045_v41 = vld [vmem:[%s12128_s1 + $0x124] ss:$28 sps:$4 sm:$0xff]  }
  0x9f   :  { %1448 = vmatpush1.bf16.msra.mxu0 %v7950_v42  ;;  %1587 = vmatpush1.bf16.msra.mxu1 %v7953_v43  ;;  %v8040_v42 = vld [vmem:[%s12128_s1 + $0x2d8] ss:$28 sps:$4 sm:$0xff]   ;;  %v8043_v43 = vld [vmem:[%s12128_s1 + $0x120] ss:$28 sps:$4 sm:$0xff]  }
  0xa0   :  { %1449 = vmatprep.subr.bf16.mxu0 %v7956_v44  ;;  %1588 = vmatprep.subr.bf16.mxu1 %v8768_v12  ;;  %v8048_v44 = vld [vmem:[%s12128_s1 + $0x314] ss:$28 sps:$4 sm:$0xff]  }
  0xa3   :  { %1450 = vmatpush1.bf16.msra.mxu0 %v7954_v46  ;;  %1589 = vmatpush1.bf16.msra.mxu1 %v7957_v47  ;;  %v8051_v46 = vld [vmem:[%s12128_s1 + $0x15c] ss:$28 sps:$4 sm:$0xff]   ;;  %v8046_v47 = vld [vmem:[%s12128_s1 + $0x310] ss:$28 sps:$4 sm:$0xff]  }
  0xa4   :  { %1472 = vmatprep.subr.bf16.mxu0 %v7960_v49  ;;  %1590 = vmatprep.subr.bf16.mxu1 %v8768_v12  ;;  %v8049_v49 = vld [vmem:[%s12128_s1 + $0x158] ss:$28 sps:$4 sm:$0xff]  }
  0xa6   :  { %1452 = vmatmul.mubr.bf16.vlgmr.msra.gmra.mrb[8].mxu0 %v9030_v6  ;;  %v7973_v6 = vld [vmem:[%s12128_s1 + $0x3c] ss:$28 sps:$4 sm:$0xff]  }
  0xa7   :  { %1473 = vmatpush1.bf16.msra.mxu0 %v7958_v50  ;;  %1591 = vmatpush1.bf16.msra.mxu1 %v7961_v52  ;;  %v8054_v50 = vld [vmem:[%s12128_s1 + $0x34c] ss:$28 sps:$4 sm:$0xff]   ;;  %v8057_v52 = vld [vmem:[%s12128_s1 + $0x194] ss:$28 sps:$4 sm:$0xff]  }
  0xa8   :  { %1474 = vmatprep.subr.bf16.mxu0 %v7964_v53  ;;  %2751 = vmatprep.subr.bf16.mxu1 %v7967_v54  ;;  %v8052_v53 = vld [vmem:[%s12128_s1 + $0x348] ss:$28 sps:$4 sm:$0xff]   ;;  %v8055_v54 = vld [vmem:[%s12128_s1 + $0x190] ss:$28 sps:$4 sm:$0xff]  }
  0xa9   :  { %1461 = vmatprep.mubr.bf16.mxu0 %v9041_v9  ;;  %v7979_v9 = vld [vmem:[%s12128_s1 + $0x74] ss:$28 sps:$4 sm:$0xff]  }
  0xaa   :  { %1607 = vmatmul.mubr.bf16.vlgmr.msra.gmra.mrb[16].mxu1 %v9162_v45 }
  0xab   :  { %1475 = vmatpush1.bf16.msra.mxu0 %v7962_v55  ;;  %2752 = vmatpush1.bf16.msra.mxu1 %v7965_v57  ;;  %v8060_v55 = vld [vmem:[%s12128_s1 + $0x384] ss:$28 sps:$4 sm:$0xff]   ;;  %v8063_v57 = vld [vmem:[%s12128_s1 + $0x1cc] ss:$28 sps:$4 sm:$0xff]  }
  0xac   :  { %1476 = vmatprep.subr.bf16.mxu0 %v7970_v58  ;;  %2753 = vmatprep.subr.bf16.mxu1 %v7973_v6  ;;  %v8058_v58 = vld [vmem:[%s12128_s1 + $0x380] ss:$28 sps:$4 sm:$0xff]   ;;  %v8061_v6 = vld [vmem:[%s12128_s1 + $0x1c8] ss:$28 sps:$4 sm:$0xff]  }
  0xad   :  { %6867 = vmatprep.mubr.msk.bf16.mxu1 %vm1200_vm0, %v9179_v51 }
  0xae   :  { %1462 = vmatmul.mubr.bf16.gmra.mrb[12].mxu0 %v9068_v17  ;;  %v7980_v17 = vld [vmem:[%s12126_s0 + $0x470] ss:$28 sps:$4 sm:$0xff]  }
  0xaf   :  { %1477 = vmatpush1.bf16.msra.mxu0 %v7968_v59  ;;  %2754 = vmatpush1.bf16.msra.mxu1 %v7971_v60  ;;  %v8066_v59 = vld [vmem:[%s12128_s1 + $0x3bc] ss:$28 sps:$4 sm:$0xff]   ;;  %v8069_v60 = vld [vmem:[%s12128_s1 + $0x204] ss:$28 sps:$4 sm:$0xff]  }
  0xb0   :  { %1478 = vmatprep.subr.bf16.mxu0 %v7976_v61  ;;  %2755 = vmatprep.subr.bf16.mxu1 %v7979_v9  ;;  %v9614_v61 = vld [vmem:[%s12127_s4] ss:$16 sps:$4 sm:$0xff]   ;;  %v8064_v9 = vld [vmem:[%s12128_s1 + $0x3b8] ss:$28 sps:$4 sm:$0xff]  }
  0xb1   :  { %6864 = vmatprep.mubr.msk.bf16.mxu0 %vm1200_vm0, %v9082_v21  ;;  %v7991_v21 = vld [vmem:[%s12128_s1 + $0xe4] ss:$28 sps:$4 sm:$0xff]  }
  0xb2   :  { %1615 = vmatmul.mubr.bf16.gmra.mrb[20].mxu1 %v9202_v56 }
  0xb3   :  { %1479 = vmatpush1.bf16.msra.mxu0 %v7974_v62  ;;  %2756 = vmatpush1.bf16.msra.mxu1 %v7977_v63  ;;  %v8067_v62 = vld [vmem:[%s12128_s1 + $0x200] ss:$28 sps:$4 sm:$0xff]   ;;  %v8072_v63 = vld [vmem:[%s12128_s1 + $0x3f4] ss:$28 sps:$4 sm:$0xff]  }
  0xb4   :  { %1480 = vmatprep.subr.bf16.mxu0 %v7982_v0  ;;  %2757 = vmatprep.subr.bf16.mxu1 %v7985_v1  ;;  %v8075_v0 = vld [vmem:[%s12128_s1 + $0x23c] ss:$28 sps:$4 sm:$0xff]   ;;  %v9632_v1 = vld [vmem:[%s12127_s4 + $0x24] ss:$16 sps:$4 sm:$0xff]  }
  0xb5   :  { %2783 = vmatprep.mubr.bf16.mxu1 %v9447_v4 }
  0xb7   :  { %1481 = vmatpush1.bf16.msra.mxu0 %v7980_v17  ;;  %2758 = vmatpush1.bf16.msra.mxu1 %v7983_v2  ;;  %v8070_v17 = vld [vmem:[%s12128_s1 + $0x3f0] ss:$28 sps:$4 sm:$0xff]   ;;  %v8073_v2 = vld [vmem:[%s12128_s1 + $0x238] ss:$28 sps:$4 sm:$0xff]  }
  0xb8   :  { %1482 = vmatprep.subr.bf16.mxu0 %v7988_v3  ;;  %2759 = vmatprep.subr.bf16.mxu1 %v7991_v21  ;;  %v8078_v3 = vld [vmem:[%s12128_s1 + $0x42c] ss:$28 sps:$4 sm:$0xff]   ;;  %v8081_v21 = vld [vmem:[%s12128_s1 + $0x274] ss:$28 sps:$4 sm:$0xff]  }
  0xbb   :  { %1483 = vmatpush1.bf16.msra.mxu0 %v7986_v48  ;;  %2760 = vmatpush1.bf16.msra.mxu1 %v7989_v5  ;;  %v8076_v48 = vld [vmem:[%s12128_s1 + $0x428] ss:$28 sps:$4 sm:$0xff]   ;;  %v8079_v5 = vld [vmem:[%s12128_s1 + $0x270] ss:$28 sps:$4 sm:$0xff]  }
  0xbc   :  { %1484 = vmatprep.subr.bf16.mxu0 %v7994_v7  ;;  %2761 = vmatprep.subr.bf16.mxu1 %v7997_v8  ;;  %v9656_v7 = vld [vmem:[%s12127_s4 + $0x20] ss:$16 sps:$4 sm:$0xff]  }
  0xbd   :  { %v8084_v8 = vld [vmem:[%s12128_s1 + $0x464] ss:$28 sps:$4 sm:$0xff]  }
  0xbf   :  { %1485 = vmatpush1.bf16.msra.mxu0 %v7992_v10  ;;  %2762 = vmatpush1.bf16.msra.mxu1 %v7995_v11  ;;  %v8087_v10 = vld [vmem:[%s12128_s1 + $0x2ac] ss:$28 sps:$4 sm:$0xff]  }
  0xc0   :  { %1486 = vmatprep.subr.bf16.mxu0 %v8000_v13  ;;  %2763 = vmatprep.subr.bf16.mxu1 %v8003_v14  ;;  %v9668_v11 = vld [vmem:[%s12127_s4 + $0xc] ss:$16 sps:$4 sm:$0xff]   ;;  %v8085_v14 = vld [vmem:[%s12128_s1 + $0x2a8] ss:$28 sps:$4 sm:$0xff]  }
  0xc1   :  { %v8082_v13 = vld [vmem:[%s12128_s1 + $0x460] ss:$28 sps:$4 sm:$0xff]  }
  0xc3   :  { %1487 = vmatpush1.bf16.msra.mxu0 %v7998_v15  ;;  %2764 = vmatpush1.bf16.msra.mxu1 %v8001_v16  ;;  %v8090_v15 = vld [vmem:[%s12128_s1 + $0x49c] ss:$28 sps:$4 sm:$0xff]   ;;  %v8093_v16 = vld [vmem:[%s12128_s1 + $0x2e4] ss:$28 sps:$4 sm:$0xff]  }
  0xc4   :  { %1488 = vmatprep.subr.bf16.mxu0 %v8006_v18  ;;  %2765 = vmatprep.subr.bf16.mxu1 %v8009_v19  ;;  %v8088_v18 = vld [vmem:[%s12128_s1 + $0x498] ss:$28 sps:$4 sm:$0xff]   ;;  %v8091_v19 = vld [vmem:[%s12128_s1 + $0x2e0] ss:$28 sps:$4 sm:$0xff]  }
  0xc7   :  { %1489 = vmatpush1.bf16.msra.mxu0 %v8004_v20  ;;  %2766 = vmatpush1.bf16.msra.mxu1 %v8007_v22  ;;  %v8096_v20 = vld [vmem:[%s12128_s1 + $0x4d4] ss:$28 sps:$4 sm:$0xff]   ;;  %v8099_v22 = vld [vmem:[%s12128_s1 + $0x31c] ss:$28 sps:$4 sm:$0xff]  }
  0xc8   :  { %2767 = vmatprep.subr.bf16.mxu1 %v8012_v23  ;;  %2857 = vmatprep.subr.bf16.mxu0 %v8015_v24  ;;  %v8094_v23 = vld [vmem:[%s12128_s1 + $0x4d0] ss:$28 sps:$4 sm:$0xff]   ;;  %v8097_v24 = vld [vmem:[%s12128_s1 + $0x318] ss:$28 sps:$4 sm:$0xff]  }
  0xca   :  { %1505 = vmatmul.mubr.bf16.vlgmr.msra.gmra.mrb[8].mxu0 %v9162_v45  ;;  %v8027_v45 = vld [vmem:[%s12128_s1 + $0x7c] ss:$28 sps:$4 sm:$0xff]  }
  0xcb   :  { %2768 = vmatpush1.bf16.msra.mxu1 %v8010_v25  ;;  %2858 = vmatpush1.bf16.msra.mxu0 %v8013_v26  ;;  %v8102_v25 = vld [vmem:[%s12128_s1 + $0x50c] ss:$28 sps:$4 sm:$0xff]   ;;  %v8105_v26 = vld [vmem:[%s12128_s1 + $0x354] ss:$28 sps:$4 sm:$0xff]  }
  0xcc   :  { %2769 = vmatprep.subr.bf16.mxu1 %v8018_v27  ;;  %2859 = vmatprep.subr.bf16.mxu0 %v8021_v28  ;;  %v8100_v27 = vld [vmem:[%s12128_s1 + $0x508] ss:$28 sps:$4 sm:$0xff]   ;;  %v8103_v28 = vld [vmem:[%s12128_s1 + $0x350] ss:$28 sps:$4 sm:$0xff]  }
  0xcd   :  { %6865 = vmatprep.mubr.msk.bf16.mxu0 %vm1200_vm0, %v9179_v51  ;;  %v8033_v51 = vld [vmem:[%s12128_s1 + $0xb4] ss:$28 sps:$4 sm:$0xff]  }
  0xcf   :  { %2770 = vmatpush1.bf16.msra.mxu1 %v8016_v29  ;;  %2860 = vmatpush1.bf16.msra.mxu0 %v8019_v30  ;;  %v8108_v29 = vld [vmem:[%s12128_s1 + $0x544] ss:$28 sps:$4 sm:$0xff]   ;;  %v8111_v30 = vld [vmem:[%s12128_s1 + $0x38c] ss:$28 sps:$4 sm:$0xff]  }
  0xd0   :  { %2771 = vmatprep.subr.bf16.mxu1 %v8024_v31  ;;  %2861 = vmatprep.subr.bf16.mxu0 %v8027_v45  ;;  %v8106_v31 = vld [vmem:[%s12128_s1 + $0x540] ss:$28 sps:$4 sm:$0xff]   ;;  %v8109_v45 = vld [vmem:[%s12128_s1 + $0x388] ss:$28 sps:$4 sm:$0xff]  }
  0xd2   :  { %1515 = vmatmul.mubr.bf16.gmra.mrb[12].mxu0 %v9202_v56  ;;  %v8039_v56 = vld [vmem:[%s12128_s1 + $0xec] ss:$28 sps:$4 sm:$0xff]  }
  0xd3   :  { %2772 = vmatpush1.bf16.msra.mxu1 %v8022_v32  ;;  %2862 = vmatpush1.bf16.msra.mxu0 %v8025_v33  ;;  %v8114_v32 = vld [vmem:[%s12128_s1 + $0x3c4] ss:$28 sps:$4 sm:$0xff]   ;;  %v8117_v33 = vld [vmem:[%s12128_s1 + $0x14] ss:$28 sps:$4 sm:$0xff]  }
  0xd4   :  { %2773 = vmatprep.subr.bf16.mxu1 %v8030_v34  ;;  %2863 = vmatprep.subr.bf16.mxu0 %v8033_v51  ;;  %v8112_v34 = vld [vmem:[%s12128_s1 + $0x3c0] ss:$28 sps:$4 sm:$0xff]   ;;  %v8115_v51 = vld [vmem:[%s12128_s1 + $0x10] ss:$28 sps:$4 sm:$0xff]  }
  0xd5   :  { %2889 = vmatprep.mubr.bf16.mxu0 %v9447_v4 }
  0xd7   :  { %2774 = vmatpush1.bf16.msra.mxu1 %v8028_v35  ;;  %2864 = vmatpush1.bf16.msra.mxu0 %v8031_v36  ;;  %v8120_v35 = vld [vmem:[%s12128_s1 + $0x3fc] ss:$28 sps:$4 sm:$0xff]   ;;  %v8123_v36 = vld [vmem:[%s12128_s1 + $0x4c] ss:$28 sps:$4 sm:$0xff]  }
  0xd8   :  { %2775 = vmatprep.subr.bf16.mxu1 %v8036_v37  ;;  %2865 = vmatprep.subr.bf16.mxu0 %v8039_v56  ;;  %v9749_v37 = vld [vmem:[%s12127_s4 + $0x8] ss:$16 sps:$4 sm:$0xff]  }
  0xd9   :  { %v8118_v56 = vld [vmem:[%s12128_s1 + $0x3f8] ss:$28 sps:$4 sm:$0xff]  }
  0xdb   :  { %2776 = vmatpush1.bf16.msra.mxu1 %v8034_v38  ;;  %2866 = vmatpush1.bf16.msra.mxu0 %v8037_v39  ;;  %v8121_v38 = vld [vmem:[%s12128_s1 + $0x48] ss:$28 sps:$4 sm:$0xff]   ;;  %v8126_v39 = vld [vmem:[%s12128_s1 + $0x434] ss:$28 sps:$4 sm:$0xff]  }
  0xdc   :  { %2777 = vmatprep.subr.bf16.mxu1 %v8042_v40  ;;  %2867 = vmatprep.subr.bf16.mxu0 %v8045_v41  ;;  %v8129_v40 = vld [vmem:[%s12128_s1 + $0x84] ss:$28 sps:$4 sm:$0xff]   ;;  %v9767_v41 = vld [vmem:[%s12127_s4 + $0x2c] ss:$16 sps:$4 sm:$0xff]  }
  0xdf   :  { %2778 = vmatpush1.bf16.msra.mxu1 %v8040_v42  ;;  %2868 = vmatpush1.bf16.msra.mxu0 %v8043_v43  ;;  %v8124_v42 = vld [vmem:[%s12128_s1 + $0x430] ss:$28 sps:$4 sm:$0xff]   ;;  %v8127_v43 = vld [vmem:[%s12128_s1 + $0x80] ss:$28 sps:$4 sm:$0xff]  }
  0xe0   :  { %2779 = vmatprep.subr.bf16.mxu1 %v8048_v44  ;;  %2869 = vmatprep.subr.bf16.mxu0 %v8051_v46  ;;  %v8132_v44 = vld [vmem:[%s12128_s1 + $0x46c] ss:$28 sps:$4 sm:$0xff]   ;;  %v8135_v46 = vld [vmem:[%s12128_s1 + $0xbc] ss:$28 sps:$4 sm:$0xff]  }
  0xe3   :  { %2780 = vmatpush1.bf16.msra.mxu1 %v8046_v47  ;;  %2870 = vmatpush1.bf16.msra.mxu0 %v8049_v49  ;;  %v9789_v47 = vld [vmem:[%s12127_s4 + $0x28] ss:$16 sps:$4 sm:$0xff]  }
  0xe4   :  { %2781 = vmatprep.subr.bf16.mxu1 %v8054_v50  ;;  %2871 = vmatprep.subr.bf16.mxu0 %v8057_v52  ;;  %v8130_v49 = vld [vmem:[%s12128_s1 + $0x468] ss:$28 sps:$4 sm:$0xff]   ;;  %v8133_v50 = vld [vmem:[%s12128_s1 + $0xb8] ss:$28 sps:$4 sm:$0xff]  }
  0xe5   :  { %v8138_v52 = vld [vmem:[%s12128_s1 + $0x4a4] ss:$28 sps:$4 sm:$0xff]  }
  0xe7   :  { %2782 = vmatpush1.bf16.msra.mxu1 %v8052_v53  ;;  %2872 = vmatpush1.bf16.msra.mxu0 %v8055_v54  ;;  %v8141_v53 = vld [vmem:[%s12128_s1 + $0xf4] ss:$28 sps:$4 sm:$0xff]   ;;  %v8136_v54 = vld [vmem:[%s12128_s1 + $0x4a0] ss:$28 sps:$4 sm:$0xff]  }
  0xe8   :  { %2804 = vmatprep.subr.bf16.mxu1 %v8060_v55  ;;  %2873 = vmatprep.subr.bf16.mxu0 %v8063_v57  ;;  %v8139_v55 = vld [vmem:[%s12128_s1 + $0xf0] ss:$28 sps:$4 sm:$0xff]   ;;  %v8144_v57 = vld [vmem:[%s12128_s1 + $0x4dc] ss:$28 sps:$4 sm:$0xff]  }
  0xea   :  { %2784 = vmatmul.mubr.bf16.vlgmr.msra.gmra.mrb[24].mxu1 %v9614_v61 }
  0xeb   :  { %2805 = vmatpush1.bf16.msra.mxu1 %v8058_v58  ;;  %2874 = vmatpush1.bf16.msra.mxu0 %v8061_v6  ;;  %v8147_v58 = vld [vmem:[%s12128_s1 + $0x12c] ss:$28 sps:$4 sm:$0xff]   ;;  %v8142_v6 = vld [vmem:[%s12128_s1 + $0x4d8] ss:$28 sps:$4 sm:$0xff]  }
  0xec   :  { %2806 = vmatprep.subr.bf16.mxu1 %v8066_v59  ;;  %2875 = vmatprep.subr.bf16.mxu0 %v8069_v60  ;;  %v8145_v59 = vld [vmem:[%s12128_s1 + $0x128] ss:$28 sps:$4 sm:$0xff]   ;;  %v8150_v60 = vld [vmem:[%s12128_s1 + $0x514] ss:$28 sps:$4 sm:$0xff]  }
  0xed   :  { %2793 = vmatprep.mubr.bf16.mxu1 %v9632_v1 }
  0xef   :  { %2807 = vmatpush1.bf16.msra.mxu1 %v8064_v9  ;;  %2876 = vmatpush1.bf16.msra.mxu0 %v8067_v62  ;;  %v8153_v9 = vld [vmem:[%s12128_s1 + $0x164] ss:$28 sps:$4 sm:$0xff]   ;;  %v8148_v62 = vld [vmem:[%s12128_s1 + $0x510] ss:$28 sps:$4 sm:$0xff]  }
  0xf0   :  { %2808 = vmatprep.subr.bf16.mxu1 %v8072_v63  ;;  %2877 = vmatprep.subr.bf16.mxu0 %v8075_v0  ;;  %v8151_v63 = vld [vmem:[%s12128_s1 + $0x160] ss:$28 sps:$4 sm:$0xff]   ;;  %v8156_v0 = vld [vmem:[%s12128_s1 + $0x54c] ss:$28 sps:$4 sm:$0xff]  }
  0xf2   :  { %2794 = vmatmul.mubr.bf16.gmra.mrb[28].mxu1 %v9656_v7 }
  0xf3   :  { %2809 = vmatpush1.bf16.msra.mxu1 %v8070_v17  ;;  %2878 = vmatpush1.bf16.msra.mxu0 %v8073_v2  ;;  %v8159_v17 = vld [vmem:[%s12128_s1 + $0x19c] ss:$28 sps:$4 sm:$0xff]   ;;  %v8154_v2 = vld [vmem:[%s12128_s1 + $0x548] ss:$28 sps:$4 sm:$0xff]  }
  0xf4   :  { %2810 = vmatprep.subr.bf16.mxu1 %v8078_v3  ;;  %2879 = vmatprep.subr.bf16.mxu0 %v8081_v21  ;;  %v8157_v3 = vld [vmem:[%s12128_s1 + $0x198] ss:$28 sps:$4 sm:$0xff]  }
  0xf5   :  { %7043 = vmatprep.mubr.msk.bf16.mxu1 %vm1200_vm0, %v9668_v11  ;;  %v8162_v21 = vld [vmem:[%s12128_s1 + $0x1d4] ss:$28 sps:$4 sm:$0xff]  }
  0xf7   :  { %2811 = vmatpush1.bf16.msra.mxu1 %v8076_v48  ;;  %2880 = vmatpush1.bf16.msra.mxu0 %v8079_v5  ;;  %v8163_v48 = vld [vmem:[%s12128_s1 + $0x1d8] ss:$28 sps:$4 sm:$0xff]   ;;  %v8160_v5 = vld [vmem:[%s12128_s1 + $0x1d0] ss:$28 sps:$4 sm:$0xff]  }
  0xf8   :  { %2812 = vmatprep.subr.bf16.mxu1 %v8084_v8  ;;  %2881 = vmatprep.subr.bf16.mxu0 %v8087_v10  ;;  %v8164_v8 = vld [vmem:[%s12128_s1 + $0x18] ss:$28 sps:$4 sm:$0xff]   ;;  %v8167_v10 = vld [vmem:[%s12128_s1 + $0x20c] ss:$28 sps:$4 sm:$0xff]  }
  0xfb   :  { %2813 = vmatpush1.bf16.msra.mxu1 %v8082_v13  ;;  %2882 = vmatpush1.bf16.msra.mxu0 %v8085_v14  ;;  %v8168_v13 = vld [vmem:[%s12128_s1 + $0x210] ss:$28 sps:$4 sm:$0xff]   ;;  %v8165_v14 = vld [vmem:[%s12128_s1 + $0x208] ss:$28 sps:$4 sm:$0xff]  }
  0xfc   :  { %2814 = vmatprep.subr.bf16.mxu1 %v8090_v15  ;;  %2883 = vmatprep.subr.bf16.mxu0 %v8093_v16  ;;  %v8169_v15 = vld [vmem:[%s12128_s1 + $0x50] ss:$28 sps:$4 sm:$0xff]   ;;  %v8172_v16 = vld [vmem:[%s12128_s1 + $0x244] ss:$28 sps:$4 sm:$0xff]  }
  0xff   :  { %2815 = vmatpush1.bf16.msra.mxu1 %v8088_v18  ;;  %2884 = vmatpush1.bf16.msra.mxu0 %v8091_v19  ;;  %v8173_v18 = vld [vmem:[%s12128_s1 + $0x248] ss:$28 sps:$4 sm:$0xff]   ;;  %v8170_v19 = vld [vmem:[%s12128_s1 + $0x240] ss:$28 sps:$4 sm:$0xff]  }
 0x100   :  { %2816 = vmatprep.subr.bf16.mxu1 %v8096_v20  ;;  %2885 = vmatprep.subr.bf16.mxu0 %v8099_v22  ;;  %v8174_v20 = vld [vmem:[%s12128_s1 + $0x88] ss:$28 sps:$4 sm:$0xff]   ;;  %v8177_v22 = vld [vmem:[%s12128_s1 + $0x27c] ss:$28 sps:$4 sm:$0xff]  }
 0x103   :  { %2817 = vmatpush1.bf16.msra.mxu1 %v8094_v23  ;;  %2886 = vmatpush1.bf16.msra.mxu0 %v8097_v24  ;;  %v8178_v23 = vld [vmem:[%s12128_s1 + $0x280] ss:$28 sps:$4 sm:$0xff]   ;;  %v8175_v24 = vld [vmem:[%s12128_s1 + $0x278] ss:$28 sps:$4 sm:$0xff]  }
 0x104   :  { %2818 = vmatprep.subr.bf16.mxu1 %v8102_v25  ;;  %2887 = vmatprep.subr.bf16.mxu0 %v8105_v26  ;;  %v8179_v25 = vld [vmem:[%s12128_s1 + $0xc0] ss:$28 sps:$4 sm:$0xff]   ;;  %v8182_v26 = vld [vmem:[%s12128_s1 + $0x2b4] ss:$28 sps:$4 sm:$0xff]  }
 0x107   :  { %2819 = vmatpush1.bf16.msra.mxu1 %v8100_v27  ;;  %2888 = vmatpush1.bf16.msra.mxu0 %v8103_v28  ;;  %v8183_v27 = vld [vmem:[%s12128_s1 + $0x2b8] ss:$28 sps:$4 sm:$0xff]  }
 0x108   :  { %2820 = vmatprep.subr.bf16.mxu1 %v8108_v29  ;;  %2910 = vmatprep.subr.bf16.mxu0 %v8111_v30 }
 0x10a   :  { %2890 = vmatmul.mubr.bf16.vlgmr.msra.gmra.mrb[16].mxu0 %v9614_v61 }
 0x10b   :  { %2821 = vmatpush1.bf16.msra.mxu1 %v8106_v31  ;;  %2911 = vmatpush1.bf16.msra.mxu0 %v8109_v45 }
 0x10c   :  { %2912 = vmatprep.subr.bf16.mxu0 %v8114_v32  ;;  %2963 = vmatprep.subr.bf16.mxu1 %v8117_v33  ;;  %v8180_v33 = vld [vmem:[%s12128_s1 + $0x2b0] ss:$28 sps:$4 sm:$0xff]  }
 0x10d   :  { %2899 = vmatprep.mubr.bf16.mxu0 %v9632_v1 }
 0x10e   :  { %2837 = vmatmul.mubr.bf16.vlgmr.msra.gmra.mrb[24].mxu1 %v9749_v37 }
 0x10f   :  { %2913 = vmatpush1.bf16.msra.mxu0 %v8112_v34  ;;  %2964 = vmatpush1.bf16.msra.mxu1 %v8115_v51  ;;  %v8184_v34 = vld [vmem:[%s12128_s1 + $0xf8] ss:$28 sps:$4 sm:$0xff]  }
 0x110   :  { %2914 = vmatprep.subr.bf16.mxu0 %v8120_v35  ;;  %2965 = vmatprep.subr.bf16.mxu1 %v8123_v36  ;;  %v8187_v35 = vld [vmem:[%s12128_s1 + $0x2ec] ss:$28 sps:$4 sm:$0xff]  }
 0x111   :  { %7044 = vmatprep.mubr.msk.bf16.mxu1 %vm1200_vm0, %v9767_v41  ;;  %v8188_v36 = vld [vmem:[%s12128_s1 + $0x2f0] ss:$28 sps:$4 sm:$0xff]  }
 0x112   :  { %2900 = vmatmul.mubr.bf16.gmra.mrb[20].mxu0 %v9656_v7 }
 0x113   :  { %2915 = vmatpush1.bf16.msra.mxu0 %v8118_v56  ;;  %2966 = vmatpush1.bf16.msra.mxu1 %v8121_v38  ;;  %v8185_v56 = vld [vmem:[%s12128_s1 + $0x2e8] ss:$28 sps:$4 sm:$0xff]   ;;  %v8189_v38 = vld [vmem:[%s12128_s1 + $0x130] ss:$28 sps:$4 sm:$0xff]  }
 0x114   :  { %2916 = vmatprep.subr.bf16.mxu0 %v8126_v39  ;;  %2967 = vmatprep.subr.bf16.mxu1 %v8129_v40  ;;  %v8192_v39 = vld [vmem:[%s12128_s1 + $0x324] ss:$28 sps:$4 sm:$0xff]  }
 0x115   :  { %7045 = vmatprep.mubr.msk.bf16.mxu0 %vm1200_vm0, %v9668_v11  ;;  %v8193_v40 = vld [vmem:[%s12128_s1 + $0x328] ss:$28 sps:$4 sm:$0xff]  }
 0x116   :  { %2847 = vmatmul.mubr.bf16.gmra.mrb[28].mxu1 %v9789_v47 }
 0x117   :  { %2917 = vmatpush1.bf16.msra.mxu0 %v8124_v42  ;;  %2968 = vmatpush1.bf16.msra.mxu1 %v8127_v43 }
 0x118   :  { %2918 = vmatprep.subr.bf16.mxu0 %v8132_v44  ;;  %2969 = vmatprep.subr.bf16.mxu1 %v8135_v46 }
 0x119   :  { %2995 = vmatprep.mubr.bf16.mxu1 %v9447_v4 }
 0x11b   :  { %2919 = vmatpush1.bf16.msra.mxu0 %v8130_v49  ;;  %2970 = vmatpush1.bf16.msra.mxu1 %v8133_v50 }
 0x11c   :  { %2920 = vmatprep.subr.bf16.mxu0 %v8138_v52  ;;  %2971 = vmatprep.subr.bf16.mxu1 %v8141_v53  ;;  %v8190_v52 = vld [vmem:[%s12128_s1 + $0x320] ss:$28 sps:$4 sm:$0xff]   ;;  %v8194_v53 = vld [vmem:[%s12128_s1 + $0x168] ss:$28 sps:$4 sm:$0xff]  }
 0x11f   :  { %2921 = vmatpush1.bf16.msra.mxu0 %v8136_v54  ;;  %2972 = vmatpush1.bf16.msra.mxu1 %v8139_v55 }
 0x120   :  { %2922 = vmatprep.subr.bf16.mxu0 %v8144_v57  ;;  %2973 = vmatprep.subr.bf16.mxu1 %v8147_v58  ;;  %v8197_v57 = vld [vmem:[%s12128_s1 + $0x35c] ss:$28 sps:$4 sm:$0xff]  }
 0x121   :  { %v8198_v58 = vld [vmem:[%s12128_s1 + $0x360] ss:$28 sps:$4 sm:$0xff]  }
 0x123   :  { %2923 = vmatpush1.bf16.msra.mxu0 %v8142_v6  ;;  %2974 = vmatpush1.bf16.msra.mxu1 %v8145_v59  ;;  %v8195_v6 = vld [vmem:[%s12128_s1 + $0x358] ss:$28 sps:$4 sm:$0xff]   ;;  %v8199_v59 = vld [vmem:[%s12128_s1 + $0x1a0] ss:$28 sps:$4 sm:$0xff]  }
 0x124   :  { %2924 = vmatprep.subr.bf16.mxu0 %v8150_v60  ;;  %2975 = vmatprep.subr.bf16.mxu1 %v8153_v9  ;;  %v8202_v60 = vld [vmem:[%s12128_s1 + $0x394] ss:$28 sps:$4 sm:$0xff]  }
 0x125   :  { %v8200_v9 = vld [vmem:[%s12128_s1 + $0x390] ss:$28 sps:$4 sm:$0xff]  }
 0x127   :  { %2925 = vmatpush1.bf16.msra.mxu0 %v8148_v62  ;;  %2976 = vmatpush1.bf16.msra.mxu1 %v8151_v63  ;;  %v8203_v62 = vld [vmem:[%s12128_s1 + $0x398] ss:$28 sps:$4 sm:$0xff]   ;;  %v8206_v63 = vld [vmem:[%s12128_s1 + $0x3cc] ss:$28 sps:$4 sm:$0xff]  }
 0x128   :  { %2926 = vmatprep.subr.bf16.mxu0 %v8156_v0  ;;  %2977 = vmatprep.subr.bf16.mxu1 %v8159_v17  ;;  %v8204_v0 = vld [vmem:[%s12128_s1 + $0x3c8] ss:$28 sps:$4 sm:$0xff]   ;;  %v8207_v17 = vld [vmem:[%s12128_s1 + $0x3d0] ss:$28 sps:$4 sm:$0xff]  }
 0x12b   :  { %2927 = vmatpush1.bf16.msra.mxu0 %v8154_v2  ;;  %2978 = vmatpush1.bf16.msra.mxu1 %v8157_v3  ;;  %v8210_v2 = vld [vmem:[%s12128_s1 + $0x404] ss:$28 sps:$4 sm:$0xff]  }
 0x12c   :  { %2979 = vmatprep.subr.bf16.mxu1 %v8162_v21  ;;  %7445 = vmatprep.subr.bf16.mxu0 %v8163_v48  ;;  %v8211_v3 = vld [vmem:[%s12128_s1 + $0x408] ss:$28 sps:$4 sm:$0xff]   ;;  %v8214_v21 = vld [vmem:[%s12128_s1 + $0x43c] ss:$28 sps:$4 sm:$0xff]  }
 0x12d   :  { %v8212_v48 = vld [vmem:[%s12128_s1 + $0x438] ss:$28 sps:$4 sm:$0xff]  }
 0x12e   :  { %2943 = vmatmul.mubr.bf16.vlgmr.msra.gmra.mrb[16].mxu0 %v9749_v37 }
 0x12f   :  { %2980 = vmatpush1.bf16.msra.mxu1 %v8160_v5  ;;  %7446 = vmatpush3.bf16.msra.mxu0 %v8164_v8  ;;  %v8218_v5 = vld [vmem:[%s12128_s1 + $0x474] ss:$28 sps:$4 sm:$0xff]  }
 0x130   :  { %2981 = vmatprep.subr.bf16.mxu1 %v8167_v10  ;;  %7447 = vmatprep.subr.bf16.mxu0 %v8168_v13  ;;  %v8219_v10 = vld [vmem:[%s12128_s1 + $0x478] ss:$28 sps:$4 sm:$0xff]  }
 0x131   :  { %7046 = vmatprep.mubr.msk.bf16.mxu0 %vm1200_vm0, %v9767_v41 }
 0x133   :  { %2982 = vmatpush1.bf16.msra.mxu1 %v8165_v14  ;;  %7448 = vmatpush3.bf16.msra.mxu0 %v8169_v15 }
 0x134   :  { %2983 = vmatprep.subr.bf16.mxu1 %v8172_v16  ;;  %7449 = vmatprep.subr.bf16.mxu0 %v8173_v18  ;;  %v8222_v18 = vld [vmem:[%s12128_s1 + $0x4ac] ss:$28 sps:$4 sm:$0xff]  }
 0x136   :  { %2953 = vmatmul.mubr.bf16.gmra.mrb[20].mxu0 %v9789_v47 }
 0x137   :  { %2984 = vmatpush1.bf16.msra.mxu1 %v8170_v19  ;;  %7450 = vmatpush3.bf16.msra.mxu0 %v8174_v20  ;;  %v8223_v20 = vld [vmem:[%s12128_s1 + $0x4b0] ss:$28 sps:$4 sm:$0xff]  }
 0x138   :  { %2985 = vmatprep.subr.bf16.mxu1 %v8177_v22  ;;  %7451 = vmatprep.subr.bf16.mxu0 %v8178_v23  ;;  %v8226_v22 = vld [vmem:[%s12128_s1 + $0x4e4] ss:$28 sps:$4 sm:$0xff]  }
 0x139   :  { %v9905_v28 = vpop.f32.mrb[0].mxu0  ;;  %v9907_v29 = vpop.f32.mrb[0].mxu1  ;;  %3101 = vmatprep.mubr.bf16.mxu0 %v9447_v4  ;;  %v8224_v23 = vld [vmem:[%s12128_s1 + $0x4e0] ss:$28 sps:$4 sm:$0xff]  }
 0x13a   :  { %v9910_v30 = vpop.f32.mrb[1].mxu0  ;;  %v9912_v31 = vpop.f32.mrb[1].mxu1 }
 0x13b   :  { %v9914_v45 = vpop.f32.mrb[2].mxu0  ;;  %v9916_v32 = vpop.f32.mrb[2].mxu1  ;;  %2986 = vmatpush1.bf16.msra.mxu1 %v8175_v24  ;;  %7452 = vmatpush3.bf16.msra.mxu0 %v8179_v25  ;;  %v8227_v24 = vld [vmem:[%s12128_s1 + $0x4e8] ss:$28 sps:$4 sm:$0xff]  }
 0x13c   :  { %v9924_v51 = vpop.f32.mrb[3].mxu0  ;;  %v9926_v4 = vpop.f32.mrb[3].mxu1  ;;  %2987 = vmatprep.subr.bf16.mxu1 %v8182_v26  ;;  %7453 = vmatprep.subr.bf16.mxu0 %v8183_v27 }
 0x13f   :  { %2988 = vmatpush1.bf16.msra.mxu1 %v8180_v33  ;;  %7454 = vmatpush3.bf16.msra.mxu0 %v8184_v34  ;;  %v8230_v34 = vld [vmem:[%s12128_s1 + $0x51c] ss:$28 sps:$4 sm:$0xff]  }
 0x140   :  { %2989 = vmatprep.subr.bf16.mxu1 %v8187_v35  ;;  %7455 = vmatprep.subr.bf16.mxu0 %v8188_v36  ;;  %v8228_v36 = vld [vmem:[%s12128_s1 + $0x518] ss:$28 sps:$4 sm:$0xff]  }
 0x141   :  { %v9946_v42 = vpop.f32.mrb[4].mxu0  ;;  %v9948_v43 = vpop.f32.mrb[4].mxu1 }
 0x142   :  { %v9950_v44 = vpop.f32.mrb[5].mxu0  ;;  %v9952_v46 = vpop.f32.mrb[5].mxu1 }
 0x143   :  { %v9954_v49 = vpop.f32.mrb[6].mxu0  ;;  %v9956_v50 = vpop.f32.mrb[6].mxu1  ;;  %2990 = vmatpush1.bf16.msra.mxu1 %v8185_v56  ;;  %7456 = vmatpush3.bf16.msra.mxu0 %v8189_v38  ;;  %v8231_v56 = vld [vmem:[%s12128_s1 + $0x520] ss:$28 sps:$4 sm:$0xff]  }
 0x144   :  { %v9964_v54 = vpop.f32.mrb[7].mxu0  ;;  %v9966_v55 = vpop.f32.mrb[7].mxu1  ;;  %2991 = vmatprep.subr.bf16.mxu1 %v8192_v39  ;;  %7457 = vmatprep.subr.bf16.mxu0 %v8193_v40  ;;  %v8234_v39 = vld [vmem:[%s12128_s1 + $0x554] ss:$28 sps:$4 sm:$0xff]  }
 0x145   :  { %v8232_v40 = vld [vmem:[%s12128_s1 + $0x550] ss:$28 sps:$4 sm:$0xff]  }
 0x147   :  { %2992 = vmatpush1.bf16.msra.mxu1 %v8190_v52  ;;  %7458 = vmatpush3.bf16.msra.mxu0 %v8194_v53  ;;  %v8235_v52 = vld [vmem:[%s12128_s1 + $0x558] ss:$28 sps:$4 sm:$0xff]   ;;  %v8238_v53 = vld [vmem:[%s12130_s2 + $0x4] ss:$28 sps:$4 sm:$0xff]  }
 0x148   :  { %2993 = vmatprep.subr.bf16.mxu1 %v8197_v57  ;;  %7459 = vmatprep.subr.bf16.mxu0 %v8198_v58  ;;  %v8241_v57 = vld [vmem:[%s12130_s2 + $0xc] ss:$28 sps:$4 sm:$0xff]   ;;  %v8236_v58 = vld [vmem:[%s12130_s2] ss:$28 sps:$4 sm:$0xff]  }
 0x14b   :  { %2994 = vmatpush1.bf16.msra.mxu1 %v8195_v6  ;;  %7460 = vmatpush3.bf16.msra.mxu0 %v8199_v59  ;;  %v8239_v6 = vld [vmem:[%s12130_s2 + $0x8] ss:$28 sps:$4 sm:$0xff]   ;;  %v8244_v59 = vld [vmem:[%s12130_s2 + $0x3c] ss:$28 sps:$4 sm:$0xff]  }
 0x14c   :  { %3016 = vmatprep.subr.bf16.mxu1 %v8202_v60  ;;  %3118 = vmatprep.subr.bf16.mxu0 %v8768_v12  ;;  %v8247_v60 = vld [vmem:[%s12130_s2 + $0x44] ss:$28 sps:$4 sm:$0xff]  }
 0x14e   :  { %2996 = vmatmul.mubr.bf16.vlgmr.msra.gmra.mrb[32].mxu1 %v9614_v61  ;;  %3102 = vmatmul.mubr.bf16.vlgmr.msra.gmra.mrb[24].mxu0 %v9614_v61  ;;  %v8208_v61 = vld [vmem:[%s12128_s1 + $0x400] ss:$28 sps:$4 sm:$0xff]  }
 0x14f   :  { %3017 = vmatpush1.bf16.msra.mxu1 %v8200_v9  ;;  %3119 = vmatpush1.bf16.msra.mxu0 %v8203_v62  ;;  %v8242_v9 = vld [vmem:[%s12130_s2 + $0x38] ss:$28 sps:$4 sm:$0xff]   ;;  %v8245_v62 = vld [vmem:[%s12130_s2 + $0x40] ss:$28 sps:$4 sm:$0xff]  }
 0x150   :  { %3018 = vmatprep.subr.bf16.mxu1 %v8206_v63  ;;  %3120 = vmatprep.subr.bf16.mxu0 %v8768_v12  ;;  %v8250_v63 = vld [vmem:[%s12130_s2 + $0x74] ss:$28 sps:$4 sm:$0xff]  }
 0x151   :  { %3005 = vmatprep.mubr.bf16.mxu1 %v9632_v1  ;;  %3109 = vmatprep.mubr.bf16.mxu0 %v9632_v1  ;;  %v8215_v1 = vld [vmem:[%s12128_s1 + $0x440] ss:$28 sps:$4 sm:$0xff]  }
 0x153   :  { %3019 = vmatpush1.bf16.msra.mxu1 %v8204_v0  ;;  %3121 = vmatpush1.bf16.msra.mxu0 %v8207_v17  ;;  %v10124_v0 = vpop.permute.xlu0 %244  ;;  %v8248_v17 = vld [vmem:[%s12130_s2 + $0x70] ss:$28 sps:$4 sm:$0xff]  }
 0x154   :  { %3020 = vmatprep.subr.bf16.mxu1 %v8210_v2  ;;  %3122 = vmatprep.subr.bf16.mxu0 %v8768_v12  ;;  %v8251_v2 = vld [vmem:[%s12130_s2 + $0x78] ss:$28 sps:$4 sm:$0xff]  }
 0x156   :  { %3006 = vmatmul.mubr.bf16.gmra.mrb[36].mxu1 %v9656_v7  ;;  %3110 = vmatmul.mubr.bf16.gmra.mrb[28].mxu0 %v9656_v7  ;;  %v8216_v7 = vld [vmem:[%s12128_s1 + $0x470] ss:$28 sps:$4 sm:$0xff]  }
 0x157   :  { %3021 = vmatpush1.bf16.msra.mxu1 %v8208_v61  ;;  %3123 = vmatpush1.bf16.msra.mxu0 %v8211_v3  ;;  %v8256_v61 = vld [vmem:[%s12130_s2 + $0xac] ss:$28 sps:$4 sm:$0xff]  }
 0x158   :  { %3022 = vmatprep.subr.bf16.mxu1 %v8214_v21  ;;  %3124 = vmatprep.subr.bf16.mxu0 %v8768_v12  ;;  %v8254_v3 = vld [vmem:[%s12130_s2 + $0xa8] ss:$28 sps:$4 sm:$0xff]   ;;  %v8257_v21 = vld [vmem:[%s12130_s2 + $0xb0] ss:$28 sps:$4 sm:$0xff]  }
 0x159   :  { %v7433_v8 = vpop.f32.mrb[8].mxu1  ;;  %7047 = vmatprep.mubr.msk.bf16.mxu1 %vm1200_vm0, %v9668_v11  ;;  %7049 = vmatprep.mubr.msk.bf16.mxu0 %vm1200_vm0, %v9668_v11  ;;  %v8220_v11 = vld [vmem:[%s12128_s1 + $0x4a8] ss:$28 sps:$4 sm:$0xff]  }
 0x15a   :  { %v7434_v13 = vpop.f32.mrb[9].mxu1 }
 0x15b   :  { %v10039_v14 = vadd.f32 %v7434_v13, %v7433_v8  ;;  %v7436_v15 = vpop.f32.mrb[10].mxu1  ;;  %3023 = vmatpush1.bf16.msra.mxu1 %v8212_v48  ;;  %3125 = vmatpush1.bf16.msra.mxu0 %v8215_v1  ;;  %v8262_v1 = vld [vmem:[%s12130_s2 + $0xe4] ss:$28 sps:$4 sm:$0xff]  }
 0x15c   :  { %v7437_v16 = vpop.f32.mrb[11].mxu1  ;;  %3024 = vmatprep.subr.bf16.mxu1 %v8218_v5  ;;  %3126 = vmatprep.subr.bf16.mxu0 %v8768_v12  ;;  %v10154_v5 = vpop.permute.xlu0 %249 }
 0x15d   :  { %v10045_v19 = vadd.f32 %v7437_v16, %v7436_v15  ;;  %v1560_v48 = vadd.f32 %v10039_v14, %v10124_v0  ;;  %v10167_v15 = vpop.permute.xlu1 %254 }
 0x15f   :  { %3025 = vmatpush1.bf16.msra.mxu1 %v8216_v7  ;;  %3127 = vmatpush1.bf16.msra.mxu0 %v8219_v10  ;;  %v10159_v7 = vld [vmem:[%s12127_s4 + $0x4] ss:$16 sps:$4 sm:$0xff]   ;;  %v1563_v14 = vadd.f32 %v10045_v19, %v10154_v5  ;;  %v8268_v19 = vld [vmem:[%s12130_s2 + $0x11c] ss:$28 sps:$4 sm:$0xff]  }
 0x160   :  { %3026 = vmatprep.subr.bf16.mxu1 %v8222_v18  ;;  %3128 = vmatprep.subr.bf16.mxu0 %v8768_v12  ;;  %v8260_v18 = vld [vmem:[%s12130_s2 + $0xe0] ss:$28 sps:$4 sm:$0xff]  }
 0x161   :  { %v7439_v25 = vpop.f32.mrb[12].mxu1 }
 0x162   :  { %v7440_v26 = vpop.f32.mrb[13].mxu1 }
 0x163   :  { %3027 = vmatpush1.bf16.msra.mxu1 %v8220_v11  ;;  %3129 = vmatpush1.bf16.msra.mxu0 %v8223_v20  ;;  %v10063_v27 = vadd.f32 %v7440_v26, %v7439_v25  ;;  %v7442_v33 = vpop.f32.mrb[14].mxu1  ;;  %v8263_v11 = vld [vmem:[%s12130_s2 + $0xe8] ss:$28 sps:$4 sm:$0xff]   ;;  %v8269_v25 = vld [vmem:[%s12130_s2 + $0x120] ss:$28 sps:$4 sm:$0xff]  }
 0x164   :  { %3028 = vmatprep.subr.bf16.mxu1 %v8226_v22  ;;  %3130 = vmatprep.subr.bf16.mxu0 %v8768_v12  ;;  %v7443_v35 = vpop.f32.mrb[15].mxu1 }
 0x165   :  { %v10075_v38 = vadd.f32 %v7443_v35, %v7442_v33  ;;  %v1568_v26 = vadd.f32 %v10063_v27, %v10167_v15  ;;  %v8274_v33 = vld [vmem:[%s12130_s2 + $0x154] ss:$28 sps:$4 sm:$0xff]   ;;  %v10197_v35 = vpop.permute.xlu1 %259 }
 0x167   :  { %3029 = vmatpush1.bf16.msra.mxu1 %v8224_v23  ;;  %3131 = vmatpush1.bf16.msra.mxu0 %v8227_v24  ;;  %v8271_v23 = vld [vmem:[%s12130_s2 + $0x124] ss:$28 sps:$4 sm:$0xff]   ;;  %v8266_v24 = vld [vmem:[%s12130_s2 + $0x118] ss:$28 sps:$4 sm:$0xff]  }
 0x168   :  { %3030 = vmatprep.subr.bf16.mxu1 %v8230_v34  ;;  %3132 = vmatprep.subr.bf16.mxu0 %v8768_v12  ;;  %v8277_v34 = vld [vmem:[%s12130_s2 + $0x15c] ss:$28 sps:$4 sm:$0xff]  }
 0x16b   :  { %3031 = vmatpush1.bf16.msra.mxu1 %v8228_v36  ;;  %3133 = vmatpush1.bf16.msra.mxu0 %v8231_v56 }
 0x16c   :  { %3032 = vmatprep.subr.bf16.mxu1 %v8234_v39  ;;  %3134 = vmatprep.subr.bf16.mxu0 %v8768_v12 }
 0x16f   :  { %3033 = vmatpush1.bf16.msra.mxu1 %v8232_v40  ;;  %3135 = vmatpush1.bf16.msra.mxu0 %v8235_v52  ;;  %v1571_v40 = vadd.f32 %v10075_v38, %v10197_v35  ;;  %v8272_v52 = vld [vmem:[%s12130_s2 + $0x150] ss:$28 sps:$4 sm:$0xff]  }
 0x170   :  { %4323 = vmatprep.subr.bf16.mxu0 %v8238_v53  ;;  %4429 = vmatprep.subr.bf16.mxu1 %v8241_v57  ;;  %v8275_v53 = vld [vmem:[%s12130_s2 + $0x158] ss:$28 sps:$4 sm:$0xff]  }
 0x171   :  { %v8283_v38 = vld [vmem:[%s12130_s2 + $0x194] ss:$28 sps:$4 sm:$0xff]  }
 0x172   :  { %3049 = vmatmul.mubr.bf16.vlgmr.msra.gmra.mrb[32].mxu1 %v9749_v37  ;;  %3151 = vmatmul.mubr.bf16.vlgmr.msra.gmra.mrb[32].mxu0 %v9749_v37  ;;  %v8253_v37 = vld [vmem:[%s12130_s2 + $0x7c] ss:$28 sps:$4 sm:$0xff]  }
 0x173   :  { %4324 = vmatpush1.bf16.msra.mxu0 %v8236_v58  ;;  %4430 = vmatpush1.bf16.msra.mxu1 %v8239_v6  ;;  %v8280_v58 = vld [vmem:[%s12130_s2 + $0x18c] ss:$28 sps:$4 sm:$0xff]  }
 0x174   :  { %4325 = vmatprep.subr.bf16.mxu0 %v8244_v59  ;;  %4431 = vmatprep.subr.bf16.mxu1 %v8247_v60  ;;  %v8278_v59 = vld [vmem:[%s12130_s2 + $0x188] ss:$28 sps:$4 sm:$0xff]   ;;  %v8281_v60 = vld [vmem:[%s12130_s2 + $0x190] ss:$28 sps:$4 sm:$0xff]  }
 0x175   :  { %7048 = vmatprep.mubr.msk.bf16.mxu1 %vm1200_vm0, %v9767_v41  ;;  %7050 = vmatprep.mubr.msk.bf16.mxu0 %vm1200_vm0, %v9767_v41  ;;  %v8259_v41 = vld [vmem:[%s12130_s2 + $0xb4] ss:$28 sps:$4 sm:$0xff]  }
 0x177   :  { %4326 = vmatpush1.bf16.msra.mxu0 %v8242_v9  ;;  %4432 = vmatpush1.bf16.msra.mxu1 %v8245_v62  ;;  %v8286_v9 = vld [vmem:[%s12130_s2 + $0x1c4] ss:$28 sps:$4 sm:$0xff]   ;;  %v8289_v62 = vld [vmem:[%s12130_s2 + $0x1cc] ss:$28 sps:$4 sm:$0xff]  }
 0x178   :  { %4327 = vmatprep.subr.bf16.mxu0 %v8250_v63  ;;  %4433 = vmatprep.subr.bf16.mxu1 %v8253_v37  ;;  %v8284_v63 = vld [vmem:[%s12130_s2 + $0x1c0] ss:$28 sps:$4 sm:$0xff]   ;;  %v8287_v37 = vld [vmem:[%s12130_s2 + $0x1c8] ss:$28 sps:$4 sm:$0xff]  }
 0x17a   :  { %3059 = vmatmul.mubr.bf16.gmra.mrb[36].mxu1 %v9789_v47  ;;  %3159 = vmatmul.mubr.bf16.gmra.mrb[36].mxu0 %v9789_v47  ;;  %v8265_v47 = vld [vmem:[%s12130_s2 + $0xec] ss:$28 sps:$4 sm:$0xff]  }
 0x17b   :  { %4328 = vmatpush1.bf16.msra.mxu0 %v8248_v17  ;;  %4434 = vmatpush1.bf16.msra.mxu1 %v8251_v2  ;;  %v8292_v17 = vld [vmem:[%s12130_s2 + $0x1fc] ss:$28 sps:$4 sm:$0xff]   ;;  %v8295_v2 = vld [vmem:[%s12130_s2 + $0x204] ss:$28 sps:$4 sm:$0xff]  }
 0x17c   :  { %4329 = vmatprep.subr.bf16.mxu0 %v8256_v61  ;;  %4435 = vmatprep.subr.bf16.mxu1 %v8259_v41  ;;  %v8290_v61 = vld [vmem:[%s12130_s2 + $0x1f8] ss:$28 sps:$4 sm:$0xff]   ;;  %v8293_v41 = vld [vmem:[%s12130_s2 + $0x200] ss:$28 sps:$4 sm:$0xff]  }
 0x17d   :  { %v1608_v8 = vpop.f32.mrb[16].mxu1  ;;  %4355 = vmatprep.mubr.bf16.mxu0 %v10159_v7  ;;  %4461 = vmatprep.mubr.bf16.mxu1 %v10159_v7 }
 0x17e   :  { %v10163_v10 = vadd.f32 %v1608_v8, %v1560_v48  ;;  %v1610_v13 = vpop.f32.mrb[17].mxu1  ;;  %v8296_v48 = vld [vmem:[%s12130_s2 + $0x230] ss:$28 sps:$4 sm:$0xff]  }
 0x17f   :  { %v1611_v16 = vpop.f32.mrb[18].mxu1  ;;  %4330 = vmatpush1.bf16.msra.mxu0 %v8254_v3  ;;  %4436 = vmatpush1.bf16.msra.mxu1 %v8257_v21  ;;  %v8298_v3 = vld [vmem:[%s12130_s2 + $0x234] ss:$28 sps:$4 sm:$0xff]   ;;  %v8301_v21 = vld [vmem:[%s12130_s2 + $0x23c] ss:$28 sps:$4 sm:$0xff]  }
 0x180   :  { %v10175_v20 = vadd.f32 %v1611_v16, %v1563_v14  ;;  %v1613_v22 = vpop.f32.mrb[19].mxu1  ;;  %4331 = vmatprep.subr.bf16.mxu0 %v8262_v1  ;;  %4437 = vmatprep.subr.bf16.mxu1 %v8265_v47  ;;  %v8299_v1 = vld [vmem:[%s12130_s2 + $0x238] ss:$28 sps:$4 sm:$0xff]   ;;  %v8304_v47 = vld [vmem:[%s12130_s2 + $0x26c] ss:$28 sps:$4 sm:$0xff]  }
 0x181   :  { %v8307_v8 = vld [vmem:[%s12130_s2 + $0x274] ss:$28 sps:$4 sm:$0xff]   ;;  %v8302_v13 = vld [vmem:[%s12130_s2 + $0x268] ss:$28 sps:$4 sm:$0xff]   ;;  %v8308_v22 = vld [vmem:[%s12130_s2 + $0x2a0] ss:$28 sps:$4 sm:$0xff]  }
 0x182   :  { %v8305_v14 = vld [vmem:[%s12130_s2 + $0x270] ss:$28 sps:$4 sm:$0xff]   ;;  %v8310_v16 = vld [vmem:[%s12130_s2 + $0x2a4] ss:$28 sps:$4 sm:$0xff]  }
 0x183   :  { %4332 = vmatpush1.bf16.msra.mxu0 %v8260_v18  ;;  %4438 = vmatpush1.bf16.msra.mxu1 %v8263_v11  ;;  %v8313_v18 = vld [vmem:[%s12130_s2 + $0x2ac] ss:$28 sps:$4 sm:$0xff]  }
 0x184   :  { %4333 = vmatprep.subr.bf16.mxu0 %v8268_v19  ;;  %4439 = vmatprep.subr.bf16.mxu1 %v8271_v23  ;;  %v8311_v19 = vld [vmem:[%s12130_s2 + $0x2a8] ss:$28 sps:$4 sm:$0xff]  }
 0x185   :  { %v1616_v36 = vpop.f32.mrb[20].mxu1 }
 0x186   :  { %v10199_v56 = vadd.f32 %v1616_v36, %v1568_v26  ;;  %v1618_v39 = vpop.f32.mrb[21].mxu1  ;;  %v8316_v26 = vld [vmem:[%s12130_s2 + $0x2dc] ss:$28 sps:$4 sm:$0xff]  }
 0x187   :  { %v1619_v27 = vpop.f32.mrb[22].mxu1  ;;  %4334 = vmatpush1.bf16.msra.mxu0 %v8266_v24  ;;  %4440 = vmatpush1.bf16.msra.mxu1 %v8269_v25  ;;  %v8317_v36 = vld [vmem:[%s12130_s2 + $0x2e0] ss:$28 sps:$4 sm:$0xff]   ;;  %v8322_v39 = vld [vmem:[%s12130_s2 + $0x314] ss:$28 sps:$4 sm:$0xff]  }
 0x188   :  { %v10209_v57 = vadd.f32 %v1619_v27, %v1571_v40  ;;  %4335 = vmatprep.subr.bf16.mxu0 %v8274_v33  ;;  %4441 = vmatprep.subr.bf16.mxu1 %v8277_v34  ;;  %v1621_v6 = vpop.f32.mrb[23].mxu1  ;;  %v8319_v33 = vld [vmem:[%s12130_s2 + $0x2e4] ss:$28 sps:$4 sm:$0xff]   ;;  %v8314_v34 = vld [vmem:[%s12130_s2 + $0x2d8] ss:$28 sps:$4 sm:$0xff]  }
 0x189   :  { %v8325_v40 = vld [vmem:[%s12130_s2 + $0x31c] ss:$28 sps:$4 sm:$0xff]  }
 0x18b   :  { %4336 = vmatpush1.bf16.msra.mxu0 %v8272_v52  ;;  %4442 = vmatpush1.bf16.msra.mxu1 %v8275_v53 }
 0x18c   :  { %4337 = vmatprep.subr.bf16.mxu0 %v8280_v58  ;;  %4443 = vmatprep.subr.bf16.mxu1 %v8283_v38  ;;  %v8320_v58 = vld [vmem:[%s12130_s2 + $0x310] ss:$28 sps:$4 sm:$0xff]   ;;  %v8323_v38 = vld [vmem:[%s12130_s2 + $0x318] ss:$28 sps:$4 sm:$0xff]  }
 0x18f   :  { %4338 = vmatpush1.bf16.msra.mxu0 %v8278_v59  ;;  %4444 = vmatpush1.bf16.msra.mxu1 %v8281_v60  ;;  %v8328_v59 = vld [vmem:[%s12130_s2 + $0x34c] ss:$28 sps:$4 sm:$0xff]   ;;  %v8331_v60 = vld [vmem:[%s12130_s2 + $0x354] ss:$28 sps:$4 sm:$0xff]  }
 0x190   :  { %4339 = vmatprep.subr.bf16.mxu0 %v8286_v9  ;;  %4445 = vmatprep.subr.bf16.mxu1 %v8289_v62  ;;  %v8326_v9 = vld [vmem:[%s12130_s2 + $0x348] ss:$28 sps:$4 sm:$0xff]   ;;  %v8329_v62 = vld [vmem:[%s12130_s2 + $0x350] ss:$28 sps:$4 sm:$0xff]  }
 0x193   :  { %4340 = vmatpush1.bf16.msra.mxu0 %v8284_v63  ;;  %4446 = vmatpush1.bf16.msra.mxu1 %v8287_v37  ;;  %v8334_v63 = vld [vmem:[%s12130_s2 + $0x384] ss:$28 sps:$4 sm:$0xff]   ;;  %v8337_v37 = vld [vmem:[%s12130_s2 + $0x38c] ss:$28 sps:$4 sm:$0xff]  }
 0x194   :  { %4341 = vmatprep.subr.bf16.mxu0 %v8292_v17  ;;  %4447 = vmatprep.subr.bf16.mxu1 %v8295_v2  ;;  %v8332_v17 = vld [vmem:[%s12130_s2 + $0x380] ss:$28 sps:$4 sm:$0xff]   ;;  %v8335_v2 = vld [vmem:[%s12130_s2 + $0x388] ss:$28 sps:$4 sm:$0xff]  }
 0x197   :  { %4342 = vmatpush1.bf16.msra.mxu0 %v8290_v61  ;;  %4448 = vmatpush1.bf16.msra.mxu1 %v8293_v41  ;;  %v8340_v61 = vld [vmem:[%s12130_s2 + $0x3bc] ss:$28 sps:$4 sm:$0xff]   ;;  %v8343_v41 = vld [vmem:[%s12130_s2 + $0x3c4] ss:$28 sps:$4 sm:$0xff]  }
 0x198   :  { %4343 = vmatprep.subr.bf16.mxu0 %v8298_v3  ;;  %4449 = vmatprep.subr.bf16.mxu1 %v8301_v21  ;;  %v10356_v3 = vld [vmem:[%s12127_s4] ss:$16 sps:$4 sm:$0xff]   ;;  %v8338_v21 = vld [vmem:[%s12130_s2 + $0x3b8] ss:$28 sps:$4 sm:$0xff]  }
 0x19b   :  { %4344 = vmatpush1.bf16.msra.mxu0 %v8296_v48  ;;  %4450 = vmatpush1.bf16.msra.mxu1 %v8299_v1  ;;  %v8341_v48 = vld [vmem:[%s12130_s2 + $0x3c0] ss:$28 sps:$4 sm:$0xff]   ;;  %v8346_v1 = vld [vmem:[%s12130_s2 + $0x3f4] ss:$28 sps:$4 sm:$0xff]  }
 0x19c   :  { %4345 = vmatprep.subr.bf16.mxu0 %v8304_v47  ;;  %4451 = vmatprep.subr.bf16.mxu1 %v8307_v8  ;;  %v8349_v47 = vld [vmem:[%s12130_s2 + $0x3fc] ss:$28 sps:$4 sm:$0xff]   ;;  %v8344_v8 = vld [vmem:[%s12130_s2 + $0x3f0] ss:$28 sps:$4 sm:$0xff]  }
 0x19d   :  { %v10277_v11 = vpop.f32.mrb[8].mxu0 }
 0x19e   :  { %v10285_v23 = vpop.f32.mrb[9].mxu0 }
 0x19f   :  { %v10287_v24 = vpop.f32.mrb[10].mxu0  ;;  %4346 = vmatpush1.bf16.msra.mxu0 %v8302_v13  ;;  %4452 = vmatpush1.bf16.msra.mxu1 %v8305_v14  ;;  %v8347_v13 = vld [vmem:[%s12130_s2 + $0x3f8] ss:$28 sps:$4 sm:$0xff]  }
 0x1a0   :  { %v10289_v25 = vpop.f32.mrb[11].mxu0  ;;  %4347 = vmatprep.subr.bf16.mxu0 %v8310_v16  ;;  %4453 = vmatprep.subr.bf16.mxu1 %v8313_v18  ;;  %v10381_v14 = vld [vmem:[%s12127_s4 + $0x24] ss:$16 sps:$4 sm:$0xff]   ;;  %v8352_v16 = vld [vmem:[%s12130_s2 + $0x42c] ss:$28 sps:$4 sm:$0xff]  }
 0x1a1   :  { %v8355_v18 = vld [vmem:[%s12130_s2 + $0x434] ss:$28 sps:$4 sm:$0xff]  }
 0x1a3   :  { %4348 = vmatpush1.bf16.msra.mxu0 %v8308_v22  ;;  %4454 = vmatpush1.bf16.msra.mxu1 %v8311_v19  ;;  %v10394_v22 = vld [vmem:[%s12127_s4 + $0x20] ss:$16 sps:$4 sm:$0xff]   ;;  %v8350_v19 = vld [vmem:[%s12130_s2 + $0x428] ss:$28 sps:$4 sm:$0xff]  }
 0x1a4   :  { %4349 = vmatprep.subr.bf16.mxu0 %v8316_v26  ;;  %4455 = vmatprep.subr.bf16.mxu1 %v8319_v33  ;;  %v8353_v26 = vld [vmem:[%s12130_s2 + $0x430] ss:$28 sps:$4 sm:$0xff]   ;;  %v8358_v33 = vld [vmem:[%s12130_s2 + $0x464] ss:$28 sps:$4 sm:$0xff]  }
 0x1a5   :  { %v10309_v27 = vpop.f32.mrb[12].mxu0 }
 0x1a6   :  { %v10311_v52 = vpop.f32.mrb[13].mxu0 }
 0x1a7   :  { %v10313_v53 = vpop.f32.mrb[14].mxu0  ;;  %4350 = vmatpush1.bf16.msra.mxu0 %v8314_v34  ;;  %4456 = vmatpush1.bf16.msra.mxu1 %v8317_v36  ;;  %v8361_v34 = vld [vmem:[%s12130_s2 + $0x46c] ss:$28 sps:$4 sm:$0xff]   ;;  %v8356_v36 = vld [vmem:[%s12130_s2 + $0x460] ss:$28 sps:$4 sm:$0xff]  }
 0x1a8   :  { %v10321_v6 = vpop.f32.mrb[15].mxu0  ;;  %4351 = vmatprep.subr.bf16.mxu0 %v8322_v39  ;;  %4457 = vmatprep.subr.bf16.mxu1 %v8325_v40  ;;  %v8359_v39 = vld [vmem:[%s12130_s2 + $0x468] ss:$28 sps:$4 sm:$0xff]   ;;  %v10419_v40 = vld [vmem:[%s12127_s4 + $0xc] ss:$16 sps:$4 sm:$0xff]  }
 0x1ab   :  { %4352 = vmatpush1.bf16.msra.mxu0 %v8320_v58  ;;  %4458 = vmatpush1.bf16.msra.mxu1 %v8323_v38  ;;  %v8364_v58 = vld [vmem:[%s12130_s2 + $0x49c] ss:$28 sps:$4 sm:$0xff]   ;;  %v8367_v38 = vld [vmem:[%s12130_s2 + $0x4a4] ss:$28 sps:$4 sm:$0xff]  }
 0x1ac   :  { %4353 = vmatprep.subr.bf16.mxu0 %v8328_v59  ;;  %4459 = vmatprep.subr.bf16.mxu1 %v8331_v60  ;;  %v8362_v59 = vld [vmem:[%s12130_s2 + $0x498] ss:$28 sps:$4 sm:$0xff]   ;;  %v8365_v60 = vld [vmem:[%s12130_s2 + $0x4a0] ss:$28 sps:$4 sm:$0xff]  }
 0x1af   :  { %4354 = vmatpush1.bf16.msra.mxu0 %v8326_v9  ;;  %4460 = vmatpush1.bf16.msra.mxu1 %v8329_v62  ;;  %v8370_v9 = vld [vmem:[%s12130_s2 + $0x4d4] ss:$28 sps:$4 sm:$0xff]   ;;  %v8373_v62 = vld [vmem:[%s12130_s2 + $0x4dc] ss:$28 sps:$4 sm:$0xff]  }
 0x1b0   :  { %4376 = vmatprep.subr.bf16.mxu0 %v8334_v63  ;;  %4482 = vmatprep.subr.bf16.mxu1 %v8337_v37  ;;  %v8368_v63 = vld [vmem:[%s12130_s2 + $0x4d0] ss:$28 sps:$4 sm:$0xff]   ;;  %v8371_v37 = vld [vmem:[%s12130_s2 + $0x4d8] ss:$28 sps:$4 sm:$0xff]  }
 0x1b2   :  { %4356 = vmatmul.mubr.bf16.vlgmr.msra.gmra.mrb[40].mxu0 %v10356_v3  ;;  %4462 = vmatmul.mubr.bf16.vlgmr.msra.gmra.mrb[40].mxu1 %v10356_v3 }
 0x1b3   :  { %4377 = vmatpush1.bf16.msra.mxu0 %v8332_v17  ;;  %4483 = vmatpush1.bf16.msra.mxu1 %v8335_v2  ;;  %v8376_v17 = vld [vmem:[%s12130_s2 + $0x50c] ss:$28 sps:$4 sm:$0xff]   ;;  %v8379_v2 = vld [vmem:[%s12130_s2 + $0x514] ss:$28 sps:$4 sm:$0xff]  }
 0x1b4   :  { %4378 = vmatprep.subr.bf16.mxu0 %v8340_v61  ;;  %4484 = vmatprep.subr.bf16.mxu1 %v8343_v41  ;;  %v8374_v61 = vld [vmem:[%s12130_s2 + $0x508] ss:$28 sps:$4 sm:$0xff]   ;;  %v8377_v41 = vld [vmem:[%s12130_s2 + $0x510] ss:$28 sps:$4 sm:$0xff]  }
 0x1b5   :  { %4365 = vmatprep.mubr.bf16.mxu0 %v10381_v14  ;;  %4471 = vmatprep.mubr.bf16.mxu1 %v10381_v14 }
 0x1b7   :  { %4379 = vmatpush1.bf16.msra.mxu0 %v8338_v21  ;;  %4485 = vmatpush1.bf16.msra.mxu1 %v8341_v48  ;;  %v8382_v21 = vld [vmem:[%s12130_s2 + $0x544] ss:$28 sps:$4 sm:$0xff]   ;;  %v8385_v48 = vld [vmem:[%s12130_s2 + $0x54c] ss:$28 sps:$4 sm:$0xff]  }
 0x1b8   :  { %4380 = vmatprep.subr.bf16.mxu0 %v8346_v1  ;;  %4486 = vmatprep.subr.bf16.mxu1 %v8349_v47  ;;  %v8380_v1 = vld [vmem:[%s12130_s2 + $0x540] ss:$28 sps:$4 sm:$0xff]   ;;  %v8383_v47 = vld [vmem:[%s12130_s2 + $0x548] ss:$28 sps:$4 sm:$0xff]  }
 0x1ba   :  { %4366 = vmatmul.mubr.bf16.gmra.mrb[44].mxu0 %v10394_v22  ;;  %4472 = vmatmul.mubr.bf16.gmra.mrb[44].mxu1 %v10394_v22 }
 0x1bb   :  { %4381 = vmatpush1.bf16.msra.mxu0 %v8344_v8  ;;  %4487 = vmatpush1.bf16.msra.mxu1 %v8347_v13  ;;  %v8388_v8 = vld [vmem:[%s12130_s2 + $0x14] ss:$28 sps:$4 sm:$0xff]  }
 0x1bc   :  { %4382 = vmatprep.subr.bf16.mxu0 %v8352_v16  ;;  %4488 = vmatprep.subr.bf16.mxu1 %v8355_v18  ;;  %v8389_v13 = vld [vmem:[%s12130_s2 + $0x1d8] ss:$28 sps:$4 sm:$0xff]   ;;  %v8386_v16 = vld [vmem:[%s12130_s2 + $0x10] ss:$28 sps:$4 sm:$0xff]  }
 0x1bd   :  { %7226 = vmatprep.mubr.msk.bf16.mxu0 %vm1200_vm0, %v10419_v40  ;;  %7228 = vmatprep.mubr.msk.bf16.mxu1 %vm1200_vm0, %v10419_v40  ;;  %v8390_v18 = vld [vmem:[%s12130_s2 + $0x18] ss:$28 sps:$4 sm:$0xff]  }
 0x1bf   :  { %4383 = vmatpush1.bf16.msra.mxu0 %v8350_v19  ;;  %4489 = vmatpush1.bf16.msra.mxu1 %v8353_v26  ;;  %v10487_v19 = vadd.f32 %v9905_v28, %v10124_v0  ;;  %v10491_v26 = vadd.f32 %v9910_v30, %v10124_v0  ;;  %v10501_v28 = vadd.f32 %v9914_v45, %v10154_v5  ;;  %v8391_v45 = vld [vmem:[%s12130_s2 + $0x48] ss:$28 sps:$4 sm:$0xff]  }
 0x1c0   :  { %4384 = vmatprep.subr.bf16.mxu0 %v8358_v33  ;;  %4490 = vmatprep.subr.bf16.mxu1 %v8361_v34  ;;  %v8393_v33 = vld [vmem:[%s12130_s2 + $0x4c] ss:$28 sps:$4 sm:$0xff]   ;;  %v10505_v30 = vadd.f32 %v9924_v51, %v10154_v5 }
 0x1c1   :  { %v8394_v34 = vld [vmem:[%s12130_s2 + $0x210] ss:$28 sps:$4 sm:$0xff]  }
 0x1c2   :  { %v8395_v51 = vld [vmem:[%s12130_s2 + $0x50] ss:$28 sps:$4 sm:$0xff]  }
 0x1c3   :  { %4385 = vmatpush1.bf16.msra.mxu0 %v8356_v36  ;;  %4491 = vmatpush1.bf16.msra.mxu1 %v8359_v39  ;;  %v1623_v36 = vmax.f32 %v10487_v19, 0.0  ;;  %v1624_v39 = vmax.f32 %v10491_v26, 0.0  ;;  %v8418_v19 = vld [vmem:[%s12130_s2 + $0x164] ss:$28 sps:$4 sm:$0xff]  }
 0x1c4   :  { %4386 = vmatprep.subr.bf16.mxu0 %v8364_v58  ;;  %4492 = vmatprep.subr.bf16.mxu1 %v8367_v38  ;;  %v10512_v58 = vld [vmem:[%s12127_s4 + $0x8] ss:$16 sps:$4 sm:$0xff]   ;;  %v10524_v38 = vadd.f32 %v9946_v42, %v10167_v15  ;;  %v10541_v42 = vld [vmem:[%s12127_s4 + $0x2c] ss:$16 sps:$4 sm:$0xff]  }
 0x1c5   :  { %v8419_v26 = vld [vmem:[%s12130_s2 + $0x328] ss:$28 sps:$4 sm:$0xff]  }
 0x1c7   :  { %4387 = vmatpush1.bf16.msra.mxu0 %v8362_v59  ;;  %4493 = vmatpush1.bf16.msra.mxu1 %v8365_v60  ;;  %v8398_v59 = vld [vmem:[%s12130_s2 + $0x84] ss:$28 sps:$4 sm:$0xff]  }
 0x1c8   :  { %4388 = vmatprep.subr.bf16.mxu0 %v8370_v9  ;;  %4494 = vmatprep.subr.bf16.mxu1 %v8373_v62  ;;  %v8399_v60 = vld [vmem:[%s12130_s2 + $0x248] ss:$28 sps:$4 sm:$0xff]   ;;  %v1630_v9 = vmax.f32 %v10501_v28, 0.0  ;;  %v1631_v62 = vmax.f32 %v10505_v30, 0.0 }
 0x1cb   :  { %4389 = vmatpush1.bf16.msra.mxu0 %v8368_v63  ;;  %4495 = vmatpush1.bf16.msra.mxu1 %v8371_v37  ;;  %v10536_v63 = vadd.f32 %v9950_v44, %v10167_v15  ;;  %v10549_v37 = vadd.f32 %v9954_v49, %v10197_v35  ;;  %v8396_v44 = vld [vmem:[%s12130_s2 + $0x80] ss:$28 sps:$4 sm:$0xff]  }
 0x1cc   :  { %4390 = vmatprep.subr.bf16.mxu0 %v8376_v17  ;;  %4496 = vmatprep.subr.bf16.mxu1 %v8379_v2  ;;  %v10553_v17 = vadd.f32 %v9964_v54, %v10197_v35  ;;  %v8400_v2 = vld [vmem:[%s12130_s2 + $0x88] ss:$28 sps:$4 sm:$0xff]   ;;  %v8403_v49 = vld [vmem:[%s12130_s2 + $0xbc] ss:$28 sps:$4 sm:$0xff]  }
 0x1cd   :  { %v8404_v54 = vld [vmem:[%s12130_s2 + $0x280] ss:$28 sps:$4 sm:$0xff]  }
 0x1cf   :  { %4391 = vmatpush1.bf16.msra.mxu0 %v8374_v61  ;;  %4497 = vmatpush1.bf16.msra.mxu1 %v8377_v41  ;;  %v1637_v61 = vmax.f32 %v10524_v38, 0.0  ;;  %v1638_v41 = vmax.f32 %v10536_v63, 0.0  ;;  %v8428_v63 = vld [vmem:[%s12130_s2 + $0x1d4] ss:$28 sps:$4 sm:$0xff]  }
 0x1d0   :  { %4392 = vmatprep.subr.bf16.mxu0 %v8382_v21  ;;  %4498 = vmatprep.subr.bf16.mxu1 %v8385_v48  ;;  %v1644_v21 = vmax.f32 %v10549_v37, 0.0  ;;  %v10573_v48 = vld [vmem:[%s12127_s4 + $0x28] ss:$16 sps:$4 sm:$0xff]  }
 0x1d1   :  { %v8429_v37 = vld [vmem:[%s12130_s2 + $0x398] ss:$28 sps:$4 sm:$0xff]  }
 0x1d3   :  { %4393 = vmatpush1.bf16.msra.mxu0 %v8380_v1  ;;  %4499 = vmatpush1.bf16.msra.mxu1 %v8383_v47  ;;  %v1645_v1 = vmax.f32 %v10553_v17, 0.0  ;;  %v8401_v47 = vld [vmem:[%s12130_s2 + $0xb8] ss:$28 sps:$4 sm:$0xff]   ;;  %v8430_v17 = vld [vmem:[%s12130_s2 + $0x208] ss:$28 sps:$4 sm:$0xff]  }
 0x1d4   :  { %4535 = vmatprep.subr.bf16.mxu0 %v8388_v8  ;;  %7473 = vmatprep.subr.bf16.mxu1 %v8389_v13  ;;  %v8405_v8 = vld [vmem:[%s12130_s2 + $0xc0] ss:$28 sps:$4 sm:$0xff]   ;;  %v8408_v13 = vld [vmem:[%s12130_s2 + $0xf4] ss:$28 sps:$4 sm:$0xff]  }
 0x1d6   :  { %4409 = vmatmul.mubr.bf16.vlgmr.msra.gmra.mrb[40].mxu0 %v10512_v58  ;;  %4515 = vmatmul.mubr.bf16.vlgmr.msra.gmra.mrb[40].mxu1 %v10512_v58 }
 0x1d7   :  { %4536 = vmatpush1.bf16.msra.mxu0 %v8386_v16  ;;  %7474 = vmatpush3.bf16.msra.mxu1 %v8390_v18  ;;  %v8409_v16 = vld [vmem:[%s12130_s2 + $0x2b8] ss:$28 sps:$4 sm:$0xff]  }
 0x1d8   :  { %4537 = vmatprep.subr.bf16.mxu0 %v8393_v33  ;;  %7475 = vmatprep.subr.bf16.mxu1 %v8394_v34 }
 0x1d9   :  { %7227 = vmatprep.mubr.msk.bf16.mxu0 %vm1200_vm0, %v10541_v42  ;;  %7229 = vmatprep.mubr.msk.bf16.mxu1 %vm1200_vm0, %v10541_v42 }
 0x1db   :  { %4538 = vmatpush1.bf16.msra.mxu0 %v8391_v45  ;;  %7476 = vmatpush3.bf16.msra.mxu1 %v8395_v51  ;;  %v8406_v51 = vld [vmem:[%s12130_s2 + $0xf0] ss:$28 sps:$4 sm:$0xff]  }
 0x1dc   :  { %4539 = vmatprep.subr.bf16.mxu0 %v8398_v59  ;;  %7477 = vmatprep.subr.bf16.mxu1 %v8399_v60  ;;  %v8410_v59 = vld [vmem:[%s12130_s2 + $0xf8] ss:$28 sps:$4 sm:$0xff]  }
 0x1de   :  { %4419 = vmatmul.mubr.bf16.gmra.mrb[44].mxu0 %v10573_v48  ;;  %4525 = vmatmul.mubr.bf16.gmra.mrb[44].mxu1 %v10573_v48 }
 0x1df   :  { %4540 = vmatpush1.bf16.msra.mxu0 %v8396_v44  ;;  %7478 = vmatpush3.bf16.msra.mxu1 %v8400_v2  ;;  %v8413_v2 = vld [vmem:[%s12130_s2 + $0x12c] ss:$28 sps:$4 sm:$0xff]  }
 0x1e0   :  { %4541 = vmatprep.subr.bf16.mxu0 %v8403_v49  ;;  %7479 = vmatprep.subr.bf16.mxu1 %v8404_v54  ;;  %v8414_v49 = vld [vmem:[%s12130_s2 + $0x2f0] ss:$28 sps:$4 sm:$0xff]  }
 0x1e1   :  { %v2838_v18 = vpop.f32.mrb[24].mxu1  ;;  %4673 = vmatprep.mubr.bf16.mxu1 %v10159_v7  ;;  %4567 = vmatprep.mubr.bf16.mxu0 %v10159_v7 }
 0x1e2   :  { %v7553_v33 = vadd.f32 %v2838_v18, %v10124_v0  ;;  %v2840_v34 = vpop.f32.mrb[25].mxu1 }
 0x1e3   :  { %v7554_v28 = vadd.f32 %v2840_v34, %v10124_v0  ;;  %v2842_v45 = vpop.f32.mrb[26].mxu1  ;;  %4542 = vmatpush1.bf16.msra.mxu0 %v8401_v47  ;;  %7480 = vmatpush3.bf16.msra.mxu1 %v8405_v8  ;;  %v8415_v34 = vld [vmem:[%s12130_s2 + $0x130] ss:$28 sps:$4 sm:$0xff]  }
 0x1e4   :  { %v3167_v60 = vmax.f32 %v7553_v33, 0.0  ;;  %v7555_v44 = vadd.f32 %v2842_v45, %v10154_v5  ;;  %v2844_v7 = vpop.f32.mrb[27].mxu1  ;;  %4543 = vmatprep.subr.bf16.mxu0 %v8408_v13  ;;  %7481 = vmatprep.subr.bf16.mxu1 %v8409_v16  ;;  %v8411_v33 = vld [vmem:[%s12130_s2 + $0x128] ss:$28 sps:$4 sm:$0xff]  }
 0x1e5   :  { %v3168_v54 = vmax.f32 %v7554_v28, 0.0  ;;  %v7556_v47 = vadd.f32 %v2844_v7, %v10154_v5 }
 0x1e6   :  { %v10610_v8 = vmax.f32 %v1623_v36, %v3167_v60  ;;  %v3174_v18 = vmax.f32 %v7555_v44, 0.0  ;;  %v8416_v60 = vld [vmem:[%s12130_s2 + $0x160] ss:$28 sps:$4 sm:$0xff]   ;;  %v8420_v44 = vld [vmem:[%s12130_s2 + $0x168] ss:$28 sps:$4 sm:$0xff]  }
 0x1e7   :  { %v10614_v13 = vmax.f32 %v1624_v39, %v3168_v54  ;;  %v3175_v16 = vmax.f32 %v7556_v47, 0.0  ;;  %4544 = vmatpush1.bf16.msra.mxu0 %v8406_v51  ;;  %7482 = vmatpush3.bf16.msra.mxu1 %v8410_v59 }
 0x1e8   :  { %v10622_v28 = vmax.f32 %v1630_v9, %v3174_v18  ;;  %4545 = vmatprep.subr.bf16.mxu0 %v8413_v2  ;;  %7483 = vmatprep.subr.bf16.mxu1 %v8414_v49  ;;  %v8423_v2 = vld [vmem:[%s12130_s2 + $0x19c] ss:$28 sps:$4 sm:$0xff]  }
 0x1e9   :  { %v10632_v36 = vmax.f32 %v1631_v62, %v3175_v16  ;;  %v2848_v39 = vpop.f32.mrb[28].mxu1  ;;  %v8424_v49 = vld [vmem:[%s12130_s2 + $0x360] ss:$28 sps:$4 sm:$0xff]  }
 0x1ea   :  { %v7557_v45 = vadd.f32 %v2848_v39, %v10167_v15  ;;  %v2850_v51 = vpop.f32.mrb[29].mxu1  ;;  %v8436_v39 = vld [vmem:[%s12130_s2 + $0x244] ss:$28 sps:$4 sm:$0xff]  }
 0x1eb   :  { %v7558_v9 = vadd.f32 %v2850_v51, %v10167_v15  ;;  %v2852_v59 = vpop.f32.mrb[30].mxu1  ;;  %4546 = vmatpush1.bf16.msra.mxu0 %v8411_v33  ;;  %7484 = vmatpush3.bf16.msra.mxu1 %v8415_v34  ;;  %v8437_v51 = vld [vmem:[%s12130_s2 + $0x408] ss:$28 sps:$4 sm:$0xff]  }
 0x1ec   :  { %v3181_v30 = vmax.f32 %v7557_v45, 0.0  ;;  %v7559_v62 = vadd.f32 %v2852_v59, %v10197_v35  ;;  %v2854_v7 = vpop.f32.mrb[31].mxu1  ;;  %4547 = vmatprep.subr.bf16.mxu0 %v8418_v19  ;;  %7485 = vmatprep.subr.bf16.mxu1 %v8419_v26  ;;  %v8421_v19 = vld [vmem:[%s12130_s2 + $0x198] ss:$28 sps:$4 sm:$0xff]   ;;  %v8425_v26 = vld [vmem:[%s12130_s2 + $0x1a0] ss:$28 sps:$4 sm:$0xff]  }
 0x1ed   :  { %v3182_v54 = vmax.f32 %v7558_v9, 0.0  ;;  %v7560_v47 = vadd.f32 %v2854_v7, %v10197_v35  ;;  %v8434_v45 = vld [vmem:[%s12130_s2 + $0x240] ss:$28 sps:$4 sm:$0xff]   ;;  %v8438_v59 = vld [vmem:[%s12130_s2 + $0x278] ss:$28 sps:$4 sm:$0xff]  }
 0x1ee   :  { %v10652_v18 = vmax.f32 %v1637_v61, %v3181_v30  ;;  %v3188_v16 = vmax.f32 %v7559_v62, 0.0  ;;  %v8440_v9 = vld [vmem:[%s12130_s2 + $0x27c] ss:$28 sps:$4 sm:$0xff]   ;;  %v8444_v30 = vld [vmem:[%s12130_s2 + $0x2b4] ss:$28 sps:$4 sm:$0xff]   ;;  %v7538_v62 = vadd.f32 %v9912_v31, %v10124_v0 }
 0x1ef   :  { %v10656_v33 = vmax.f32 %v1638_v41, %v3182_v54  ;;  %v3189_v34 = vmax.f32 %v7560_v47, 0.0  ;;  %4548 = vmatpush1.bf16.msra.mxu0 %v8416_v60  ;;  %7486 = vmatpush3.bf16.msra.mxu1 %v8420_v44  ;;  %v8426_v41 = vld [vmem:[%s12130_s2 + $0x1d0] ss:$28 sps:$4 sm:$0xff]   ;;  %v8441_v60 = vld [vmem:[%s12130_s2 + $0x440] ss:$28 sps:$4 sm:$0xff]   ;;  %v7537_v44 = vadd.f32 %v9907_v29, %v10124_v0  ;;  %v7540_v54 = vadd.f32 %v9926_v4, %v10154_v5 }
 0x1f0   :  { %v10666_v38 = vmax.f32 %v1644_v21, %v3188_v16  ;;  %4549 = vmatprep.subr.bf16.mxu0 %v8423_v2  ;;  %7487 = vmatprep.subr.bf16.mxu1 %v8424_v49  ;;  %v8432_v21 = vld [vmem:[%s12130_s2 + $0x20c] ss:$28 sps:$4 sm:$0xff]   ;;  %v7539_v2 = vadd.f32 %v9916_v32, %v10154_v5 }
 0x1f1   :  { %v10673_v61 = vmax.f32 %v1645_v1, %v3189_v34  ;;  %v8433_v1 = vld [vmem:[%s12130_s2 + $0x3d0] ss:$28 sps:$4 sm:$0xff]   ;;  %v8445_v34 = vld [vmem:[%s12130_s2 + $0x478] ss:$28 sps:$4 sm:$0xff]   ;;  %v1625_v32 = vmax.f32 %v7537_v44, 0.0  ;;  %v7541_v44 = vadd.f32 %v9948_v43, %v10167_v15 }
 0x1f2   :  { %v8442_v31 = vld [vmem:[%s12130_s2 + $0x2b0] ss:$28 sps:$4 sm:$0xff]  }
 0x1f3   :  { %4550 = vmatpush1.bf16.msra.mxu0 %v8421_v19  ;;  %7488 = vmatpush3.bf16.msra.mxu1 %v8425_v26  ;;  %v8448_v4 = vld [vmem:[%s12130_s2 + $0x2ec] ss:$28 sps:$4 sm:$0xff]  }
 0x1f4   :  { %4551 = vmatprep.subr.bf16.mxu0 %v8428_v63  ;;  %4690 = vmatprep.subr.bf16.mxu1 %v8768_v12 }
 0x1f6   :  { %4674 = vmatmul.mubr.bf16.vlgmr.msra.gmra.mrb[48].mxu1 %v10356_v3 }
 0x1f7   :  { %4552 = vmatpush1.bf16.msra.mxu0 %v8426_v41  ;;  %4691 = vmatpush1.bf16.msra.mxu1 %v8429_v37  ;;  %v1626_v41 = vmax.f32 %v7538_v62, 0.0  ;;  %v8452_v62 = vld [vmem:[%s12130_s2 + $0x324] ss:$28 sps:$4 sm:$0xff]  }
 0x1f8   :  { %4553 = vmatprep.subr.bf16.mxu0 %v8432_v21  ;;  %4692 = vmatprep.subr.bf16.mxu1 %v8768_v12 }
 0x1f9   :  { %4681 = vmatprep.mubr.bf16.mxu1 %v10381_v14 }
 0x1fb   :  { %4554 = vmatpush1.bf16.msra.mxu0 %v8430_v17  ;;  %4693 = vmatpush1.bf16.msra.mxu1 %v8433_v1  ;;  %v1632_v17 = vmax.f32 %v7539_v2, 0.0 }
 0x1fc   :  { %4555 = vmatprep.subr.bf16.mxu0 %v8436_v39  ;;  %4694 = vmatprep.subr.bf16.mxu1 %v8768_v12 }
 0x1fe   :  { %4682 = vmatmul.mubr.bf16.gmra.mrb[52].mxu1 %v10394_v22 }
 0x1ff   :  { %4556 = vmatpush1.bf16.msra.mxu0 %v8434_v45  ;;  %4695 = vmatpush1.bf16.msra.mxu1 %v8437_v51  ;;  %v1633_v45 = vmax.f32 %v7540_v54, 0.0 }
 0x200   :  { %4557 = vmatprep.subr.bf16.mxu0 %v8440_v9  ;;  %4696 = vmatprep.subr.bf16.mxu1 %v8768_v12 }
 0x201   :  { %v2944_v7 = vpop.f32.mrb[16].mxu0  ;;  %7232 = vmatprep.mubr.msk.bf16.mxu1 %vm1200_vm0, %v10419_v40 }
 0x202   :  { %v7561_v49 = vadd.f32 %v2944_v7, %v10124_v0  ;;  %v2946_v29 = vpop.f32.mrb[17].mxu0  ;;  %v7542_v7 = vadd.f32 %v9952_v46, %v10167_v15  ;;  %v8450_v46 = vld [vmem:[%s12130_s2 + $0x320] ss:$28 sps:$4 sm:$0xff]  }
 0x203   :  { %v7562_v47 = vadd.f32 %v2946_v29, %v10124_v0  ;;  %v2948_v16 = vpop.f32.mrb[18].mxu0  ;;  %4558 = vmatpush1.bf16.msra.mxu0 %v8438_v59  ;;  %4697 = vmatpush1.bf16.msra.mxu1 %v8441_v60  ;;  %v8446_v59 = vld [vmem:[%s12130_s2 + $0x2e8] ss:$28 sps:$4 sm:$0xff]   ;;  %v8449_v60 = vld [vmem:[%s12130_s2 + $0x4b0] ss:$28 sps:$4 sm:$0xff]   ;;  %v7543_v29 = vadd.f32 %v9956_v50, %v10197_v35  ;;  %v1639_v50 = vmax.f32 %v7541_v44, 0.0 }
 0x204   :  { %v3169_v19 = vmax.f32 %v7561_v49, 0.0  ;;  %v7563_v26 = vadd.f32 %v2948_v16, %v10154_v5  ;;  %v2950_v63 = vpop.f32.mrb[19].mxu0  ;;  %4559 = vmatprep.subr.bf16.mxu0 %v8444_v30  ;;  %4698 = vmatprep.subr.bf16.mxu1 %v8768_v12 }
 0x205   :  { %v3170_v37 = vmax.f32 %v7562_v47, 0.0  ;;  %v7564_v21 = vadd.f32 %v2950_v63, %v10154_v5  ;;  %v7544_v47 = vadd.f32 %v9966_v55, %v10197_v35  ;;  %v8456_v55 = vld [vmem:[%s12130_s2 + $0x35c] ss:$28 sps:$4 sm:$0xff]   ;;  %v1640_v63 = vmax.f32 %v7542_v7, 0.0 }
 0x206   :  { %v10742_v1 = vmax.f32 %v1625_v32, %v3169_v19  ;;  %v3176_v39 = vmax.f32 %v7563_v26, 0.0 }
 0x207   :  { %v10744_v51 = vmax.f32 %v1626_v41, %v3170_v37  ;;  %v3177_v9 = vmax.f32 %v7564_v21, 0.0  ;;  %4560 = vmatpush1.bf16.msra.mxu0 %v8442_v31  ;;  %4699 = vmatpush1.bf16.msra.mxu1 %v8445_v34  ;;  %v8453_v34 = vld [vmem:[%s12130_s2 + $0x4e8] ss:$28 sps:$4 sm:$0xff]   ;;  %v1646_v37 = vmax.f32 %v7543_v29, 0.0  ;;  %v8461_v29 = vld [vmem:[%s12130_s2 + $0x558] ss:$28 sps:$4 sm:$0xff]  }
 0x208   :  { %v10754_v30 = vmax.f32 %v1632_v17, %v3176_v39  ;;  %4561 = vmatprep.subr.bf16.mxu0 %v8448_v4  ;;  %4700 = vmatprep.subr.bf16.mxu1 %v8768_v12  ;;  %v1647_v39 = vmax.f32 %v7544_v47, 0.0  ;;  %v8462_v47 = vld [vmem:[%s12130_s2 + $0x3c8] ss:$28 sps:$4 sm:$0xff]  }
 0x209   :  { %v10762_v2 = vmax.f32 %v1633_v45, %v3177_v9  ;;  %v2954_v49 = vpop.f32.mrb[20].mxu0 }
 0x20a   :  { %v7565_v43 = vadd.f32 %v2954_v49, %v10167_v15  ;;  %v2956_v54 = vpop.f32.mrb[21].mxu0  ;;  %v8458_v49 = vld [vmem:[%s12130_s2 + $0x390] ss:$28 sps:$4 sm:$0xff]  }
 0x20b   :  { %v7566_v16 = vadd.f32 %v2956_v54, %v10167_v15  ;;  %v2958_v31 = vpop.f32.mrb[22].mxu0  ;;  %4562 = vmatpush1.bf16.msra.mxu0 %v8446_v59  ;;  %4701 = vmatpush1.bf16.msra.mxu1 %v8449_v60  ;;  %v8454_v59 = vld [vmem:[%s12130_s2 + $0x358] ss:$28 sps:$4 sm:$0xff]   ;;  %v8457_v60 = vld [vmem:[%s12130_s2 + $0x520] ss:$28 sps:$4 sm:$0xff]  }
 0x20c   :  { %v3183_v32 = vmax.f32 %v7565_v43, 0.0  ;;  %v7567_v19 = vadd.f32 %v2958_v31, %v10197_v35  ;;  %v2960_v26 = vpop.f32.mrb[23].mxu0  ;;  %4563 = vmatprep.subr.bf16.mxu0 %v8452_v62  ;;  %4702 = vmatprep.subr.bf16.mxu1 %v8768_v12  ;;  %v8460_v62 = vld [vmem:[%s12130_s2 + $0x394] ss:$28 sps:$4 sm:$0xff]   ;;  %v8464_v43 = vld [vmem:[%s12130_s2 + $0x3cc] ss:$28 sps:$4 sm:$0xff]  }
 0x20d   :  { %v3184_v4 = vmax.f32 %v7566_v16, 0.0  ;;  %v7568_v41 = vadd.f32 %v2960_v26, %v10197_v35  ;;  %v8467_v54 = vld [vmem:[%s12131_s3 + $0x4] ss:$28 sps:$4 sm:$0xff]   ;;  %v8482_v26 = vld [vmem:[%s12130_s2 + $0x474] ss:$28 sps:$4 sm:$0xff]  }
 0x20e   :  { %v10782_v21 = vmax.f32 %v1639_v50, %v3183_v32  ;;  %v3190_v17 = vmax.f32 %v7567_v19, 0.0  ;;  %v8465_v16 = vld [vmem:[%s12131_s3] ss:$28 sps:$4 sm:$0xff]   ;;  %v8474_v32 = vld [vmem:[%s12130_s2 + $0x438] ss:$28 sps:$4 sm:$0xff]  }
 0x20f   :  { %v10784_v45 = vmax.f32 %v1640_v63, %v3184_v4  ;;  %v3191_v9 = vmax.f32 %v7568_v41, 0.0  ;;  %4564 = vmatpush1.bf16.msra.mxu0 %v8450_v46  ;;  %4703 = vmatpush1.bf16.msra.mxu1 %v8453_v34  ;;  %v8470_v31 = vld [vmem:[%s12130_s2 + $0x404] ss:$28 sps:$4 sm:$0xff]   ;;  %v8471_v34 = vld [vmem:[%s12131_s3 + $0x38] ss:$28 sps:$4 sm:$0xff]  }
 0x210   :  { %v10792_v44 = vmax.f32 %v1646_v37, %v3190_v17  ;;  %4565 = vmatprep.subr.bf16.mxu0 %v8456_v55  ;;  %4704 = vmatprep.subr.bf16.mxu1 %v8768_v12  ;;  %v8468_v46 = vld [vmem:[%s12130_s2 + $0x400] ss:$28 sps:$4 sm:$0xff]   ;;  %v8477_v19 = vld [vmem:[%s12131_s3 + $0x70] ss:$28 sps:$4 sm:$0xff]   ;;  %v8483_v17 = vld [vmem:[%s12131_s3 + $0xa8] ss:$28 sps:$4 sm:$0xff]  }
 0x211   :  { %v10798_v7 = vmax.f32 %v1647_v39, %v3191_v9  ;;  %v8476_v50 = vld [vmem:[%s12130_s2 + $0x43c] ss:$28 sps:$4 sm:$0xff]   ;;  %v8480_v37 = vld [vmem:[%s12130_s2 + $0x470] ss:$28 sps:$4 sm:$0xff]   ;;  %v8491_v9 = vld [vmem:[%s12131_s3 + $0xe4] ss:$28 sps:$4 sm:$0xff]  }
 0x213   :  { %4566 = vmatpush1.bf16.msra.mxu0 %v8454_v59  ;;  %4705 = vmatpush1.bf16.msra.mxu1 %v8457_v60  ;;  %v10877_v60 = vld [vmem:[%s12127_s4 + $0x4] ss:$16 sps:$4 sm:$0xff]  }
 0x214   :  { %4588 = vmatprep.subr.bf16.mxu0 %v8460_v62  ;;  %4706 = vmatprep.subr.bf16.mxu1 %v8768_v12  ;;  %v8486_v62 = vld [vmem:[%s12130_s2 + $0x4a8] ss:$28 sps:$4 sm:$0xff]  }
 0x216   :  { %4568 = vmatmul.mubr.bf16.vlgmr.msra.gmra.mrb[48].mxu0 %v10356_v3  ;;  %v8473_v3 = vld [vmem:[%s12131_s3 + $0x3c] ss:$28 sps:$4 sm:$0xff]  }
 0x217   :  { %4589 = vmatpush1.bf16.msra.mxu0 %v8458_v49  ;;  %4707 = vmatpush1.bf16.msra.mxu1 %v8461_v29  ;;  %v8489_v49 = vld [vmem:[%s12131_s3 + $0xe0] ss:$28 sps:$4 sm:$0xff]  }
 0x218   :  { %4590 = vmatprep.subr.bf16.mxu0 %v8464_v43  ;;  %5895 = vmatprep.subr.bf16.mxu1 %v8467_v54  ;;  %v8494_v29 = vld [vmem:[%s12130_s2 + $0x4e4] ss:$28 sps:$4 sm:$0xff]   ;;  %v8497_v43 = vld [vmem:[%s12131_s3 + $0x11c] ss:$28 sps:$4 sm:$0xff]  }
 0x219   :  { %4577 = vmatprep.mubr.bf16.mxu0 %v10381_v14  ;;  %v8479_v14 = vld [vmem:[%s12131_s3 + $0x74] ss:$28 sps:$4 sm:$0xff]  }
 0x21a   :  { %4723 = vmatmul.mubr.bf16.vlgmr.msra.gmra.mrb[56].mxu1 %v10512_v58 }
 0x21b   :  { %4591 = vmatpush1.bf16.msra.mxu0 %v8462_v47  ;;  %5896 = vmatpush1.bf16.msra.mxu1 %v8465_v16  ;;  %v8492_v16 = vld [vmem:[%s12130_s2 + $0x4e0] ss:$28 sps:$4 sm:$0xff]  }
 0x21c   :  { %4592 = vmatprep.subr.bf16.mxu0 %v8470_v31  ;;  %5897 = vmatprep.subr.bf16.mxu1 %v8473_v3  ;;  %v8495_v31 = vld [vmem:[%s12131_s3 + $0x118] ss:$28 sps:$4 sm:$0xff]  }
 0x21d   :  { %7233 = vmatprep.mubr.msk.bf16.mxu1 %vm1200_vm0, %v10541_v42 }
 0x21e   :  { %4578 = vmatmul.mubr.bf16.gmra.mrb[52].mxu0 %v10394_v22  ;;  %v8485_v22 = vld [vmem:[%s12131_s3 + $0xac] ss:$28 sps:$4 sm:$0xff]  }
 0x21f   :  { %4593 = vmatpush1.bf16.msra.mxu0 %v8468_v46  ;;  %5898 = vmatpush1.bf16.msra.mxu1 %v8471_v34  ;;  %v8500_v34 = vld [vmem:[%s12130_s2 + $0x51c] ss:$28 sps:$4 sm:$0xff]  }
 0x220   :  { %4594 = vmatprep.subr.bf16.mxu0 %v8476_v50  ;;  %5899 = vmatprep.subr.bf16.mxu1 %v8479_v14  ;;  %v8503_v50 = vld [vmem:[%s12131_s3 + $0x154] ss:$28 sps:$4 sm:$0xff]  }
 0x221   :  { %v7461_v55 = vpop.f32.mrb[24].mxu0  ;;  %7230 = vmatprep.mubr.msk.bf16.mxu0 %vm1200_vm0, %v10419_v40  ;;  %v8488_v40 = vld [vmem:[%s12130_s2 + $0x4ac] ss:$28 sps:$4 sm:$0xff]  }
 0x222   :  { %4731 = vmatmul.mubr.bf16.gmra.mrb[60].mxu1 %v10573_v48  ;;  %v7462_v63 = vpop.f32.mrb[25].mxu0 }
 0x223   :  { %v10858_v4 = vadd.f32 %v7462_v63, %v7461_v55  ;;  %4595 = vmatpush1.bf16.msra.mxu0 %v8474_v32  ;;  %5900 = vmatpush1.bf16.msra.mxu1 %v8477_v19  ;;  %v7464_v41 = vpop.f32.mrb[26].mxu0  ;;  %v8498_v19 = vld [vmem:[%s12130_s2 + $0x518] ss:$28 sps:$4 sm:$0xff]   ;;  %v8509_v55 = vld [vmem:[%s12131_s3 + $0x18c] ss:$28 sps:$4 sm:$0xff]  }
 0x224   :  { %v7465_v39 = vpop.f32.mrb[27].mxu0  ;;  %4596 = vmatprep.subr.bf16.mxu0 %v8482_v26  ;;  %5901 = vmatprep.subr.bf16.mxu1 %v8485_v22  ;;  %v8501_v26 = vld [vmem:[%s12131_s3 + $0x150] ss:$28 sps:$4 sm:$0xff]  }
 0x225   :  { %v10872_v59 = vadd.f32 %v7465_v39, %v7464_v41  ;;  %5927 = vmatprep.mubr.bf16.mxu1 %v10877_v60  ;;  %v8506_v22 = vld [vmem:[%s12130_s2 + $0x554] ss:$28 sps:$4 sm:$0xff]   ;;  %v8507_v41 = vld [vmem:[%s12131_s3 + $0x188] ss:$28 sps:$4 sm:$0xff]   ;;  %v8510_v39 = vld [vmem:[%s12131_s3 + $0x1c0] ss:$28 sps:$4 sm:$0xff]  }
 0x226   :  { %v8504_v63 = vld [vmem:[%s12130_s2 + $0x550] ss:$28 sps:$4 sm:$0xff]  }
 0x227   :  { %4597 = vmatpush1.bf16.msra.mxu0 %v8480_v37  ;;  %5902 = vmatpush1.bf16.msra.mxu1 %v8483_v17  ;;  %v8512_v37 = vld [vmem:[%s12131_s3 + $0x1c4] ss:$28 sps:$4 sm:$0xff]   ;;  %v8515_v17 = vld [vmem:[%s12131_s3 + $0xc] ss:$28 sps:$4 sm:$0xff]  }
 0x228   :  { %4598 = vmatprep.subr.bf16.mxu0 %v8488_v40  ;;  %5903 = vmatprep.subr.bf16.mxu1 %v8491_v9  ;;  %v8513_v40 = vld [vmem:[%s12131_s3 + $0x8] ss:$28 sps:$4 sm:$0xff]   ;;  %v8518_v9 = vld [vmem:[%s12131_s3 + $0x1fc] ss:$28 sps:$4 sm:$0xff]  }
 0x229   :  { %v7467_v54 = vpop.f32.mrb[28].mxu0 }
 0x22a   :  { %v7468_v47 = vpop.f32.mrb[29].mxu0 }
 0x22b   :  { %4599 = vmatpush1.bf16.msra.mxu0 %v8486_v62  ;;  %5904 = vmatpush1.bf16.msra.mxu1 %v8489_v49  ;;  %v10898_v3 = vadd.f32 %v7468_v47, %v7467_v54  ;;  %v7470_v46 = vpop.f32.mrb[30].mxu0  ;;  %v8521_v62 = vld [vmem:[%s12131_s3 + $0x44] ss:$28 sps:$4 sm:$0xff]   ;;  %v8516_v49 = vld [vmem:[%s12131_s3 + $0x1f8] ss:$28 sps:$4 sm:$0xff]  }
 0x22c   :  { %4600 = vmatprep.subr.bf16.mxu0 %v8494_v29  ;;  %5905 = vmatprep.subr.bf16.mxu1 %v8497_v43  ;;  %v7471_v14 = vpop.f32.mrb[31].mxu0  ;;  %v8519_v29 = vld [vmem:[%s12131_s3 + $0x40] ss:$28 sps:$4 sm:$0xff]   ;;  %v8524_v43 = vld [vmem:[%s12131_s3 + $0x234] ss:$28 sps:$4 sm:$0xff]  }
 0x22d   :  { %v10906_v32 = vadd.f32 %v7471_v14, %v7470_v46  ;;  %v8522_v54 = vld [vmem:[%s12131_s3 + $0x230] ss:$28 sps:$4 sm:$0xff]   ;;  %v8525_v47 = vld [vmem:[%s12131_s3 + $0x78] ss:$28 sps:$4 sm:$0xff]   ;;  %v7546_v46 = vadd.f32 %v10285_v23, %v10124_v0  ;;  %v3104_v14 = vadd.f32 %v10858_v4, %v10124_v0 }
 0x22e   :  { %v8539_v23 = vld [vmem:[%s12131_s3 + $0xec] ss:$28 sps:$4 sm:$0xff]  }
 0x22f   :  { %4601 = vmatpush1.bf16.msra.mxu0 %v8492_v16  ;;  %5906 = vmatpush1.bf16.msra.mxu1 %v8495_v31  ;;  %v8530_v16 = vld [vmem:[%s12131_s3 + $0x26c] ss:$28 sps:$4 sm:$0xff]   ;;  %v7545_v31 = vadd.f32 %v10277_v11, %v10124_v0  ;;  %v8536_v11 = vld [vmem:[%s12131_s3 + $0x2a4] ss:$28 sps:$4 sm:$0xff]  }
 0x230   :  { %4602 = vmatprep.subr.bf16.mxu0 %v8500_v34  ;;  %5907 = vmatprep.subr.bf16.mxu1 %v8503_v50  ;;  %v8528_v34 = vld [vmem:[%s12131_s3 + $0x268] ss:$28 sps:$4 sm:$0xff]   ;;  %v8531_v50 = vld [vmem:[%s12131_s3 + $0xb0] ss:$28 sps:$4 sm:$0xff]  }
 0x233   :  { %4603 = vmatpush1.bf16.msra.mxu0 %v8498_v19  ;;  %5908 = vmatpush1.bf16.msra.mxu1 %v8501_v26  ;;  %v1636_v19 = vmax.f32 %v10175_v20, 0.0  ;;  %v1627_v26 = vmax.f32 %v7545_v31, 0.0  ;;  %v7548_v20 = vadd.f32 %v10289_v25, %v10154_v5  ;;  %v7549_v31 = vadd.f32 %v10309_v27, %v10167_v15  ;;  %v8543_v27 = vld [vmem:[%s12131_s3 + $0x120] ss:$28 sps:$4 sm:$0xff]  }
 0x234   :  { %4604 = vmatprep.subr.bf16.mxu0 %v8506_v22  ;;  %5909 = vmatprep.subr.bf16.mxu1 %v8509_v55  ;;  %v7547_v22 = vadd.f32 %v10287_v24, %v10154_v5 }
 0x237   :  { %4605 = vmatpush1.bf16.msra.mxu0 %v8504_v63  ;;  %5910 = vmatpush1.bf16.msra.mxu1 %v8507_v41  ;;  %v1628_v63 = vmax.f32 %v7546_v46, 0.0 }
 0x238   :  { %5911 = vmatprep.subr.bf16.mxu1 %v8512_v37  ;;  %6001 = vmatprep.subr.bf16.mxu0 %v8515_v17 }
 0x23a   :  { %4621 = vmatmul.mubr.bf16.vlgmr.msra.gmra.mrb[48].mxu0 %v10512_v58  ;;  %v8527_v58 = vld [vmem:[%s12131_s3 + $0x7c] ss:$28 sps:$4 sm:$0xff]  }
 0x23b   :  { %5912 = vmatpush1.bf16.msra.mxu1 %v8510_v39  ;;  %6002 = vmatpush1.bf16.msra.mxu0 %v8513_v40  ;;  %v3107_v40 = vadd.f32 %v10872_v59, %v10154_v5  ;;  %v8542_v59 = vld [vmem:[%s12131_s3 + $0x2dc] ss:$28 sps:$4 sm:$0xff]  }
 0x23c   :  { %5913 = vmatprep.subr.bf16.mxu1 %v8518_v9  ;;  %6003 = vmatprep.subr.bf16.mxu0 %v8521_v62 }
 0x23d   :  { %7231 = vmatprep.mubr.msk.bf16.mxu0 %vm1200_vm0, %v10541_v42  ;;  %v8533_v42 = vld [vmem:[%s12131_s3 + $0xb4] ss:$28 sps:$4 sm:$0xff]  }
 0x23f   :  { %5914 = vmatpush1.bf16.msra.mxu1 %v8516_v49  ;;  %6004 = vmatpush1.bf16.msra.mxu0 %v8519_v29  ;;  %v8537_v49 = vld [vmem:[%s12131_s3 + $0xe8] ss:$28 sps:$4 sm:$0xff]  }
 0x240   :  { %5915 = vmatprep.subr.bf16.mxu1 %v8524_v43  ;;  %6005 = vmatprep.subr.bf16.mxu0 %v8527_v58 }
 0x242   :  { %4631 = vmatmul.mubr.bf16.gmra.mrb[52].mxu0 %v10573_v48  ;;  %v1629_v48 = vmax.f32 %v10163_v10, 0.0  ;;  %v8534_v10 = vld [vmem:[%s12131_s3 + $0x2a0] ss:$28 sps:$4 sm:$0xff]  }
 0x243   :  { %5916 = vmatpush1.bf16.msra.mxu1 %v8522_v54  ;;  %6006 = vmatpush1.bf16.msra.mxu0 %v8525_v47 }
 0x244   :  { %5917 = vmatprep.subr.bf16.mxu1 %v8530_v16  ;;  %6007 = vmatprep.subr.bf16.mxu0 %v8533_v42  ;;  %v8545_v16 = vld [vmem:[%s12131_s3 + $0x124] ss:$28 sps:$4 sm:$0xff]   ;;  %v1634_v42 = vmax.f32 %v7547_v22, 0.0  ;;  %v8540_v22 = vld [vmem:[%s12131_s3 + $0x2d8] ss:$28 sps:$4 sm:$0xff]  }
 0x245   :  { %v3050_v55 = vpop.f32.mrb[32].mxu1  ;;  %v3152_v4 = vpop.f32.mrb[32].mxu0  ;;  %6033 = vmatprep.mubr.bf16.mxu0 %v10877_v60 }
 0x246   :  { %v7569_v41 = vadd.f32 %v3050_v55, %v10124_v0  ;;  %v3153_v37 = vadd.f32 %v3152_v4, %v3104_v14  ;;  %v3052_v17 = vpop.f32.mrb[33].mxu1  ;;  %v3154_v39 = vpop.f32.mrb[33].mxu0 }
 0x247   :  { %v7570_v24 = vadd.f32 %v3052_v17, %v10124_v0  ;;  %v3054_v9 = vpop.f32.mrb[34].mxu1  ;;  %v3155_v62 = vpop.f32.mrb[34].mxu0  ;;  %5918 = vmatpush1.bf16.msra.mxu1 %v8528_v34  ;;  %6008 = vmatpush1.bf16.msra.mxu0 %v8531_v50  ;;  %v8548_v17 = vld [vmem:[%s12131_s3 + $0x314] ss:$28 sps:$4 sm:$0xff]   ;;  %v8551_v39 = vld [vmem:[%s12131_s3 + $0x15c] ss:$28 sps:$4 sm:$0xff]  }
 0x248   :  { %v3171_v29 = vmax.f32 %v7569_v41, 0.0  ;;  %v3173_v43 = vmax.f32 %v3153_v37, 0.0  ;;  %v7571_v58 = vadd.f32 %v3054_v9, %v10154_v5  ;;  %v3156_v54 = vadd.f32 %v3155_v62, %v3107_v40  ;;  %v3056_v25 = vpop.f32.mrb[35].mxu1  ;;  %v3157_v47 = vpop.f32.mrb[35].mxu0  ;;  %5919 = vmatprep.subr.bf16.mxu1 %v8536_v11  ;;  %6009 = vmatprep.subr.bf16.mxu0 %v8539_v23 }
 0x249   :  { %v3172_v46 = vmax.f32 %v7570_v24, 0.0  ;;  %v7572_v34 = vadd.f32 %v3056_v25, %v10154_v5  ;;  %v1635_v41 = vmax.f32 %v7548_v20, 0.0  ;;  %v1650_v40 = vmax.f32 %v10209_v57, 0.0  ;;  %v8546_v57 = vld [vmem:[%s12131_s3 + $0x310] ss:$28 sps:$4 sm:$0xff]  }
 0x24a   :  { %v11017_v50 = vmax.f32 %v1627_v26, %v3171_v29  ;;  %v11019_v14 = vmax.f32 %v1629_v48, %v3173_v43  ;;  %v3178_v55 = vmax.f32 %v7571_v58, 0.0  ;;  %v3180_v4 = vmax.f32 %v3156_v54, 0.0  ;;  %v8549_v54 = vld [vmem:[%s12131_s3 + $0x158] ss:$28 sps:$4 sm:$0xff]  }
 0x24b   :  { %v11021_v11 = vmax.f32 %v1628_v63, %v3172_v46  ;;  %v3179_v23 = vmax.f32 %v7572_v34, 0.0  ;;  %5920 = vmatpush1.bf16.msra.mxu1 %v8534_v10  ;;  %6010 = vmatpush1.bf16.msra.mxu0 %v8537_v49  ;;  %v1643_v26 = vmax.f32 %v10199_v56, 0.0  ;;  %v3112_v63 = vadd.f32 %v10898_v3, %v10167_v15 }
 0x24c   :  { %v11030_v48 = vmax.f32 %v1634_v42, %v3178_v55  ;;  %v11032_v37 = vmax.f32 %v1636_v19, %v3180_v4  ;;  %5921 = vmatprep.subr.bf16.mxu1 %v8542_v59  ;;  %6011 = vmatprep.subr.bf16.mxu0 %v8545_v16  ;;  %v7550_v56 = vadd.f32 %v10311_v52, %v10167_v15  ;;  %v1641_v24 = vmax.f32 %v7549_v31, 0.0  ;;  %v8557_v31 = vld [vmem:[%s12131_s3 + $0x194] ss:$28 sps:$4 sm:$0xff]  }
 0x24d   :  { %v7551_v19 = vadd.f32 %v10313_v53, %v10197_v35  ;;  %v11047_v10 = vmax.f32 %v1635_v41, %v3179_v23  ;;  %v3060_v3 = vpop.f32.mrb[36].mxu1  ;;  %v3160_v20 = vpop.f32.mrb[36].mxu0  ;;  %v3115_v29 = vadd.f32 %v10906_v32, %v10197_v35  ;;  %v7552_v52 = vadd.f32 %v10321_v6, %v10197_v35  ;;  %v8554_v32 = vld [vmem:[%s12131_s3 + $0x34c] ss:$28 sps:$4 sm:$0xff]  }
 0x24e   :  { %v7573_v9 = vadd.f32 %v3060_v3, %v10167_v15  ;;  %v3161_v62 = vadd.f32 %v3160_v20, %v3112_v63  ;;  %v3062_v49 = vpop.f32.mrb[37].mxu1  ;;  %v3162_v59 = vpop.f32.mrb[37].mxu0  ;;  %v1642_v34 = vmax.f32 %v7550_v56, 0.0  ;;  %v8555_v56 = vld [vmem:[%s12131_s3 + $0x190] ss:$28 sps:$4 sm:$0xff]  }
 0x24f   :  { %v7574_v53 = vadd.f32 %v3062_v49, %v10167_v15  ;;  %v3064_v43 = vpop.f32.mrb[38].mxu1  ;;  %v3163_v58 = vpop.f32.mrb[38].mxu0  ;;  %5922 = vmatpush1.bf16.msra.mxu1 %v8540_v22  ;;  %6012 = vmatpush1.bf16.msra.mxu0 %v8543_v27  ;;  %v1648_v55 = vmax.f32 %v7551_v19, 0.0  ;;  %v1649_v3 = vmax.f32 %v7552_v52, 0.0  ;;  %v8558_v49 = vld [vmem:[%s12131_s3 + $0x380] ss:$28 sps:$4 sm:$0xff]  }
 0x250   :  { %v3185_v25 = vmax.f32 %v7573_v9, 0.0  ;;  %v3187_v47 = vmax.f32 %v3161_v62, 0.0  ;;  %v7575_v16 = vadd.f32 %v3064_v43, %v10197_v35  ;;  %v3164_v42 = vadd.f32 %v3163_v58, %v3115_v29  ;;  %v3066_v6 = vpop.f32.mrb[39].mxu1  ;;  %5923 = vmatprep.subr.bf16.mxu1 %v8548_v17  ;;  %6013 = vmatprep.subr.bf16.mxu0 %v8551_v39  ;;  %v3165_v46 = vpop.f32.mrb[39].mxu0  ;;  %v8552_v39 = vld [vmem:[%s12131_s3 + $0x348] ss:$28 sps:$4 sm:$0xff]  }
 0x251   :  { %v3186_v4 = vmax.f32 %v7574_v53, 0.0  ;;  %v7576_v41 = vadd.f32 %v3066_v6, %v10197_v35  ;;  %v8563_v9 = vld [vmem:[%s12131_s3 + $0x1cc] ss:$28 sps:$4 sm:$0xff]   ;;  %v8566_v59 = vld [vmem:[%s12131_s3 + $0x3bc] ss:$28 sps:$4 sm:$0xff]  }
 0x252   :  { %v11069_v23 = vmax.f32 %v1641_v24, %v3185_v25  ;;  %v11071_v22 = vmax.f32 %v1643_v26, %v3187_v47  ;;  %v3192_v27 = vmax.f32 %v7575_v16, 0.0  ;;  %v3194_v63 = vmax.f32 %v3164_v42, 0.0  ;;  %v8560_v24 = vld [vmem:[%s12131_s3 + $0x384] ss:$28 sps:$4 sm:$0xff]   ;;  %v8564_v52 = vld [vmem:[%s12131_s3 + $0x3b8] ss:$28 sps:$4 sm:$0xff]  }
 0x253   :  { %v11073_v20 = vmax.f32 %v1642_v34, %v3186_v4  ;;  %v3193_v17 = vmax.f32 %v7576_v41, 0.0  ;;  %5924 = vmatpush1.bf16.msra.mxu1 %v8546_v57  ;;  %6014 = vmatpush1.bf16.msra.mxu0 %v8549_v54  ;;  %v8569_v29 = vld [vmem:[%s12131_s3 + $0x204] ss:$28 sps:$4 sm:$0xff]   ;;  %v8572_v43 = vld [vmem:[%s12131_s3 + $0x3f4] ss:$28 sps:$4 sm:$0xff]  }
 0x254   :  { %v11081_v19 = vmax.f32 %v1648_v55, %v3192_v27  ;;  %v11083_v26 = vmax.f32 %v1650_v40, %v3194_v63  ;;  %5925 = vmatprep.subr.bf16.mxu1 %v8554_v32  ;;  %6015 = vmatprep.subr.bf16.mxu0 %v8557_v31  ;;  %v8561_v40 = vld [vmem:[%s12131_s3 + $0x1c8] ss:$28 sps:$4 sm:$0xff]   ;;  %v11108_v57 = vld [vmem:[%s12127_s4] ss:$16 sps:$4 sm:$0xff]   ;;  %v8575_v58 = vld [vmem:[%s12131_s3 + $0x23c] ss:$28 sps:$4 sm:$0xff]  }
 0x255   :  { %v11091_v62 = vmax.f32 %v1649_v3, %v3193_v17  ;;  %v8567_v53 = vld [vmem:[%s12131_s3 + $0x200] ss:$28 sps:$4 sm:$0xff]   ;;  %v11126_v54 = vld [vmem:[%s12127_s4 + $0x24] ss:$16 sps:$4 sm:$0xff]   ;;  %v8570_v32 = vld [vmem:[%s12131_s3 + $0x3f0] ss:$28 sps:$4 sm:$0xff]  }
 0x256   :  { %v8573_v25 = vld [vmem:[%s12131_s3 + $0x238] ss:$28 sps:$4 sm:$0xff]   ;;  %v8578_v47 = vld [vmem:[%s12131_s3 + $0x42c] ss:$28 sps:$4 sm:$0xff]   ;;  %v11144_v42 = vld [vmem:[%s12127_s4 + $0x20] ss:$16 sps:$4 sm:$0xff]  }
 0x257   :  { %5926 = vmatpush1.bf16.msra.mxu1 %v8552_v39  ;;  %6016 = vmatpush1.bf16.msra.mxu0 %v8555_v56  ;;  %v8581_v16 = vld [vmem:[%s12131_s3 + $0x274] ss:$28 sps:$4 sm:$0xff]   ;;  %v8576_v6 = vld [vmem:[%s12131_s3 + $0x428] ss:$28 sps:$4 sm:$0xff]   ;;  %v11162_v55 = vld [vmem:[%s12127_s4 + $0xc] ss:$16 sps:$4 sm:$0xff]  }
 0x258   :  { %5948 = vmatprep.subr.bf16.mxu1 %v8560_v24  ;;  %6017 = vmatprep.subr.bf16.mxu0 %v8563_v9  ;;  %v8579_v31 = vld [vmem:[%s12131_s3 + $0x270] ss:$28 sps:$4 sm:$0xff]   ;;  %v8584_v46 = vld [vmem:[%s12131_s3 + $0x464] ss:$28 sps:$4 sm:$0xff]   ;;  %v8590_v27 = vld [vmem:[%s12131_s3 + $0x49c] ss:$28 sps:$4 sm:$0xff]  }
 0x259   :  { %v8587_v34 = vld [vmem:[%s12131_s3 + $0x2ac] ss:$28 sps:$4 sm:$0xff]   ;;  %v8582_v4 = vld [vmem:[%s12131_s3 + $0x460] ss:$28 sps:$4 sm:$0xff]   ;;  %v8588_v3 = vld [vmem:[%s12131_s3 + $0x498] ss:$28 sps:$4 sm:$0xff]  }
 0x25a   :  { %5928 = vmatmul.mubr.bf16.vlgmr.msra.gmra.mrb[64].mxu1 %v11108_v57  ;;  %v8585_v41 = vld [vmem:[%s12131_s3 + $0x2a8] ss:$28 sps:$4 sm:$0xff]   ;;  %v8591_v17 = vld [vmem:[%s12131_s3 + $0x2e0] ss:$28 sps:$4 sm:$0xff]   ;;  %v8596_v39 = vld [vmem:[%s12131_s3 + $0x4d4] ss:$28 sps:$4 sm:$0xff]  }
 0x25b   :  { %5949 = vmatpush1.bf16.msra.mxu1 %v8558_v49  ;;  %6018 = vmatpush1.bf16.msra.mxu0 %v8561_v40  ;;  %v8593_v63 = vld [vmem:[%s12131_s3 + $0x2e4] ss:$28 sps:$4 sm:$0xff]   ;;  %v8599_v56 = vld [vmem:[%s12131_s3 + $0x31c] ss:$28 sps:$4 sm:$0xff]   ;;  %v8594_v24 = vld [vmem:[%s12131_s3 + $0x4d0] ss:$28 sps:$4 sm:$0xff]  }
 0x25c   :  { %5950 = vmatprep.subr.bf16.mxu1 %v8566_v59  ;;  %6019 = vmatprep.subr.bf16.mxu0 %v8569_v29  ;;  %v8597_v9 = vld [vmem:[%s12131_s3 + $0x318] ss:$28 sps:$4 sm:$0xff]   ;;  %v8602_v49 = vld [vmem:[%s12131_s3 + $0x50c] ss:$28 sps:$4 sm:$0xff]  }
 0x25d   :  { %5937 = vmatprep.mubr.bf16.mxu1 %v11126_v54  ;;  %v8605_v40 = vld [vmem:[%s12131_s3 + $0x354] ss:$28 sps:$4 sm:$0xff]   ;;  %v8600_v59 = vld [vmem:[%s12131_s3 + $0x508] ss:$28 sps:$4 sm:$0xff]  }
 0x25e   :  { %v8603_v29 = vld [vmem:[%s12131_s3 + $0x350] ss:$28 sps:$4 sm:$0xff]  }
 0x25f   :  { %5951 = vmatpush1.bf16.msra.mxu1 %v8564_v52  ;;  %6020 = vmatpush1.bf16.msra.mxu0 %v8567_v53  ;;  %v8608_v52 = vld [vmem:[%s12131_s3 + $0x544] ss:$28 sps:$4 sm:$0xff]   ;;  %v8611_v53 = vld [vmem:[%s12131_s3 + $0x38c] ss:$28 sps:$4 sm:$0xff]  }
 0x260   :  { %5952 = vmatprep.subr.bf16.mxu1 %v8572_v43  ;;  %6021 = vmatprep.subr.bf16.mxu0 %v8575_v58  ;;  %v8606_v43 = vld [vmem:[%s12131_s3 + $0x540] ss:$28 sps:$4 sm:$0xff]   ;;  %v8609_v58 = vld [vmem:[%s12131_s3 + $0x388] ss:$28 sps:$4 sm:$0xff]  }
 0x262   :  { %5938 = vmatmul.mubr.bf16.gmra.mrb[68].mxu1 %v11144_v42 }
 0x263   :  { %5953 = vmatpush1.bf16.msra.mxu1 %v8570_v32  ;;  %6022 = vmatpush1.bf16.msra.mxu0 %v8573_v25  ;;  %v8614_v32 = vld [vmem:[%s12131_s3 + $0x3c4] ss:$28 sps:$4 sm:$0xff]   ;;  %v8617_v25 = vld [vmem:[%s12131_s3 + $0x14] ss:$28 sps:$4 sm:$0xff]  }
 0x264   :  { %5954 = vmatprep.subr.bf16.mxu1 %v8578_v47  ;;  %6023 = vmatprep.subr.bf16.mxu0 %v8581_v16  ;;  %v8612_v47 = vld [vmem:[%s12131_s3 + $0x3c0] ss:$28 sps:$4 sm:$0xff]   ;;  %v8615_v16 = vld [vmem:[%s12131_s3 + $0x10] ss:$28 sps:$4 sm:$0xff]  }
 0x265   :  { %7409 = vmatprep.mubr.msk.bf16.mxu1 %vm1200_vm0, %v11162_v55 }
 0x267   :  { %5955 = vmatpush1.bf16.msra.mxu1 %v8576_v6  ;;  %6024 = vmatpush1.bf16.msra.mxu0 %v8579_v31  ;;  %v8620_v6 = vld [vmem:[%s12131_s3 + $0x3fc] ss:$28 sps:$4 sm:$0xff]   ;;  %v8623_v31 = vld [vmem:[%s12131_s3 + $0x4c] ss:$28 sps:$4 sm:$0xff]  }
 0x268   :  { %5956 = vmatprep.subr.bf16.mxu1 %v8584_v46  ;;  %6025 = vmatprep.subr.bf16.mxu0 %v8587_v34  ;;  %v11243_v46 = vld [vmem:[%s12127_s4 + $0x8] ss:$16 sps:$4 sm:$0xff]  }
 0x269   :  { %v8618_v34 = vld [vmem:[%s12131_s3 + $0x3f8] ss:$28 sps:$4 sm:$0xff]  }
 0x26b   :  { %5957 = vmatpush1.bf16.msra.mxu1 %v8582_v4  ;;  %6026 = vmatpush1.bf16.msra.mxu0 %v8585_v41  ;;  %v8621_v4 = vld [vmem:[%s12131_s3 + $0x48] ss:$28 sps:$4 sm:$0xff]   ;;  %v8626_v41 = vld [vmem:[%s12131_s3 + $0x434] ss:$28 sps:$4 sm:$0xff]  }
 0x26c   :  { %5958 = vmatprep.subr.bf16.mxu1 %v8590_v27  ;;  %6027 = vmatprep.subr.bf16.mxu0 %v8593_v63  ;;  %v8629_v27 = vld [vmem:[%s12131_s3 + $0x84] ss:$28 sps:$4 sm:$0xff]   ;;  %v11261_v63 = vld [vmem:[%s12127_s4 + $0x2c] ss:$16 sps:$4 sm:$0xff]  }
 0x26f   :  { %5959 = vmatpush1.bf16.msra.mxu1 %v8588_v3  ;;  %6028 = vmatpush1.bf16.msra.mxu0 %v8591_v17  ;;  %v8624_v3 = vld [vmem:[%s12131_s3 + $0x430] ss:$28 sps:$4 sm:$0xff]   ;;  %v8627_v17 = vld [vmem:[%s12131_s3 + $0x80] ss:$28 sps:$4 sm:$0xff]  }
 0x270   :  { %5960 = vmatprep.subr.bf16.mxu1 %v8596_v39  ;;  %6029 = vmatprep.subr.bf16.mxu0 %v8599_v56  ;;  %v8632_v39 = vld [vmem:[%s12131_s3 + $0x46c] ss:$28 sps:$4 sm:$0xff]   ;;  %v8635_v56 = vld [vmem:[%s12131_s3 + $0xbc] ss:$28 sps:$4 sm:$0xff]  }
 0x273   :  { %5961 = vmatpush1.bf16.msra.mxu1 %v8594_v24  ;;  %6030 = vmatpush1.bf16.msra.mxu0 %v8597_v9  ;;  %v11283_v24 = vld [vmem:[%s12127_s4 + $0x28] ss:$16 sps:$4 sm:$0xff]  }
 0x274   :  { %5962 = vmatprep.subr.bf16.mxu1 %v8602_v49  ;;  %6031 = vmatprep.subr.bf16.mxu0 %v8605_v40  ;;  %v8630_v9 = vld [vmem:[%s12131_s3 + $0x468] ss:$28 sps:$4 sm:$0xff]   ;;  %v8633_v49 = vld [vmem:[%s12131_s3 + $0xb8] ss:$28 sps:$4 sm:$0xff]  }
 0x275   :  { %v8638_v40 = vld [vmem:[%s12131_s3 + $0x4a4] ss:$28 sps:$4 sm:$0xff]  }
 0x277   :  { %5963 = vmatpush1.bf16.msra.mxu1 %v8600_v59  ;;  %6032 = vmatpush1.bf16.msra.mxu0 %v8603_v29  ;;  %v8641_v59 = vld [vmem:[%s12131_s3 + $0xf4] ss:$28 sps:$4 sm:$0xff]   ;;  %v8636_v29 = vld [vmem:[%s12131_s3 + $0x4a0] ss:$28 sps:$4 sm:$0xff]  }
 0x278   :  { %5964 = vmatprep.subr.bf16.mxu1 %v8608_v52  ;;  %6054 = vmatprep.subr.bf16.mxu0 %v8611_v53  ;;  %v8639_v52 = vld [vmem:[%s12131_s3 + $0xf0] ss:$28 sps:$4 sm:$0xff]   ;;  %v8644_v53 = vld [vmem:[%s12131_s3 + $0x4dc] ss:$28 sps:$4 sm:$0xff]  }
 0x27a   :  { %6034 = vmatmul.mubr.bf16.vlgmr.msra.gmra.mrb[56].mxu0 %v11108_v57 }
 0x27b   :  { %5965 = vmatpush1.bf16.msra.mxu1 %v8606_v43  ;;  %6055 = vmatpush1.bf16.msra.mxu0 %v8609_v58  ;;  %v8647_v43 = vld [vmem:[%s12131_s3 + $0x12c] ss:$28 sps:$4 sm:$0xff]   ;;  %v8642_v58 = vld [vmem:[%s12131_s3 + $0x4d8] ss:$28 sps:$4 sm:$0xff]  }
 0x27c   :  { %6056 = vmatprep.subr.bf16.mxu0 %v8614_v32  ;;  %6107 = vmatprep.subr.bf16.mxu1 %v8617_v25  ;;  %v8645_v32 = vld [vmem:[%s12131_s3 + $0x128] ss:$28 sps:$4 sm:$0xff]   ;;  %v8650_v25 = vld [vmem:[%s12131_s3 + $0x514] ss:$28 sps:$4 sm:$0xff]  }
 0x27d   :  { %6043 = vmatprep.mubr.bf16.mxu0 %v11126_v54 }
 0x27e   :  { %5981 = vmatmul.mubr.bf16.vlgmr.msra.gmra.mrb[64].mxu1 %v11243_v46 }
 0x27f   :  { %6057 = vmatpush1.bf16.msra.mxu0 %v8612_v47  ;;  %6108 = vmatpush1.bf16.msra.mxu1 %v8615_v16  ;;  %v8653_v47 = vld [vmem:[%s12131_s3 + $0x164] ss:$28 sps:$4 sm:$0xff]   ;;  %v8648_v16 = vld [vmem:[%s12131_s3 + $0x510] ss:$28 sps:$4 sm:$0xff]  }
 0x280   :  { %6058 = vmatprep.subr.bf16.mxu0 %v8620_v6  ;;  %6109 = vmatprep.subr.bf16.mxu1 %v8623_v31  ;;  %v8651_v6 = vld [vmem:[%s12131_s3 + $0x160] ss:$28 sps:$4 sm:$0xff]   ;;  %v8656_v31 = vld [vmem:[%s12131_s3 + $0x54c] ss:$28 sps:$4 sm:$0xff]  }
 0x281   :  { %7410 = vmatprep.mubr.msk.bf16.mxu1 %vm1200_vm0, %v11261_v63 }
 0x282   :  { %6044 = vmatmul.mubr.bf16.gmra.mrb[60].mxu0 %v11144_v42 }
 0x283   :  { %6059 = vmatpush1.bf16.msra.mxu0 %v8618_v34  ;;  %6110 = vmatpush1.bf16.msra.mxu1 %v8621_v4  ;;  %v8659_v34 = vld [vmem:[%s12131_s3 + $0x19c] ss:$28 sps:$4 sm:$0xff]   ;;  %v8654_v4 = vld [vmem:[%s12131_s3 + $0x548] ss:$28 sps:$4 sm:$0xff]  }
 0x284   :  { %6060 = vmatprep.subr.bf16.mxu0 %v8626_v41  ;;  %6111 = vmatprep.subr.bf16.mxu1 %v8629_v27  ;;  %v8657_v41 = vld [vmem:[%s12131_s3 + $0x198] ss:$28 sps:$4 sm:$0xff]  }
 0x285   :  { %7411 = vmatprep.mubr.msk.bf16.mxu0 %vm1200_vm0, %v11162_v55  ;;  %v8662_v27 = vld [vmem:[%s12131_s3 + $0x1d4] ss:$28 sps:$4 sm:$0xff]  }
 0x286   :  { %5991 = vmatmul.mubr.bf16.gmra.mrb[68].mxu1 %v11283_v24 }
 0x287   :  { %6061 = vmatpush1.bf16.msra.mxu0 %v8624_v3  ;;  %6112 = vmatpush1.bf16.msra.mxu1 %v8627_v17  ;;  %v8663_v3 = vld [vmem:[%s12131_s3 + $0x1d8] ss:$28 sps:$4 sm:$0xff]   ;;  %v8660_v17 = vld [vmem:[%s12131_s3 + $0x1d0] ss:$28 sps:$4 sm:$0xff]  }
 0x288   :  { %6062 = vmatprep.subr.bf16.mxu0 %v8632_v39  ;;  %6113 = vmatprep.subr.bf16.mxu1 %v8635_v56  ;;  %v8664_v39 = vld [vmem:[%s12131_s3 + $0x18] ss:$28 sps:$4 sm:$0xff]   ;;  %v8667_v56 = vld [vmem:[%s12131_s3 + $0x20c] ss:$28 sps:$4 sm:$0xff]  }
 0x289   :  { %6139 = vmatprep.mubr.bf16.mxu1 %v10877_v60 }
 0x28b   :  { %6063 = vmatpush1.bf16.msra.mxu0 %v8630_v9  ;;  %6114 = vmatpush1.bf16.msra.mxu1 %v8633_v49  ;;  %v8668_v9 = vld [vmem:[%s12131_s3 + $0x210] ss:$28 sps:$4 sm:$0xff]   ;;  %v8665_v49 = vld [vmem:[%s12131_s3 + $0x208] ss:$28 sps:$4 sm:$0xff]  }
 0x28c   :  { %6064 = vmatprep.subr.bf16.mxu0 %v8638_v40  ;;  %6115 = vmatprep.subr.bf16.mxu1 %v8641_v59  ;;  %v8669_v40 = vld [vmem:[%s12131_s3 + $0x50] ss:$28 sps:$4 sm:$0xff]   ;;  %v8672_v59 = vld [vmem:[%s12131_s3 + $0x244] ss:$28 sps:$4 sm:$0xff]  }
 0x28f   :  { %6065 = vmatpush1.bf16.msra.mxu0 %v8636_v29  ;;  %6116 = vmatpush1.bf16.msra.mxu1 %v8639_v52  ;;  %v8673_v29 = vld [vmem:[%s12131_s3 + $0x248] ss:$28 sps:$4 sm:$0xff]   ;;  %v8670_v52 = vld [vmem:[%s12131_s3 + $0x240] ss:$28 sps:$4 sm:$0xff]  }
 0x290   :  { %6066 = vmatprep.subr.bf16.mxu0 %v8644_v53  ;;  %6117 = vmatprep.subr.bf16.mxu1 %v8647_v43  ;;  %v8674_v53 = vld [vmem:[%s12131_s3 + $0x88] ss:$28 sps:$4 sm:$0xff]   ;;  %v8677_v43 = vld [vmem:[%s12131_s3 + $0x27c] ss:$28 sps:$4 sm:$0xff]  }
 0x293   :  { %6067 = vmatpush1.bf16.msra.mxu0 %v8642_v58  ;;  %6118 = vmatpush1.bf16.msra.mxu1 %v8645_v32  ;;  %v8678_v58 = vld [vmem:[%s12131_s3 + $0x280] ss:$28 sps:$4 sm:$0xff]   ;;  %v8675_v32 = vld [vmem:[%s12131_s3 + $0x278] ss:$28 sps:$4 sm:$0xff]  }
 0x294   :  { %6068 = vmatprep.subr.bf16.mxu0 %v8650_v25  ;;  %6119 = vmatprep.subr.bf16.mxu1 %v8653_v47  ;;  %v8679_v25 = vld [vmem:[%s12131_s3 + $0xc0] ss:$28 sps:$4 sm:$0xff]   ;;  %v8682_v47 = vld [vmem:[%s12131_s3 + $0x2b4] ss:$28 sps:$4 sm:$0xff]  }
 0x297   :  { %6069 = vmatpush1.bf16.msra.mxu0 %v8648_v16  ;;  %6120 = vmatpush1.bf16.msra.mxu1 %v8651_v6  ;;  %v8683_v16 = vld [vmem:[%s12131_s3 + $0x2b8] ss:$28 sps:$4 sm:$0xff]  }
 0x298   :  { %6070 = vmatprep.subr.bf16.mxu0 %v8656_v31  ;;  %6121 = vmatprep.subr.bf16.mxu1 %v8659_v34 }
 0x29b   :  { %6071 = vmatpush1.bf16.msra.mxu0 %v8654_v4  ;;  %6122 = vmatpush1.bf16.msra.mxu1 %v8657_v41 }
 0x29c   :  { %6123 = vmatprep.subr.bf16.mxu1 %v8662_v27  ;;  %7501 = vmatprep.subr.bf16.mxu0 %v8663_v3  ;;  %v8680_v3 = vld [vmem:[%s12131_s3 + $0x2b0] ss:$28 sps:$4 sm:$0xff]  }
 0x29e   :  { %6087 = vmatmul.mubr.bf16.vlgmr.msra.gmra.mrb[56].mxu0 %v11243_v46 }
 0x29f   :  { %6124 = vmatpush1.bf16.msra.mxu1 %v8660_v17  ;;  %7502 = vmatpush3.bf16.msra.mxu0 %v8664_v39 }
 0x2a0   :  { %6125 = vmatprep.subr.bf16.mxu1 %v8667_v56  ;;  %7503 = vmatprep.subr.bf16.mxu0 %v8668_v9 }
 0x2a1   :  { %7412 = vmatprep.mubr.msk.bf16.mxu0 %vm1200_vm0, %v11261_v63 }
 0x2a3   :  { %6126 = vmatpush1.bf16.msra.mxu1 %v8665_v49  ;;  %7504 = vmatpush3.bf16.msra.mxu0 %v8669_v40  ;;  %v8687_v49 = vld [vmem:[%s12131_s3 + $0x2ec] ss:$28 sps:$4 sm:$0xff]  }
 0x2a4   :  { %6127 = vmatprep.subr.bf16.mxu1 %v8672_v59  ;;  %7505 = vmatprep.subr.bf16.mxu0 %v8673_v29 }
 0x2a6   :  { %6097 = vmatmul.mubr.bf16.gmra.mrb[60].mxu0 %v11283_v24 }
 0x2a7   :  { %6128 = vmatpush1.bf16.msra.mxu1 %v8670_v52  ;;  %7506 = vmatpush3.bf16.msra.mxu0 %v8674_v53 }
 0x2a8   :  { %6129 = vmatprep.subr.bf16.mxu1 %v8677_v43  ;;  %7507 = vmatprep.subr.bf16.mxu0 %v8678_v58  ;;  %v8688_v58 = vld [vmem:[%s12131_s3 + $0x2f0] ss:$28 sps:$4 sm:$0xff]  }
 0x2a9   :  { %v4410_v6 = vpop.f32.mrb[40].mxu0  ;;  %v4516_v31 = vpop.f32.mrb[40].mxu1  ;;  %6245 = vmatprep.mubr.bf16.mxu0 %v10877_v60  ;;  %v8684_v60 = vld [vmem:[%s12131_s3 + $0xf8] ss:$28 sps:$4 sm:$0xff]  }
 0x2aa   :  { %v7577_v34 = vadd.f32 %v4410_v6, %v10124_v0  ;;  %v7585_v4 = vadd.f32 %v4516_v31, %v10124_v0  ;;  %v4412_v41 = vpop.f32.mrb[41].mxu0  ;;  %v4518_v27 = vpop.f32.mrb[41].mxu1 }
 0x2ab   :  { %v7578_v17 = vadd.f32 %v4412_v41, %v10124_v0  ;;  %v7586_v39 = vadd.f32 %v4518_v27, %v10124_v0  ;;  %v4414_v56 = vpop.f32.mrb[42].mxu0  ;;  %v4520_v9 = vpop.f32.mrb[42].mxu1  ;;  %6130 = vmatpush1.bf16.msra.mxu1 %v8675_v32  ;;  %7508 = vmatpush3.bf16.msra.mxu0 %v8679_v25 }
 0x2ac   :  { %v4739_v40 = vmax.f32 %v7577_v34, 0.0  ;;  %v4741_v59 = vmax.f32 %v7585_v4, 0.0  ;;  %v7579_v29 = vadd.f32 %v4414_v56, %v10154_v5  ;;  %v7587_v52 = vadd.f32 %v4520_v9, %v10154_v5  ;;  %v4416_v53 = vpop.f32.mrb[43].mxu0  ;;  %v4522_v43 = vpop.f32.mrb[43].mxu1  ;;  %6131 = vmatprep.subr.bf16.mxu1 %v8682_v47  ;;  %7509 = vmatprep.subr.bf16.mxu0 %v8683_v16 }
 0x2ad   :  { %v4740_v32 = vmax.f32 %v7578_v17, 0.0  ;;  %v4742_v25 = vmax.f32 %v7586_v39, 0.0  ;;  %v7580_v6 = vadd.f32 %v4416_v53, %v10154_v5  ;;  %v7588_v31 = vadd.f32 %v4522_v43, %v10154_v5 }
 0x2ae   :  { %v11421_v34 = vmax.f32 %v10610_v8, %v4739_v40  ;;  %v11424_v4 = vmax.f32 %v10742_v1, %v4741_v59  ;;  %v4746_v41 = vmax.f32 %v7579_v29, 0.0  ;;  %v4748_v27 = vmax.f32 %v7587_v52, 0.0  ;;  %v8685_v8 = vld [vmem:[%s12131_s3 + $0x2e8] ss:$28 sps:$4 sm:$0xff]   ;;  %v8689_v1 = vld [vmem:[%s12131_s3 + $0x130] ss:$28 sps:$4 sm:$0xff]  }
 0x2af   :  { %v11427_v47 = vmax.f32 %v10614_v13, %v4740_v32  ;;  %v11430_v16 = vmax.f32 %v10744_v51, %v4742_v25  ;;  %v4747_v17 = vmax.f32 %v7580_v6, 0.0  ;;  %v4749_v39 = vmax.f32 %v7588_v31, 0.0  ;;  %6132 = vmatpush1.bf16.msra.mxu1 %v8680_v3  ;;  %7510 = vmatpush3.bf16.msra.mxu0 %v8684_v60  ;;  %v8692_v51 = vld [vmem:[%s12131_s3 + $0x324] ss:$28 sps:$4 sm:$0xff]   ;;  %v8697_v32 = vld [vmem:[%s12131_s3 + $0x35c] ss:$28 sps:$4 sm:$0xff]  }
 0x2b0   :  { %v11439_v56 = vmax.f32 %v10622_v28, %v4746_v41  ;;  %v11442_v13 = vmax.f32 %v10754_v30, %v4748_v27  ;;  %6133 = vmatprep.subr.bf16.mxu1 %v8687_v49  ;;  %7511 = vmatprep.subr.bf16.mxu0 %v8688_v58  ;;  %v8693_v3 = vld [vmem:[%s12131_s3 + $0x328] ss:$28 sps:$4 sm:$0xff]   ;;  %v8690_v52 = vld [vmem:[%s12131_s3 + $0x320] ss:$28 sps:$4 sm:$0xff]  }
 0x2b1   :  { %v11451_v9 = vmax.f32 %v10632_v36, %v4747_v17  ;;  %v11454_v60 = vmax.f32 %v10762_v2, %v4749_v39  ;;  %v4420_v28 = vpop.f32.mrb[44].mxu0  ;;  %v4526_v40 = vpop.f32.mrb[44].mxu1  ;;  %v8694_v2 = vld [vmem:[%s12131_s3 + $0x168] ss:$28 sps:$4 sm:$0xff]   ;;  %v8698_v39 = vld [vmem:[%s12131_s3 + $0x360] ss:$28 sps:$4 sm:$0xff]  }
 0x2b2   :  { %v7581_v30 = vadd.f32 %v4420_v28, %v10167_v15  ;;  %v7589_v49 = vadd.f32 %v4526_v40, %v10167_v15  ;;  %v4422_v59 = vpop.f32.mrb[45].mxu0  ;;  %v4528_v29 = vpop.f32.mrb[45].mxu1 }
 0x2b3   :  { %v7582_v53 = vadd.f32 %v4422_v59, %v10167_v15  ;;  %v7590_v36 = vadd.f32 %v4528_v29, %v10167_v15  ;;  %v4424_v43 = vpop.f32.mrb[46].mxu0  ;;  %v4530_v58 = vpop.f32.mrb[46].mxu1  ;;  %6134 = vmatpush1.bf16.msra.mxu1 %v8685_v8  ;;  %7512 = vmatpush3.bf16.msra.mxu0 %v8689_v1 }
 0x2b4   :  { %v4753_v25 = vmax.f32 %v7581_v30, 0.0  ;;  %v4755_v6 = vmax.f32 %v7589_v49, 0.0  ;;  %v7583_v31 = vadd.f32 %v4424_v43, %v10197_v35  ;;  %v7591_v41 = vadd.f32 %v4530_v58, %v10197_v35  ;;  %v4426_v27 = vpop.f32.mrb[47].mxu0  ;;  %v4532_v17 = vpop.f32.mrb[47].mxu1  ;;  %6135 = vmatprep.subr.bf16.mxu1 %v8692_v51  ;;  %7513 = vmatprep.subr.bf16.mxu0 %v8693_v3 }
 0x2b5   :  { %v4754_v8 = vmax.f32 %v7582_v53, 0.0  ;;  %v4756_v1 = vmax.f32 %v7590_v36, 0.0  ;;  %v7584_v28 = vadd.f32 %v4426_v27, %v10197_v35  ;;  %v7592_v40 = vadd.f32 %v4532_v17, %v10197_v35 }
 0x2b6   :  { %v11477_v30 = vmax.f32 %v10652_v18, %v4753_v25  ;;  %v11480_v49 = vmax.f32 %v10782_v21, %v4755_v6  ;;  %v4760_v59 = vmax.f32 %v7583_v31, 0.0  ;;  %v4762_v29 = vmax.f32 %v7591_v41, 0.0  ;;  %v8695_v18 = vld [vmem:[%s12131_s3 + $0x358] ss:$28 sps:$4 sm:$0xff]   ;;  %v8699_v21 = vld [vmem:[%s12131_s3 + $0x1a0] ss:$28 sps:$4 sm:$0xff]  }
 0x2b7   :  { %v11483_v51 = vmax.f32 %v10656_v33, %v4754_v8  ;;  %v11486_v3 = vmax.f32 %v10784_v45, %v4756_v1  ;;  %v4761_v53 = vmax.f32 %v7584_v28, 0.0  ;;  %v4763_v36 = vmax.f32 %v7592_v40, 0.0  ;;  %6136 = vmatpush1.bf16.msra.mxu1 %v8690_v52  ;;  %7514 = vmatpush3.bf16.msra.mxu0 %v8694_v2  ;;  %v8702_v45 = vld [vmem:[%s12131_s3 + $0x394] ss:$28 sps:$4 sm:$0xff]   ;;  %v8711_v25 = vld [vmem:[%s12131_s3 + $0x408] ss:$28 sps:$4 sm:$0xff]  }
 0x2b8   :  { %v11495_v43 = vmax.f32 %v10666_v38, %v4760_v59  ;;  %v11498_v33 = vmax.f32 %v10792_v44, %v4762_v29  ;;  %6137 = vmatprep.subr.bf16.mxu1 %v8697_v32  ;;  %7515 = vmatprep.subr.bf16.mxu0 %v8698_v39  ;;  %v8700_v38 = vld [vmem:[%s12131_s3 + $0x390] ss:$28 sps:$4 sm:$0xff]   ;;  %v8703_v44 = vld [vmem:[%s12131_s3 + $0x398] ss:$28 sps:$4 sm:$0xff]   ;;  %v8710_v32 = vld [vmem:[%s12131_s3 + $0x404] ss:$28 sps:$4 sm:$0xff]  }
 0x2b9   :  { %v11504_v52 = vmax.f32 %v10673_v61, %v4761_v53  ;;  %v11507_v58 = vmax.f32 %v10798_v7, %v4763_v36  ;;  %v8706_v61 = vld [vmem:[%s12131_s3 + $0x3cc] ss:$28 sps:$4 sm:$0xff]   ;;  %v8714_v6 = vld [vmem:[%s12131_s3 + $0x43c] ss:$28 sps:$4 sm:$0xff]   ;;  %v8718_v41 = vld [vmem:[%s12131_s3 + $0x474] ss:$28 sps:$4 sm:$0xff]  }
 0x2ba   :  { %v8704_v7 = vld [vmem:[%s12131_s3 + $0x3c8] ss:$28 sps:$4 sm:$0xff]   ;;  %v8707_v2 = vld [vmem:[%s12131_s3 + $0x3d0] ss:$28 sps:$4 sm:$0xff]   ;;  %v8715_v31 = vld [vmem:[%s12131_s3 + $0x440] ss:$28 sps:$4 sm:$0xff]  }
 0x2bb   :  { %6138 = vmatpush1.bf16.msra.mxu1 %v8695_v18  ;;  %7516 = vmatpush3.bf16.msra.mxu0 %v8699_v21  ;;  %v8716_v8 = vld [vmem:[%s12131_s3 + $0x470] ss:$28 sps:$4 sm:$0xff]   ;;  %v8719_v1 = vld [vmem:[%s12131_s3 + $0x478] ss:$28 sps:$4 sm:$0xff]   ;;  %v8720_v59 = vld [vmem:[%s12131_s3 + $0x4a8] ss:$28 sps:$4 sm:$0xff]  }
 0x2bc   :  { %6160 = vmatprep.subr.bf16.mxu1 %v8702_v45  ;;  %6262 = vmatprep.subr.bf16.mxu0 %v8768_v12  ;;  %v8723_v29 = vld [vmem:[%s12131_s3 + $0x4b0] ss:$28 sps:$4 sm:$0xff]   ;;  %v8726_v53 = vld [vmem:[%s12131_s3 + $0x4e4] ss:$28 sps:$4 sm:$0xff]  }
 0x2bd   :  { %v8724_v21 = vld [vmem:[%s12131_s3 + $0x4e0] ss:$28 sps:$4 sm:$0xff]   ;;  %v8727_v45 = vld [vmem:[%s12131_s3 + $0x4e8] ss:$28 sps:$4 sm:$0xff]  }
 0x2be   :  { %6140 = vmatmul.mubr.bf16.vlgmr.msra.gmra.mrb[72].mxu1 %v11108_v57  ;;  %6246 = vmatmul.mubr.bf16.vlgmr.msra.gmra.mrb[64].mxu0 %v11108_v57  ;;  %v8708_v57 = vld [vmem:[%s12131_s3 + $0x400] ss:$28 sps:$4 sm:$0xff]  }
 0x2bf   :  { %6161 = vmatpush1.bf16.msra.mxu1 %v8700_v38  ;;  %6263 = vmatpush1.bf16.msra.mxu0 %v8703_v44 }
 0x2c0   :  { %6162 = vmatprep.subr.bf16.mxu1 %v8706_v61  ;;  %6264 = vmatprep.subr.bf16.mxu0 %v8768_v12  ;;  %v8730_v61 = vld [vmem:[%s12131_s3 + $0x51c] ss:$28 sps:$4 sm:$0xff]  }
 0x2c1   :  { %6149 = vmatprep.mubr.bf16.mxu1 %v11126_v54  ;;  %6253 = vmatprep.mubr.bf16.mxu0 %v11126_v54  ;;  %v8712_v54 = vld [vmem:[%s12131_s3 + $0x438] ss:$28 sps:$4 sm:$0xff]  }
 0x2c3   :  { %6163 = vmatpush1.bf16.msra.mxu1 %v8704_v7  ;;  %6265 = vmatpush1.bf16.msra.mxu0 %v8707_v2 }
 0x2c4   :  { %6164 = vmatprep.subr.bf16.mxu1 %v8710_v32  ;;  %6266 = vmatprep.subr.bf16.mxu0 %v8768_v12  ;;  %v8728_v32 = vld [vmem:[%s12131_s3 + $0x518] ss:$28 sps:$4 sm:$0xff]  }
 0x2c6   :  { %6150 = vmatmul.mubr.bf16.gmra.mrb[76].mxu1 %v11144_v42  ;;  %6254 = vmatmul.mubr.bf16.gmra.mrb[68].mxu0 %v11144_v42 }
 0x2c7   :  { %6165 = vmatpush1.bf16.msra.mxu1 %v8708_v57  ;;  %6267 = vmatpush1.bf16.msra.mxu0 %v8711_v25  ;;  %v8731_v57 = vld [vmem:[%s12131_s3 + $0x520] ss:$28 sps:$4 sm:$0xff]   ;;  %v8734_v25 = vld [vmem:[%s12131_s3 + $0x554] ss:$28 sps:$4 sm:$0xff]  }
 0x2c8   :  { %6166 = vmatprep.subr.bf16.mxu1 %v8714_v6  ;;  %6268 = vmatprep.subr.bf16.mxu0 %v8768_v12  ;;  %v8732_v6 = vld [vmem:[%s12131_s3 + $0x550] ss:$28 sps:$4 sm:$0xff]  }
 0x2c9   :  { %v7489_v27 = vpop.f32.mrb[48].mxu1  ;;  %7413 = vmatprep.mubr.msk.bf16.mxu1 %vm1200_vm0, %v11162_v55  ;;  %7415 = vmatprep.mubr.msk.bf16.mxu0 %vm1200_vm0, %v11162_v55  ;;  %v8722_v55 = vld [vmem:[%s12131_s3 + $0x4ac] ss:$28 sps:$4 sm:$0xff]  }
 0x2ca   :  { %v7490_v42 = vpop.f32.mrb[49].mxu1 }
 0x2cb   :  { %v7491_v17 = vadd.f32 %v7490_v42, %v7489_v27  ;;  %v7492_v39 = vpop.f32.mrb[50].mxu1  ;;  %6167 = vmatpush1.bf16.msra.mxu1 %v8712_v54  ;;  %6269 = vmatpush1.bf16.msra.mxu0 %v8715_v31  ;;  %v8735_v54 = vld [vmem:[%s12131_s3 + $0x558] ss:$28 sps:$4 sm:$0xff]  }
 0x2cc   :  { %v7493_v28 = vpop.f32.mrb[51].mxu1  ;;  %6168 = vmatprep.subr.bf16.mxu1 %v8718_v41  ;;  %6270 = vmatprep.subr.bf16.mxu0 %v8768_v12 }
 0x2cd   :  { %v7494_v40 = vadd.f32 %v7493_v28, %v7492_v39  ;;  %v4676_v31 = vadd.f32 %v7491_v17, %v10124_v0 }
 0x2cf   :  { %6169 = vmatpush1.bf16.msra.mxu1 %v8716_v8  ;;  %6271 = vmatpush1.bf16.msra.mxu0 %v8719_v1  ;;  %v4679_v42 = vadd.f32 %v7494_v40, %v10154_v5 }
 0x2d0   :  { %6170 = vmatprep.subr.bf16.mxu1 %v8722_v55  ;;  %6272 = vmatprep.subr.bf16.mxu0 %v8768_v12 }
 0x2d1   :  { %v7495_v36 = vpop.f32.mrb[52].mxu1 }
 0x2d2   :  { %v7496_v18 = vpop.f32.mrb[53].mxu1 }
 0x2d3   :  { %6171 = vmatpush1.bf16.msra.mxu1 %v8720_v59  ;;  %6273 = vmatpush1.bf16.msra.mxu0 %v8723_v29  ;;  %v7497_v38 = vadd.f32 %v7496_v18, %v7495_v36  ;;  %v7498_v44 = vpop.f32.mrb[54].mxu1 }
 0x2d4   :  { %6172 = vmatprep.subr.bf16.mxu1 %v8726_v53  ;;  %6274 = vmatprep.subr.bf16.mxu0 %v8768_v12  ;;  %v7499_v7 = vpop.f32.mrb[55].mxu1 }
 0x2d5   :  { %v7500_v2 = vadd.f32 %v7499_v7, %v7498_v44 }
 0x2d7   :  { %6173 = vmatpush1.bf16.msra.mxu1 %v8724_v21  ;;  %6275 = vmatpush1.bf16.msra.mxu0 %v8727_v45  ;;  %v4687_v53 = vadd.f32 %v7500_v2, %v10197_v35 }
 0x2d8   :  { %6174 = vmatprep.subr.bf16.mxu1 %v8730_v61  ;;  %6276 = vmatprep.subr.bf16.mxu0 %v8768_v12 }
 0x2db   :  { %6175 = vmatpush1.bf16.msra.mxu1 %v8728_v32  ;;  %6277 = vmatpush1.bf16.msra.mxu0 %v8731_v57 }
 0x2dc   :  { %6176 = vmatprep.subr.bf16.mxu1 %v8734_v25  ;;  %6278 = vmatprep.subr.bf16.mxu0 %v8768_v12 }
 0x2df   :  { %6177 = vmatpush1.bf16.msra.mxu1 %v8732_v6  ;;  %6279 = vmatpush1.bf16.msra.mxu0 %v8735_v54 }
 0x2e2   :  { %6193 = vmatmul.mubr.bf16.vlgmr.msra.gmra.mrb[72].mxu1 %v11243_v46  ;;  %6295 = vmatmul.mubr.bf16.vlgmr.msra.gmra.mrb[72].mxu0 %v11243_v46 }
 0x2e3   :  { %7414 = vmatprep.mubr.msk.bf16.mxu1 %vm1200_vm0, %v11261_v63  ;;  %7416 = vmatprep.mubr.msk.bf16.mxu0 %vm1200_vm0, %v11261_v63 }
 0x2ea   :  { %6203 = vmatmul.mubr.bf16.gmra.mrb[76].mxu1 %v11283_v24  ;;  %6303 = vmatmul.mubr.bf16.gmra.mrb[76].mxu0 %v11283_v24  ;;  %v4684_v24 = vadd.f32 %v7497_v38, %v10167_v15 }
 0x2ed   :  { %v4724_v41 = vpop.f32.mrb[56].mxu1 }
 0x2ee   :  { %v4725_v12 = vadd.f32 %v4724_v41, %v4676_v31  ;;  %v4726_v27 = vpop.f32.mrb[57].mxu1 }
 0x2ef   :  { %v4727_v39 = vpop.f32.mrb[58].mxu1 }
 0x2f0   :  { %v4745_v8 = vmax.f32 %v4725_v12, 0.0  ;;  %v4728_v46 = vadd.f32 %v4727_v39, %v4679_v42  ;;  %v4729_v1 = vpop.f32.mrb[59].mxu1 }
 0x2f2   :  { %v11617_v28 = vmax.f32 %v11019_v14, %v4745_v8  ;;  %v4752_v55 = vmax.f32 %v4728_v46, 0.0 }
 0x2f4   :  { %v11620_v63 = vmax.f32 %v11032_v37, %v4752_v55 }
 0x2f5   :  { %v4732_v59 = vpop.f32.mrb[60].mxu1 }
 0x2f6   :  { %v4733_v17 = vadd.f32 %v4732_v59, %v4684_v24  ;;  %v4734_v29 = vpop.f32.mrb[61].mxu1 }
 0x2f7   :  { %v4735_v36 = vpop.f32.mrb[62].mxu1 }
 0x2f8   :  { %v4759_v40 = vmax.f32 %v4733_v17, 0.0  ;;  %v4736_v18 = vadd.f32 %v4735_v36, %v4687_v53  ;;  %v4737_v21 = vpop.f32.mrb[63].mxu1 }
 0x2fa   :  { %v11625_v45 = vmax.f32 %v11071_v22, %v4759_v40  ;;  %v4766_v14 = vmax.f32 %v4736_v18, 0.0 }
 0x2fc   :  { %v11628_v44 = vmax.f32 %v11083_v26, %v4766_v14 }
 0x30d   :  { %v4622_v37 = vpop.f32.mrb[48].mxu0 }
 0x30e   :  { %v7593_v61 = vadd.f32 %v4622_v37, %v10124_v0  ;;  %v4624_v38 = vpop.f32.mrb[49].mxu0 }
 0x30f   :  { %v7594_v7 = vadd.f32 %v4624_v38, %v10124_v0  ;;  %v4626_v32 = vpop.f32.mrb[50].mxu0 }
 0x310   :  { %v4743_v57 = vmax.f32 %v7593_v61, 0.0  ;;  %v7595_v2 = vadd.f32 %v4626_v32, %v10154_v5  ;;  %v4628_v25 = vpop.f32.mrb[51].mxu0 }
 0x311   :  { %v4744_v6 = vmax.f32 %v7594_v7, 0.0  ;;  %v7596_v54 = vadd.f32 %v4628_v25, %v10154_v5 }
 0x312   :  { %v11635_v22 = vmax.f32 %v11017_v50, %v4743_v57  ;;  %v4750_v31 = vmax.f32 %v7595_v2, 0.0 }
 0x313   :  { %v11638_v26 = vmax.f32 %v11021_v11, %v4744_v6  ;;  %v4751_v41 = vmax.f32 %v7596_v54, 0.0 }
 0x314   :  { %v11641_v12 = vmax.f32 %v11030_v48, %v4750_v31 }
 0x315   :  { %v11644_v27 = vmax.f32 %v11047_v10, %v4751_v41  ;;  %v4632_v42 = vpop.f32.mrb[52].mxu0 }
 0x316   :  { %v7597_v39 = vadd.f32 %v4632_v42, %v10167_v15  ;;  %v4634_v8 = vpop.f32.mrb[53].mxu0 }
 0x317   :  { %v7598_v46 = vadd.f32 %v4634_v8, %v10167_v15  ;;  %v4636_v1 = vpop.f32.mrb[54].mxu0 }
 0x318   :  { %v4757_v50 = vmax.f32 %v7597_v39, 0.0  ;;  %v7599_v55 = vadd.f32 %v4636_v1, %v10197_v35  ;;  %v4638_v24 = vpop.f32.mrb[55].mxu0 }
 0x319   :  { %v4758_v11 = vmax.f32 %v7598_v46, 0.0  ;;  %v7600_v59 = vadd.f32 %v4638_v24, %v10197_v35 }
 0x31a   :  { %v11651_v48 = vmax.f32 %v11069_v23, %v4757_v50  ;;  %v4764_v17 = vmax.f32 %v7599_v55, 0.0 }
 0x31b   :  { %v11654_v10 = vmax.f32 %v11073_v20, %v4758_v11  ;;  %v4765_v29 = vmax.f32 %v7600_v59, 0.0 }
 0x31c   :  { %v11657_v53 = vmax.f32 %v11081_v19, %v4764_v17 }
 0x31d   :  { %v11660_v36 = vmax.f32 %v11091_v62, %v4765_v29 }
 0x351   :  { %v5982_v40 = vpop.f32.mrb[64].mxu1 }
 0x352   :  { %v7601_v18 = vadd.f32 %v5982_v40, %v10124_v0  ;;  %v5984_v21 = vpop.f32.mrb[65].mxu1 }
 0x353   :  { %v7602_v14 = vadd.f32 %v5984_v21, %v10124_v0  ;;  %v5986_v37 = vpop.f32.mrb[66].mxu1 }
 0x354   :  { %v6311_v23 = vmax.f32 %v7601_v18, 0.0  ;;  %v7603_v61 = vadd.f32 %v5986_v37, %v10154_v5  ;;  %v5988_v38 = vpop.f32.mrb[67].mxu1 }
 0x355   :  { %v6312_v20 = vmax.f32 %v7602_v14, 0.0  ;;  %v7604_v7 = vadd.f32 %v5988_v38, %v10154_v5 }
 0x356   :  { %v11667_v19 = vmax.f32 %v11421_v34, %v6311_v23  ;;  %v6318_v32 = vmax.f32 %v7603_v61, 0.0 }
 0x357   :  { %v11670_v62 = vmax.f32 %v11427_v47, %v6312_v20  ;;  %v6319_v57 = vmax.f32 %v7604_v7, 0.0 }
 0x358   :  { %v11673_v2 = vmax.f32 %v11439_v56, %v6318_v32 }
 0x359   :  { %v11676_v25 = vmax.f32 %v11451_v9, %v6319_v57  ;;  %v5992_v6 = vpop.f32.mrb[68].mxu1 }
 0x35a   :  { %v7605_v54 = vadd.f32 %v5992_v6, %v10167_v15  ;;  %v5994_v31 = vpop.f32.mrb[69].mxu1 }
 0x35b   :  { %v7606_v41 = vadd.f32 %v5994_v31, %v10167_v15  ;;  %v5996_v42 = vpop.f32.mrb[70].mxu1 }
 0x35c   :  { %v6325_v34 = vmax.f32 %v7605_v54, 0.0  ;;  %v7607_v39 = vadd.f32 %v5996_v42, %v10197_v35  ;;  %v5998_v8 = vpop.f32.mrb[71].mxu1 }
 0x35d   :  { %v6326_v47 = vmax.f32 %v7606_v41, 0.0  ;;  %v7608_v46 = vadd.f32 %v5998_v8, %v10197_v35 }
 0x35e   :  { %v11683_v56 = vmax.f32 %v11477_v30, %v6325_v34  ;;  %v6332_v1 = vmax.f32 %v7607_v39, 0.0 }
 0x35f   :  { %v11686_v9 = vmax.f32 %v11483_v51, %v6326_v47  ;;  %v6333_v50 = vmax.f32 %v7608_v46, 0.0 }
 0x360   :  { %v11689_v55 = vmax.f32 %v11495_v43, %v6332_v1 }
 0x361   :  { %v11692_v24 = vmax.f32 %v11504_v52, %v6333_v50 }
 0x371   :  { %v6088_v11 = vpop.f32.mrb[56].mxu0 }
 0x372   :  { %v7609_v59 = vadd.f32 %v6088_v11, %v10124_v0  ;;  %v6090_v17 = vpop.f32.mrb[57].mxu0 }
 0x373   :  { %v7610_v29 = vadd.f32 %v6090_v17, %v10124_v0  ;;  %v6092_v40 = vpop.f32.mrb[58].mxu0 }
 0x374   :  { %v6313_v30 = vmax.f32 %v7609_v59, 0.0  ;;  %v7611_v18 = vadd.f32 %v6092_v40, %v10154_v5  ;;  %v6094_v21 = vpop.f32.mrb[59].mxu0 }
 0x375   :  { %v6314_v51 = vmax.f32 %v7610_v29, 0.0  ;;  %v7612_v14 = vadd.f32 %v6094_v21, %v10154_v5 }
 0x376   :  { %v11699_v43 = vmax.f32 %v11424_v4, %v6313_v30  ;;  %v6320_v37 = vmax.f32 %v7611_v18, 0.0  ;;  %v6367_v18 = vadd.f32 %v11670_v62, %v11667_v19 }
 0x377   :  { %v11702_v52 = vmax.f32 %v11430_v16, %v6314_v51  ;;  %v6321_v23 = vmax.f32 %v7612_v14, 0.0 }
 0x378   :  { %v11705_v61 = vmax.f32 %v11442_v13, %v6320_v37  ;;  %v6368_v21 = vadd.f32 %v6367_v18, %v11699_v43 }
 0x379   :  { %v11708_v38 = vmax.f32 %v11454_v60, %v6321_v23  ;;  %v6098_v20 = vpop.f32.mrb[60].mxu0 }
 0x37a   :  { %v7613_v7 = vadd.f32 %v6098_v20, %v10167_v15  ;;  %v6100_v32 = vpop.f32.mrb[61].mxu0 }
 0x37b   :  { %v7614_v57 = vadd.f32 %v6100_v32, %v10167_v15  ;;  %v6102_v6 = vpop.f32.mrb[62].mxu0 }
 0x37c   :  { %v6327_v4 = vmax.f32 %v7613_v7, 0.0  ;;  %v7615_v54 = vadd.f32 %v6102_v6, %v10197_v35  ;;  %v6104_v31 = vpop.f32.mrb[63].mxu0 }
 0x37d   :  { %v6328_v16 = vmax.f32 %v7614_v57, 0.0  ;;  %v7616_v41 = vadd.f32 %v6104_v31, %v10197_v35  ;;  %v6386_v57 = vadd.f32 %v11686_v9, %v11683_v56 }
 0x37e   :  { %v11715_v13 = vmax.f32 %v11480_v49, %v6327_v4  ;;  %v6334_v42 = vmax.f32 %v7615_v54, 0.0 }
 0x37f   :  { %v11718_v60 = vmax.f32 %v11486_v3, %v6328_v16  ;;  %v6335_v34 = vmax.f32 %v7616_v41, 0.0 }
 0x380   :  { %v11721_v39 = vmax.f32 %v11498_v33, %v6334_v42 }
 0x381   :  { %v11724_v8 = vmax.f32 %v11507_v58, %v6335_v34  ;;  %v6377_v58 = vadd.f32 %v11676_v25, %v11673_v2 }
 0x383   :  { %v6378_v6 = vadd.f32 %v6377_v58, %v11705_v61 }
 0x391   :  { %v7517_v47 = vpop.f32.mrb[64].mxu0 }
 0x392   :  { %v7518_v46 = vpop.f32.mrb[65].mxu0 }
 0x393   :  { %v7519_v1 = vadd.f32 %v7518_v46, %v7517_v47  ;;  %v7520_v50 = vpop.f32.mrb[66].mxu0 }
 0x394   :  { %v7521_v11 = vpop.f32.mrb[67].mxu0 }
 0x395   :  { %v7522_v59 = vadd.f32 %v7521_v11, %v7520_v50  ;;  %v6248_v33 = vadd.f32 %v7519_v1, %v10124_v0  ;;  %v6369_v1 = vadd.f32 %v6368_v21, %v11702_v52  ;;  %v6387_v50 = vadd.f32 %v6386_v57, %v11715_v13 }
 0x397   :  { %v6251_v32 = vadd.f32 %v7522_v59, %v10154_v5 }
 0x399   :  { %v7523_v17 = vpop.f32.mrb[68].mxu0 }
 0x39a   :  { %v7524_v49 = vpop.f32.mrb[69].mxu0 }
 0x39b   :  { %v7525_v29 = vadd.f32 %v7524_v49, %v7523_v17  ;;  %v7526_v40 = vpop.f32.mrb[70].mxu0 }
 0x39c   :  { %v7527_v30 = vpop.f32.mrb[71].mxu0 }
 0x39d   :  { %v7528_v3 = vadd.f32 %v7527_v30, %v7526_v40  ;;  %v6379_v30 = vadd.f32 %v6378_v6, %v11708_v38 }
 0x3b5   :  { %v6194_v51 = vpop.f32.mrb[72].mxu1  ;;  %v6296_v14 = vpop.f32.mrb[72].mxu0 }
 0x3b6   :  { %v7617_v37 = vadd.f32 %v6194_v51, %v10124_v0  ;;  %v6297_v23 = vadd.f32 %v6296_v14, %v6248_v33  ;;  %v6196_v20 = vpop.f32.mrb[73].mxu1  ;;  %v6298_v7 = vpop.f32.mrb[73].mxu0  ;;  %v6388_v51 = vadd.f32 %v6387_v50, %v11718_v60 }
 0x3b7   :  { %v7618_v4 = vadd.f32 %v6196_v20, %v10124_v0  ;;  %v6198_v54 = vpop.f32.mrb[74].mxu1  ;;  %v6299_v31 = vpop.f32.mrb[74].mxu0 }
 0x3b8   :  { %v6315_v16 = vmax.f32 %v7617_v37, 0.0  ;;  %v6317_v41 = vmax.f32 %v6297_v23, 0.0  ;;  %v7619_v42 = vadd.f32 %v6198_v54, %v10154_v5  ;;  %v6300_v34 = vadd.f32 %v6299_v31, %v6251_v32  ;;  %v6200_v47 = vpop.f32.mrb[75].mxu1  ;;  %v6301_v46 = vpop.f32.mrb[75].mxu0 }
 0x3b9   :  { %v6316_v11 = vmax.f32 %v7618_v4, 0.0  ;;  %v7620_v59 = vadd.f32 %v6200_v47, %v10154_v5  ;;  %v6259_v23 = vadd.f32 %v7528_v3, %v10197_v35 }
 0x3ba   :  { %v11743_v17 = vmax.f32 %v11635_v22, %v6315_v16  ;;  %v11746_v0 = vmax.f32 %v11617_v28, %v6317_v41  ;;  %v6322_v49 = vmax.f32 %v7619_v42, 0.0  ;;  %v6324_v40 = vmax.f32 %v6300_v34, 0.0 }
 0x3bb   :  { %v11750_v18 = vmax.f32 %v11638_v26, %v6316_v11  ;;  %v6323_v33 = vmax.f32 %v7620_v59, 0.0  ;;  %v6256_v28 = vadd.f32 %v7525_v29, %v10167_v15  ;;  %v6395_v22 = vadd.f32 %v11692_v24, %v11689_v55 }
 0x3bc   :  { %v6370_v58 = vadd.f32 %v6369_v1, %v11743_v17  ;;  %v11754_v21 = vmax.f32 %v11641_v12, %v6322_v49  ;;  %v11757_v5 = vmax.f32 %v11620_v63, %v6324_v40  ;;  %v6373_v54 = vsel %vm6372_vm1, %v11746_v0, 0.0 }
 0x3bd   :  { %v11764_v26 = vmax.f32 %v11644_v27, %v6323_v33  ;;  %v6204_v14 = vpop.f32.mrb[76].mxu1  ;;  %v6304_v37 = vpop.f32.mrb[76].mxu0  ;;  %v6396_v57 = vadd.f32 %v6395_v22, %v11721_v39 }
 0x3be   :  { %v6380_v12 = vadd.f32 %v6379_v30, %v11754_v21  ;;  %v7621_v20 = vadd.f32 %v6204_v14, %v10167_v15  ;;  %v6305_v63 = vadd.f32 %v6304_v37, %v6256_v28  ;;  %v6206_v7 = vpop.f32.mrb[77].mxu1  ;;  %v6306_v32 = vpop.f32.mrb[77].mxu0  ;;  %v6371_v29 = vadd.f32 %v6370_v58, %v11750_v18 }
 0x3bf   :  { %v7622_v6 = vadd.f32 %v6206_v7, %v10167_v15  ;;  %v6208_v4 = vpop.f32.mrb[78].mxu1  ;;  %v6307_v27 = vpop.f32.mrb[78].mxu0  ;;  %v6382_v3 = vsel %vm6372_vm1, %v11757_v5, 0.0  ;;  %v6397_v28 = vadd.f32 %v6396_v57, %v11724_v8  ;;  %v6542_v7 = vld [vmem:[%s12132_s6 + $0x8] sm:$0xff]  ;;  %v6593_v32 = vld [vmem:[%s12133_s7] sm:$0xff] }
 0x3c0   :  { %v6329_v31 = vmax.f32 %v7621_v20, 0.0  ;;  %v6331_v16 = vmax.f32 %v6305_v63, 0.0  ;;  %v7623_v41 = vadd.f32 %v6208_v4, %v10197_v35  ;;  %v6308_v42 = vadd.f32 %v6307_v27, %v6259_v23  ;;  %v6210_v34 = vpop.f32.mrb[79].mxu1  ;;  %v6309_v47 = vpop.f32.mrb[79].mxu0  ;;  %v6544_v20 = vld [vmem:[%s12132_s6 + $0x18] sm:$0xff]  ;;  %v6594_v63 = vld [vmem:[%s12133_s7 + $0x8] sm:$0xff] }
 0x3c1   :  { %v6330_v46 = vmax.f32 %v7622_v6, 0.0  ;;  %v7624_v1 = vadd.f32 %v6210_v34, %v10197_v35  ;;  %v6374_v50 = vadd.f32 %v6373_v54, %v6371_v29  ;;  %v6381_v15 = vadd.f32 %v6380_v12, %v11764_v26  ;;  %v6543_v12 = vld [vmem:[%s12132_s6 + $0x10] sm:$0xff] }
 0x3c2   :  { %v11780_v11 = vmax.f32 %v11651_v48, %v6329_v31  ;;  %v11783_v59 = vmax.f32 %v11625_v45, %v6331_v16  ;;  %v6336_v49 = vmax.f32 %v7623_v41, 0.0  ;;  %v6338_v40 = vmax.f32 %v6308_v42, 0.0 }
 0x3c3   :  { %v11786_v30 = vmax.f32 %v11654_v10, %v6330_v46  ;;  %v6337_v33 = vmax.f32 %v7624_v1, 0.0  ;;  %6375 = vadd.xlane.f32.xlu0 %v6374_v50  ;;  %v6383_v58 = vadd.f32 %v6382_v3, %v6381_v15 }
 0x3c4   :  { %v6389_v35 = vadd.f32 %v6388_v51, %v11780_v11  ;;  %v11791_v22 = vmax.f32 %v11657_v53, %v6336_v49  ;;  %v11794_v48 = vmax.f32 %v11628_v44, %v6338_v40  ;;  %v6391_v37 = vsel %vm6372_vm1, %v11783_v59, 0.0 }
 0x3c5   :  { %v11797_v45 = vmax.f32 %v11660_v36, %v6337_v33  ;;  %6384 = vadd.xlane.f32.xlu1 %v6383_v58  ;;  %v6541_v36 = vld [vmem:[%s12132_s6] sm:$0xff] }
 0x3c6   :  { %v6398_v10 = vadd.f32 %v6397_v28, %v11791_v22  ;;  %v6390_v14 = vadd.f32 %v6389_v35, %v11786_v30  ;;  %v6400_v53 = vsel %vm6372_vm1, %v11794_v48, 0.0 }
 0x3c8   :  { %v6392_v23 = vadd.f32 %v6391_v37, %v6390_v14  ;;  %v6399_v51 = vadd.f32 %v6398_v10, %v11797_v45 }
 0x3ca   :  { %6393 = vadd.xlane.f32.xlu0 %v6392_v23  ;;  %v6401_v44 = vadd.f32 %v6400_v53, %v6399_v51 }
 0x3ce   :  { %6402 = vadd.xlane.f32.xlu0 %v6401_v44 }
 0x3d6   :  { %6547 = vperm.xlu1 %7723, %v6541_v36  }
 0x3da   :  { %6557 = vperm.xlu1 %7723, %v6543_v12  }
 0x3de   :  { %6562 = vperm.xlu1 %7723, %v6544_v20  }
 0x3e2   :  { %6604 = vperm.xlu1 %7723, %v6594_v63  }
 0x3e4   :  { %6552 = vperm.xlu0 %7722, %v6542_v7  }
 0x3e8   :  { %6599 = vperm.xlu0 %7722, %v6593_v32  }
 0x450   :  { %v6376_v29 = vpop.xlane.xlu0 %6375 }
 0x451   :  { %v6405_v57 = vmul.f32 0.00125, %v6376_v29 }
 0x452   :  { %v6385_v6 = vpop.xlane.xlu1 %6384 }
 0x453   :  { %v6406_v4 = vmul.f32 0.00125, %v6385_v6  ;;  %v11825_v27 = vsub.f32 %v11667_v19, %v6405_v57  ;;  %v11828_v54 = vsub.f32 %v11670_v62, %v6405_v57  ;;  %v11831_v3 = vsub.f32 %v11699_v43, %v6405_v57 }
 0x454   :  { %v11834_v31 = vsub.f32 %v11702_v52, %v6405_v57  ;;  %v11837_v16 = vsub.f32 %v11746_v0, %v6405_v57  ;;  %v11847_v62 = vsub.f32 %v11743_v17, %v6405_v57  ;;  %v11850_v43 = vsub.f32 %v11750_v18, %v6405_v57 }
 0x455   :  { %v6437_v41 = vmul.f32 %v11825_v27, %v11825_v27  ;;  %v6438_v42 = vmul.f32 %v11828_v54, %v11828_v54  ;;  %v11844_v19 = vsub.f32 %v11673_v2, %v6406_v4  ;;  %v6439_v0 = vmul.f32 %v11831_v3, %v11831_v3 }
 0x456   :  { %v11855_v47 = vsub.f32 %v11676_v25, %v6406_v4  ;;  %v11858_v46 = vsub.f32 %v11705_v61, %v6406_v4  ;;  %v6440_v2 = vmul.f32 %v11834_v31, %v11834_v31  ;;  %v6443_v17 = vmul.f32 %v11837_v16, %v11837_v16 }
 0x457   :  { %v6394_v52 = vpop.xlane.xlu0 %6393  ;;  %v6465_v34 = vadd.f32 %v6438_v42, %v6437_v41  ;;  %v11865_v18 = vsub.f32 %v11708_v38, %v6406_v4  ;;  %v11868_v15 = vsub.f32 %v11754_v21, %v6406_v4  ;;  %v6444_v25 = vmul.f32 %v11844_v19, %v11844_v19 }
 0x458   :  { %v6407_v1 = vmul.f32 0.00125, %v6394_v52  ;;  %v6445_v61 = vmul.f32 %v11855_v47, %v11855_v47  ;;  %v6441_v49 = vmul.f32 %v11847_v62, %v11847_v62  ;;  %v6442_v40 = vmul.f32 %v11850_v43, %v11850_v43 }
 0x459   :  { %v6466_v50 = vadd.f32 %v6465_v34, %v6439_v0  ;;  %v11879_v33 = vsub.f32 %v11764_v26, %v6406_v4  ;;  %v11882_v38 = vsub.f32 %v11757_v5, %v6406_v4  ;;  %v6446_v28 = vmul.f32 %v11858_v46, %v11858_v46 }
 0x45a   :  { %v6474_v35 = vadd.f32 %v6445_v61, %v6444_v25  ;;  %v11887_v10 = vsub.f32 %v11683_v56, %v6407_v1  ;;  %v6470_v14 = vsel %vm6372_vm1, %v6443_v17, 0.0  ;;  %v6447_v37 = vmul.f32 %v11865_v18, %v11865_v18 }
 0x45b   :  { %v6403_v21 = vpop.xlane.xlu0 %6402  ;;  %v6467_v58 = vadd.f32 %v6466_v50, %v6440_v2  ;;  %v11893_v26 = vsub.f32 %v11686_v9, %v6407_v1  ;;  %v11896_v5 = vsub.f32 %v11715_v13, %v6407_v1  ;;  %v6448_v53 = vmul.f32 %v11868_v15, %v11868_v15 }
 0x45c   :  { %v6408_v23 = vmul.f32 0.00125, %v6403_v21  ;;  %v6475_v44 = vadd.f32 %v6474_v35, %v6446_v28  ;;  %v6449_v56 = vmul.f32 %v11879_v33, %v11879_v33  ;;  %v11903_v36 = vsub.f32 %v11718_v60, %v6407_v1 }
 0x45d   :  { %v6468_v51 = vadd.f32 %v6467_v58, %v6441_v49  ;;  %v6451_v12 = vmul.f32 %v11887_v10, %v11887_v10  ;;  %v6452_v9 = vmul.f32 %v11893_v26, %v11893_v26  ;;  %v6450_v20 = vmul.f32 %v11882_v38, %v11882_v38 }
 0x45e   :  { %v6476_v63 = vadd.f32 %v6475_v44, %v6447_v37  ;;  %v11912_v7 = vsub.f32 %v11780_v11, %v6407_v1  ;;  %v11915_v32 = vsub.f32 %v11786_v30, %v6407_v1  ;;  %v11918_v60 = vsub.f32 %v11783_v59, %v6407_v1 }
 0x45f   :  { %v6469_v13 = vadd.f32 %v6468_v51, %v6442_v40  ;;  %v6453_v29 = vmul.f32 %v11896_v5, %v11896_v5  ;;  %v6483_v57 = vadd.f32 %v6452_v9, %v6451_v12  ;;  %v11923_v41 = vsub.f32 %v11689_v55, %v6408_v23  ;;  %v6596_v12 = vld [vmem:[%s12133_s7 + $0x18] sm:$0xff]  ;;  %v6595_v9 = vld [vmem:[%s12133_s7 + $0x10] sm:$0xff] }
 0x460   :  { %v6477_v4 = vadd.f32 %v6476_v63, %v6448_v53  ;;  %v11926_v42 = vsub.f32 %v11692_v24, %v6408_v23  ;;  %v6454_v11 = vmul.f32 %v11903_v36, %v11903_v36  ;;  %v11931_v52 = vsub.f32 %v11721_v39, %v6408_v23 }
 0x461   :  { %v6471_v6 = vadd.f32 %v6470_v14, %v6469_v13  ;;  %v6484_v30 = vadd.f32 %v6483_v57, %v6453_v29  ;;  %v6479_v0 = vsel %vm6372_vm1, %v6450_v20, 0.0  ;;  %v6455_v34 = vmul.f32 %v11912_v7, %v11912_v7  ;;  %v6548_v13 = vpop.permute.xlu1 %6547 }
 0x462   :  { %v6478_v59 = vadd.f32 %v6477_v4, %v6449_v56  ;;  %v11937_v55 = vsub.f32 %v11724_v8, %v6408_v23  ;;  %v6458_v24 = vmul.f32 %v11923_v41, %v11923_v41  ;;  %v6459_v2 = vmul.f32 %v11926_v42, %v11926_v42 }
 0x463   :  { %6472 = vadd.xlane.f32.xlu1 %v6471_v6  ;;  %v6485_v1 = vadd.f32 %v6484_v30, %v6454_v11  ;;  %v6456_v39 = vmul.f32 %v11915_v32, %v11915_v32  ;;  %v6457_v50 = vmul.f32 %v11918_v60, %v11918_v60  ;;  %v11948_v61 = vsub.f32 %v11791_v22, %v6408_v23  ;;  %v11978_v29 = vpop.permute.xlu0 %6552 }
 0x464   :  { %v6480_v17 = vadd.f32 %v6479_v0, %v6478_v59  ;;  %v6460_v8 = vmul.f32 %v11931_v52, %v11931_v52  ;;  %v6492_v49 = vadd.f32 %v6459_v2, %v6458_v24  ;;  %v11953_v40 = vsub.f32 %v11794_v48, %v6408_v23 }
 0x465   :  { %v6486_v25 = vadd.f32 %v6485_v1, %v6455_v34  ;;  %v11956_v58 = vsub.f32 %v11797_v45, %v6408_v23  ;;  %v6461_v28 = vmul.f32 %v11937_v55, %v11937_v55  ;;  %v6488_v14 = vsel %vm6372_vm1, %v6457_v50, 0.0  ;;  %v11974_v20 = vpop.permute.xlu1 %6557 }
 0x466   :  { %6481 = vadd.xlane.f32.xlu0 %v6480_v17  ;;  %v6493_v35 = vadd.f32 %v6492_v49, %v6460_v8  ;;  %v6462_v37 = vmul.f32 %v11948_v61, %v11948_v61  ;;  %v6464_v53 = vmul.f32 %v11953_v40, %v11953_v40 }
 0x467   :  { %v6487_v21 = vadd.f32 %v6486_v25, %v6456_v39  ;;  %v6463_v48 = vmul.f32 %v11956_v58, %v11956_v58  ;;  %v6600_v6 = vpop.permute.xlu0 %6599 }
 0x468   :  { %v6494_v51 = vadd.f32 %v6493_v35, %v6461_v28  ;;  %v6497_v44 = vsel %vm6372_vm1, %v6464_v53, 0.0 }
 0x469   :  { %v6489_v22 = vadd.f32 %v6488_v14, %v6487_v21  ;;  %v11976_v63 = vpop.permute.xlu1 %6562 }
 0x46a   :  { %v6495_v45 = vadd.f32 %v6494_v51, %v6462_v37 }
 0x46b   :  { %6490 = vadd.xlane.f32.xlu1 %v6489_v22 }
 0x46c   :  { %v6496_v23 = vadd.f32 %v6495_v45, %v6463_v48 }
 0x46d   :  { %v11980_v57 = vpop.permute.xlu1 %6604 }
 0x46e   :  { %v6498_v56 = vadd.f32 %v6497_v44, %v6496_v23 }
 0x470   :  { %6499 = vadd.xlane.f32.xlu0 %v6498_v56 }
 0x47c   :  { %6614 = vperm.xlu1 %7723, %v6596_v12  }
 0x486   :  { %6609 = vperm.xlu0 %7722, %v6595_v9  }
 0x4f0   :  { %v6473_v4 = vpop.xlane.xlu1 %6472 }
 0x4f1   :  { %v6501_v11 = vmul.f32 0.00125, %v6473_v4 }
 0x4f3   :  { %v6505_v30 = vadd.f32 1e-05, %v6501_v11  ;;  %v6482_v59 = vpop.xlane.xlu0 %6481 }
 0x4f4   :  { %v6502_v0 = vmul.f32 0.00125, %v6482_v59 }
 0x4f5   :  { %8736 = vrsqrt.f32 %v6505_v30 }
 0x4f6   :  { %v6506_v34 = vadd.f32 1e-05, %v6502_v0 }
 0x4f8   :  { %8738 = vrsqrt.f32 %v6506_v34  ;;  %v6491_v1 = vpop.xlane.xlu1 %6490 }
 0x4f9   :  { %v6503_v24 = vmul.f32 0.00125, %v6491_v1 }
 0x4fb   :  { %v6507_v2 = vadd.f32 1e-05, %v6503_v24 }
 0x4fd   :  { %8740 = vrsqrt.f32 %v6507_v2  ;;  %v6500_v39 = vpop.xlane.xlu0 %6499 }
 0x4fe   :  { %v6504_v14 = vmul.f32 0.00125, %v6500_v39 }
 0x4ff   :  { %v8737_v17 = vpop.eup %8736 }
 0x500   :  { %v6513_v50 = vmul.f32 %v8737_v17, %v11825_v27  ;;  %v6514_v25 = vmul.f32 %v8737_v17, %v11828_v54  ;;  %v6515_v8 = vmul.f32 %v8737_v17, %v11831_v3  ;;  %v6516_v49 = vmul.f32 %v8737_v17, %v11834_v31 }
 0x501   :  { %v6517_v21 = vmul.f32 %v8737_v17, %v11847_v62  ;;  %v6518_v28 = vmul.f32 %v8737_v17, %v11850_v43  ;;  %v6519_v35 = vmul.f32 %v8737_v17, %v11837_v16  ;;  %v6508_v54 = vadd.f32 1e-05, %v6504_v14 }
 0x502   :  { %v6565_v22 = vmul.f32 %v6548_v13, %v6513_v50  ;;  %v6566_v37 = vmul.f32 %v6548_v13, %v6514_v25  ;;  %v6567_v51 = vmul.f32 %v6548_v13, %v6515_v8  ;;  %v6568_v53 = vmul.f32 %v6548_v13, %v6516_v49  ;;  %v8739_v48 = vpop.eup %8738 }
 0x503   :  { %v6569_v45 = vmul.f32 %v6548_v13, %v6517_v21  ;;  %v6570_v27 = vmul.f32 %v6548_v13, %v6518_v28  ;;  %v6571_v23 = vmul.f32 %v6548_v13, %v6519_v35  ;;  %v6520_v43 = vmul.f32 %v8739_v48, %v11844_v19 }
 0x504   :  { %v6617_v44 = vadd.f32 %v6600_v6, %v6565_v22  ;;  %v6618_v3 = vadd.f32 %v6600_v6, %v6566_v37  ;;  %v6619_v56 = vadd.f32 %v6600_v6, %v6567_v51  ;;  %v6620_v31 = vadd.f32 %v6600_v6, %v6568_v53 }
 0x505   :  { %v6621_v12 = vadd.f32 %v6600_v6, %v6569_v45  ;;  %v6622_v62 = vadd.f32 %v6600_v6, %v6570_v27  ;;  %v6623_v9 = vadd.f32 %v6600_v6, %v6571_v23  ;;  %v6521_v16 = vmul.f32 %v8739_v48, %v11855_v47  ;;  %v6610_v28 = vpop.permute.xlu0 %6609 }
 0x506   :  { %6645 = vst [vmem:[%s12134_s8] sm:$0xff] %v6617_v44  ;;  %6646 = vst [vmem:[%s12134_s8 + $0x8] sm:$0xff] %v6618_v3  ;;  %v6522_v19 = vmul.f32 %v8739_v48, %v11858_v46  ;;  %v6523_v13 = vmul.f32 %v8739_v48, %v11865_v18  ;;  %v6524_v6 = vmul.f32 %v8739_v48, %v11868_v15  ;;  %8742 = vrsqrt.f32 %v6508_v54 }
 0x507   :  { %6647 = vst [vmem:[%s12134_s8 + $0x10] sm:$0xff] %v6619_v56  ;;  %6648 = vst [vmem:[%s12134_s8 + $0x18] sm:$0xff] %v6620_v31  ;;  %v6525_v47 = vmul.f32 %v8739_v48, %v11879_v33  ;;  %v6526_v46 = vmul.f32 %v8739_v48, %v11882_v38  ;;  %v6572_v18 = vmul.f32 %v11978_v29, %v6520_v43  ;;  %v8741_v15 = vpop.eup %8740  ;;  %v6615_v31 = vpop.permute.xlu1 %6614 }
 0x508   :  { %6649 = vst [vmem:[%s12134_s8 + $0x20] sm:$0xff] %v6621_v12  ;;  %6650 = vst [vmem:[%s12134_s8 + $0x28] sm:$0xff] %v6622_v62  ;;  %v6573_v4 = vmul.f32 %v11978_v29, %v6521_v16  ;;  %v6574_v11 = vmul.f32 %v11978_v29, %v6522_v19  ;;  %v6575_v30 = vmul.f32 %v11978_v29, %v6523_v13 }
 0x509   :  { %6651 = vst.msk [vmem:[%s12134_s8 + $0x30] sm:$0xff] %vm6372_vm1, %v6623_v9  ;;  %v6576_v59 = vmul.f32 %v11978_v29, %v6524_v6  ;;  %v6577_v0 = vmul.f32 %v11978_v29, %v6525_v47  ;;  %v6578_v34 = vmul.f32 %v11978_v29, %v6526_v46  ;;  %v6624_v33 = vadd.f32 %v11980_v57, %v6572_v18 }
 0x50a   :  { %v6527_v38 = vmul.f32 %v8741_v15, %v11887_v10  ;;  %v6625_v1 = vadd.f32 %v11980_v57, %v6573_v4  ;;  %v6626_v24 = vadd.f32 %v11980_v57, %v6574_v11  ;;  %v6627_v2 = vadd.f32 %v11980_v57, %v6575_v30 }
 0x50b   :  { %v6628_v17 = vadd.f32 %v11980_v57, %v6576_v59  ;;  %v6629_v39 = vadd.f32 %v11980_v57, %v6577_v0  ;;  %v6630_v50 = vadd.f32 %v11980_v57, %v6578_v34  ;;  %6652 = vst [vmem:[%s12134_s8 + $0x38] sm:$0xff] %v6624_v33  ;;  %v6528_v29 = vmul.f32 %v8741_v15, %v11893_v26 }
 0x50c   :  { %v6529_v10 = vmul.f32 %v8741_v15, %v11896_v5  ;;  %6653 = vst [vmem:[%s12134_s8 + $0x40] sm:$0xff] %v6625_v1  ;;  %6654 = vst [vmem:[%s12134_s8 + $0x48] sm:$0xff] %v6626_v24  ;;  %v6530_v26 = vmul.f32 %v8741_v15, %v11903_v36  ;;  %v6531_v5 = vmul.f32 %v8741_v15, %v11912_v7 }
 0x50d   :  { %6655 = vst [vmem:[%s12134_s8 + $0x50] sm:$0xff] %v6627_v2  ;;  %6656 = vst [vmem:[%s12134_s8 + $0x58] sm:$0xff] %v6628_v17  ;;  %v6532_v57 = vmul.f32 %v8741_v15, %v11915_v32  ;;  %v6533_v25 = vmul.f32 %v8741_v15, %v11918_v60  ;;  %v6579_v8 = vmul.f32 %v11974_v20, %v6527_v38 }
 0x50e   :  { %6657 = vst [vmem:[%s12134_s8 + $0x60] sm:$0xff] %v6629_v39  ;;  %6658 = vst.msk [vmem:[%s12134_s8 + $0x68] sm:$0xff] %vm6372_vm1, %v6630_v50  ;;  %v6580_v49 = vmul.f32 %v11974_v20, %v6528_v29  ;;  %v6581_v36 = vmul.f32 %v11974_v20, %v6529_v10  ;;  %v6582_v7 = vmul.f32 %v11974_v20, %v6530_v26 }
 0x50f   :  { %v6583_v32 = vmul.f32 %v11974_v20, %v6531_v5  ;;  %v6584_v60 = vmul.f32 %v11974_v20, %v6532_v57  ;;  %v6585_v21 = vmul.f32 %v11974_v20, %v6533_v25  ;;  %v6631_v35 = vadd.f32 %v6610_v28, %v6579_v8 }
 0x510   :  { %v6632_v14 = vadd.f32 %v6610_v28, %v6580_v49  ;;  %v6633_v22 = vadd.f32 %v6610_v28, %v6581_v36  ;;  %v6634_v37 = vadd.f32 %v6610_v28, %v6582_v7  ;;  %v8743_v45 = vpop.eup %8742 }
 0x511   :  { %v6635_v51 = vadd.f32 %v6610_v28, %v6583_v32  ;;  %v6636_v53 = vadd.f32 %v6610_v28, %v6584_v60  ;;  %v6637_v48 = vadd.f32 %v6610_v28, %v6585_v21  ;;  %6659 = vst [vmem:[%s12134_s8 + $0x70] sm:$0xff] %v6631_v35  ;;  %v6534_v20 = vmul.f32 %v8743_v45, %v11923_v41 }
 0x512   :  { %6660 = vst [vmem:[%s12134_s8 + $0x78] sm:$0xff] %v6632_v14  ;;  %6661 = vst [vmem:[%s12134_s8 + $0x80] sm:$0xff] %v6633_v22  ;;  %v6535_v27 = vmul.f32 %v8743_v45, %v11926_v42  ;;  %v6536_v23 = vmul.f32 %v8743_v45, %v11931_v52  ;;  %v6537_v54 = vmul.f32 %v8743_v45, %v11937_v55 }
 0x513   :  { %6662 = vst [vmem:[%s12134_s8 + $0x88] sm:$0xff] %v6634_v37  ;;  %6663 = vst [vmem:[%s12134_s8 + $0x90] sm:$0xff] %v6635_v51  ;;  %v6538_v41 = vmul.f32 %v8743_v45, %v11948_v61  ;;  %v6539_v42 = vmul.f32 %v8743_v45, %v11956_v58  ;;  %v6540_v52 = vmul.f32 %v8743_v45, %v11953_v40 }
 0x514   :  { %6664 = vst [vmem:[%s12134_s8 + $0x98] sm:$0xff] %v6636_v53  ;;  %6665 = vst.msk [vmem:[%s12134_s8 + $0xa0] sm:$0xff] %vm6372_vm1, %v6637_v48  ;;  %v6586_v55 = vmul.f32 %v11976_v63, %v6534_v20  ;;  %v6587_v44 = vmul.f32 %v11976_v63, %v6535_v27  ;;  %v6588_v3 = vmul.f32 %v11976_v63, %v6536_v23 }
 0x515   :  { %v6589_v56 = vmul.f32 %v11976_v63, %v6537_v54  ;;  %v6590_v12 = vmul.f32 %v11976_v63, %v6538_v41  ;;  %v6591_v62 = vmul.f32 %v11976_v63, %v6539_v42  ;;  %v6592_v9 = vmul.f32 %v11976_v63, %v6540_v52 }
 0x516   :  { %v6638_v61 = vadd.f32 %v6615_v31, %v6586_v55  ;;  %v6639_v43 = vadd.f32 %v6615_v31, %v6587_v44  ;;  %v6640_v58 = vadd.f32 %v6615_v31, %v6588_v3 }
 0x517   :  { %v6641_v16 = vadd.f32 %v6615_v31, %v6589_v56  ;;  %v6642_v40 = vadd.f32 %v6615_v31, %v6590_v12  ;;  %v6643_v19 = vadd.f32 %v6615_v31, %v6591_v62  ;;  %v6644_v13 = vadd.f32 %v6615_v31, %v6592_v9 }
 0x518   :  { %6666 = vst [vmem:[%s12134_s8 + $0xa8] sm:$0xff] %v6638_v61  ;;  %6667 = vst [vmem:[%s12134_s8 + $0xb0] sm:$0xff] %v6639_v43 }
 0x519   :  { %6668 = vst [vmem:[%s12134_s8 + $0xb8] sm:$0xff] %v6640_v58  ;;  %6669 = vst [vmem:[%s12134_s8 + $0xc0] sm:$0xff] %v6641_v16 }
 0x51a   :  { %6670 = vst [vmem:[%s12134_s8 + $0xc8] sm:$0xff] %v6642_v40  ;;  %6671 = vst [vmem:[%s12134_s8 + $0xd0] sm:$0xff] %v6643_v19 }
 0x51b   :  { %6672 = vst.msk [vmem:[%s12134_s8 + $0xd8] sm:$0xff] %vm6372_vm1, %v6644_v13 }

// kernel: net_forward.6
= control target key start
LH: loop header
LB: loop body
LE: loop exit
PB: predicated region body
PF: predicated region fallthrough
CT: control target
= control target key end

     0   :  { %v4271_v1 = vmov 0   ;;  %vm650_vm0 = vcmask 261120   ;;  %s5636_s0 = inlined_call_operand.vmem [shape: bf16[800,128], index: 0, kind: input, shape index: {}]   ;;  %s5637_s4 = inlined_call_operand.vmem [shape: bf16[64,800], index: 4, kind: input, shape index: {}]   ;;  %s5638_s1 = inlined_call_operand.vmem [shape: bf16[800,128], index: 1, kind: input, shape index: {}]   ;;  %s5639_s5 = inlined_call_operand.vmem [shape: f32[64,1], index: 5, kind: input, shape index: {}]   ;;  %s5640_s2 = inlined_call_operand.vmem [shape: bf16[800,128], index: 2, kind: input, shape index: {}]   ;;  %s5641_s3 = inlined_call_operand.vmem [shape: bf16[800,128], index: 3, kind: input, shape index: {}]   ;;  %s5642_s6 = inlined_call_operand.vmem [shape: f32[64,1], index: 6, kind: input, shape index: {}]   ;;  %s5643_s7 = inlined_call_operand.vmem [shape: f32[64,1], index: 7, kind: input, shape index: {}]   ;;  %s5644_s8 = inlined_call_operand.vmem [shape: f32[64,128], index: 8, kind: output, shape index: {}]  }
   0x1   :  { %v3987_v0 = vld [vmem:[%s5636_s0 + $0x40] sm:$0xff]   ;;  %3985 = vset.pattern.permute.xlu0 %v4271_v1  ;;  %3986 = vset.pattern.permute.xlu1 %v4271_v1  ;;  %v3991_v5 = vld [vmem:[%s5636_s0 + $0x48] sm:$0xff]   ;;  %v3995_v9 = vld [vmem:[%s5636_s0 + $0x50] sm:$0xff]  }
   0x2   :  { %v3988_v2 = vld [vmem:[%s5636_s0 + $0xc0] sm:$0xff]   ;;  %3416 = vmatprep.subr.bf16.mxu0 %v3987_v0  ;;  %v3992_v6 = vld [vmem:[%s5636_s0 + $0xc8] sm:$0xff]   ;;  %v3996_v10 = vld [vmem:[%s5636_s0 + $0xd0] sm:$0xff]  }
   0x3   :  { %v3989_v3 = vld [vmem:[%s5636_s0] sm:$0xff]   ;;  %3456 = vmatprep.subr.bf16.mxu1 %v3988_v2  ;;  %v3993_v7 = vld [vmem:[%s5636_s0 + $0x8] sm:$0xff]   ;;  %v3997_v11 = vld [vmem:[%s5636_s0 + $0x10] sm:$0xff]  }
   0x4   :  { %v3990_v4 = vld [vmem:[%s5636_s0 + $0x80] sm:$0xff]   ;;  %3417 = vmatpush3.bf16.msra.mxu0 %v3989_v3  ;;  %v3994_v8 = vld [vmem:[%s5636_s0 + $0x88] sm:$0xff]   ;;  %v3998_v12 = vld [vmem:[%s5636_s0 + $0x90] sm:$0xff]  }
   0x5   :  { %3457 = vmatpush3.bf16.msra.mxu1 %v3990_v4  ;;  %3418 = vmatprep.subr.bf16.mxu0 %v3991_v5  ;;  %v3999_v13 = vld [vmem:[%s5636_s0 + $0x58] sm:$0xff]   ;;  %v4003_v17 = vld [vmem:[%s5636_s0 + $0x60] sm:$0xff]   ;;  %v4007_v21 = vld [vmem:[%s5636_s0 + $0x68] sm:$0xff]  }
   0x6   :  { %3458 = vmatprep.subr.bf16.mxu1 %v3992_v6  ;;  %v4000_v14 = vld [vmem:[%s5636_s0 + $0xd8] sm:$0xff]   ;;  %v4004_v18 = vld [vmem:[%s5636_s0 + $0xe0] sm:$0xff]   ;;  %v4008_v22 = vld [vmem:[%s5636_s0 + $0xe8] sm:$0xff]  }
   0x7   :  { %v4001_v15 = vld [vmem:[%s5636_s0 + $0x18] sm:$0xff]   ;;  %v4005_v19 = vld [vmem:[%s5636_s0 + $0x20] sm:$0xff]   ;;  %v4009_v23 = vld [vmem:[%s5636_s0 + $0x28] sm:$0xff]  }
   0x8   :  { %3419 = vmatpush3.bf16.msra.mxu0 %v3993_v7  ;;  %v4002_v16 = vld [vmem:[%s5636_s0 + $0x98] sm:$0xff]   ;;  %v4006_v20 = vld [vmem:[%s5636_s0 + $0xa0] sm:$0xff]   ;;  %v4010_v24 = vld [vmem:[%s5636_s0 + $0xa8] sm:$0xff]  }
   0x9   :  { %3459 = vmatpush3.bf16.msra.mxu1 %v3994_v8  ;;  %3420 = vmatprep.subr.bf16.mxu0 %v3995_v9  ;;  %v4011_v25 = vld [vmem:[%s5636_s0 + $0x70] sm:$0xff]   ;;  %v4015_v29 = vld [vmem:[%s5636_s0 + $0x78] sm:$0xff]   ;;  %v4416_v33 = vld [vmem:[%s5637_s4 + $0x4] ss:$28 sps:$4 sm:$0xff]  }
   0xa   :  { %3460 = vmatprep.subr.bf16.mxu1 %v3996_v10  ;;  %v4012_v26 = vld [vmem:[%s5636_s0 + $0xf0] sm:$0xff]   ;;  %v4016_v30 = vld [vmem:[%s5636_s0 + $0xf8] sm:$0xff]   ;;  %v4421_v34 = vld [vmem:[%s5637_s4 + $0xc] ss:$28 sps:$4 sm:$0xff]   ;;  %695 = vmatprep.mubr.bf16.mxu0 %v4416_v33 }
   0xb   :  { %v4013_v27 = vld [vmem:[%s5636_s0 + $0x30] sm:$0xff]   ;;  %v4017_v31 = vld [vmem:[%s5636_s0 + $0x38] sm:$0xff]   ;;  %v4432_v36 = vld [vmem:[%s5637_s4 + $0x8] ss:$28 sps:$4 sm:$0xff]   ;;  %760 = vmatprep.mubr.bf16.mxu1 %v4421_v34 }
   0xc   :  { %3421 = vmatpush3.bf16.msra.mxu0 %v3997_v11  ;;  %v4014_v28 = vld [vmem:[%s5636_s0 + $0xb0] sm:$0xff]   ;;  %v4018_v32 = vld [vmem:[%s5636_s0 + $0xb8] sm:$0xff]   ;;  %v4025_v37 = vld [vmem:[%s5636_s0 + $0x140] sm:$0xff]  }
   0xd   :  { %3461 = vmatpush3.bf16.msra.mxu1 %v3998_v12  ;;  %3422 = vmatprep.subr.bf16.mxu0 %v3999_v13  ;;  %v4427_v35 = vld [vmem:[%s5637_s4] ss:$28 sps:$4 sm:$0xff]   ;;  %v4028_v40 = vld [vmem:[%s5636_s0 + $0x148] sm:$0xff]   ;;  %v4465_v44 = vld [vmem:[%s5637_s4 + $0x38] ss:$28 sps:$4 sm:$0xff]  }
   0xe   :  { %3462 = vmatprep.subr.bf16.mxu1 %v4000_v14  ;;  %v4026_v38 = vld [vmem:[%s5636_s0 + $0x100] sm:$0xff]   ;;  %v4029_v41 = vld [vmem:[%s5636_s0 + $0x108] sm:$0xff]   ;;  %v4455_v42 = vld [vmem:[%s5637_s4 + $0x3c] ss:$28 sps:$4 sm:$0xff]  }
   0xf   :  { %v4027_v39 = vld [vmem:[%s5636_s0 + $0x180] sm:$0xff]   ;;  %v4036_v46 = vld [vmem:[%s5636_s0 + $0x150] sm:$0xff]   ;;  %v4038_v48 = vld [vmem:[%s5636_s0 + $0x158] sm:$0xff]  }
  0x10   :  { %3423 = vmatpush3.bf16.msra.mxu0 %v4001_v15  ;;  %v4460_v43 = vld [vmem:[%s5637_s4 + $0x44] ss:$28 sps:$4 sm:$0xff]   ;;  %v4037_v47 = vld [vmem:[%s5636_s0 + $0x110] sm:$0xff]   ;;  %v4039_v49 = vld [vmem:[%s5636_s0 + $0x118] sm:$0xff]  }
  0x11   :  { %3463 = vmatpush3.bf16.msra.mxu1 %v4002_v16  ;;  %3424 = vmatprep.subr.bf16.mxu0 %v4003_v17  ;;  %v4471_v45 = vld [vmem:[%s5637_s4 + $0x40] ss:$28 sps:$4 sm:$0xff]   ;;  %v4491_v50 = vld [vmem:[%s5637_s4 + $0x74] ss:$28 sps:$4 sm:$0xff]   ;;  %v4048_v56 = vld [vmem:[%s5636_s0 + $0x188] sm:$0xff]  }
  0x12   :  { %3464 = vmatprep.subr.bf16.mxu1 %v4004_v18  ;;  %v4496_v51 = vld [vmem:[%s5637_s4 + $0x7c] ss:$28 sps:$4 sm:$0xff]   ;;  %v4501_v52 = vld [vmem:[%s5637_s4 + $0x70] ss:$28 sps:$4 sm:$0xff]   ;;  %v4046_v54 = vld [vmem:[%s5636_s0 + $0x160] sm:$0xff]  }
  0x13   :  { %v4506_v53 = vld [vmem:[%s5637_s4 + $0x78] ss:$28 sps:$4 sm:$0xff]   ;;  %v4047_v55 = vld [vmem:[%s5636_s0 + $0x120] sm:$0xff]   ;;  %v4049_v57 = vld [vmem:[%s5636_s0 + $0x168] sm:$0xff]  }
  0x14   :  { %3425 = vmatpush3.bf16.msra.mxu0 %v4005_v19  ;;  %v4050_v58 = vld [vmem:[%s5636_s0 + $0x128] sm:$0xff]   ;;  %v4535_v60 = vld [vmem:[%s5637_s4 + $0xb4] ss:$28 sps:$4 sm:$0xff]   ;;  %v4059_v1 = vld [vmem:[%s5636_s0 + $0x178] sm:$0xff]  }
  0x15   :  { %3465 = vmatpush3.bf16.msra.mxu1 %v4006_v20  ;;  %3426 = vmatprep.subr.bf16.mxu0 %v4007_v21  ;;  %v4530_v59 = vld [vmem:[%s5637_s4 + $0xac] ss:$28 sps:$4 sm:$0xff]   ;;  %v4057_v63 = vld [vmem:[%s5636_s0 + $0x170] sm:$0xff]   ;;  %v4060_v2 = vld [vmem:[%s5636_s0 + $0x138] sm:$0xff]  }
  0x16   :  { %3466 = vmatprep.subr.bf16.mxu1 %v4008_v22  ;;  %v4541_v61 = vld [vmem:[%s5637_s4 + $0xa8] ss:$28 sps:$4 sm:$0xff]   ;;  %v4546_v62 = vld [vmem:[%s5637_s4 + $0xb0] ss:$28 sps:$4 sm:$0xff]   ;;  %v4571_v4 = vld [vmem:[%s5637_s4 + $0x18] ss:$28 sps:$4 sm:$0xff]  }
  0x17   :  { %v4058_v0 = vld [vmem:[%s5636_s0 + $0x130] sm:$0xff]   ;;  %v4065_v6 = vld [vmem:[%s5638_s1 + $0xc0] sm:$0xff]   ;;  %v4070_v11 = vld [vmem:[%s5638_s1 + $0xc8] sm:$0xff]  }
  0x18   :  { %3427 = vmatpush3.bf16.msra.mxu0 %v4009_v23  ;;  %v4566_v3 = vld [vmem:[%s5637_s4 + $0x14] ss:$28 sps:$4 sm:$0xff]   ;;  %v4067_v8 = vld [vmem:[%s5638_s1 + $0x40] sm:$0xff]   ;;  %v4071_v12 = vld [vmem:[%s5638_s1 + $0x48] sm:$0xff]  }
  0x19   :  { %3467 = vmatpush3.bf16.msra.mxu1 %v4010_v24  ;;  %3428 = vmatprep.subr.bf16.mxu0 %v4011_v25  ;;  %v4576_v5 = vld [vmem:[%s5637_s4 + $0x10] ss:$28 sps:$4 sm:$0xff]   ;;  %v4068_v9 = vld [vmem:[%s5638_s1 + $0x80] sm:$0xff]   ;;  %v4081_v21 = vld [vmem:[%s5638_s1 + $0xd8] sm:$0xff]  }
  0x1a   :  { %3468 = vmatprep.subr.bf16.mxu1 %v4012_v26  ;;  %v4587_v7 = vld [vmem:[%s5637_s4 + $0x50] ss:$28 sps:$4 sm:$0xff]   ;;  %v4069_v10 = vld [vmem:[%s5638_s1] sm:$0xff]   ;;  %v4082_v22 = vld [vmem:[%s5638_s1 + $0x58] sm:$0xff]  }
  0x1b   :  { %v4072_v13 = vld [vmem:[%s5638_s1 + $0x88] sm:$0xff]   ;;  %v4076_v16 = vld [vmem:[%s5638_s1 + $0xd0] sm:$0xff]   ;;  %v4083_v23 = vld [vmem:[%s5638_s1 + $0x98] sm:$0xff]  }
  0x1c   :  { %3429 = vmatpush3.bf16.msra.mxu0 %v4013_v27  ;;  %v4073_v14 = vld [vmem:[%s5638_s1 + $0x8] sm:$0xff]   ;;  %v4078_v18 = vld [vmem:[%s5638_s1 + $0x50] sm:$0xff]   ;;  %v4084_v24 = vld [vmem:[%s5638_s1 + $0x18] sm:$0xff]  }
  0x1d   :  { %3469 = vmatpush3.bf16.msra.mxu1 %v4014_v28  ;;  %3430 = vmatprep.subr.bf16.mxu0 %v4015_v29  ;;  %v4616_v15 = vld [vmem:[%s5637_s4 + $0x4c] ss:$28 sps:$4 sm:$0xff]   ;;  %v4079_v19 = vld [vmem:[%s5638_s1 + $0x90] sm:$0xff]   ;;  %v4652_v25 = vld [vmem:[%s5637_s4 + $0x84] ss:$28 sps:$4 sm:$0xff]  }
  0x1e   :  { %3470 = vmatprep.subr.bf16.mxu1 %v4016_v30  ;;  %v4625_v17 = vld [vmem:[%s5637_s4 + $0x48] ss:$28 sps:$4 sm:$0xff]   ;;  %v4080_v20 = vld [vmem:[%s5638_s1 + $0x10] sm:$0xff]   ;;  %v4660_v27 = vld [vmem:[%s5637_s4 + $0x80] ss:$28 sps:$4 sm:$0xff]  }
  0x1f   :  { %v4087_v26 = vld [vmem:[%s5638_s1 + $0xe0] sm:$0xff]  }
  0x20   :  { %3431 = vmatpush3.bf16.msra.mxu0 %v4017_v31  ;;  %v4089_v28 = vld [vmem:[%s5638_s1 + $0x60] sm:$0xff]  }
  0x21   :  { %3471 = vmatpush3.bf16.msra.mxu1 %v4018_v32  ;;  %3496 = vmatprep.subr.bf16.mxu0 %v4025_v37  ;;  %v4090_v29 = vld [vmem:[%s5638_s1 + $0xa0] sm:$0xff]   ;;  %v4093_v32 = vld [vmem:[%s5638_s1 + $0xe8] sm:$0xff]  }
  0x22   :  { %3920 = vmatprep.subr.bf16.mxu1 %v4027_v39  ;;  %v4091_v30 = vld [vmem:[%s5638_s1 + $0x20] sm:$0xff]  }
  0x23   :  { %696 = vmatmul.mubr.bf16.vlgmr.msra.gmra.mrb[0].mxu0 %v4427_v35  ;;  %v4676_v31 = vld [vmem:[%s5637_s4 + $0x88] ss:$28 sps:$4 sm:$0xff]   ;;  %v4686_v37 = vld [vmem:[%s5637_s4 + $0xc0] ss:$28 sps:$4 sm:$0xff]  }
  0x24   :  { %761 = vmatmul.mubr.bf16.vlgmr.msra.gmra.mrb[0].mxu1 %v4432_v36  ;;  %3497 = vmatpush3.bf16.msra.mxu0 %v4026_v38  ;;  %v4095_v38 = vld [vmem:[%s5638_s1 + $0x68] sm:$0xff]  }
  0x25   :  { %3498 = vmatprep.subr.bf16.mxu0 %v4028_v40  ;;  %3921 = vmatpush3.bf16.msra.mxu1 %v4027_v39  ;;  %v4096_v39 = vld [vmem:[%s5638_s1 + $0xa8] sm:$0xff]  }
  0x26   :  { %703 = vmatprep.mubr.bf16.mxu0 %v4455_v42  ;;  %768 = vmatprep.mubr.bf16.mxu1 %v4460_v43  ;;  %v4097_v40 = vld [vmem:[%s5638_s1 + $0x28] sm:$0xff]  }
  0x27   :  { %3922 = vmatprep.subr.bf16.mxu1 %v4048_v56 }
  0x28   :  { %3499 = vmatpush3.bf16.msra.mxu0 %v4029_v41  ;;  %v4703_v41 = vld [vmem:[%s5637_s4 + $0xbc] ss:$28 sps:$4 sm:$0xff]  }
  0x29   :  { %3500 = vmatprep.subr.bf16.mxu0 %v4036_v46  ;;  %3923 = vmatpush3.bf16.msra.mxu1 %v4048_v56  ;;  %v4100_v46 = vld [vmem:[%s5638_s1 + $0xf0] sm:$0xff]   ;;  %v4106_v56 = vld [vmem:[%s5638_s1 + $0x78] sm:$0xff]  }
  0x2a   :  { %3582 = vmatprep.subr.bf16.mxu1 %v4065_v6  ;;  %v4116_v6 = vld [vmem:[%s5638_s1 + $0x158] sm:$0xff]  }
  0x2b   :  { %704 = vmatmul.mubr.bf16.gmra.mrb[4].mxu0 %v4465_v44 }
  0x2c   :  { %769 = vmatmul.mubr.bf16.gmra.mrb[4].mxu1 %v4471_v45  ;;  %3501 = vmatpush3.bf16.msra.mxu0 %v4037_v47  ;;  %v4711_v47 = vld [vmem:[%s5637_s4 + $0xb8] ss:$28 sps:$4 sm:$0xff]  }
  0x2d   :  { %3502 = vmatprep.subr.bf16.mxu0 %v4038_v48  ;;  %711 = vmatprep.mubr.bf16.mxu0 %v4491_v50  ;;  %v4102_v48 = vld [vmem:[%s5638_s1 + $0x70] sm:$0xff]  }
  0x2e   :  { %776 = vmatprep.mubr.bf16.mxu1 %v4496_v51 }
  0x30   :  { %3503 = vmatpush3.bf16.msra.mxu0 %v4039_v49  ;;  %v4103_v49 = vld [vmem:[%s5638_s1 + $0xb0] sm:$0xff]  }
  0x31   :  { %3504 = vmatprep.subr.bf16.mxu0 %v4046_v54  ;;  %v4104_v54 = vld [vmem:[%s5638_s1 + $0x30] sm:$0xff]  }
  0x33   :  { %712 = vmatmul.mubr.bf16.gmra.mrb[8].mxu0 %v4501_v52 }
  0x34   :  { %777 = vmatmul.mubr.bf16.gmra.mrb[8].mxu1 %v4506_v53  ;;  %3505 = vmatpush3.bf16.msra.mxu0 %v4047_v55  ;;  %v4105_v55 = vld [vmem:[%s5638_s1 + $0xf8] sm:$0xff]  }
  0x35   :  { %3506 = vmatprep.subr.bf16.mxu0 %v4049_v57  ;;  %719 = vmatprep.mubr.bf16.mxu0 %v4530_v59  ;;  %v4107_v57 = vld [vmem:[%s5638_s1 + $0xb8] sm:$0xff]  }
  0x36   :  { %784 = vmatprep.mubr.bf16.mxu1 %v4535_v60 }
  0x38   :  { %3507 = vmatpush3.bf16.msra.mxu0 %v4050_v58  ;;  %v4109_v58 = vld [vmem:[%s5638_s1 + $0x140] sm:$0xff]  }
  0x39   :  { %3508 = vmatprep.subr.bf16.mxu0 %v4057_v63  ;;  %v4110_v63 = vld [vmem:[%s5638_s1 + $0x100] sm:$0xff]  }
  0x3b   :  { %720 = vmatmul.mubr.bf16.gmra.mrb[12].mxu0 %v4541_v61 }
  0x3c   :  { %785 = vmatmul.mubr.bf16.gmra.mrb[12].mxu1 %v4546_v62  ;;  %3509 = vmatpush3.bf16.msra.mxu0 %v4058_v0  ;;  %v4111_v0 = vld [vmem:[%s5638_s1 + $0x180] sm:$0xff]  }
  0x3d   :  { %3510 = vmatprep.subr.bf16.mxu0 %v4059_v1  ;;  %825 = vmatprep.mubr.bf16.mxu0 %v4566_v3  ;;  %v4112_v1 = vld [vmem:[%s5638_s1 + $0x148] sm:$0xff]  }
  0x3e   :  { %3924 = vmatprep.mubr.msk.bf16.mxu1 %vm650_vm0, %v4571_v4 }
  0x40   :  { %3511 = vmatpush3.bf16.msra.mxu0 %v4060_v2  ;;  %v4113_v2 = vld [vmem:[%s5638_s1 + $0x108] sm:$0xff]  }
  0x41   :  { %3542 = vmatprep.subr.bf16.mxu0 %v4067_v8  ;;  %v62_v8 = vld [vmem:[%s5639_s5] sm:$0xff] }
  0x42   :  { %172 = vperm.xlu0 %3985, %v62_v8   ;;  %v4166_v8 = vld [vmem:[%s5640_s2 + $0x158] sm:$0xff]  }
  0x43   :  { %826 = vmatmul.mubr.bf16.vlgmr.msra.gmra.mrb[16].mxu0 %v4576_v5 }
  0x44   :  { %3925 = vmatmul.mubr.msk.bf16.vlgmr.msra.gmra.mrb[16].mxu1 %vm650_vm0, %v4587_v7  ;;  %3543 = vmatpush3.bf16.msra.mxu0 %v4069_v10  ;;  %v4127_v10 = vld [vmem:[%s5640_s2 + $0xc0] sm:$0xff]  }
  0x45   :  { %3583 = vmatpush3.bf16.msra.mxu1 %v4068_v9  ;;  %3544 = vmatprep.subr.bf16.mxu0 %v4071_v12  ;;  %v4121_v9 = vld [vmem:[%s5638_s1 + $0x168] sm:$0xff]   ;;  %v65_v12 = vld [vmem:[%s5639_s5 + $0x18] sm:$0xff] }
  0x46   :  { %3584 = vmatprep.subr.bf16.mxu1 %v4070_v11  ;;  %833 = vmatprep.mubr.bf16.mxu0 %v4616_v15  ;;  %v4122_v11 = vld [vmem:[%s5638_s1 + $0x128] sm:$0xff]  }
  0x47   :  { %3928 = vmatprep.mubr.msk.bf16.mxu1 %vm650_vm0, %v4676_v31 }
  0x48   :  { %3545 = vmatpush3.bf16.msra.mxu0 %v4073_v14  ;;  %v4130_v14 = vld [vmem:[%s5640_s2] sm:$0xff]  }
  0x49   :  { %3585 = vmatpush3.bf16.msra.mxu1 %v4072_v13  ;;  %3546 = vmatprep.subr.bf16.mxu0 %v4078_v18  ;;  %v4126_v13 = vld [vmem:[%s5638_s1 + $0x138] sm:$0xff]   ;;  %v4133_v18 = vld [vmem:[%s5640_s2 + $0x48] sm:$0xff]  }
  0x4a   :  { %3586 = vmatprep.subr.bf16.mxu1 %v4076_v16  ;;  %v4132_v16 = vld [vmem:[%s5640_s2 + $0x88] sm:$0xff]  }
  0x4b   :  { %834 = vmatmul.mubr.bf16.gmra.mrb[20].mxu0 %v4625_v17 }
  0x4c   :  { %3547 = vmatpush3.bf16.msra.mxu0 %v4080_v20  ;;  %841 = vmatprep.mubr.bf16.mxu0 %v4652_v25  ;;  %v4135_v20 = vld [vmem:[%s5640_s2 + $0xd0] sm:$0xff]  }
  0x4d   :  { %3587 = vmatpush3.bf16.msra.mxu1 %v4079_v19  ;;  %3548 = vmatprep.subr.bf16.mxu0 %v4082_v22  ;;  %v4134_v19 = vld [vmem:[%s5640_s2 + $0x8] sm:$0xff]   ;;  %v69_v22 = vld [vmem:[%s5639_s5 + $0x38] sm:$0xff] }
  0x4e   :  { %3588 = vmatprep.subr.bf16.mxu1 %v4081_v21  ;;  %3929 = vmatmul.mubr.msk.bf16.gmra.mrb[20].mxu1 %vm650_vm0, %v4686_v37  ;;  %v68_v21 = vld [vmem:[%s5639_s5 + $0x30] sm:$0xff] }
  0x4f   :  { %1428 = vmatprep.mubr.bf16.mxu1 %v4421_v34 }
  0x50   :  { %3549 = vmatpush3.bf16.msra.mxu0 %v4084_v24  ;;  %v4141_v24 = vld [vmem:[%s5640_s2 + $0x58] sm:$0xff]  }
  0x51   :  { %3589 = vmatpush3.bf16.msra.mxu1 %v4083_v23  ;;  %3550 = vmatprep.subr.bf16.mxu0 %v4089_v28  ;;  %v4139_v23 = vld [vmem:[%s5640_s2 + $0xd8] sm:$0xff]  }
  0x52   :  { %3590 = vmatprep.subr.bf16.mxu1 %v4087_v26  ;;  %v4140_v26 = vld [vmem:[%s5640_s2 + $0x98] sm:$0xff]  }
  0x53   :  { %842 = vmatmul.mubr.bf16.gmra.mrb[24].mxu0 %v4660_v27  ;;  %v4142_v28 = vld [vmem:[%s5640_s2 + $0x18] sm:$0xff]  }
  0x54   :  { %3551 = vmatpush3.bf16.msra.mxu0 %v4091_v30  ;;  %849 = vmatprep.mubr.bf16.mxu0 %v4703_v41  ;;  %v4145_v30 = vld [vmem:[%s5640_s2 + $0x60] sm:$0xff]  }
  0x55   :  { %3591 = vmatpush3.bf16.msra.mxu1 %v4090_v29  ;;  %3552 = vmatprep.subr.bf16.mxu0 %v4095_v38  ;;  %v4143_v29 = vld [vmem:[%s5640_s2 + $0xe0] sm:$0xff]   ;;  %v4149_v38 = vld [vmem:[%s5640_s2 + $0x68] sm:$0xff]  }
  0x56   :  { %3592 = vmatprep.subr.bf16.mxu1 %v4093_v32  ;;  %v4146_v32 = vld [vmem:[%s5640_s2 + $0x20] sm:$0xff]  }
  0x58   :  { %3553 = vmatpush3.bf16.msra.mxu0 %v4097_v40  ;;  %v4151_v40 = vld [vmem:[%s5640_s2 + $0xf0] sm:$0xff]  }
  0x59   :  { %3593 = vmatpush3.bf16.msra.mxu1 %v4096_v39  ;;  %3554 = vmatprep.subr.bf16.mxu0 %v4102_v48  ;;  %v4150_v39 = vld [vmem:[%s5640_s2 + $0x28] sm:$0xff]   ;;  %v4154_v48 = vld [vmem:[%s5640_s2 + $0x30] sm:$0xff]  }
  0x5a   :  { %3594 = vmatprep.subr.bf16.mxu1 %v4100_v46  ;;  %v4153_v46 = vld [vmem:[%s5640_s2 + $0x70] sm:$0xff]  }
  0x5b   :  { %850 = vmatmul.mubr.bf16.gmra.mrb[28].mxu0 %v4711_v47 }
  0x5c   :  { %1363 = vmatprep.mubr.bf16.mxu0 %v4416_v33  ;;  %3555 = vmatpush3.bf16.msra.mxu0 %v4104_v54  ;;  %v4108_v33 = vld [vmem:[%s5638_s1 + $0x38] sm:$0xff]  }
  0x5d   :  { %3595 = vmatpush3.bf16.msra.mxu1 %v4103_v49  ;;  %3556 = vmatprep.subr.bf16.mxu0 %v4106_v56  ;;  %v4155_v49 = vld [vmem:[%s5640_s2 + $0xf8] sm:$0xff]   ;;  %v4161_v56 = vld [vmem:[%s5640_s2 + $0x180] sm:$0xff]  }
  0x5e   :  { %3596 = vmatprep.subr.bf16.mxu1 %v4105_v55  ;;  %v4156_v54 = vld [vmem:[%s5640_s2 + $0xb8] sm:$0xff]  }
  0x5f   :  { %v4158_v55 = vld [vmem:[%s5640_s2 + $0x38] sm:$0xff]  }
  0x60   :  { %3557 = vmatpush3.bf16.msra.mxu0 %v4108_v33  ;;  %v4160_v33 = vld [vmem:[%s5640_s2 + $0x100] sm:$0xff]  }
  0x61   :  { %3597 = vmatpush3.bf16.msra.mxu1 %v4107_v57  ;;  %3622 = vmatprep.subr.bf16.mxu0 %v4109_v58  ;;  %v4948_v57 = vld [vmem:[%s5637_s4 + $0x4] ss:$28 sps:$4 sm:$0xff]   ;;  %v4162_v58 = vld [vmem:[%s5640_s2 + $0x148] sm:$0xff]  }
  0x62   :  { %3932 = vmatprep.subr.bf16.mxu1 %v4111_v0 }
  0x63   :  { %1364 = vmatmul.mubr.bf16.vlgmr.msra.gmra.mrb[32].mxu0 %v4427_v35  ;;  %v4115_v35 = vld [vmem:[%s5638_s1 + $0x110] sm:$0xff]  }
  0x64   :  { %1429 = vmatmul.mubr.bf16.vlgmr.msra.gmra.mrb[24].mxu1 %v4432_v36  ;;  %3623 = vmatpush3.bf16.msra.mxu0 %v4110_v63  ;;  %v4114_v36 = vld [vmem:[%s5638_s1 + $0x150] sm:$0xff]   ;;  %v4963_v63 = vld [vmem:[%s5637_s4 + $0x8] ss:$28 sps:$4 sm:$0xff]  }
  0x65   :  { %3933 = vmatpush3.bf16.msra.mxu1 %v4111_v0  ;;  %3624 = vmatprep.subr.bf16.mxu0 %v4112_v1  ;;  %v4170_v0 = vld [vmem:[%s5640_s2 + $0x188] sm:$0xff]   ;;  %v4972_v1 = vld [vmem:[%s5637_s4] ss:$28 sps:$4 sm:$0xff]  }
  0x66   :  { %1436 = vmatprep.mubr.bf16.mxu1 %v4460_v43  ;;  %1371 = vmatprep.mubr.bf16.mxu0 %v4455_v42  ;;  %v4120_v43 = vld [vmem:[%s5638_s1 + $0x188] sm:$0xff]   ;;  %v4117_v42 = vld [vmem:[%s5638_s1 + $0x118] sm:$0xff]  }
  0x67   :  { %3934 = vmatprep.subr.bf16.mxu1 %v4120_v43 }
  0x68   :  { %3625 = vmatpush3.bf16.msra.mxu0 %v4113_v2  ;;  %v4978_v2 = vld [vmem:[%s5637_s4 + $0x44] ss:$28 sps:$4 sm:$0xff]  }
  0x69   :  { %3626 = vmatprep.subr.bf16.mxu0 %v4114_v36  ;;  %3935 = vmatpush3.bf16.msra.mxu1 %v4120_v43  ;;  %v4163_v36 = vld [vmem:[%s5640_s2 + $0x108] sm:$0xff]   ;;  %v4177_v43 = vld [vmem:[%s5641_s3 + $0xc0] sm:$0xff]  }
  0x6a   :  { %3708 = vmatprep.subr.bf16.mxu1 %v4127_v10  ;;  %v4168_v10 = vld [vmem:[%s5640_s2 + $0x160] sm:$0xff]  }
  0x6b   :  { %1372 = vmatmul.mubr.bf16.gmra.mrb[36].mxu0 %v4465_v44  ;;  %v63_v44 = vld [vmem:[%s5639_s5 + $0x8] sm:$0xff] }
  0x6c   :  { %1437 = vmatmul.mubr.bf16.gmra.mrb[28].mxu1 %v4471_v45  ;;  %3627 = vmatpush3.bf16.msra.mxu0 %v4115_v35  ;;  %v4118_v45 = vld [vmem:[%s5638_s1 + $0x160] sm:$0xff]   ;;  %v4987_v35 = vld [vmem:[%s5637_s4 + $0x3c] ss:$28 sps:$4 sm:$0xff]  }
  0x6d   :  { %1444 = vmatprep.mubr.bf16.mxu1 %v4496_v51  ;;  %1379 = vmatprep.mubr.bf16.mxu0 %v4491_v50  ;;  %v4119_v50 = vld [vmem:[%s5638_s1 + $0x120] sm:$0xff]   ;;  %v64_v51 = vld [vmem:[%s5639_s5 + $0x10] sm:$0xff] }
  0x6e   :  { %3628 = vmatprep.subr.bf16.mxu0 %v4116_v6  ;;  %182 = vperm.xlu1 %3986, %v64_v51   ;;  %v4164_v6 = vld [vmem:[%s5640_s2 + $0x150] sm:$0xff]   ;;  %v4167_v51 = vld [vmem:[%s5640_s2 + $0x118] sm:$0xff]  }
  0x6f   :  { %177 = vperm.xlu0 %3985, %v63_v44   ;;  %v5011_v44 = vld [vmem:[%s5637_s4 + $0x38] ss:$28 sps:$4 sm:$0xff]  }
  0x70   :  { %3629 = vmatpush3.bf16.msra.mxu0 %v4117_v42  ;;  %v4165_v42 = vld [vmem:[%s5640_s2 + $0x110] sm:$0xff]  }
  0x71   :  { %3630 = vmatprep.subr.bf16.mxu0 %v4118_v45  ;;  %v5005_v45 = vld [vmem:[%s5637_s4 + $0x40] ss:$28 sps:$4 sm:$0xff]  }
  0x72   :  { %187 = vperm.xlu1 %3986, %v65_v12   ;;  %v5041_v12 = vld [vmem:[%s5637_s4 + $0x78] ss:$28 sps:$4 sm:$0xff]  }
  0x73   :  { %1380 = vmatmul.mubr.bf16.gmra.mrb[40].mxu0 %v4501_v52  ;;  %v4124_v52 = vld [vmem:[%s5638_s1 + $0x130] sm:$0xff]  }
  0x74   :  { %1445 = vmatmul.mubr.bf16.gmra.mrb[32].mxu1 %v4506_v53  ;;  %3631 = vmatpush3.bf16.msra.mxu0 %v4119_v50  ;;  %v4123_v53 = vld [vmem:[%s5638_s1 + $0x170] sm:$0xff]   ;;  %v5017_v50 = vld [vmem:[%s5637_s4 + $0x7c] ss:$28 sps:$4 sm:$0xff]  }
  0x75   :  { %1452 = vmatprep.mubr.bf16.mxu1 %v4535_v60  ;;  %1387 = vmatprep.mubr.bf16.mxu0 %v4530_v59  ;;  %v4125_v59 = vld [vmem:[%s5638_s1 + $0x178] sm:$0xff]   ;;  %v66_v60 = vld [vmem:[%s5639_s5 + $0x20] sm:$0xff] }
  0x76   :  { %3632 = vmatprep.subr.bf16.mxu0 %v4121_v9  ;;  %192 = vperm.xlu0 %3985, %v66_v60   ;;  %v5026_v9 = vld [vmem:[%s5637_s4 + $0x74] ss:$28 sps:$4 sm:$0xff]   ;;  %v4172_v60 = vld [vmem:[%s5640_s2 + $0x128] sm:$0xff]  }
  0x78   :  { %3633 = vmatpush3.bf16.msra.mxu0 %v4122_v11  ;;  %v4169_v11 = vld [vmem:[%s5640_s2 + $0x120] sm:$0xff]  }
  0x79   :  { %3634 = vmatprep.subr.bf16.mxu0 %v4123_v53  ;;  %v4171_v53 = vld [vmem:[%s5640_s2 + $0x168] sm:$0xff]  }
  0x7a   :  { %202 = vperm.xlu0 %3985, %v68_v21   ;;  %v4178_v21 = vld [vmem:[%s5641_s3 + $0x80] sm:$0xff]  }
  0x7b   :  { %1388 = vmatmul.mubr.bf16.gmra.mrb[44].mxu0 %v4541_v61  ;;  %v67_v61 = vld [vmem:[%s5639_s5 + $0x28] sm:$0xff] }
  0x7c   :  { %1453 = vmatmul.mubr.bf16.gmra.mrb[36].mxu1 %v4546_v62  ;;  %3635 = vmatpush3.bf16.msra.mxu0 %v4124_v52  ;;  %v4129_v62 = vld [vmem:[%s5640_s2 + $0x40] sm:$0xff]   ;;  %v5047_v52 = vld [vmem:[%s5637_s4 + $0x70] ss:$28 sps:$4 sm:$0xff]  }
  0x7d   :  { %3936 = vmatprep.mubr.msk.bf16.mxu1 %vm650_vm0, %v4571_v4  ;;  %1493 = vmatprep.mubr.bf16.mxu0 %v4566_v3  ;;  %v4128_v4 = vld [vmem:[%s5640_s2 + $0x80] sm:$0xff]   ;;  %v4131_v3 = vld [vmem:[%s5640_s2 + $0xc8] sm:$0xff]  }
  0x7e   :  { %3636 = vmatprep.subr.bf16.mxu0 %v4125_v59  ;;  %197 = vperm.xlu1 %3986, %v67_v61   ;;  %v5053_v59 = vld [vmem:[%s5637_s4 + $0xb4] ss:$28 sps:$4 sm:$0xff]  }
  0x7f   :  { %v4174_v61 = vld [vmem:[%s5640_s2 + $0x130] sm:$0xff]  }
  0x80   :  { %3637 = vmatpush3.bf16.msra.mxu0 %v4126_v13  ;;  %v5062_v13 = vld [vmem:[%s5637_s4 + $0xac] ss:$28 sps:$4 sm:$0xff]  }
  0x81   :  { %3668 = vmatprep.subr.bf16.mxu0 %v4129_v62  ;;  %v4173_v62 = vld [vmem:[%s5640_s2 + $0x170] sm:$0xff]  }
  0x82   :  { %207 = vperm.xlu1 %3986, %v69_v22   ;;  %v4183_v22 = vld [vmem:[%s5641_s3 + $0x48] sm:$0xff]  }
  0x83   :  { %1494 = vmatmul.mubr.bf16.vlgmr.msra.gmra.mrb[48].mxu0 %v4576_v5  ;;  %v4136_v5 = vld [vmem:[%s5640_s2 + $0x90] sm:$0xff]  }
  0x84   :  { %3937 = vmatmul.mubr.msk.bf16.vlgmr.msra.gmra.mrb[40].mxu1 %vm650_vm0, %v4587_v7  ;;  %3669 = vmatpush3.bf16.msra.mxu0 %v4130_v14  ;;  %v4137_v7 = vld [vmem:[%s5640_s2 + $0x50] sm:$0xff]  }
  0x85   :  { %3709 = vmatpush3.bf16.msra.mxu1 %v4128_v4  ;;  %3670 = vmatprep.subr.bf16.mxu0 %v4133_v18  ;;  %v4175_v4 = vld [vmem:[%s5640_s2 + $0x178] sm:$0xff]   ;;  %v5077_v14 = vld [vmem:[%s5637_s4 + $0xb0] ss:$28 sps:$4 sm:$0xff]  }
  0x86   :  { %3710 = vmatprep.subr.bf16.mxu1 %v4131_v3  ;;  %1501 = vmatprep.mubr.bf16.mxu0 %v4616_v15  ;;  %v4138_v15 = vld [vmem:[%s5640_s2 + $0x10] sm:$0xff]   ;;  %v5083_v3 = vld [vmem:[%s5637_s4 + $0xa8] ss:$28 sps:$4 sm:$0xff]   ;;  %v4176_v18 = vld [vmem:[%s5640_s2 + $0x138] sm:$0xff]  }
  0x87   :  { %3940 = vmatprep.mubr.msk.bf16.mxu1 %vm650_vm0, %v4676_v31 }
  0x88   :  { %3671 = vmatpush3.bf16.msra.mxu0 %v4134_v19  ;;  %v5099_v19 = vld [vmem:[%s5637_s4 + $0x14] ss:$28 sps:$4 sm:$0xff]  }
  0x89   :  { %3711 = vmatpush3.bf16.msra.mxu1 %v4132_v16  ;;  %3672 = vmatprep.subr.bf16.mxu0 %v4137_v7  ;;  %v5089_v16 = vld [vmem:[%s5637_s4 + $0x18] ss:$28 sps:$4 sm:$0xff]   ;;  %v4180_v7 = vld [vmem:[%s5641_s3] sm:$0xff]  }
  0x8a   :  { %3712 = vmatprep.subr.bf16.mxu1 %v4135_v20  ;;  %v4179_v20 = vld [vmem:[%s5641_s3 + $0x40] sm:$0xff]  }
  0x8b   :  { %1502 = vmatmul.mubr.bf16.gmra.mrb[52].mxu0 %v4625_v17  ;;  %v4144_v17 = vld [vmem:[%s5640_s2 + $0xa0] sm:$0xff]  }
  0x8c   :  { %3941 = vmatmul.mubr.msk.bf16.gmra.mrb[44].mxu1 %vm650_vm0, %v4686_v37  ;;  %3673 = vmatpush3.bf16.msra.mxu0 %v4138_v15  ;;  %v5120_v15 = vld [vmem:[%s5637_s4 + $0x50] ss:$28 sps:$4 sm:$0xff]  }
  0x8d   :  { %3713 = vmatpush3.bf16.msra.mxu1 %v4136_v5  ;;  %3674 = vmatprep.subr.bf16.mxu0 %v4141_v24  ;;  %v4181_v5 = vld [vmem:[%s5641_s3 + $0xc8] sm:$0xff]  }
  0x8e   :  { %3714 = vmatprep.subr.bf16.mxu1 %v4139_v23  ;;  %1509 = vmatprep.mubr.bf16.mxu0 %v4652_v25  ;;  %v4147_v25 = vld [vmem:[%s5640_s2 + $0xe8] sm:$0xff]  }
  0x8f   :  { %2104 = vmatprep.mubr.bf16.mxu1 %v4421_v34  ;;  %v4148_v34 = vld [vmem:[%s5640_s2 + $0xa8] sm:$0xff]  }
  0x90   :  { %3675 = vmatpush3.bf16.msra.mxu0 %v4142_v28  ;;  %v4182_v23 = vld [vmem:[%s5641_s3 + $0x88] sm:$0xff]   ;;  %v4185_v28 = vld [vmem:[%s5641_s3 + $0xd0] sm:$0xff]  }
  0x91   :  { %3715 = vmatpush3.bf16.msra.mxu1 %v4140_v26  ;;  %3676 = vmatprep.subr.bf16.mxu0 %v4145_v30  ;;  %v5130_v24 = vld [vmem:[%s5637_s4 + $0x10] ss:$28 sps:$4 sm:$0xff]  }
  0x92   :  { %3716 = vmatprep.subr.bf16.mxu1 %v4143_v29  ;;  %v4184_v26 = vld [vmem:[%s5641_s3 + $0x8] sm:$0xff]   ;;  %v4187_v30 = vld [vmem:[%s5641_s3 + $0x50] sm:$0xff]  }
  0x93   :  { %1510 = vmatmul.mubr.bf16.gmra.mrb[56].mxu0 %v4660_v27  ;;  %v4152_v27 = vld [vmem:[%s5640_s2 + $0xb0] sm:$0xff]   ;;  %v5142_v29 = vld [vmem:[%s5637_s4 + $0x4c] ss:$28 sps:$4 sm:$0xff]  }
  0x94   :  { %3677 = vmatpush3.bf16.msra.mxu0 %v4146_v32  ;;  %1517 = vmatprep.mubr.bf16.mxu0 %v4703_v41  ;;  %v4157_v41 = vld [vmem:[%s5640_s2 + $0x78] sm:$0xff]   ;;  %v4188_v32 = vld [vmem:[%s5641_s3 + $0x10] sm:$0xff]  }
  0x95   :  { %3717 = vmatpush3.bf16.msra.mxu1 %v4144_v17  ;;  %3678 = vmatprep.subr.bf16.mxu0 %v4149_v38  ;;  %v4186_v17 = vld [vmem:[%s5641_s3 + $0x90] sm:$0xff]   ;;  %v4191_v38 = vld [vmem:[%s5641_s3 + $0x58] sm:$0xff]  }
  0x96   :  { %3718 = vmatprep.subr.bf16.mxu1 %v4147_v25  ;;  %v4189_v25 = vld [vmem:[%s5641_s3 + $0xd8] sm:$0xff]  }
  0x98   :  { %3679 = vmatpush3.bf16.msra.mxu0 %v4150_v39  ;;  %v4192_v39 = vld [vmem:[%s5641_s3 + $0x18] sm:$0xff]  }
  0x99   :  { %3719 = vmatpush3.bf16.msra.mxu1 %v4148_v34  ;;  %3680 = vmatprep.subr.bf16.mxu0 %v4153_v46  ;;  %v5170_v34 = vld [vmem:[%s5637_s4 + $0x48] ss:$28 sps:$4 sm:$0xff]  }
  0x9a   :  { %3720 = vmatprep.subr.bf16.mxu1 %v4151_v40  ;;  %v4193_v40 = vld [vmem:[%s5641_s3 + $0xe0] sm:$0xff]  }
  0x9b   :  { %1518 = vmatmul.mubr.bf16.gmra.mrb[60].mxu0 %v4711_v47  ;;  %v4159_v47 = vld [vmem:[%s5640_s2 + $0x140] sm:$0xff]  }
  0x9c   :  { %3681 = vmatpush3.bf16.msra.mxu0 %v4154_v48  ;;  %2039 = vmatprep.mubr.bf16.mxu0 %v4948_v57  ;;  %v4195_v46 = vld [vmem:[%s5641_s3 + $0x60] sm:$0xff]   ;;  %v4265_v48 = vld [vmem:[%s5637_s4 + $0xc] ss:$28 sps:$4 sm:$0xff]  }
  0x9d   :  { %3721 = vmatpush3.bf16.msra.mxu1 %v4152_v27  ;;  %3682 = vmatprep.subr.bf16.mxu0 %v4157_v41  ;;  %v4194_v27 = vld [vmem:[%s5641_s3 + $0xa0] sm:$0xff]   ;;  %v4197_v41 = vld [vmem:[%s5641_s3 + $0xe8] sm:$0xff]  }
  0x9e   :  { %3722 = vmatprep.subr.bf16.mxu1 %v4155_v49  ;;  %v4196_v49 = vld [vmem:[%s5641_s3 + $0x20] sm:$0xff]  }
  0xa0   :  { %3683 = vmatpush3.bf16.msra.mxu0 %v4158_v55  ;;  %v4198_v55 = vld [vmem:[%s5641_s3 + $0xa8] sm:$0xff]  }
  0xa1   :  { %3723 = vmatpush3.bf16.msra.mxu1 %v4156_v54  ;;  %3748 = vmatprep.subr.bf16.mxu0 %v4159_v47  ;;  %v4199_v54 = vld [vmem:[%s5641_s3 + $0x68] sm:$0xff]  }
  0xa2   :  { %3944 = vmatprep.subr.bf16.mxu1 %v4161_v56  ;;  %v4200_v47 = vld [vmem:[%s5641_s3 + $0x28] sm:$0xff]  }
  0xa3   :  { %2040 = vmatmul.mubr.bf16.vlgmr.msra.gmra.mrb[64].mxu0 %v4972_v1 }
  0xa4   :  { %2105 = vmatmul.mubr.bf16.vlgmr.msra.gmra.mrb[48].mxu1 %v4963_v63  ;;  %3749 = vmatpush3.bf16.msra.mxu0 %v4160_v33  ;;  %v4201_v33 = vld [vmem:[%s5641_s3 + $0xf0] sm:$0xff]  }
  0xa5   :  { %3945 = vmatpush3.bf16.msra.mxu1 %v4161_v56  ;;  %2112 = vmatprep.mubr.bf16.mxu1 %v4978_v2  ;;  %v5209_v56 = vld [vmem:[%s5637_s4 + $0x80] ss:$28 sps:$4 sm:$0xff]  }
  0xa6   :  { %3750 = vmatprep.subr.bf16.mxu0 %v4162_v58  ;;  %2047 = vmatprep.mubr.bf16.mxu0 %v4987_v35  ;;  %v5221_v58 = vld [vmem:[%s5637_s4 + $0xbc] ss:$28 sps:$4 sm:$0xff]  }
  0xa7   :  { %3946 = vmatprep.subr.bf16.mxu1 %v4170_v0 }
  0xa8   :  { %3751 = vmatpush3.bf16.msra.mxu0 %v4163_v36  ;;  %v4202_v36 = vld [vmem:[%s5641_s3 + $0xb0] sm:$0xff]  }
  0xa9   :  { %3947 = vmatpush3.bf16.msra.mxu1 %v4170_v0  ;;  %3752 = vmatprep.subr.bf16.mxu0 %v4164_v6  ;;  %v4203_v0 = vld [vmem:[%s5641_s3 + $0x70] sm:$0xff]   ;;  %v3048_v6 = vld [vmem:[%s5642_s6] sm:$0xff] }
  0xaa   :  { %3834 = vmatprep.subr.bf16.mxu1 %v4177_v43  ;;  %v4204_v43 = vld [vmem:[%s5641_s3 + $0x30] sm:$0xff]   ;;  %3058 = vperm.xlu1 %3986, %v3048_v6  }
  0xab   :  { %2048 = vmatmul.mubr.bf16.gmra.mrb[68].mxu0 %v5011_v44 }
  0xac   :  { %2113 = vmatmul.mubr.bf16.gmra.mrb[52].mxu1 %v5005_v45  ;;  %3753 = vmatpush3.bf16.msra.mxu0 %v4165_v42  ;;  %v4205_v42 = vld [vmem:[%s5641_s3 + $0xf8] sm:$0xff]  }
  0xad   :  { %2120 = vmatprep.mubr.bf16.mxu1 %v5017_v50  ;;  %2055 = vmatprep.mubr.bf16.mxu0 %v5026_v9 }
  0xae   :  { %3754 = vmatprep.subr.bf16.mxu0 %v4166_v8  ;;  %v3049_v8 = vld [vmem:[%s5642_s6 + $0x8] sm:$0xff] }
  0xaf   :  { %3063 = vperm.xlu0 %3985, %v3049_v8   ;;  %v4224_v8 = vld [vmem:[%s5641_s3 + $0x138] sm:$0xff]  }
  0xb0   :  { %3755 = vmatpush3.bf16.msra.mxu0 %v4167_v51  ;;  %v4207_v51 = vld [vmem:[%s5641_s3 + $0x78] sm:$0xff]  }
  0xb1   :  { %3756 = vmatprep.subr.bf16.mxu0 %v4168_v10  ;;  %v5248_v10 = vld [vmem:[%s5637_s4 + $0xb8] ss:$28 sps:$4 sm:$0xff]  }
  0xb3   :  { %2056 = vmatmul.mubr.bf16.gmra.mrb[72].mxu0 %v5047_v52 }
  0xb4   :  { %2121 = vmatmul.mubr.bf16.gmra.mrb[56].mxu1 %v5041_v12  ;;  %3757 = vmatpush3.bf16.msra.mxu0 %v4169_v11  ;;  %v4206_v11 = vld [vmem:[%s5641_s3 + $0xb8] sm:$0xff]  }
  0xb5   :  { %2128 = vmatprep.mubr.bf16.mxu1 %v5053_v59  ;;  %2063 = vmatprep.mubr.bf16.mxu0 %v5062_v13 }
  0xb6   :  { %3758 = vmatprep.subr.bf16.mxu0 %v4171_v53  ;;  %v3050_v53 = vld [vmem:[%s5642_s6 + $0x10] sm:$0xff] }
  0xb7   :  { %3068 = vperm.xlu1 %3986, %v3050_v53  }
  0xb8   :  { %3759 = vmatpush3.bf16.msra.mxu0 %v4172_v60  ;;  %v3052_v60 = vld [vmem:[%s5642_s6 + $0x20] sm:$0xff] }
  0xb9   :  { %3760 = vmatprep.subr.bf16.mxu0 %v4173_v62  ;;  %v4208_v62 = vld [vmem:[%s5641_s3 + $0x38] sm:$0xff]   ;;  %3078 = vperm.xlu0 %3985, %v3052_v60  }
  0xbb   :  { %2064 = vmatmul.mubr.bf16.gmra.mrb[76].mxu0 %v5083_v3 }
  0xbc   :  { %2129 = vmatmul.mubr.bf16.gmra.mrb[60].mxu1 %v5077_v14  ;;  %3761 = vmatpush3.bf16.msra.mxu0 %v4174_v61  ;;  %v4209_v61 = vld [vmem:[%s5641_s3 + $0x140] sm:$0xff]  }
  0xbd   :  { %3948 = vmatprep.mubr.msk.bf16.mxu1 %vm650_vm0, %v5089_v16  ;;  %2169 = vmatprep.mubr.bf16.mxu0 %v5099_v19 }
  0xbe   :  { %3762 = vmatprep.subr.bf16.mxu0 %v4175_v4  ;;  %v4210_v4 = vld [vmem:[%s5641_s3 + $0x100] sm:$0xff]  }
  0xc0   :  { %3763 = vmatpush3.bf16.msra.mxu0 %v4176_v18  ;;  %v3051_v18 = vld [vmem:[%s5642_s6 + $0x18] sm:$0xff] }
  0xc1   :  { %3794 = vmatprep.subr.bf16.mxu0 %v4179_v20  ;;  %v4211_v20 = vld [vmem:[%s5641_s3 + $0x148] sm:$0xff]   ;;  %3073 = vperm.xlu1 %3986, %v3051_v18  }
  0xc3   :  { %2170 = vmatmul.mubr.bf16.vlgmr.msra.gmra.mrb[80].mxu0 %v5130_v24 }
  0xc4   :  { %3949 = vmatmul.mubr.msk.bf16.vlgmr.msra.gmra.mrb[64].mxu1 %vm650_vm0, %v5120_v15  ;;  %3795 = vmatpush3.bf16.msra.mxu0 %v4180_v7  ;;  %v4213_v7 = vld [vmem:[%s5641_s3 + $0x150] sm:$0xff]  }
  0xc5   :  { %3835 = vmatpush3.bf16.msra.mxu1 %v4178_v21  ;;  %3796 = vmatprep.subr.bf16.mxu0 %v4183_v22  ;;  %v3053_v21 = vld [vmem:[%s5642_s6 + $0x28] sm:$0xff]  ;;  %v4217_v22 = vld [vmem:[%s5641_s3 + $0x160] sm:$0xff]  }
  0xc6   :  { %3836 = vmatprep.subr.bf16.mxu1 %v4181_v5  ;;  %2177 = vmatprep.mubr.bf16.mxu0 %v5142_v29  ;;  %v3055_v5 = vld [vmem:[%s5642_s6 + $0x38] sm:$0xff] }
  0xc7   :  { %3952 = vmatprep.mubr.msk.bf16.mxu1 %vm650_vm0, %v4676_v31  ;;  %v4190_v31 = vld [vmem:[%s5641_s3 + $0x98] sm:$0xff]   ;;  %3083 = vperm.xlu1 %3986, %v3053_v21  }
  0xc8   :  { %3797 = vmatpush3.bf16.msra.mxu0 %v4184_v26 }
  0xc9   :  { %3837 = vmatpush3.bf16.msra.mxu1 %v4182_v23  ;;  %3798 = vmatprep.subr.bf16.mxu0 %v4187_v30  ;;  %v4219_v23 = vld [vmem:[%s5641_s3 + $0x168] sm:$0xff]  }
  0xca   :  { %3838 = vmatprep.subr.bf16.mxu1 %v4185_v28 }
  0xcb   :  { %2178 = vmatmul.mubr.bf16.gmra.mrb[84].mxu0 %v5170_v34  ;;  %3093 = vperm.xlu1 %3986, %v3055_v5  }
  0xcc   :  { %3953 = vmatmul.mubr.msk.bf16.gmra.mrb[68].mxu1 %vm650_vm0, %v4686_v37  ;;  %3799 = vmatpush3.bf16.msra.mxu0 %v4188_v32  ;;  %v5182_v37 = vld [vmem:[%s5637_s4 + $0x84] ss:$28 sps:$4 sm:$0xff]  }
  0xcd   :  { %3839 = vmatpush3.bf16.msra.mxu1 %v4186_v17  ;;  %3800 = vmatprep.subr.bf16.mxu0 %v4191_v38  ;;  %v4220_v38 = vld [vmem:[%s5641_s3 + $0x128] sm:$0xff]  }
  0xce   :  { %3840 = vmatprep.subr.bf16.mxu1 %v4189_v25  ;;  %2185 = vmatprep.mubr.bf16.mxu0 %v5182_v37 }
  0xcf   :  { %2780 = vmatprep.mubr.bf16.mxu1 %v4265_v48 }
  0xd0   :  { %3801 = vmatpush3.bf16.msra.mxu0 %v4192_v39 }
  0xd1   :  { %3841 = vmatpush3.bf16.msra.mxu1 %v4190_v31  ;;  %3802 = vmatprep.subr.bf16.mxu0 %v4195_v46 }
  0xd2   :  { %3842 = vmatprep.subr.bf16.mxu1 %v4193_v40 }
  0xd3   :  { %2186 = vmatmul.mubr.bf16.gmra.mrb[88].mxu0 %v5209_v56 }
  0xd4   :  { %3803 = vmatpush3.bf16.msra.mxu0 %v4196_v49  ;;  %2193 = vmatprep.mubr.bf16.mxu0 %v5221_v58 }
  0xd5   :  { %3843 = vmatpush3.bf16.msra.mxu1 %v4194_v27  ;;  %3804 = vmatprep.subr.bf16.mxu0 %v4199_v54  ;;  %v4222_v54 = vld [vmem:[%s5641_s3 + $0x130] sm:$0xff]  }
  0xd6   :  { %3844 = vmatprep.subr.bf16.mxu1 %v4197_v41 }
  0xd8   :  { %3805 = vmatpush3.bf16.msra.mxu0 %v4200_v47 }
  0xd9   :  { %3845 = vmatpush3.bf16.msra.mxu1 %v4198_v55  ;;  %3806 = vmatprep.subr.bf16.mxu0 %v4203_v0 }
  0xda   :  { %3846 = vmatprep.subr.bf16.mxu1 %v4201_v33 }
  0xdb   :  { %2194 = vmatmul.mubr.bf16.gmra.mrb[92].mxu0 %v5248_v10 }
  0xdc   :  { %3807 = vmatpush3.bf16.msra.mxu0 %v4204_v43  ;;  %2715 = vmatprep.mubr.bf16.mxu0 %v4948_v57  ;;  %v4212_v57 = vld [vmem:[%s5641_s3 + $0x108] sm:$0xff]  }
  0xdd   :  { %3847 = vmatpush3.bf16.msra.mxu1 %v4202_v36  ;;  %3808 = vmatprep.subr.bf16.mxu0 %v4207_v51 }
  0xde   :  { %3848 = vmatprep.subr.bf16.mxu1 %v4205_v42 }
  0xe0   :  { %3809 = vmatpush3.bf16.msra.mxu0 %v4208_v62 }
  0xe1   :  { %3849 = vmatpush3.bf16.msra.mxu1 %v4206_v11  ;;  %3874 = vmatprep.subr.bf16.mxu0 %v4209_v61 }
  0xe2   :  { %3968 = vmatprep.subr.bf16.mxu1 %v4209_v61 }
  0xe3   :  { %2716 = vmatmul.mubr.bf16.vlgmr.msra.gmra.mrb[96].mxu0 %v4972_v1  ;;  %v4214_v1 = vld [vmem:[%s5641_s3 + $0x110] sm:$0xff]  }
  0xe4   :  { %2781 = vmatmul.mubr.bf16.vlgmr.msra.gmra.mrb[72].mxu1 %v4963_v63  ;;  %3875 = vmatpush3.bf16.msra.mxu0 %v4210_v4  ;;  %v3054_v63 = vld [vmem:[%s5642_s6 + $0x30] sm:$0xff] }
  0xe5   :  { %3976 = vmatpush3.bf16.msra.mxu1 %v4210_v4  ;;  %2788 = vmatprep.mubr.bf16.mxu1 %v4978_v2  ;;  %v4215_v2 = vld [vmem:[%s5641_s3 + $0x158] sm:$0xff]  }
  0xe6   :  { %3969 = vmatprep.subr.bf16.mxu1 %v4211_v20  ;;  %3876 = vmatprep.subr.bf16.mxu0 %v4211_v20  ;;  %v4226_v20 = vld [vmem:[%s5641_s3 + $0x188] sm:$0xff]  }
  0xe7   :  { %2723 = vmatprep.mubr.bf16.mxu0 %v4987_v35  ;;  %3088 = vperm.xlu0 %3985, %v3054_v63   ;;  %v4216_v35 = vld [vmem:[%s5641_s3 + $0x118] sm:$0xff]  }
  0xe8   :  { %3877 = vmatpush3.bf16.msra.mxu0 %v4212_v57 }
  0xe9   :  { %3977 = vmatpush3.bf16.msra.mxu1 %v4212_v57  ;;  %3878 = vmatprep.subr.bf16.mxu0 %v4213_v7 }
  0xea   :  { %3970 = vmatprep.subr.bf16.mxu1 %v4213_v7 }
  0xeb   :  { %2724 = vmatmul.mubr.bf16.gmra.mrb[100].mxu0 %v5011_v44  ;;  %v4218_v44 = vld [vmem:[%s5641_s3 + $0x120] sm:$0xff]  }
  0xec   :  { %2789 = vmatmul.mubr.bf16.gmra.mrb[76].mxu1 %v5005_v45  ;;  %3879 = vmatpush3.bf16.msra.mxu0 %v4214_v1  ;;  %v5311_v45 = vpop.permute.xlu0 %172 }
  0xed   :  { %3978 = vmatpush3.bf16.msra.mxu1 %v4214_v1  ;;  %2796 = vmatprep.mubr.bf16.mxu1 %v5017_v50  ;;  %v5335_v41 = vpop.permute.xlu1 %182 }
  0xee   :  { %3971 = vmatprep.subr.bf16.mxu1 %v4215_v2  ;;  %3880 = vmatprep.subr.bf16.mxu0 %v4215_v2 }
  0xef   :  { %2731 = vmatprep.mubr.bf16.mxu0 %v5026_v9 }
  0xf0   :  { %3881 = vmatpush3.bf16.msra.mxu0 %v4216_v35  ;;  %v5328_v48 = vpop.permute.xlu0 %177 }
  0xf1   :  { %3979 = vmatpush3.bf16.msra.mxu1 %v4216_v35  ;;  %3882 = vmatprep.subr.bf16.mxu0 %v4217_v22  ;;  %v5354_v61 = vpop.permute.xlu1 %187 }
  0xf2   :  { %3972 = vmatprep.subr.bf16.mxu1 %v4217_v22 }
  0xf3   :  { %2732 = vmatmul.mubr.bf16.gmra.mrb[104].mxu0 %v5047_v52 }
  0xf4   :  { %2797 = vmatmul.mubr.bf16.gmra.mrb[80].mxu1 %v5041_v12  ;;  %3883 = vmatpush3.bf16.msra.mxu0 %v4218_v44  ;;  %v4221_v12 = vld [vmem:[%s5641_s3 + $0x170] sm:$0xff]  }
  0xf5   :  { %3980 = vmatpush3.bf16.msra.mxu1 %v4218_v44  ;;  %2804 = vmatprep.mubr.bf16.mxu1 %v5053_v59  ;;  %v4223_v59 = vld [vmem:[%s5641_s3 + $0x178] sm:$0xff]   ;;  %v5361_v18 = vpop.permute.xlu0 %192 }
  0xf6   :  { %v3432_v26 = vpop.f32.mrb[0].mxu0  ;;  %3973 = vmatprep.subr.bf16.mxu1 %v4219_v23  ;;  %3884 = vmatprep.subr.bf16.mxu0 %v4219_v23 }
  0xf7   :  { %v3472_v28 = vpop.f32.mrb[0].mxu1  ;;  %v3433_v50 = vpop.f32.mrb[1].mxu0  ;;  %2739 = vmatprep.mubr.bf16.mxu0 %v5062_v13 }
  0xf8   :  { %v3473_v30 = vpop.f32.mrb[1].mxu1  ;;  %v3434_v9 = vadd.f32 %v3433_v50, %v3432_v26  ;;  %v3435_v32 = vpop.f32.mrb[2].mxu0  ;;  %3885 = vmatpush3.bf16.msra.mxu0 %v4220_v38 }
  0xf9   :  { %v3474_v17 = vadd.f32 %v3473_v30, %v3472_v28  ;;  %v3475_v25 = vpop.f32.mrb[2].mxu1  ;;  %v3436_v31 = vpop.f32.mrb[3].mxu0  ;;  %3981 = vmatpush3.bf16.msra.mxu1 %v4220_v38  ;;  %3886 = vmatprep.subr.bf16.mxu0 %v4221_v12 }
  0xfa   :  { %v3476_v39 = vpop.f32.mrb[3].mxu1  ;;  %v698_v40 = vadd.f32 %v3434_v9, %v5311_v45  ;;  %v3437_v46 = vadd.f32 %v3436_v31, %v3435_v32  ;;  %3974 = vmatprep.subr.bf16.mxu1 %v4221_v12  ;;  %v5377_v30 = vpop.permute.xlu0 %202 }
  0xfb   :  { %v3477_v27 = vadd.f32 %v3476_v39, %v3475_v25  ;;  %2740 = vmatmul.mubr.bf16.gmra.mrb[108].mxu0 %v5083_v3 }
  0xfc   :  { %v5331_v52 = vadd.f32 %v3474_v17, %v698_v40  ;;  %v701_v49 = vadd.f32 %v3437_v46, %v5328_v48  ;;  %2805 = vmatmul.mubr.bf16.gmra.mrb[84].mxu1 %v5077_v14  ;;  %3887 = vmatpush3.bf16.msra.mxu0 %v4222_v54  ;;  %v4225_v14 = vld [vmem:[%s5641_s3 + $0x180] sm:$0xff]  }
  0xfd   :  { %3982 = vmatpush3.bf16.msra.mxu1 %v4222_v54  ;;  %3888 = vmatprep.subr.bf16.mxu0 %v4223_v59  ;;  %v5373_v28 = vpop.permute.xlu1 %197 }
  0xfe   :  { %v3438_v55 = vpop.f32.mrb[4].mxu0  ;;  %v5343_v33 = vadd.f32 %v3477_v27, %v701_v49  ;;  %3975 = vmatprep.subr.bf16.mxu1 %v4223_v59  ;;  %2869 = vmatprep.mubr.bf16.mxu1 %v5221_v58 }
  0xff   :  { %v3478_v47 = vpop.f32.mrb[4].mxu1  ;;  %v3439_v13 = vpop.f32.mrb[5].mxu0  ;;  %2845 = vmatprep.mubr.bf16.mxu0 %v5099_v19 }
 0x100   :  { %v3479_v0 = vpop.f32.mrb[5].mxu1  ;;  %v3440_v36 = vadd.f32 %v3439_v13, %v3438_v55  ;;  %v3441_v43 = vpop.f32.mrb[6].mxu0  ;;  %3889 = vmatpush3.bf16.msra.mxu0 %v4224_v8 }
 0x101   :  { %v3480_v6 = vadd.f32 %v3479_v0, %v3478_v47  ;;  %v3481_v42 = vpop.f32.mrb[6].mxu1  ;;  %v3442_v51 = vpop.f32.mrb[7].mxu0  ;;  %3983 = vmatpush3.bf16.msra.mxu1 %v4224_v8  ;;  %v4270_v0 = vld [vmem:[%s5637_s4 + $0xc0] ss:$28 sps:$4 sm:$0xff]  }
 0x102   :  { %v3482_v11 = vpop.f32.mrb[7].mxu1  ;;  %v706_v53 = vadd.f32 %v3440_v36, %v5335_v41  ;;  %v3443_v60 = vadd.f32 %v3442_v51, %v3441_v43  ;;  %3956 = vmatprep.subr.bf16.mxu1 %v4225_v14 }
 0x103   :  { %v3483_v62 = vadd.f32 %v3482_v11, %v3481_v42  ;;  %2846 = vmatmul.mubr.bf16.vlgmr.msra.gmra.mrb[112].mxu0 %v5130_v24 }
 0x104   :  { %v5357_v3 = vadd.f32 %v3480_v6, %v706_v53  ;;  %v709_v4 = vadd.f32 %v3443_v60, %v5354_v61  ;;  %2870 = vmatmul.mubr.bf16.vlgmr.msra.gmra.mrb[88].mxu1 %v5248_v10  ;;  %2853 = vmatprep.mubr.bf16.mxu0 %v5142_v29  ;;  %v4269_v29 = vld [vmem:[%s5637_s4 + $0x88] ss:$28 sps:$4 sm:$0xff]  }
 0x105   :  { %3957 = vmatpush3.bf16.msra.mxu1 %v4225_v14  ;;  %3960 = vmatprep.mubr.msk.bf16.mxu1 %vm650_vm0, %v5089_v16 }
 0x106   :  { %v3444_v57 = vpop.f32.mrb[8].mxu0  ;;  %v5366_v7 = vadd.f32 %v3483_v62, %v709_v4  ;;  %3958 = vmatprep.subr.bf16.mxu1 %v4226_v20 }
 0x107   :  { %v3484_v21 = vpop.f32.mrb[8].mxu1  ;;  %v3445_v58 = vpop.f32.mrb[9].mxu0 }
 0x108   :  { %v3485_v63 = vpop.f32.mrb[9].mxu1  ;;  %v3446_v19 = vadd.f32 %v3445_v58, %v3444_v57  ;;  %v3447_v5 = vpop.f32.mrb[10].mxu0 }
 0x109   :  { %v3486_v1 = vadd.f32 %v3485_v63, %v3484_v21  ;;  %v3487_v2 = vpop.f32.mrb[10].mxu1  ;;  %v3448_v35 = vpop.f32.mrb[11].mxu0  ;;  %3959 = vmatpush3.bf16.msra.mxu1 %v4226_v20 }
 0x10a   :  { %v3488_v22 = vpop.f32.mrb[11].mxu1  ;;  %v714_v44 = vadd.f32 %v3446_v19, %v5361_v18  ;;  %v3449_v23 = vadd.f32 %v3448_v35, %v3447_v5 }
 0x10b   :  { %v3489_v26 = vadd.f32 %v3488_v22, %v3487_v2  ;;  %2854 = vmatmul.mubr.bf16.gmra.mrb[116].mxu0 %v5170_v34 }
 0x10c   :  { %v717_v10 = vadd.f32 %v3449_v23, %v5373_v28  ;;  %v779_v50 = vadd.f32 %v3486_v1, %v714_v44  ;;  %3961 = vmatmul.mubr.msk.bf16.vlgmr.msra.gmra.mrb[92].mxu1 %vm650_vm0, %v5120_v15  ;;  %2861 = vmatprep.mubr.bf16.mxu0 %v5182_v37  ;;  %v5388_v15 = vpop.permute.xlu1 %207 }
 0x10d   :  { %3964 = vmatprep.mubr.msk.bf16.mxu1 %vm650_vm0, %v4269_v29 }
 0x10e   :  { %v3450_v24 = vpop.f32.mrb[12].mxu0  ;;  %v782_v17 = vadd.f32 %v3489_v26, %v717_v10 }
 0x10f   :  { %v3490_v9 = vpop.f32.mrb[12].mxu1  ;;  %v3451_v32 = vpop.f32.mrb[13].mxu0 }
 0x110   :  { %v3491_v25 = vpop.f32.mrb[13].mxu1  ;;  %v3452_v16 = vadd.f32 %v3451_v32, %v3450_v24  ;;  %v3453_v31 = vpop.f32.mrb[14].mxu0 }
 0x111   :  { %v3492_v38 = vadd.f32 %v3491_v25, %v3490_v9  ;;  %v3493_v39 = vpop.f32.mrb[14].mxu1  ;;  %v3454_v40 = vpop.f32.mrb[15].mxu0 }
 0x112   :  { %v3494_v12 = vpop.f32.mrb[15].mxu1  ;;  %v722_v46 = vadd.f32 %v3452_v16, %v5377_v30  ;;  %v3455_v27 = vadd.f32 %v3454_v40, %v3453_v31 }
 0x113   :  { %v3495_v49 = vadd.f32 %v3494_v12, %v3493_v39  ;;  %2862 = vmatmul.mubr.bf16.gmra.mrb[120].mxu0 %v5209_v56 }
 0x114   :  { %v725_v54 = vadd.f32 %v3455_v27, %v5388_v15  ;;  %v787_v59 = vadd.f32 %v3492_v38, %v722_v46  ;;  %3965 = vmatmul.mubr.msk.bf16.gmra.mrb[96].mxu1 %vm650_vm0, %v4270_v0 }
 0x116   :  { %v790_v55 = vadd.f32 %v3495_v49, %v725_v54  ;;  %v3512_v47 = vpop.f32.mrb[16].mxu0 }
 0x117   :  { %v3926_v34 = vpop.f32.mrb[16].mxu1  ;;  %v3513_v36 = vpop.f32.mrb[17].mxu0 }
 0x118   :  { %v892_v13 = vpop.f32.mrb[17].mxu1  ;;  %v3514_v37 = vadd.f32 %v3513_v36, %v3512_v47  ;;  %v3515_v43 = vpop.f32.mrb[18].mxu0 }
 0x119   :  { %v3927_v6 = vpop.f32.mrb[18].mxu1  ;;  %v3516_v8 = vpop.f32.mrb[19].mxu0 }
 0x11a   :  { %v895_v42 = vpop.f32.mrb[19].mxu1  ;;  %v828_v51 = vadd.f32 %v3514_v37, %v5331_v52  ;;  %v3517_v11 = vadd.f32 %v3516_v8, %v3515_v43 }
 0x11c   :  { %v5397_v53 = vadd.f32 %v892_v13, %v828_v51  ;;  %v831_v14 = vadd.f32 %v3517_v11, %v5343_v33 }
 0x11e   :  { %v5400_v60 = vadd.f32 %v895_v42, %v831_v14  ;;  %v3518_v62 = vpop.f32.mrb[20].mxu0 }
 0x11f   :  { %v3519_v4 = vpop.f32.mrb[21].mxu0 }
 0x120   :  { %v3520_v20 = vadd.f32 %v3519_v4, %v3518_v62  ;;  %v3521_v57 = vpop.f32.mrb[22].mxu0 }
 0x121   :  { %v3522_v21 = vpop.f32.mrb[23].mxu0  ;;  %v3930_v23 = vpop.f32.mrb[20].mxu1 }
 0x122   :  { %v836_v56 = vadd.f32 %v3520_v20, %v5357_v3  ;;  %v3523_v58 = vadd.f32 %v3522_v21, %v3521_v57  ;;  %v908_v10 = vpop.f32.mrb[21].mxu1 }
 0x123   :  { %v3931_v3 = vpop.f32.mrb[22].mxu1 }
 0x124   :  { %v5403_v63 = vadd.f32 %v3926_v34, %v836_v56  ;;  %v839_v19 = vadd.f32 %v3523_v58, %v5366_v7  ;;  %v911_v9 = vpop.f32.mrb[23].mxu1 }
 0x126   :  { %v5406_v52 = vadd.f32 %v3927_v6, %v839_v19  ;;  %v3524_v1 = vpop.f32.mrb[24].mxu0 }
 0x127   :  { %v3525_v5 = vpop.f32.mrb[25].mxu0 }
 0x128   :  { %v3526_v2 = vadd.f32 %v3525_v5, %v3524_v1  ;;  %v3527_v33 = vpop.f32.mrb[26].mxu0 }
 0x129   :  { %v3528_v35 = vpop.f32.mrb[27].mxu0 }
 0x12a   :  { %v3529_v22 = vadd.f32 %v3528_v35, %v3527_v33  ;;  %v844_v44 = vadd.f32 %v3526_v2, %v779_v50 }
 0x12c   :  { %v847_v26 = vadd.f32 %v3529_v22, %v782_v17  ;;  %v5408_v24 = vadd.f32 %v908_v10, %v844_v44 }
 0x12e   :  { %v5410_v32 = vadd.f32 %v911_v9, %v847_v26  ;;  %v3530_v25 = vpop.f32.mrb[28].mxu0 }
 0x12f   :  { %v3531_v7 = vpop.f32.mrb[29].mxu0 }
 0x130   :  { %v3532_v16 = vadd.f32 %v3531_v7, %v3530_v25  ;;  %v3533_v38 = vpop.f32.mrb[30].mxu0 }
 0x131   :  { %v3534_v31 = vpop.f32.mrb[31].mxu0 }
 0x132   :  { %v852_v39 = vadd.f32 %v3532_v16, %v787_v59  ;;  %v3535_v29 = vadd.f32 %v3534_v31, %v3533_v38 }
 0x134   :  { %v5412_v40 = vadd.f32 %v3930_v23, %v852_v39  ;;  %v855_v12 = vadd.f32 %v3535_v29, %v790_v55 }
 0x136   :  { %v5414_v50 = vadd.f32 %v3931_v3, %v855_v12  ;;  %v3558_v46 = vpop.f32.mrb[32].mxu0 }
 0x137   :  { %v3598_v17 = vpop.f32.mrb[24].mxu1  ;;  %v3559_v54 = vpop.f32.mrb[33].mxu0 }
 0x138   :  { %v3599_v27 = vpop.f32.mrb[25].mxu1  ;;  %v3560_v47 = vadd.f32 %v3559_v54, %v3558_v46  ;;  %v3561_v13 = vpop.f32.mrb[34].mxu0 }
 0x139   :  { %v3600_v49 = vadd.f32 %v3599_v27, %v3598_v17  ;;  %v3601_v34 = vpop.f32.mrb[26].mxu1  ;;  %v3562_v6 = vpop.f32.mrb[35].mxu0 }
 0x13a   :  { %v3602_v0 = vpop.f32.mrb[27].mxu1  ;;  %v1366_v37 = vadd.f32 %v3560_v47, %v5311_v45  ;;  %v3563_v59 = vadd.f32 %v3562_v6, %v3561_v13 }
 0x13b   :  { %v3603_v36 = vadd.f32 %v3602_v0, %v3601_v34 }
 0x13c   :  { %v1369_v43 = vadd.f32 %v3563_v59, %v5328_v48  ;;  %v1431_v42 = vadd.f32 %v3600_v49, %v1366_v37 }
 0x13e   :  { %v3564_v8 = vpop.f32.mrb[36].mxu0  ;;  %v1434_v11 = vadd.f32 %v3603_v36, %v1369_v43 }
 0x13f   :  { %v3604_v55 = vpop.f32.mrb[28].mxu1  ;;  %v3565_v62 = vpop.f32.mrb[37].mxu0 }
 0x140   :  { %v3605_v51 = vpop.f32.mrb[29].mxu1  ;;  %v3566_v20 = vadd.f32 %v3565_v62, %v3564_v8  ;;  %v3567_v57 = vpop.f32.mrb[38].mxu0 }
 0x141   :  { %v3606_v14 = vadd.f32 %v3605_v51, %v3604_v55  ;;  %v3607_v4 = vpop.f32.mrb[30].mxu1  ;;  %v3568_v58 = vpop.f32.mrb[39].mxu0 }
 0x142   :  { %v3608_v21 = vpop.f32.mrb[31].mxu1  ;;  %v1374_v19 = vadd.f32 %v3566_v20, %v5335_v41  ;;  %v3569_v1 = vadd.f32 %v3568_v58, %v3567_v57 }
 0x143   :  { %v3609_v56 = vadd.f32 %v3608_v21, %v3607_v4 }
 0x144   :  { %v1377_v5 = vadd.f32 %v3569_v1, %v5354_v61  ;;  %v1439_v2 = vadd.f32 %v3606_v14, %v1374_v19 }
 0x146   :  { %v3570_v35 = vpop.f32.mrb[40].mxu0  ;;  %v1442_v44 = vadd.f32 %v3609_v56, %v1377_v5 }
 0x147   :  { %v3610_v33 = vpop.f32.mrb[32].mxu1  ;;  %v3571_v26 = vpop.f32.mrb[41].mxu0 }
 0x148   :  { %v3611_v22 = vpop.f32.mrb[33].mxu1  ;;  %v3572_v3 = vadd.f32 %v3571_v26, %v3570_v35  ;;  %v3573_v9 = vpop.f32.mrb[42].mxu0 }
 0x149   :  { %v3612_v23 = vadd.f32 %v3611_v22, %v3610_v33  ;;  %v3613_v10 = vpop.f32.mrb[34].mxu1  ;;  %v3574_v16 = vpop.f32.mrb[43].mxu0  ;;  %v923_v22 = vmax.f32 %v5397_v53, 0.0 }
 0x14a   :  { %v3614_v25 = vpop.f32.mrb[35].mxu1  ;;  %v1382_v38 = vadd.f32 %v3572_v3, %v5361_v18  ;;  %v3575_v31 = vadd.f32 %v3574_v16, %v3573_v9 }
 0x14b   :  { %v3615_v7 = vadd.f32 %v3614_v25, %v3613_v10 }
 0x14c   :  { %v1385_v39 = vadd.f32 %v3575_v31, %v5373_v28  ;;  %v5422_v29 = vadd.f32 %v3612_v23, %v1382_v38 }
 0x14e   :  { %v3576_v17 = vpop.f32.mrb[44].mxu0  ;;  %v1450_v27 = vadd.f32 %v3615_v7, %v1385_v39  ;;  %v924_v7 = vmax.f32 %v5400_v60, 0.0  ;;  %v926_v60 = vmax.f32 %v5406_v52, 0.0  ;;  %v928_v52 = vmax.f32 %v5410_v32, 0.0 }
 0x14f   :  { %v3616_v12 = vpop.f32.mrb[36].mxu1  ;;  %v3577_v54 = vpop.f32.mrb[45].mxu0 }
 0x150   :  { %v3617_v46 = vpop.f32.mrb[37].mxu1  ;;  %v3578_v47 = vadd.f32 %v3577_v54, %v3576_v17  ;;  %v3579_v13 = vpop.f32.mrb[46].mxu0  ;;  %v925_v54 = vmax.f32 %v5403_v63, 0.0  ;;  %v927_v63 = vmax.f32 %v5408_v24, 0.0 }
 0x151   :  { %v3618_v49 = vadd.f32 %v3617_v46, %v3616_v12  ;;  %v3619_v34 = vpop.f32.mrb[38].mxu1  ;;  %v3580_v6 = vpop.f32.mrb[47].mxu0 }
 0x152   :  { %v3620_v0 = vpop.f32.mrb[39].mxu1  ;;  %v1390_v37 = vadd.f32 %v3578_v47, %v5377_v30  ;;  %v3581_v59 = vadd.f32 %v3580_v6, %v3579_v13 }
 0x153   :  { %v3621_v36 = vadd.f32 %v3620_v0, %v3619_v34 }
 0x154   :  { %v1393_v43 = vadd.f32 %v3581_v59, %v5388_v15  ;;  %v5426_v55 = vadd.f32 %v3618_v49, %v1390_v37 }
 0x156   :  { %v3638_v51 = vpop.f32.mrb[48].mxu0  ;;  %v1458_v62 = vadd.f32 %v3621_v36, %v1393_v43 }
 0x157   :  { %v3938_v8 = vpop.f32.mrb[40].mxu1  ;;  %v3639_v4 = vpop.f32.mrb[49].mxu0 }
 0x158   :  { %v1560_v14 = vpop.f32.mrb[41].mxu1  ;;  %v3640_v57 = vadd.f32 %v3639_v4, %v3638_v51  ;;  %v3641_v21 = vpop.f32.mrb[50].mxu0 }
 0x159   :  { %v3939_v20 = vpop.f32.mrb[42].mxu1  ;;  %v3642_v58 = vpop.f32.mrb[51].mxu0 }
 0x15a   :  { %v1563_v56 = vpop.f32.mrb[43].mxu1  ;;  %v1496_v19 = vadd.f32 %v3640_v57, %v1431_v42  ;;  %v3643_v1 = vadd.f32 %v3642_v58, %v3641_v21 }
 0x15c   :  { %v1561_v5 = vadd.f32 %v1560_v14, %v1496_v19  ;;  %v1499_v33 = vadd.f32 %v3643_v1, %v1434_v11 }
 0x15e   :  { %v1591_v23 = vmax.f32 %v1561_v5, 0.0  ;;  %v1564_v26 = vadd.f32 %v1563_v56, %v1499_v33  ;;  %v3644_v10 = vpop.f32.mrb[52].mxu0 }
 0x15f   :  { %v3942_v35 = vpop.f32.mrb[44].mxu1  ;;  %v3645_v9 = vpop.f32.mrb[53].mxu0 }
 0x160   :  { %v1576_v3 = vpop.f32.mrb[45].mxu1  ;;  %v1592_v16 = vmax.f32 %v1564_v26, 0.0  ;;  %v3646_v38 = vadd.f32 %v3645_v9, %v3644_v10  ;;  %v3647_v31 = vpop.f32.mrb[54].mxu0  ;;  %v5430_v12 = vmax.f32 %v923_v22, %v1591_v23  ;;  %v929_v26 = vmax.f32 %v5412_v40, 0.0 }
 0x161   :  { %v3943_v25 = vpop.f32.mrb[46].mxu1  ;;  %v3648_v42 = vpop.f32.mrb[55].mxu0 }
 0x162   :  { %v1579_v39 = vpop.f32.mrb[47].mxu1  ;;  %v1504_v17 = vadd.f32 %v3646_v38, %v1439_v2  ;;  %v3649_v11 = vadd.f32 %v3648_v42, %v3647_v31  ;;  %v5432_v46 = vmax.f32 %v924_v7, %v1592_v16  ;;  %v930_v31 = vmax.f32 %v5414_v50, 0.0 }
 0x164   :  { %v1569_v53 = vadd.f32 %v3938_v8, %v1504_v17  ;;  %v1507_v49 = vadd.f32 %v3649_v11, %v1442_v44 }
 0x166   :  { %v1593_v34 = vmax.f32 %v1569_v53, 0.0  ;;  %v1572_v47 = vadd.f32 %v3939_v20, %v1507_v49  ;;  %v3650_v13 = vpop.f32.mrb[56].mxu0 }
 0x167   :  { %v3651_v0 = vpop.f32.mrb[57].mxu0 }
 0x168   :  { %v1594_v36 = vmax.f32 %v1572_v47, 0.0  ;;  %v3652_v6 = vadd.f32 %v3651_v0, %v3650_v13  ;;  %v3653_v37 = vpop.f32.mrb[58].mxu0  ;;  %v5436_v59 = vmax.f32 %v925_v54, %v1593_v34 }
 0x169   :  { %v3654_v43 = vpop.f32.mrb[59].mxu0 }
 0x16a   :  { %v3655_v2 = vadd.f32 %v3654_v43, %v3653_v37  ;;  %v1512_v51 = vadd.f32 %v3652_v6, %v5422_v29  ;;  %v5439_v14 = vmax.f32 %v926_v60, %v1594_v36 }
 0x16c   :  { %v1577_v44 = vadd.f32 %v1576_v3, %v1512_v51  ;;  %v1515_v8 = vadd.f32 %v3655_v2, %v1450_v27 }
 0x16e   :  { %v1595_v4 = vmax.f32 %v1577_v44, 0.0  ;;  %v1580_v20 = vadd.f32 %v1579_v39, %v1515_v8  ;;  %v3656_v57 = vpop.f32.mrb[60].mxu0 }
 0x16f   :  { %v3657_v21 = vpop.f32.mrb[61].mxu0 }
 0x170   :  { %v5443_v56 = vmax.f32 %v927_v63, %v1595_v4  ;;  %v1596_v58 = vmax.f32 %v1580_v20, 0.0  ;;  %v3658_v19 = vadd.f32 %v3657_v21, %v3656_v57  ;;  %v3659_v1 = vpop.f32.mrb[62].mxu0 }
 0x171   :  { %v3660_v5 = vpop.f32.mrb[63].mxu0 }
 0x172   :  { %v5445_v33 = vmax.f32 %v928_v52, %v1596_v58  ;;  %v1520_v29 = vadd.f32 %v3658_v19, %v5426_v55  ;;  %v3661_v22 = vadd.f32 %v3660_v5, %v3659_v1 }
 0x174   :  { %v1585_v27 = vadd.f32 %v3942_v35, %v1520_v29  ;;  %v1523_v23 = vadd.f32 %v3661_v22, %v1458_v62 }
 0x176   :  { %v1597_v10 = vmax.f32 %v1585_v27, 0.0  ;;  %v1588_v3 = vadd.f32 %v3943_v25, %v1523_v23  ;;  %v3684_v32 = vpop.f32.mrb[64].mxu0 }
 0x177   :  { %v3724_v24 = vpop.f32.mrb[48].mxu1  ;;  %v3685_v38 = vpop.f32.mrb[65].mxu0 }
 0x178   :  { %v3725_v9 = vpop.f32.mrb[49].mxu1  ;;  %v1598_v39 = vmax.f32 %v1588_v3, 0.0  ;;  %v3686_v42 = vadd.f32 %v3685_v38, %v3684_v32  ;;  %v3687_v11 = vpop.f32.mrb[66].mxu0  ;;  %v5450_v55 = vmax.f32 %v929_v26, %v1597_v10 }
 0x179   :  { %v3726_v7 = vadd.f32 %v3725_v9, %v3724_v24  ;;  %v3727_v16 = vpop.f32.mrb[50].mxu1  ;;  %v3688_v62 = vpop.f32.mrb[67].mxu0 }
 0x17a   :  { %v3728_v17 = vpop.f32.mrb[51].mxu1  ;;  %v2042_v53 = vadd.f32 %v3686_v42, %v5311_v45  ;;  %v3689_v40 = vadd.f32 %v3688_v62, %v3687_v11  ;;  %v5453_v49 = vmax.f32 %v930_v31, %v1598_v39 }
 0x17b   :  { %v3729_v35 = vadd.f32 %v3728_v17, %v3727_v16 }
 0x17c   :  { %v2045_v25 = vadd.f32 %v3689_v40, %v5328_v48  ;;  %v2107_v54 = vadd.f32 %v3726_v7, %v2042_v53 }
 0x17e   :  { %v3690_v13 = vpop.f32.mrb[68].mxu0  ;;  %v2110_v50 = vadd.f32 %v3729_v35, %v2045_v25 }
 0x17f   :  { %v3730_v34 = vpop.f32.mrb[52].mxu1  ;;  %v3691_v36 = vpop.f32.mrb[69].mxu0 }
 0x180   :  { %v3731_v47 = vpop.f32.mrb[53].mxu1  ;;  %v3692_v6 = vadd.f32 %v3691_v36, %v3690_v13  ;;  %v3693_v43 = vpop.f32.mrb[70].mxu0 }
 0x181   :  { %v3732_v0 = vadd.f32 %v3731_v47, %v3730_v34  ;;  %v3733_v60 = vpop.f32.mrb[54].mxu1  ;;  %v3694_v51 = vpop.f32.mrb[71].mxu0 }
 0x182   :  { %v3734_v37 = vpop.f32.mrb[55].mxu1  ;;  %v2050_v44 = vadd.f32 %v3692_v6, %v5335_v41  ;;  %v3695_v8 = vadd.f32 %v3694_v51, %v3693_v43 }
 0x183   :  { %v3735_v2 = vadd.f32 %v3734_v37, %v3733_v60 }
 0x184   :  { %v2053_v63 = vadd.f32 %v3695_v8, %v5354_v61  ;;  %v2115_v4 = vadd.f32 %v3732_v0, %v2050_v44 }
 0x186   :  { %v3696_v21 = vpop.f32.mrb[72].mxu0  ;;  %v2118_v52 = vadd.f32 %v3735_v2, %v2053_v63 }
 0x187   :  { %v3736_v20 = vpop.f32.mrb[56].mxu1  ;;  %v3697_v1 = vpop.f32.mrb[73].mxu0 }
 0x188   :  { %v3737_v57 = vpop.f32.mrb[57].mxu1  ;;  %v3698_v5 = vadd.f32 %v3697_v1, %v3696_v21  ;;  %v3699_v22 = vpop.f32.mrb[74].mxu0 }
 0x189   :  { %v3738_v58 = vadd.f32 %v3737_v57, %v3736_v20  ;;  %v3739_v19 = vpop.f32.mrb[58].mxu1  ;;  %v3700_v23 = vpop.f32.mrb[75].mxu0 }
 0x18a   :  { %v3740_v29 = vpop.f32.mrb[59].mxu1  ;;  %v2058_v24 = vadd.f32 %v3698_v5, %v5361_v18  ;;  %v3701_v26 = vadd.f32 %v3700_v23, %v3699_v22 }
 0x18b   :  { %v3741_v27 = vadd.f32 %v3740_v29, %v3739_v19 }
 0x18c   :  { %v2061_v10 = vadd.f32 %v3701_v26, %v5373_v28  ;;  %v2123_v3 = vadd.f32 %v3738_v58, %v2058_v24 }
 0x18e   :  { %v3702_v7 = vpop.f32.mrb[76].mxu0  ;;  %v2126_v16 = vadd.f32 %v3741_v27, %v2061_v10 }
 0x18f   :  { %v3742_v9 = vpop.f32.mrb[60].mxu1  ;;  %v3703_v39 = vpop.f32.mrb[77].mxu0 }
 0x190   :  { %v3743_v32 = vpop.f32.mrb[61].mxu1  ;;  %v3704_v42 = vadd.f32 %v3703_v39, %v3702_v7  ;;  %v3705_v11 = vpop.f32.mrb[78].mxu0 }
 0x191   :  { %v3744_v38 = vadd.f32 %v3743_v32, %v3742_v9  ;;  %v3745_v31 = vpop.f32.mrb[62].mxu1  ;;  %v3706_v62 = vpop.f32.mrb[79].mxu0 }
 0x192   :  { %v3746_v17 = vpop.f32.mrb[63].mxu1  ;;  %v2066_v53 = vadd.f32 %v3704_v42, %v5377_v30  ;;  %v3707_v40 = vadd.f32 %v3706_v62, %v3705_v11 }
 0x193   :  { %v3747_v35 = vadd.f32 %v3746_v17, %v3745_v31 }
 0x194   :  { %v2069_v25 = vadd.f32 %v3707_v40, %v5388_v15  ;;  %v2131_v34 = vadd.f32 %v3744_v38, %v2066_v53 }
 0x196   :  { %v3764_v0 = vpop.f32.mrb[80].mxu0  ;;  %v2134_v60 = vadd.f32 %v3747_v35, %v2069_v25 }
 0x197   :  { %v3950_v47 = vpop.f32.mrb[64].mxu1  ;;  %v3765_v6 = vpop.f32.mrb[81].mxu0 }
 0x198   :  { %v2236_v13 = vpop.f32.mrb[65].mxu1  ;;  %v3766_v37 = vadd.f32 %v3765_v6, %v3764_v0  ;;  %v3767_v2 = vpop.f32.mrb[82].mxu0 }
 0x199   :  { %v3951_v36 = vpop.f32.mrb[66].mxu1  ;;  %v3768_v51 = vpop.f32.mrb[83].mxu0 }
 0x19a   :  { %v2239_v43 = vpop.f32.mrb[67].mxu1  ;;  %v2172_v44 = vadd.f32 %v3766_v37, %v2107_v54  ;;  %v3769_v8 = vadd.f32 %v3768_v51, %v3767_v2 }
 0x19c   :  { %v2237_v63 = vadd.f32 %v2236_v13, %v2172_v44  ;;  %v2175_v20 = vadd.f32 %v3769_v8, %v2110_v50 }
 0x19e   :  { %v2267_v21 = vmax.f32 %v2237_v63, 0.0  ;;  %v2240_v58 = vadd.f32 %v2239_v43, %v2175_v20  ;;  %v3770_v19 = vpop.f32.mrb[84].mxu0 }
 0x19f   :  { %v3954_v57 = vpop.f32.mrb[68].mxu1  ;;  %v3771_v5 = vpop.f32.mrb[85].mxu0 }
 0x1a0   :  { %v2252_v1 = vpop.f32.mrb[69].mxu1  ;;  %v2268_v22 = vmax.f32 %v2240_v58, 0.0  ;;  %v3772_v27 = vadd.f32 %v3771_v5, %v3770_v19  ;;  %v3773_v23 = vpop.f32.mrb[86].mxu0  ;;  %v5463_v26 = vmax.f32 %v5430_v12, %v2267_v21 }
 0x1a1   :  { %v3955_v29 = vpop.f32.mrb[70].mxu1  ;;  %v3774_v10 = vpop.f32.mrb[87].mxu0 }
 0x1a2   :  { %v2255_v24 = vpop.f32.mrb[71].mxu1  ;;  %v2180_v9 = vadd.f32 %v3772_v27, %v2115_v4  ;;  %v3775_v54 = vadd.f32 %v3774_v10, %v3773_v23  ;;  %v5466_v32 = vmax.f32 %v5432_v46, %v2268_v22 }
 0x1a4   :  { %v2245_v50 = vadd.f32 %v3950_v47, %v2180_v9  ;;  %v2183_v7 = vadd.f32 %v3775_v54, %v2118_v52 }
 0x1a6   :  { %v2269_v38 = vmax.f32 %v2245_v50, 0.0  ;;  %v2248_v31 = vadd.f32 %v3951_v36, %v2183_v7  ;;  %v3776_v39 = vpop.f32.mrb[88].mxu0 }
 0x1a7   :  { %v3777_v42 = vpop.f32.mrb[89].mxu0 }
 0x1a8   :  { %v2270_v17 = vmax.f32 %v2248_v31, 0.0  ;;  %v3778_v11 = vadd.f32 %v3777_v42, %v3776_v39  ;;  %v3779_v35 = vpop.f32.mrb[90].mxu0  ;;  %v5469_v62 = vmax.f32 %v5436_v59, %v2269_v38 }
 0x1a9   :  { %v3780_v12 = vpop.f32.mrb[91].mxu0 }
 0x1aa   :  { %v3781_v53 = vadd.f32 %v3780_v12, %v3779_v35  ;;  %v2188_v40 = vadd.f32 %v3778_v11, %v2123_v3  ;;  %v5472_v4 = vmax.f32 %v5439_v14, %v2270_v17 }
 0x1ac   :  { %v2253_v46 = vadd.f32 %v2252_v1, %v2188_v40  ;;  %v2191_v25 = vadd.f32 %v3781_v53, %v2126_v16 }
 0x1ae   :  { %v2271_v47 = vmax.f32 %v2253_v46, 0.0  ;;  %v2256_v52 = vadd.f32 %v2255_v24, %v2191_v25  ;;  %v3782_v13 = vpop.f32.mrb[92].mxu0 }
 0x1af   :  { %v3783_v0 = vpop.f32.mrb[93].mxu0 }
 0x1b0   :  { %v5475_v36 = vmax.f32 %v5443_v56, %v2271_v47  ;;  %v2272_v6 = vmax.f32 %v2256_v52, 0.0  ;;  %v3784_v37 = vadd.f32 %v3783_v0, %v3782_v13  ;;  %v3785_v43 = vpop.f32.mrb[94].mxu0 }
 0x1b1   :  { %v3786_v59 = vpop.f32.mrb[95].mxu0 }
 0x1b2   :  { %v5478_v2 = vmax.f32 %v5445_v33, %v2272_v6  ;;  %v2196_v3 = vadd.f32 %v3784_v37, %v2131_v34  ;;  %v3787_v51 = vadd.f32 %v3786_v59, %v3785_v43 }
 0x1b4   :  { %v2261_v14 = vadd.f32 %v3954_v57, %v2196_v3  ;;  %v2199_v44 = vadd.f32 %v3787_v51, %v2134_v60 }
 0x1b6   :  { %v2273_v16 = vmax.f32 %v2261_v14, 0.0  ;;  %v2264_v63 = vadd.f32 %v3955_v29, %v2199_v44  ;;  %v3810_v21 = vpop.f32.mrb[96].mxu0 }
 0x1b7   :  { %v3850_v8 = vpop.f32.mrb[72].mxu1  ;;  %v3811_v56 = vpop.f32.mrb[97].mxu0 }
 0x1b8   :  { %v3851_v20 = vpop.f32.mrb[73].mxu1  ;;  %v2274_v1 = vmax.f32 %v2264_v63, 0.0  ;;  %v3812_v5 = vadd.f32 %v3811_v56, %v3810_v21  ;;  %v3813_v27 = vpop.f32.mrb[98].mxu0  ;;  %v5481_v23 = vmax.f32 %v5450_v55, %v2273_v16 }
 0x1b9   :  { %v3852_v58 = vadd.f32 %v3851_v20, %v3850_v8  ;;  %v3853_v19 = vpop.f32.mrb[74].mxu1  ;;  %v3814_v34 = vpop.f32.mrb[99].mxu0 }
 0x1ba   :  { %v3854_v22 = vpop.f32.mrb[75].mxu1  ;;  %v2718_v57 = vadd.f32 %v3812_v5, %v5311_v45  ;;  %v3815_v60 = vadd.f32 %v3814_v34, %v3813_v27  ;;  %v5485_v24 = vmax.f32 %v5453_v49, %v2274_v1 }
 0x1bb   :  { %v3855_v33 = vadd.f32 %v3854_v22, %v3853_v19 }
 0x1bc   :  { %v2721_v29 = vadd.f32 %v3815_v60, %v5328_v48  ;;  %v5488_v10 = vadd.f32 %v3852_v58, %v2718_v57 }
 0x1be   :  { %v3816_v50 = vpop.f32.mrb[100].mxu0  ;;  %v2786_v7 = vadd.f32 %v3855_v33, %v2721_v29 }
 0x1bf   :  { %v3856_v9 = vpop.f32.mrb[76].mxu1  ;;  %v3817_v55 = vpop.f32.mrb[101].mxu0 }
 0x1c0   :  { %v3857_v54 = vpop.f32.mrb[77].mxu1  ;;  %v3818_v39 = vadd.f32 %v3817_v55, %v3816_v50  ;;  %v3819_v17 = vpop.f32.mrb[102].mxu0 }
 0x1c1   :  { %v3858_v38 = vadd.f32 %v3857_v54, %v3856_v9  ;;  %v3859_v31 = vpop.f32.mrb[78].mxu1  ;;  %v3820_v45 = vpop.f32.mrb[103].mxu0 }
 0x1c2   :  { %v3860_v42 = vpop.f32.mrb[79].mxu1  ;;  %v2726_v35 = vadd.f32 %v3818_v39, %v5335_v41  ;;  %v3821_v49 = vadd.f32 %v3820_v45, %v3819_v17 }
 0x1c3   :  { %v3861_v11 = vadd.f32 %v3860_v42, %v3859_v31 }
 0x1c4   :  { %v2729_v12 = vadd.f32 %v3821_v49, %v5354_v61  ;;  %v2791_v48 = vadd.f32 %v3858_v38, %v2726_v35 }
 0x1c6   :  { %v3822_v46 = vpop.f32.mrb[104].mxu0  ;;  %v2794_v25 = vadd.f32 %v3861_v11, %v2729_v12 }
 0x1c7   :  { %v3862_v53 = vpop.f32.mrb[80].mxu1  ;;  %v3823_v13 = vpop.f32.mrb[105].mxu0 }
 0x1c8   :  { %v3863_v40 = vpop.f32.mrb[81].mxu1  ;;  %v3824_v0 = vadd.f32 %v3823_v13, %v3822_v46  ;;  %v3825_v37 = vpop.f32.mrb[106].mxu0 }
 0x1c9   :  { %v3864_v47 = vadd.f32 %v3863_v40, %v3862_v53  ;;  %v3865_v52 = vpop.f32.mrb[82].mxu1  ;;  %v3826_v59 = vpop.f32.mrb[107].mxu0 }
 0x1ca   :  { %v3866_v6 = vpop.f32.mrb[83].mxu1  ;;  %v2734_v3 = vadd.f32 %v3824_v0, %v5361_v18  ;;  %v3827_v51 = vadd.f32 %v3826_v59, %v3825_v37 }
 0x1cb   :  { %v3867_v43 = vadd.f32 %v3866_v6, %v3865_v52 }
 0x1cc   :  { %v2737_v41 = vadd.f32 %v3827_v51, %v5373_v28  ;;  %v5494_v14 = vadd.f32 %v3864_v47, %v2734_v3 }
 0x1ce   :  { %v3828_v8 = vpop.f32.mrb[108].mxu0  ;;  %v5496_v16 = vadd.f32 %v3867_v43, %v2737_v41 }
 0x1cf   :  { %v3868_v61 = vpop.f32.mrb[84].mxu1  ;;  %v3829_v21 = vpop.f32.mrb[109].mxu0 }
 0x1d0   :  { %v3869_v44 = vpop.f32.mrb[85].mxu1  ;;  %v3830_v58 = vadd.f32 %v3829_v21, %v3828_v8  ;;  %v3831_v56 = vpop.f32.mrb[110].mxu0 }
 0x1d1   :  { %v3870_v63 = vadd.f32 %v3869_v44, %v3868_v61  ;;  %v3871_v20 = vpop.f32.mrb[86].mxu1  ;;  %v3832_v5 = vpop.f32.mrb[111].mxu0 }
 0x1d2   :  { %v3872_v19 = vpop.f32.mrb[87].mxu1  ;;  %v2742_v18 = vadd.f32 %v3830_v58, %v5377_v30  ;;  %v3833_v22 = vadd.f32 %v3832_v5, %v3831_v56 }
 0x1d3   :  { %v3873_v1 = vadd.f32 %v3872_v19, %v3871_v20 }
 0x1d4   :  { %v2745_v28 = vadd.f32 %v3833_v22, %v5388_v15  ;;  %v2807_v27 = vadd.f32 %v3870_v63, %v2742_v18 }
 0x1d6   :  { %v3890_v57 = vpop.f32.mrb[112].mxu0  ;;  %v2810_v60 = vadd.f32 %v3873_v1, %v2745_v28 }
 0x1d7   :  { %v3908_v33 = vpop.f32.mrb[88].mxu1  ;;  %v3891_v54 = vpop.f32.mrb[113].mxu0 }
 0x1d8   :  { %v3909_v34 = vpop.f32.mrb[89].mxu1  ;;  %v3892_v38 = vadd.f32 %v3891_v54, %v3890_v57  ;;  %v3893_v31 = vpop.f32.mrb[114].mxu0 }
 0x1d9   :  { %v3910_v29 = vadd.f32 %v3909_v34, %v3908_v33  ;;  %v3911_v9 = vpop.f32.mrb[90].mxu1  ;;  %v3894_v39 = vpop.f32.mrb[115].mxu0 }
 0x1da   :  { %v3912_v50 = vpop.f32.mrb[91].mxu1  ;;  %v3895_v17 = vadd.f32 %v3894_v39, %v3893_v31  ;;  %v2848_v30 = vadd.f32 %v3892_v38, %v5488_v10  ;;  %v5536_v31 = vpop.permute.xlu0 %3063 }
 0x1db   :  { %v3913_v55 = vadd.f32 %v3912_v50, %v3911_v9  ;;  %v2872_v42 = vadd.f32 %v3910_v29, %v2807_v27  ;;  %v5532_v50 = vpop.permute.xlu1 %3058 }
 0x1dc   :  { %v2851_v45 = vadd.f32 %v3895_v17, %v2786_v7 }
 0x1dd   :  { %v2875_v11 = vadd.f32 %v3913_v55, %v2810_v60 }
 0x1de   :  { %v3896_v49 = vpop.f32.mrb[116].mxu0  ;;  %v5540_v39 = vpop.permute.xlu0 %3078 }
 0x1df   :  { %v3962_v15 = vpop.f32.mrb[92].mxu1  ;;  %v3897_v40 = vpop.f32.mrb[117].mxu0 }
 0x1e0   :  { %v2912_v35 = vpop.f32.mrb[93].mxu1  ;;  %v3898_v47 = vadd.f32 %v3897_v40, %v3896_v49  ;;  %v3899_v52 = vpop.f32.mrb[118].mxu0 }
 0x1e1   :  { %v2913_v12 = vadd.f32 %v2912_v35, %v2848_v30  ;;  %v3963_v53 = vpop.f32.mrb[94].mxu1  ;;  %v3900_v6 = vpop.f32.mrb[119].mxu0 }
 0x1e2   :  { %v2915_v46 = vpop.f32.mrb[95].mxu1  ;;  %v2856_v37 = vadd.f32 %v3898_v47, %v2791_v48  ;;  %v3901_v43 = vadd.f32 %v3900_v6, %v3899_v52  ;;  %v5534_v38 = vpop.permute.xlu1 %3068 }
 0x1e3   :  { %v2943_v13 = vmax.f32 %v2913_v12, 0.0  ;;  %v2916_v0 = vadd.f32 %v2915_v46, %v2851_v45  ;;  %v5544_v17 = vpop.permute.xlu0 %3088 }
 0x1e4   :  { %v2859_v10 = vadd.f32 %v3901_v43, %v2794_v25  ;;  %v2921_v7 = vadd.f32 %v3962_v15, %v2856_v37 }
 0x1e5   :  { %v2944_v59 = vmax.f32 %v2916_v0, 0.0  ;;  %v5502_v3 = vmax.f32 %v5463_v26, %v2943_v13 }
 0x1e6   :  { %v3902_v8 = vpop.f32.mrb[120].mxu0  ;;  %v2945_v63 = vmax.f32 %v2921_v7, 0.0  ;;  %v2924_v20 = vadd.f32 %v3963_v53, %v2859_v10  ;;  %v5538_v55 = vpop.permute.xlu1 %3073 }
 0x1e7   :  { %v3966_v51 = vpop.f32.mrb[96].mxu1  ;;  %2959 = vadd.xlane.f32.xlu0 %v5502_v3  ;;  %v2952_v41 = vmax.f32 %v5466_v32, %v2944_v59  ;;  %v3903_v48 = vpop.f32.mrb[121].mxu0 }
 0x1e8   :  { %v2937_v61 = vadd.f32 %v3966_v51, %v2872_v42  ;;  %v2928_v44 = vpop.f32.mrb[97].mxu1  ;;  %v3904_v56 = vadd.f32 %v3903_v48, %v3902_v8  ;;  %v3905_v26 = vpop.f32.mrb[122].mxu0  ;;  %v2953_v25 = vmax.f32 %v5469_v62, %v2945_v63  ;;  %v2946_v18 = vmax.f32 %v2924_v20, 0.0 }
 0x1e9   :  { %v3967_v21 = vpop.f32.mrb[98].mxu1  ;;  %2961 = vadd.xlane.f32.xlu1 %v2952_v41  ;;  %v3906_v5 = vpop.f32.mrb[123].mxu0 }
 0x1ea   :  { %v2949_v58 = vmax.f32 %v2937_v61, 0.0  ;;  %v2940_v19 = vadd.f32 %v3967_v21, %v2875_v11  ;;  %v2931_v1 = vpop.f32.mrb[99].mxu1  ;;  %v2864_v32 = vadd.f32 %v3904_v56, %v5494_v14  ;;  %v3907_v28 = vadd.f32 %v3906_v5, %v3905_v26  ;;  %v5542_v42 = vpop.permute.xlu1 %3083  ;;  %v3111_v26 = vld [vmem:[%s5643_s7 + $0x38] sm:$0xff] }
 0x1eb   :  { %2963 = vadd.xlane.f32.xlu0 %v2953_v25  ;;  %v2954_v33 = vmax.f32 %v5472_v4, %v2946_v18  ;;  %v3105_v4 = vld [vmem:[%s5643_s7 + $0x8] sm:$0xff] }
 0x1ec   :  { %v2950_v22 = vmax.f32 %v2940_v19, 0.0  ;;  %v2957_v27 = vmax.f32 %v5481_v23, %v2949_v58  ;;  %v2867_v34 = vadd.f32 %v3907_v28, %v5496_v16  ;;  %v2929_v57 = vadd.f32 %v2928_v44, %v2864_v32  ;;  %v3107_v23 = vld [vmem:[%s5643_s7 + $0x18] sm:$0xff]  ;;  %v3108_v16 = vld [vmem:[%s5643_s7 + $0x20] sm:$0xff] }
 0x1ee   :  { %2971 = vadd.xlane.f32.xlu1 %v2957_v27  ;;  %v2958_v60 = vmax.f32 %v5485_v24, %v2950_v22  ;;  %v2932_v29 = vadd.f32 %v2931_v1, %v2867_v34  ;;  %v2947_v62 = vmax.f32 %v2929_v57, 0.0  ;;  %v3109_v24 = vld [vmem:[%s5643_s7 + $0x28] sm:$0xff]  ;;  %v5546_v30 = vpop.permute.xlu1 %3093  ;;  %v3110_v1 = vld [vmem:[%s5643_s7 + $0x30] sm:$0xff] }
 0x1ef   :  { %2965 = vadd.xlane.f32.xlu0 %v2954_v33 }
 0x1f0   :  { %v2948_v9 = vmax.f32 %v2932_v29, 0.0  ;;  %v2955_v54 = vmax.f32 %v5475_v36, %v2947_v62  ;;  %v3104_v36 = vld [vmem:[%s5643_s7] sm:$0xff] }
 0x1f2   :  { %2967 = vadd.xlane.f32.xlu1 %v2955_v54  ;;  %v2956_v14 = vmax.f32 %v5478_v2, %v2948_v9  ;;  %v3106_v2 = vld [vmem:[%s5643_s7 + $0x10] sm:$0xff] }
 0x1f3   :  { %2973 = vadd.xlane.f32.xlu0 %v2958_v60 }
 0x1f7   :  { %2969 = vadd.xlane.f32.xlu0 %v2956_v14 }
 0x203   :  { %3119 = vperm.xlu1 %3986, %v3105_v4  }
 0x207   :  { %3129 = vperm.xlu1 %3986, %v3107_v23  }
 0x20b   :  { %3139 = vperm.xlu1 %3986, %v3109_v24  }
 0x20d   :  { %3114 = vperm.xlu0 %3985, %v3104_v36  }
 0x211   :  { %3124 = vperm.xlu0 %3985, %v3106_v2  }
 0x215   :  { %3134 = vperm.xlu0 %3985, %v3108_v16  }
 0x274   :  { %v2960_v11 = vpop.xlane.xlu0 %2959 }
 0x275   :  { %v2976_v45 = vmul.f32 0.0078125, %v2960_v11 }
 0x276   :  { %v2962_v15 = vpop.xlane.xlu1 %2961 }
 0x277   :  { %v5549_v35 = vsub.f32 %v5502_v3, %v2976_v45  ;;  %v2977_v49 = vmul.f32 0.0078125, %v2962_v15 }
 0x278   :  { %v2964_v40 = vpop.xlane.xlu0 %2963 }
 0x279   :  { %v5551_v12 = vsub.f32 %v2952_v41, %v2977_v49  ;;  %v2992_v53 = vmul.f32 %v5549_v35, %v5549_v35  ;;  %v2978_v46 = vmul.f32 0.0078125, %v2964_v40 }
 0x27b   :  { %v2972_v47 = vpop.xlane.xlu1 %2971  ;;  %3000 = vadd.xlane.f32.xlu1 %v2992_v53  ;;  %v2993_v52 = vmul.f32 %v5551_v12, %v5551_v12  ;;  %v5557_v0 = vsub.f32 %v2953_v25, %v2978_v46 }
 0x27c   :  { %v2982_v13 = vmul.f32 0.0078125, %v2972_v47  ;;  %v2966_v6 = vpop.xlane.xlu0 %2965 }
 0x27d   :  { %3002 = vadd.xlane.f32.xlu0 %v2993_v52  ;;  %v2979_v43 = vmul.f32 0.0078125, %v2966_v6  ;;  %v2994_v59 = vmul.f32 %v5557_v0, %v5557_v0 }
 0x27e   :  { %v5559_v37 = vsub.f32 %v2957_v27, %v2982_v13 }
 0x27f   :  { %v5563_v3 = vsub.f32 %v2954_v33, %v2979_v43  ;;  %3004 = vadd.xlane.f32.xlu1 %v2994_v59  ;;  %v2968_v10 = vpop.xlane.xlu1 %2967 }
 0x280   :  { %v2974_v7 = vpop.xlane.xlu0 %2973  ;;  %v2980_v51 = vmul.f32 0.0078125, %v2968_v10  ;;  %v2998_v61 = vmul.f32 %v5559_v37, %v5559_v37 }
 0x281   :  { %v2983_v41 = vmul.f32 0.0078125, %v2974_v7  ;;  %v2995_v44 = vmul.f32 %v5563_v3, %v5563_v3 }
 0x282   :  { %v5569_v8 = vsub.f32 %v2955_v54, %v2980_v51 }
 0x283   :  { %v5571_v63 = vsub.f32 %v2958_v60, %v2983_v41  ;;  %3012 = vadd.xlane.f32.xlu1 %v2998_v61  ;;  %3006 = vadd.xlane.f32.xlu0 %v2995_v44  ;;  %v3120_v25 = vpop.permute.xlu1 %3119 }
 0x284   :  { %v2970_v20 = vpop.xlane.xlu0 %2969  ;;  %v2996_v48 = vmul.f32 %v5569_v8, %v5569_v8 }
 0x285   :  { %v2981_v21 = vmul.f32 0.0078125, %v2970_v20  ;;  %v2999_v58 = vmul.f32 %v5571_v63, %v5571_v63 }
 0x287   :  { %v5577_v19 = vsub.f32 %v2956_v14, %v2981_v21  ;;  %3008 = vadd.xlane.f32.xlu1 %v2996_v48  ;;  %3014 = vadd.xlane.f32.xlu0 %v2999_v58  ;;  %v5587_v18 = vpop.permute.xlu1 %3129 }
 0x289   :  { %v2997_v56 = vmul.f32 %v5577_v19, %v5577_v19 }
 0x28b   :  { %3010 = vadd.xlane.f32.xlu0 %v2997_v56  ;;  %v5589_v32 = vpop.permute.xlu1 %3139 }
 0x28c   :  { %v3115_v5 = vpop.permute.xlu0 %3114 }
 0x290   :  { %v3125_v22 = vpop.permute.xlu0 %3124 }
 0x294   :  { %v5591_v28 = vpop.permute.xlu0 %3134 }
 0x298   :  { %3149 = vperm.xlu1 %3986, %v3111_v26  }
 0x2a1   :  { %3144 = vperm.xlu0 %3985, %v3110_v1  }
 0x308   :  { %v3001_v27 = vpop.xlane.xlu1 %3000 }
 0x309   :  { %v3016_v33 = vmul.f32 0.0078125, %v3001_v27 }
 0x30a   :  { %v3003_v34 = vpop.xlane.xlu0 %3002 }
 0x30b   :  { %v3024_v57 = vadd.f32 1e-05, %v3016_v33  ;;  %v3017_v60 = vmul.f32 0.0078125, %v3003_v34 }
 0x30c   :  { %v3005_v62 = vpop.xlane.xlu1 %3004 }
 0x30d   :  { %4227 = vrsqrt.f32 %v3024_v57  ;;  %v3025_v29 = vadd.f32 1e-05, %v3017_v60  ;;  %v3018_v9 = vmul.f32 0.0078125, %v3005_v62 }
 0x30f   :  { %4229 = vrsqrt.f32 %v3025_v29  ;;  %v3026_v54 = vadd.f32 1e-05, %v3018_v9 }
 0x310   :  { %v3013_v14 = vpop.xlane.xlu1 %3012  ;;  %v3007_v4 = vpop.xlane.xlu0 %3006 }
 0x311   :  { %4231 = vrsqrt.f32 %v3026_v54  ;;  %v3022_v23 = vmul.f32 0.0078125, %v3013_v14  ;;  %v3019_v24 = vmul.f32 0.0078125, %v3007_v4 }
 0x313   :  { %v3030_v36 = vadd.f32 1e-05, %v3022_v23  ;;  %v3027_v2 = vadd.f32 1e-05, %v3019_v24 }
 0x314   :  { %v3009_v16 = vpop.xlane.xlu1 %3008  ;;  %v3015_v11 = vpop.xlane.xlu0 %3014 }
 0x315   :  { %4233 = vrsqrt.f32 %v3030_v36  ;;  %v3020_v45 = vmul.f32 0.0078125, %v3009_v16  ;;  %v3023_v15 = vmul.f32 0.0078125, %v3015_v11 }
 0x316   :  { %4235 = vrsqrt.f32 %v3027_v2 }
 0x317   :  { %v4228_v49 = vpop.eup %4227  ;;  %v3028_v40 = vadd.f32 1e-05, %v3020_v45  ;;  %v3031_v46 = vadd.f32 1e-05, %v3023_v15 }
 0x318   :  { %v3040_v53 = vmul.f32 %v4228_v49, %v5549_v35  ;;  %v3011_v52 = vpop.xlane.xlu0 %3010 }
 0x319   :  { %v4230_v47 = vpop.eup %4229  ;;  %4237 = vrsqrt.f32 %v3028_v40  ;;  %v3021_v43 = vmul.f32 0.0078125, %v3011_v52 }
 0x31a   :  { %v3096_v13 = vmul.f32 %v5532_v50, %v3040_v53  ;;  %v3041_v6 = vmul.f32 %v4230_v47, %v5551_v12  ;;  %4239 = vrsqrt.f32 %v3031_v46 }
 0x31b   :  { %v4232_v59 = vpop.eup %4231  ;;  %v3029_v51 = vadd.f32 1e-05, %v3021_v43 }
 0x31c   :  { %v3152_v10 = vadd.f32 %v3115_v5, %v3096_v13  ;;  %v3097_v7 = vmul.f32 %v5536_v31, %v3041_v6  ;;  %v3042_v41 = vmul.f32 %v4232_v59, %v5557_v0 }
 0x31d   :  { %4241 = vrsqrt.f32 %v3029_v51 }
 0x31e   :  { %3160 = vst [vmem:[%s5644_s8] sm:$0xff] %v3152_v10  ;;  %v3153_v35 = vadd.f32 %v3120_v25, %v3097_v7  ;;  %v3098_v50 = vmul.f32 %v5534_v38, %v3042_v41 }
 0x31f   :  { %v4234_v61 = vpop.eup %4233 }
 0x320   :  { %3161 = vst [vmem:[%s5644_s8 + $0x8] sm:$0xff] %v3153_v35  ;;  %v4236_v12 = vpop.eup %4235  ;;  %v3154_v44 = vadd.f32 %v3125_v22, %v3098_v50  ;;  %v3046_v31 = vmul.f32 %v4234_v61, %v5559_v37  ;;  %v3145_v48 = vpop.permute.xlu0 %3144 }
 0x321   :  { %v3043_v20 = vmul.f32 %v4236_v12, %v5563_v3 }
 0x322   :  { %3162 = vst [vmem:[%s5644_s8 + $0x10] sm:$0xff] %v3154_v44  ;;  %v3102_v0 = vmul.f32 %v5544_v17, %v3046_v31 }
 0x323   :  { %v4238_v21 = vpop.eup %4237  ;;  %v3099_v38 = vmul.f32 %v5538_v55, %v3043_v20 }
 0x324   :  { %v4240_v58 = vpop.eup %4239  ;;  %v3044_v56 = vmul.f32 %v4238_v21, %v5569_v8  ;;  %v3158_v26 = vadd.f32 %v3145_v48, %v3102_v0  ;;  %v3150_v8 = vpop.permute.xlu1 %3149 }
 0x325   :  { %v3155_v1 = vadd.f32 %v5587_v18, %v3099_v38  ;;  %v3047_v37 = vmul.f32 %v4240_v58, %v5571_v63 }
 0x326   :  { %v3100_v3 = vmul.f32 %v5540_v39, %v3044_v56  ;;  %3166 = vst [vmem:[%s5644_s8 + $0x30] sm:$0xff] %v3158_v26 }
 0x327   :  { %v4242_v25 = vpop.eup %4241  ;;  %3163 = vst [vmem:[%s5644_s8 + $0x18] sm:$0xff] %v3155_v1  ;;  %v3103_v55 = vmul.f32 %v5546_v30, %v3047_v37 }
 0x328   :  { %v3156_v17 = vadd.f32 %v5591_v28, %v3100_v3  ;;  %v3045_v5 = vmul.f32 %v4242_v25, %v5577_v19 }
 0x329   :  { %v3159_v18 = vadd.f32 %v3150_v8, %v3103_v55 }
 0x32a   :  { %3164 = vst [vmem:[%s5644_s8 + $0x20] sm:$0xff] %v3156_v17  ;;  %v3101_v39 = vmul.f32 %v5542_v42, %v3045_v5 }
 0x32b   :  { %3167 = vst [vmem:[%s5644_s8 + $0x38] sm:$0xff] %v3159_v18 }
 0x32c   :  { %v3157_v63 = vadd.f32 %v5589_v32, %v3101_v39 }
 0x32e   :  { %3165 = vst [vmem:[%s5644_s8 + $0x28] sm:$0xff] %v3157_v63 }

// kernel: net_forward.7
= control target key start
LH: loop header
LB: loop body
LE: loop exit
PB: predicated region body
PF: predicated region fallthrough
CT: control target
= control target key end

     0   :  { %v4147_v22 = vmov 1966171168   ;;  %v560_v24 = vlaneseq  ;;  %vm4150_vm0 = vmmov 0   ;;  %vm2983_vm1 = vcmask 982016   ;;  %s5110_s1 = inlined_call_operand.vmem [shape: bf16[4096,120], index: 1, kind: input, shape index: {}]   ;;  %s5111_s0 = inlined_call_operand.vmem [shape: bf16[2,4096], index: 0, kind: input, shape index: {}]   ;;  %s5112_s2 = inlined_call_operand.vmem [shape: f32[1,120], index: 2, kind: input, shape index: {}]   ;;  %s5113_s3 = inlined_call_operand.vmem [shape: f32[120,60], index: 3, kind: input, shape index: {}]   ;;  %s5114_s5 = inlined_call_operand.vmem [shape: f32[60,1], index: 5, kind: input, shape index: {}]   ;;  %s5115_s6 = inlined_call_operand.<no memory space> [shape: f32[1,1], index: 6, kind: input, shape index: {}]   ;;  %s5116_s4 = inlined_call_operand.vmem [shape: f32[1,60], index: 4, kind: input, shape index: {}]   ;;  %s5117_s7 = inlined_call_operand.vmem [shape: f32[2,1], index: 7, kind: output, shape index: {}]  }
   0x1   :  { %v3887_v0 = vld [vmem:[%s5110_s1 + $0x40] sm:$0xff]   ;;  %v3891_v4 = vld [vmem:[%s5110_s1 + $0x48] sm:$0xff]   ;;  %v3895_v8 = vld [vmem:[%s5110_s1 + $0x50] sm:$0xff]   ;;  %v558_v23 = vunpack.c.l.s4 %v4147_v22  ;;  %vm3077_vm2 = vcmask 1043456   ;;  %vm4151_vm3 = vmmov 1   ;;  %vm3073_vm5 = vcmask 490496  }
   0x2   :  { %v3888_v1 = vld [vmem:[%s5110_s1 + $0xc0] sm:$0xff]   ;;  %3419 = vmatprep.subr.bf16.mxu0 %v3887_v0  ;;  %v3892_v5 = vld [vmem:[%s5110_s1 + $0xc8] sm:$0xff]   ;;  %v3896_v9 = vld [vmem:[%s5110_s1 + $0xd0] sm:$0xff]   ;;  %v561_v30 = vshrl.u32 %v560_v24, 7  ;;  %vm3151_vm6 = vcmask 1024  }
   0x3   :  { %v3889_v2 = vld [vmem:[%s5110_s1] sm:$0xff]   ;;  %3441 = vmatprep.subr.bf16.mxu1 %v3888_v1  ;;  %v3893_v6 = vld [vmem:[%s5110_s1 + $0x8] sm:$0xff]   ;;  %v3897_v10 = vld [vmem:[%s5110_s1 + $0x10] sm:$0xff]   ;;  %v559_v29 = vunpack.c.0.s8 %v558_v23 }
   0x4   :  { %v3890_v3 = vld [vmem:[%s5110_s1 + $0x80] sm:$0xff]   ;;  %3420 = vmatpush3.bf16.msra.mxu0 %v3889_v2  ;;  %v3894_v7 = vld [vmem:[%s5110_s1 + $0x88] sm:$0xff]   ;;  %v3898_v11 = vld [vmem:[%s5110_s1 + $0x90] sm:$0xff]  }
   0x5   :  { %3442 = vmatpush3.bf16.msra.mxu1 %v3890_v3  ;;  %3421 = vmatprep.subr.bf16.mxu0 %v3891_v4  ;;  %v3899_v12 = vld [vmem:[%s5110_s1 + $0x58] sm:$0xff]   ;;  %v3903_v16 = vld [vmem:[%s5110_s1 + $0x60] sm:$0xff]   ;;  %v3907_v20 = vld [vmem:[%s5110_s1 + $0x68] sm:$0xff]   ;;  %v4282_v35 = vsub.s32 %v559_v29, %v561_v30 }
   0x6   :  { %3443 = vmatprep.subr.bf16.mxu1 %v3892_v5  ;;  %v3900_v13 = vld [vmem:[%s5110_s1 + $0xd8] sm:$0xff]   ;;  %v3904_v17 = vld [vmem:[%s5110_s1 + $0xe0] sm:$0xff]   ;;  %v3908_v21 = vld [vmem:[%s5110_s1 + $0xe8] sm:$0xff]  }
   0x7   :  { %v3901_v14 = vld [vmem:[%s5110_s1 + $0x18] sm:$0xff]   ;;  %v3905_v18 = vld [vmem:[%s5110_s1 + $0x20] sm:$0xff]   ;;  %v3909_v25 = vld [vmem:[%s5110_s1 + $0x28] sm:$0xff]  }
   0x8   :  { %3422 = vmatpush3.bf16.msra.mxu0 %v3893_v6  ;;  %v3902_v15 = vld [vmem:[%s5110_s1 + $0x98] sm:$0xff]   ;;  %v3906_v19 = vld [vmem:[%s5110_s1 + $0xa0] sm:$0xff]   ;;  %v3910_v26 = vld [vmem:[%s5110_s1 + $0xa8] sm:$0xff]  }
   0x9   :  { %3444 = vmatpush3.bf16.msra.mxu1 %v3894_v7  ;;  %3423 = vmatprep.subr.bf16.mxu0 %v3895_v8  ;;  %v3911_v27 = vld [vmem:[%s5110_s1 + $0x70] sm:$0xff]   ;;  %v3915_v33 = vld [vmem:[%s5110_s1 + $0x78] sm:$0xff]   ;;  %v29_v38 = vld [vmem:[%s5111_s0] sm:$0xff] }
   0xa   :  { %3445 = vmatprep.subr.bf16.mxu1 %v3896_v9  ;;  %v3912_v28 = vld [vmem:[%s5110_s1 + $0xf0] sm:$0xff]   ;;  %v3916_v34 = vld [vmem:[%s5110_s1 + $0xf8] sm:$0xff]   ;;  %v556_v39 = vcombine.high %v29_v38, %v29_v38  ;;  %v563_v40 = vrot.slane %v29_v38, %v4282_v35  ;;  %v3920_v41 = vld [vmem:[%s5110_s1 + $0x140] sm:$0xff]  }
   0xb   :  { %v3913_v31 = vld [vmem:[%s5110_s1 + $0x30] sm:$0xff]   ;;  %v3917_v36 = vld [vmem:[%s5110_s1 + $0x38] sm:$0xff]   ;;  %v3921_v42 = vld [vmem:[%s5110_s1 + $0x1c0] sm:$0xff]  }
   0xc   :  { %3424 = vmatpush3.bf16.msra.mxu0 %v3897_v10  ;;  %v3914_v32 = vld [vmem:[%s5110_s1 + $0xb0] sm:$0xff]   ;;  %v3918_v37 = vld [vmem:[%s5110_s1 + $0xb8] sm:$0xff]   ;;  %v571_v43 = vcombine.high %v563_v40, %v563_v40  ;;  %v579_v44 = vrot.slane %v563_v40, %v4282_v35  ;;  %v4302_v45 = vrot.slane %v556_v39, %v4282_v35  ;;  %v3922_v46 = vld [vmem:[%s5110_s1 + $0x100] sm:$0xff]  }
   0xd   :  { %3446 = vmatpush3.bf16.msra.mxu1 %v3898_v11  ;;  %3425 = vmatprep.subr.bf16.mxu0 %v3899_v12  ;;  %v3923_v48 = vld [vmem:[%s5110_s1 + $0x180] sm:$0xff]   ;;  %v3924_v51 = vld [vmem:[%s5110_s1 + $0x148] sm:$0xff]   ;;  %v3928_v58 = vld [vmem:[%s5110_s1 + $0x150] sm:$0xff]  }
   0xe   :  { %3447 = vmatprep.subr.bf16.mxu1 %v3900_v13  ;;  %v593_v47 = vrot.slane %v571_v43, %v4282_v35  ;;  %v572_v49 = vcombine.high %v4302_v45, %v4302_v45  ;;  %v601_v50 = vcombine.high %v579_v44, %v579_v44  ;;  %v3925_v53 = vld [vmem:[%s5110_s1 + $0x1c8] sm:$0xff]   ;;  %v3929_v59 = vld [vmem:[%s5110_s1 + $0x1d0] sm:$0xff]   ;;  %v3932_v62 = vld [vmem:[%s5110_s1 + $0x158] sm:$0xff]  }
   0xf   :  { %v3926_v55 = vld [vmem:[%s5110_s1 + $0x108] sm:$0xff]   ;;  %v3930_v60 = vld [vmem:[%s5110_s1 + $0x110] sm:$0xff]   ;;  %v3933_v63 = vld [vmem:[%s5110_s1 + $0x1d8] sm:$0xff]  }
  0x10   :  { %3426 = vmatpush3.bf16.msra.mxu0 %v3901_v14  ;;  %2352 = vmatprep.mubr.bf16.mxu0 %v593_v47  ;;  %v603_v52 = vcombine.high %v593_v47, %v593_v47  ;;  %v600_v54 = vrot.slane %v572_v49, %v4282_v35  ;;  %v3927_v56 = vld [vmem:[%s5110_s1 + $0x188] sm:$0xff]   ;;  %v3931_v61 = vld [vmem:[%s5110_s1 + $0x190] sm:$0xff]   ;;  %v3934_v0 = vld [vmem:[%s5110_s1 + $0x118] sm:$0xff]  }
  0x11   :  { %3448 = vmatpush3.bf16.msra.mxu1 %v3902_v15  ;;  %3427 = vmatprep.subr.bf16.mxu0 %v3903_v16  ;;  %v3935_v1 = vld [vmem:[%s5110_s1 + $0x198] sm:$0xff]   ;;  %v3936_v2 = vld [vmem:[%s5110_s1 + $0x160] sm:$0xff]   ;;  %v3940_v6 = vld [vmem:[%s5110_s1 + $0x168] sm:$0xff]  }
  0x12   :  { %3449 = vmatprep.subr.bf16.mxu1 %v3904_v17  ;;  %2392 = vmatprep.mubr.bf16.mxu1 %v603_v52  ;;  %v604_v57 = vcombine.high %v600_v54, %v600_v54  ;;  %v3937_v3 = vld [vmem:[%s5110_s1 + $0x1e0] sm:$0xff]   ;;  %v3941_v7 = vld [vmem:[%s5110_s1 + $0x1e8] sm:$0xff]   ;;  %v3944_v10 = vld [vmem:[%s5110_s1 + $0x170] sm:$0xff]  }
  0x13   :  { %v3938_v4 = vld [vmem:[%s5110_s1 + $0x120] sm:$0xff]   ;;  %v3942_v8 = vld [vmem:[%s5110_s1 + $0x128] sm:$0xff]   ;;  %v3945_v11 = vld [vmem:[%s5110_s1 + $0x1f0] sm:$0xff]  }
  0x14   :  { %3428 = vmatpush3.bf16.msra.mxu0 %v3905_v18  ;;  %v3939_v5 = vld [vmem:[%s5110_s1 + $0x1a0] sm:$0xff]   ;;  %v3943_v9 = vld [vmem:[%s5110_s1 + $0x1a8] sm:$0xff]   ;;  %v3946_v12 = vld [vmem:[%s5110_s1 + $0x130] sm:$0xff]   ;;  %v586_v18 = vrot.slane %v4302_v45, %v4282_v35 }
  0x15   :  { %3450 = vmatpush3.bf16.msra.mxu1 %v3906_v19  ;;  %3429 = vmatprep.subr.bf16.mxu0 %v3907_v20  ;;  %v3947_v13 = vld [vmem:[%s5110_s1 + $0x1b0] sm:$0xff]   ;;  %v3948_v14 = vld [vmem:[%s5110_s1 + $0x178] sm:$0xff]   ;;  %v3952_v19 = vld [vmem:[%s5110_s1 + $0x240] sm:$0xff]  }
  0x16   :  { %3451 = vmatprep.subr.bf16.mxu1 %v3908_v21  ;;  %v3949_v15 = vld [vmem:[%s5110_s1 + $0x1f8] sm:$0xff]   ;;  %v3953_v20 = vld [vmem:[%s5110_s1 + $0x2c0] sm:$0xff]   ;;  %v602_v23 = vcombine.high %v586_v18, %v586_v18  ;;  %v3956_v24 = vld [vmem:[%s5110_s1 + $0x248] sm:$0xff]  }
  0x17   :  { %v3950_v16 = vld [vmem:[%s5110_s1 + $0x138] sm:$0xff]   ;;  %v3954_v21 = vld [vmem:[%s5110_s1 + $0x200] sm:$0xff]   ;;  %v3961_v29 = vld [vmem:[%s5110_s1 + $0x2d0] sm:$0xff]  }
  0x18   :  { %3430 = vmatpush3.bf16.msra.mxu0 %v3909_v25  ;;  %v3951_v17 = vld [vmem:[%s5110_s1 + $0x1b8] sm:$0xff]   ;;  %v3955_v22 = vld [vmem:[%s5110_s1 + $0x280] sm:$0xff]   ;;  %v3957_v25 = vld [vmem:[%s5110_s1 + $0x2c8] sm:$0xff]  }
  0x19   :  { %3452 = vmatpush3.bf16.msra.mxu1 %v3910_v26  ;;  %3431 = vmatprep.subr.bf16.mxu0 %v3911_v27  ;;  %v3958_v26 = vld [vmem:[%s5110_s1 + $0x208] sm:$0xff]   ;;  %v3962_v30 = vld [vmem:[%s5110_s1 + $0x210] sm:$0xff]   ;;  %v3969_v38 = vld [vmem:[%s5110_s1 + $0x2e0] sm:$0xff]  }
  0x1a   :  { %3453 = vmatprep.subr.bf16.mxu1 %v3912_v28  ;;  %v3959_v27 = vld [vmem:[%s5110_s1 + $0x288] sm:$0xff]   ;;  %v3960_v28 = vld [vmem:[%s5110_s1 + $0x250] sm:$0xff]   ;;  %v3970_v39 = vld [vmem:[%s5110_s1 + $0x220] sm:$0xff]  }
  0x1b   :  { %v3971_v40 = vld [vmem:[%s5110_s1 + $0x2a0] sm:$0xff]   ;;  %v3974_v43 = vld [vmem:[%s5110_s1 + $0x228] sm:$0xff]   ;;  %v3976_v45 = vld [vmem:[%s5110_s1 + $0x270] sm:$0xff]  }
  0x1c   :  { %3432 = vmatpush3.bf16.msra.mxu0 %v3913_v31  ;;  %v3963_v31 = vld [vmem:[%s5110_s1 + $0x290] sm:$0xff]   ;;  %v3980_v49 = vld [vmem:[%s5110_s1 + $0x278] sm:$0xff]   ;;  %v30_v52 = vld [vmem:[%s5111_s0 + $0x8] sm:$0xff] }
  0x1d   :  { %3454 = vmatpush3.bf16.msra.mxu1 %v3914_v32  ;;  %3433 = vmatprep.subr.bf16.mxu0 %v3915_v33  ;;  %v3964_v32 = vld [vmem:[%s5110_s1 + $0x258] sm:$0xff]   ;;  %v3978_v47 = vld [vmem:[%s5110_s1 + $0x230] sm:$0xff]   ;;  %vm3880_vm4 = vmpackc.low %vm3077_vm2, %vm4151_vm3 }
  0x1e   :  { %3455 = vmatprep.subr.bf16.mxu1 %v3916_v34  ;;  %v3965_v33 = vld [vmem:[%s5110_s1 + $0x2d8] sm:$0xff]  }
  0x1f   :  { %v3966_v34 = vld [vmem:[%s5110_s1 + $0x218] sm:$0xff]  }
  0x20   :  { %3434 = vmatpush3.bf16.msra.mxu0 %v3917_v36  ;;  %v3967_v36 = vld [vmem:[%s5110_s1 + $0x298] sm:$0xff]  }
  0x21   :  { %3456 = vmatpush3.bf16.msra.mxu1 %v3918_v37  ;;  %3463 = vmatprep.subr.bf16.mxu0 %v3920_v41  ;;  %v3968_v37 = vld [vmem:[%s5110_s1 + $0x260] sm:$0xff]   ;;  %v3972_v41 = vld [vmem:[%s5110_s1 + $0x268] sm:$0xff]  }
  0x22   :  { %3485 = vmatprep.subr.bf16.mxu1 %v3921_v42  ;;  %v3973_v42 = vld [vmem:[%s5110_s1 + $0x2e8] sm:$0xff]  }
  0x23   :  { %2353 = vmatmul.mubr.bf16.vlgmr.msra.gmra.mrb[0].mxu0 %v579_v44  ;;  %v3975_v44 = vld [vmem:[%s5110_s1 + $0x2a8] sm:$0xff]  }
  0x24   :  { %3464 = vmatpush3.bf16.msra.mxu0 %v3922_v46  ;;  %2393 = vmatmul.mubr.bf16.vlgmr.msra.gmra.mrb[0].mxu1 %v601_v50  ;;  %v3977_v46 = vld [vmem:[%s5110_s1 + $0x2f0] sm:$0xff]   ;;  %v3981_v50 = vld [vmem:[%s5110_s1 + $0x2f8] sm:$0xff]  }
  0x25   :  { %3465 = vmatprep.subr.bf16.mxu0 %v3924_v51  ;;  %3486 = vmatpush3.bf16.msra.mxu1 %v3923_v48  ;;  %v3979_v48 = vld [vmem:[%s5110_s1 + $0x2b0] sm:$0xff]   ;;  %v3982_v51 = vld [vmem:[%s5110_s1 + $0x238] sm:$0xff]  }
  0x26   :  { %2432 = vmatprep.mubr.bf16.mxu0 %v600_v54  ;;  %3487 = vmatprep.subr.bf16.mxu1 %v3925_v53  ;;  %v3983_v53 = vld [vmem:[%s5110_s1 + $0x2b8] sm:$0xff]   ;;  %v612_v54 = vrot.slane %v30_v52, %v4282_v35 }
  0x27   :  { %2472 = vmatprep.mubr.bf16.mxu1 %v604_v57 }
  0x28   :  { %3466 = vmatpush3.bf16.msra.mxu0 %v3926_v55  ;;  %v605_v55 = vcombine.high %v30_v52, %v30_v52  ;;  %v620_v57 = vcombine.high %v612_v54, %v612_v54  ;;  %v4033_v52 = vld [vmem:[%s5110_s1 + $0x460] sm:$0xff]  }
  0x29   :  { %3467 = vmatprep.subr.bf16.mxu0 %v3928_v58  ;;  %3488 = vmatpush3.bf16.msra.mxu1 %v3927_v56  ;;  %v3984_v56 = vld [vmem:[%s5110_s1 + $0x340] sm:$0xff]   ;;  %v628_v58 = vrot.slane %v612_v54, %v4282_v35 }
  0x2a   :  { %3489 = vmatprep.subr.bf16.mxu1 %v3929_v59  ;;  %v3985_v59 = vld [vmem:[%s5110_s1 + $0x3c0] sm:$0xff]  }
  0x2b   :  { %v4035_v54 = vld [vmem:[%s5110_s1 + $0x420] sm:$0xff]  }
  0x2c   :  { %3468 = vmatpush3.bf16.msra.mxu0 %v3930_v60  ;;  %v4508_v60 = vrot.slane %v605_v55, %v4282_v35  ;;  %v4036_v55 = vld [vmem:[%s5110_s1 + $0x4a0] sm:$0xff]  }
  0x2d   :  { %3469 = vmatprep.subr.bf16.mxu0 %v3932_v62  ;;  %3490 = vmatpush3.bf16.msra.mxu1 %v3931_v61  ;;  %v3986_v61 = vld [vmem:[%s5110_s1 + $0x300] sm:$0xff]   ;;  %v642_v62 = vrot.slane %v620_v57, %v4282_v35  ;;  %v4038_v57 = vld [vmem:[%s5110_s1 + $0x4e8] sm:$0xff]  }
  0x2e   :  { %3491 = vmatprep.subr.bf16.mxu1 %v3933_v63  ;;  %v3987_v63 = vld [vmem:[%s5110_s1 + $0x380] sm:$0xff]  }
  0x30   :  { %3470 = vmatpush3.bf16.msra.mxu0 %v3934_v0  ;;  %v621_v0 = vcombine.high %v4508_v60, %v4508_v60 }
  0x31   :  { %3471 = vmatprep.subr.bf16.mxu0 %v3936_v2  ;;  %3492 = vmatpush3.bf16.msra.mxu1 %v3935_v1  ;;  %v650_v1 = vcombine.high %v628_v58, %v628_v58  ;;  %v3988_v2 = vld [vmem:[%s5110_s1 + $0x348] sm:$0xff]  }
  0x32   :  { %3493 = vmatprep.subr.bf16.mxu1 %v3937_v3  ;;  %v652_v3 = vcombine.high %v642_v62, %v642_v62 }
  0x34   :  { %3472 = vmatpush3.bf16.msra.mxu0 %v3938_v4  ;;  %v3989_v4 = vld [vmem:[%s5110_s1 + $0x3c8] sm:$0xff]  }
  0x35   :  { %3473 = vmatprep.subr.bf16.mxu0 %v3940_v6  ;;  %3494 = vmatpush3.bf16.msra.mxu1 %v3939_v5  ;;  %v649_v5 = vrot.slane %v621_v0, %v4282_v35  ;;  %v3990_v6 = vld [vmem:[%s5110_s1 + $0x308] sm:$0xff]   ;;  %v4045_v0 = vld [vmem:[%s5110_s1 + $0x478] sm:$0xff]  }
  0x36   :  { %3495 = vmatprep.subr.bf16.mxu1 %v3941_v7  ;;  %v3991_v7 = vld [vmem:[%s5110_s1 + $0x388] sm:$0xff]  }
  0x38   :  { %3474 = vmatpush3.bf16.msra.mxu0 %v3942_v8  ;;  %v653_v8 = vcombine.high %v649_v5, %v649_v5 }
  0x39   :  { %3475 = vmatprep.subr.bf16.mxu0 %v3944_v10  ;;  %3496 = vmatpush3.bf16.msra.mxu1 %v3943_v9  ;;  %v3992_v9 = vld [vmem:[%s5110_s1 + $0x350] sm:$0xff]  }
  0x3a   :  { %3497 = vmatprep.subr.bf16.mxu1 %v3945_v11  ;;  %v3993_v10 = vld [vmem:[%s5110_s1 + $0x3d0] sm:$0xff]  }
  0x3b   :  { %v3994_v11 = vld [vmem:[%s5110_s1 + $0x310] sm:$0xff]  }
  0x3c   :  { %3476 = vmatpush3.bf16.msra.mxu0 %v3946_v12  ;;  %v3995_v12 = vld [vmem:[%s5110_s1 + $0x390] sm:$0xff]  }
  0x3d   :  { %3477 = vmatprep.subr.bf16.mxu0 %v3948_v14  ;;  %3498 = vmatpush3.bf16.msra.mxu1 %v3947_v13  ;;  %v3996_v13 = vld [vmem:[%s5110_s1 + $0x358] sm:$0xff]  }
  0x3e   :  { %3499 = vmatprep.subr.bf16.mxu1 %v3949_v15  ;;  %v3997_v14 = vld [vmem:[%s5110_s1 + $0x3d8] sm:$0xff]  }
  0x3f   :  { %v3998_v15 = vld [vmem:[%s5110_s1 + $0x318] sm:$0xff]  }
  0x40   :  { %3478 = vmatpush3.bf16.msra.mxu0 %v3950_v16  ;;  %v3999_v16 = vld [vmem:[%s5110_s1 + $0x398] sm:$0xff]  }
  0x41   :  { %3507 = vmatprep.subr.bf16.mxu0 %v3952_v19  ;;  %3500 = vmatpush3.bf16.msra.mxu1 %v3951_v17  ;;  %v4000_v17 = vld [vmem:[%s5110_s1 + $0x360] sm:$0xff]  }
  0x42   :  { %3529 = vmatprep.subr.bf16.mxu1 %v3953_v20  ;;  %v4002_v19 = vld [vmem:[%s5110_s1 + $0x320] sm:$0xff]  }
  0x43   :  { %2433 = vmatmul.mubr.bf16.vlgmr.msra.gmra.mrb[4].mxu0 %v586_v18  ;;  %v4001_v18 = vld [vmem:[%s5110_s1 + $0x3e0] sm:$0xff]  }
  0x44   :  { %3508 = vmatpush3.bf16.msra.mxu0 %v3954_v21  ;;  %2473 = vmatmul.mubr.bf16.vlgmr.msra.gmra.mrb[4].mxu1 %v602_v23  ;;  %v4003_v20 = vld [vmem:[%s5110_s1 + $0x3a0] sm:$0xff]   ;;  %v4004_v21 = vld [vmem:[%s5110_s1 + $0x368] sm:$0xff]  }
  0x45   :  { %3509 = vmatprep.subr.bf16.mxu0 %v3956_v24  ;;  %3530 = vmatpush3.bf16.msra.mxu1 %v3955_v22  ;;  %v4005_v22 = vld [vmem:[%s5110_s1 + $0x3e8] sm:$0xff]  }
  0x46   :  { %3531 = vmatprep.subr.bf16.mxu1 %v3957_v25  ;;  %2512 = vmatprep.mubr.bf16.mxu0 %v642_v62  ;;  %v4006_v23 = vld [vmem:[%s5110_s1 + $0x328] sm:$0xff]   ;;  %v4008_v25 = vld [vmem:[%s5110_s1 + $0x370] sm:$0xff]  }
  0x47   :  { %2552 = vmatprep.mubr.bf16.mxu1 %v652_v3  ;;  %v4007_v24 = vld [vmem:[%s5110_s1 + $0x3a8] sm:$0xff]   ;;  %v4043_v62 = vld [vmem:[%s5110_s1 + $0x430] sm:$0xff]  }
  0x48   :  { %3510 = vmatpush3.bf16.msra.mxu0 %v3958_v26  ;;  %v4009_v26 = vld [vmem:[%s5110_s1 + $0x3f0] sm:$0xff]  }
  0x49   :  { %3511 = vmatprep.subr.bf16.mxu0 %v3960_v28  ;;  %3532 = vmatpush3.bf16.msra.mxu1 %v3959_v27  ;;  %v4010_v27 = vld [vmem:[%s5110_s1 + $0x330] sm:$0xff]  }
  0x4a   :  { %3533 = vmatprep.subr.bf16.mxu1 %v3961_v29  ;;  %v4011_v28 = vld [vmem:[%s5110_s1 + $0x3b0] sm:$0xff]   ;;  %v4012_v29 = vld [vmem:[%s5110_s1 + $0x378] sm:$0xff]  }
  0x4b   :  { %v31_v3 = vld [vmem:[%s5111_s0 + $0x10] sm:$0xff] }
  0x4c   :  { %3512 = vmatpush3.bf16.msra.mxu0 %v3962_v30  ;;  %v4013_v30 = vld [vmem:[%s5110_s1 + $0x3f8] sm:$0xff]  }
  0x4d   :  { %3513 = vmatprep.subr.bf16.mxu0 %v3964_v32  ;;  %3534 = vmatpush3.bf16.msra.mxu1 %v3963_v31  ;;  %v4014_v31 = vld [vmem:[%s5110_s1 + $0x338] sm:$0xff]  }
  0x4e   :  { %3535 = vmatprep.subr.bf16.mxu1 %v3965_v33  ;;  %v4015_v32 = vld [vmem:[%s5110_s1 + $0x3b8] sm:$0xff]   ;;  %v635_v33 = vrot.slane %v4508_v60, %v4282_v35  ;;  %v4041_v60 = vld [vmem:[%s5110_s1 + $0x470] sm:$0xff]  }
  0x50   :  { %3514 = vmatpush3.bf16.msra.mxu0 %v3966_v34  ;;  %v4017_v34 = vld [vmem:[%s5110_s1 + $0x440] sm:$0xff]  }
  0x51   :  { %3515 = vmatprep.subr.bf16.mxu0 %v3968_v37  ;;  %3536 = vmatpush3.bf16.msra.mxu1 %v3967_v36  ;;  %v4018_v36 = vld [vmem:[%s5110_s1 + $0x4c0] sm:$0xff]  }
  0x52   :  { %3537 = vmatprep.subr.bf16.mxu1 %v3969_v38  ;;  %v4019_v37 = vld [vmem:[%s5110_s1 + $0x400] sm:$0xff]  }
  0x53   :  { %v4020_v38 = vld [vmem:[%s5110_s1 + $0x480] sm:$0xff]  }
  0x54   :  { %3516 = vmatpush3.bf16.msra.mxu0 %v3970_v39  ;;  %v651_v39 = vcombine.high %v635_v33, %v635_v33 }
  0x55   :  { %3517 = vmatprep.subr.bf16.mxu0 %v3972_v41  ;;  %3538 = vmatpush3.bf16.msra.mxu1 %v3971_v40  ;;  %v4021_v40 = vld [vmem:[%s5110_s1 + $0x448] sm:$0xff]  }
  0x56   :  { %3539 = vmatprep.subr.bf16.mxu1 %v3973_v42  ;;  %v4022_v41 = vld [vmem:[%s5110_s1 + $0x4c8] sm:$0xff]  }
  0x57   :  { %v4023_v42 = vld [vmem:[%s5110_s1 + $0x408] sm:$0xff]  }
  0x58   :  { %3518 = vmatpush3.bf16.msra.mxu0 %v3974_v43  ;;  %v4024_v43 = vld [vmem:[%s5110_s1 + $0x488] sm:$0xff]  }
  0x59   :  { %3519 = vmatprep.subr.bf16.mxu0 %v3976_v45  ;;  %3540 = vmatpush3.bf16.msra.mxu1 %v3975_v44  ;;  %v4025_v44 = vld [vmem:[%s5110_s1 + $0x450] sm:$0xff]  }
  0x5a   :  { %3541 = vmatprep.subr.bf16.mxu1 %v3977_v46  ;;  %v4026_v45 = vld [vmem:[%s5110_s1 + $0x4d0] sm:$0xff]  }
  0x5b   :  { %v4027_v46 = vld [vmem:[%s5110_s1 + $0x410] sm:$0xff]  }
  0x5c   :  { %3520 = vmatpush3.bf16.msra.mxu0 %v3978_v47  ;;  %v4028_v47 = vld [vmem:[%s5110_s1 + $0x490] sm:$0xff]  }
  0x5d   :  { %3521 = vmatprep.subr.bf16.mxu0 %v3980_v49  ;;  %3542 = vmatpush3.bf16.msra.mxu1 %v3979_v48  ;;  %v4029_v48 = vld [vmem:[%s5110_s1 + $0x458] sm:$0xff]  }
  0x5e   :  { %3543 = vmatprep.subr.bf16.mxu1 %v3981_v50  ;;  %v4030_v49 = vld [vmem:[%s5110_s1 + $0x4d8] sm:$0xff]  }
  0x5f   :  { %v4031_v50 = vld [vmem:[%s5110_s1 + $0x418] sm:$0xff]  }
  0x60   :  { %3522 = vmatpush3.bf16.msra.mxu0 %v3982_v51  ;;  %v4032_v51 = vld [vmem:[%s5110_s1 + $0x498] sm:$0xff]  }
  0x61   :  { %3551 = vmatprep.subr.bf16.mxu0 %v3984_v56  ;;  %3544 = vmatpush3.bf16.msra.mxu1 %v3983_v53  ;;  %v4034_v53 = vld [vmem:[%s5110_s1 + $0x4e0] sm:$0xff]   ;;  %v4037_v56 = vld [vmem:[%s5110_s1 + $0x468] sm:$0xff]  }
  0x62   :  { %3573 = vmatprep.subr.bf16.mxu1 %v3985_v59  ;;  %v4040_v59 = vld [vmem:[%s5110_s1 + $0x4a8] sm:$0xff]  }
  0x63   :  { %2513 = vmatmul.mubr.bf16.vlgmr.msra.gmra.mrb[8].mxu0 %v628_v58  ;;  %v4039_v58 = vld [vmem:[%s5110_s1 + $0x428] sm:$0xff]  }
  0x64   :  { %3552 = vmatpush3.bf16.msra.mxu0 %v3986_v61  ;;  %2553 = vmatmul.mubr.bf16.vlgmr.msra.gmra.mrb[8].mxu1 %v650_v1  ;;  %v4042_v61 = vld [vmem:[%s5110_s1 + $0x4f0] sm:$0xff]   ;;  %v4046_v1 = vld [vmem:[%s5110_s1 + $0x4f8] sm:$0xff]  }
  0x65   :  { %3553 = vmatprep.subr.bf16.mxu0 %v3988_v2  ;;  %3574 = vmatpush3.bf16.msra.mxu1 %v3987_v63  ;;  %v4044_v63 = vld [vmem:[%s5110_s1 + $0x4b0] sm:$0xff]   ;;  %v4047_v2 = vld [vmem:[%s5110_s1 + $0x438] sm:$0xff]  }
  0x66   :  { %2592 = vmatprep.mubr.bf16.mxu0 %v649_v5  ;;  %3575 = vmatprep.subr.bf16.mxu1 %v3989_v4  ;;  %v4048_v4 = vld [vmem:[%s5110_s1 + $0x4b8] sm:$0xff]   ;;  %v661_v5 = vrot.slane %v31_v3, %v4282_v35 }
  0x67   :  { %2632 = vmatprep.mubr.bf16.mxu1 %v653_v8 }
  0x68   :  { %3554 = vmatpush3.bf16.msra.mxu0 %v3990_v6  ;;  %v654_v6 = vcombine.high %v31_v3, %v31_v3  ;;  %v669_v8 = vcombine.high %v661_v5, %v661_v5  ;;  %v4098_v3 = vld [vmem:[%s5110_s1 + $0x660] sm:$0xff]  }
  0x69   :  { %3555 = vmatprep.subr.bf16.mxu0 %v3992_v9  ;;  %3576 = vmatpush3.bf16.msra.mxu1 %v3991_v7  ;;  %v4049_v7 = vld [vmem:[%s5110_s1 + $0x540] sm:$0xff]   ;;  %v677_v9 = vrot.slane %v661_v5, %v4282_v35 }
  0x6a   :  { %3577 = vmatprep.subr.bf16.mxu1 %v3993_v10  ;;  %v4050_v10 = vld [vmem:[%s5110_s1 + $0x5c0] sm:$0xff]  }
  0x6b   :  { %v4100_v5 = vld [vmem:[%s5110_s1 + $0x620] sm:$0xff]  }
  0x6c   :  { %3556 = vmatpush3.bf16.msra.mxu0 %v3994_v11  ;;  %v4714_v11 = vrot.slane %v654_v6, %v4282_v35  ;;  %v4101_v6 = vld [vmem:[%s5110_s1 + $0x6a0] sm:$0xff]  }
  0x6d   :  { %3557 = vmatprep.subr.bf16.mxu0 %v3996_v13  ;;  %3578 = vmatpush3.bf16.msra.mxu1 %v3995_v12  ;;  %v4051_v12 = vld [vmem:[%s5110_s1 + $0x500] sm:$0xff]   ;;  %v691_v13 = vrot.slane %v669_v8, %v4282_v35  ;;  %v4103_v8 = vld [vmem:[%s5110_s1 + $0x6e8] sm:$0xff]  }
  0x6e   :  { %3579 = vmatprep.subr.bf16.mxu1 %v3997_v14  ;;  %v4052_v14 = vld [vmem:[%s5110_s1 + $0x580] sm:$0xff]  }
  0x70   :  { %3558 = vmatpush3.bf16.msra.mxu0 %v3998_v15  ;;  %v670_v15 = vcombine.high %v4714_v11, %v4714_v11 }
  0x71   :  { %3559 = vmatprep.subr.bf16.mxu0 %v4000_v17  ;;  %3580 = vmatpush3.bf16.msra.mxu1 %v3999_v16  ;;  %v699_v16 = vcombine.high %v677_v9, %v677_v9  ;;  %v4053_v17 = vld [vmem:[%s5110_s1 + $0x548] sm:$0xff]  }
  0x72   :  { %3581 = vmatprep.subr.bf16.mxu1 %v4001_v18  ;;  %v701_v18 = vcombine.high %v691_v13, %v691_v13 }
  0x74   :  { %3560 = vmatpush3.bf16.msra.mxu0 %v4002_v19  ;;  %v4054_v19 = vld [vmem:[%s5110_s1 + $0x5c8] sm:$0xff]  }
  0x75   :  { %3561 = vmatprep.subr.bf16.mxu0 %v4004_v21  ;;  %3582 = vmatpush3.bf16.msra.mxu1 %v4003_v20  ;;  %v698_v20 = vrot.slane %v670_v15, %v4282_v35  ;;  %v4055_v21 = vld [vmem:[%s5110_s1 + $0x508] sm:$0xff]   ;;  %v4110_v15 = vld [vmem:[%s5110_s1 + $0x678] sm:$0xff]  }
  0x76   :  { %3583 = vmatprep.subr.bf16.mxu1 %v4005_v22  ;;  %v4056_v22 = vld [vmem:[%s5110_s1 + $0x588] sm:$0xff]  }
  0x78   :  { %3562 = vmatpush3.bf16.msra.mxu0 %v4006_v23  ;;  %v702_v23 = vcombine.high %v698_v20, %v698_v20 }
  0x79   :  { %3563 = vmatprep.subr.bf16.mxu0 %v4008_v25  ;;  %3584 = vmatpush3.bf16.msra.mxu1 %v4007_v24  ;;  %v4057_v24 = vld [vmem:[%s5110_s1 + $0x550] sm:$0xff]  }
  0x7a   :  { %3585 = vmatprep.subr.bf16.mxu1 %v4009_v26  ;;  %v4058_v25 = vld [vmem:[%s5110_s1 + $0x5d0] sm:$0xff]  }
  0x7b   :  { %v4059_v26 = vld [vmem:[%s5110_s1 + $0x510] sm:$0xff]  }
  0x7c   :  { %3564 = vmatpush3.bf16.msra.mxu0 %v4010_v27  ;;  %v4060_v27 = vld [vmem:[%s5110_s1 + $0x590] sm:$0xff]  }
  0x7d   :  { %3565 = vmatprep.subr.bf16.mxu0 %v4012_v29  ;;  %3586 = vmatpush3.bf16.msra.mxu1 %v4011_v28  ;;  %v4061_v28 = vld [vmem:[%s5110_s1 + $0x558] sm:$0xff]  }
  0x7e   :  { %3587 = vmatprep.subr.bf16.mxu1 %v4013_v30  ;;  %v4062_v29 = vld [vmem:[%s5110_s1 + $0x5d8] sm:$0xff]  }
  0x7f   :  { %v4063_v30 = vld [vmem:[%s5110_s1 + $0x518] sm:$0xff]  }
  0x80   :  { %3566 = vmatpush3.bf16.msra.mxu0 %v4014_v31  ;;  %v4064_v31 = vld [vmem:[%s5110_s1 + $0x598] sm:$0xff]  }
  0x81   :  { %3595 = vmatprep.subr.bf16.mxu0 %v4017_v34  ;;  %3588 = vmatpush3.bf16.msra.mxu1 %v4015_v32  ;;  %v4065_v32 = vld [vmem:[%s5110_s1 + $0x560] sm:$0xff]  }
  0x82   :  { %3617 = vmatprep.subr.bf16.mxu1 %v4018_v36  ;;  %v4067_v34 = vld [vmem:[%s5110_s1 + $0x520] sm:$0xff]  }
  0x83   :  { %2593 = vmatmul.mubr.bf16.vlgmr.msra.gmra.mrb[12].mxu0 %v635_v33  ;;  %v4066_v33 = vld [vmem:[%s5110_s1 + $0x5e0] sm:$0xff]  }
  0x84   :  { %3596 = vmatpush3.bf16.msra.mxu0 %v4019_v37  ;;  %2633 = vmatmul.mubr.bf16.vlgmr.msra.gmra.mrb[12].mxu1 %v651_v39  ;;  %v4068_v36 = vld [vmem:[%s5110_s1 + $0x5a0] sm:$0xff]   ;;  %v4069_v37 = vld [vmem:[%s5110_s1 + $0x568] sm:$0xff]  }
  0x85   :  { %3597 = vmatprep.subr.bf16.mxu0 %v4021_v40  ;;  %3618 = vmatpush3.bf16.msra.mxu1 %v4020_v38  ;;  %v4070_v38 = vld [vmem:[%s5110_s1 + $0x5e8] sm:$0xff]  }
  0x86   :  { %3619 = vmatprep.subr.bf16.mxu1 %v4022_v41  ;;  %2672 = vmatprep.mubr.bf16.mxu0 %v691_v13  ;;  %v4071_v39 = vld [vmem:[%s5110_s1 + $0x528] sm:$0xff]   ;;  %v4073_v41 = vld [vmem:[%s5110_s1 + $0x570] sm:$0xff]  }
  0x87   :  { %2712 = vmatprep.mubr.bf16.mxu1 %v701_v18  ;;  %v4072_v40 = vld [vmem:[%s5110_s1 + $0x5a8] sm:$0xff]   ;;  %v4108_v13 = vld [vmem:[%s5110_s1 + $0x630] sm:$0xff]   ;;  %v32_v18 = vld [vmem:[%s5111_s0 + $0x18] sm:$0xff] }
  0x88   :  { %3598 = vmatpush3.bf16.msra.mxu0 %v4023_v42  ;;  %v4074_v42 = vld [vmem:[%s5110_s1 + $0x5f0] sm:$0xff]  }
  0x89   :  { %3599 = vmatprep.subr.bf16.mxu0 %v4025_v44  ;;  %3620 = vmatpush3.bf16.msra.mxu1 %v4024_v43  ;;  %v4075_v43 = vld [vmem:[%s5110_s1 + $0x530] sm:$0xff]  }
  0x8a   :  { %3621 = vmatprep.subr.bf16.mxu1 %v4026_v45  ;;  %v4076_v44 = vld [vmem:[%s5110_s1 + $0x5b0] sm:$0xff]   ;;  %v4077_v45 = vld [vmem:[%s5110_s1 + $0x578] sm:$0xff]  }
  0x8c   :  { %3600 = vmatpush3.bf16.msra.mxu0 %v4027_v46  ;;  %v4078_v46 = vld [vmem:[%s5110_s1 + $0x5f8] sm:$0xff]  }
  0x8d   :  { %3601 = vmatprep.subr.bf16.mxu0 %v4029_v48  ;;  %3622 = vmatpush3.bf16.msra.mxu1 %v4028_v47  ;;  %v4079_v47 = vld [vmem:[%s5110_s1 + $0x538] sm:$0xff]  }
  0x8e   :  { %3623 = vmatprep.subr.bf16.mxu1 %v4030_v49  ;;  %v4080_v48 = vld [vmem:[%s5110_s1 + $0x5b8] sm:$0xff]   ;;  %v684_v49 = vrot.slane %v4714_v11, %v4282_v35  ;;  %v4106_v11 = vld [vmem:[%s5110_s1 + $0x670] sm:$0xff]  }
  0x90   :  { %3602 = vmatpush3.bf16.msra.mxu0 %v4031_v50  ;;  %v4082_v50 = vld [vmem:[%s5110_s1 + $0x640] sm:$0xff]  }
  0x91   :  { %3603 = vmatprep.subr.bf16.mxu0 %v4033_v52  ;;  %3624 = vmatpush3.bf16.msra.mxu1 %v4032_v51  ;;  %v4083_v51 = vld [vmem:[%s5110_s1 + $0x6c0] sm:$0xff]  }
  0x92   :  { %3625 = vmatprep.subr.bf16.mxu1 %v4034_v53  ;;  %v4084_v52 = vld [vmem:[%s5110_s1 + $0x600] sm:$0xff]  }
  0x93   :  { %v4085_v53 = vld [vmem:[%s5110_s1 + $0x680] sm:$0xff]  }
  0x94   :  { %3604 = vmatpush3.bf16.msra.mxu0 %v4035_v54  ;;  %v700_v54 = vcombine.high %v684_v49, %v684_v49 }
  0x95   :  { %3605 = vmatprep.subr.bf16.mxu0 %v4037_v56  ;;  %3626 = vmatpush3.bf16.msra.mxu1 %v4036_v55  ;;  %v4086_v55 = vld [vmem:[%s5110_s1 + $0x648] sm:$0xff]  }
  0x96   :  { %3627 = vmatprep.subr.bf16.mxu1 %v4038_v57  ;;  %v4087_v56 = vld [vmem:[%s5110_s1 + $0x6c8] sm:$0xff]  }
  0x97   :  { %v4088_v57 = vld [vmem:[%s5110_s1 + $0x608] sm:$0xff]  }
  0x98   :  { %3606 = vmatpush3.bf16.msra.mxu0 %v4039_v58  ;;  %v4089_v58 = vld [vmem:[%s5110_s1 + $0x688] sm:$0xff]  }
  0x99   :  { %3607 = vmatprep.subr.bf16.mxu0 %v4041_v60  ;;  %3628 = vmatpush3.bf16.msra.mxu1 %v4040_v59  ;;  %v4090_v59 = vld [vmem:[%s5110_s1 + $0x650] sm:$0xff]  }
  0x9a   :  { %3629 = vmatprep.subr.bf16.mxu1 %v4042_v61  ;;  %v4091_v60 = vld [vmem:[%s5110_s1 + $0x6d0] sm:$0xff]  }
  0x9b   :  { %v4092_v61 = vld [vmem:[%s5110_s1 + $0x610] sm:$0xff]  }
  0x9c   :  { %3608 = vmatpush3.bf16.msra.mxu0 %v4043_v62  ;;  %v4093_v62 = vld [vmem:[%s5110_s1 + $0x690] sm:$0xff]  }
  0x9d   :  { %3609 = vmatprep.subr.bf16.mxu0 %v4045_v0  ;;  %3630 = vmatpush3.bf16.msra.mxu1 %v4044_v63  ;;  %v4094_v63 = vld [vmem:[%s5110_s1 + $0x658] sm:$0xff]  }
  0x9e   :  { %3631 = vmatprep.subr.bf16.mxu1 %v4046_v1  ;;  %v4095_v0 = vld [vmem:[%s5110_s1 + $0x6d8] sm:$0xff]  }
  0x9f   :  { %v4096_v1 = vld [vmem:[%s5110_s1 + $0x618] sm:$0xff]  }
  0xa0   :  { %3610 = vmatpush3.bf16.msra.mxu0 %v4047_v2  ;;  %v4097_v2 = vld [vmem:[%s5110_s1 + $0x698] sm:$0xff]  }
  0xa1   :  { %3639 = vmatprep.subr.bf16.mxu0 %v4049_v7  ;;  %3632 = vmatpush3.bf16.msra.mxu1 %v4048_v4  ;;  %v4099_v4 = vld [vmem:[%s5110_s1 + $0x6e0] sm:$0xff]   ;;  %v4102_v7 = vld [vmem:[%s5110_s1 + $0x668] sm:$0xff]  }
  0xa2   :  { %3661 = vmatprep.subr.bf16.mxu1 %v4050_v10  ;;  %v4105_v10 = vld [vmem:[%s5110_s1 + $0x6a8] sm:$0xff]  }
  0xa3   :  { %2673 = vmatmul.mubr.bf16.vlgmr.msra.gmra.mrb[16].mxu0 %v677_v9  ;;  %v4104_v9 = vld [vmem:[%s5110_s1 + $0x628] sm:$0xff]  }
  0xa4   :  { %3640 = vmatpush3.bf16.msra.mxu0 %v4051_v12  ;;  %2713 = vmatmul.mubr.bf16.vlgmr.msra.gmra.mrb[16].mxu1 %v699_v16  ;;  %v4107_v12 = vld [vmem:[%s5110_s1 + $0x6f0] sm:$0xff]   ;;  %v4111_v16 = vld [vmem:[%s5110_s1 + $0x6f8] sm:$0xff]  }
  0xa5   :  { %3641 = vmatprep.subr.bf16.mxu0 %v4053_v17  ;;  %3662 = vmatpush3.bf16.msra.mxu1 %v4052_v14  ;;  %v4109_v14 = vld [vmem:[%s5110_s1 + $0x6b0] sm:$0xff]   ;;  %v4112_v17 = vld [vmem:[%s5110_s1 + $0x638] sm:$0xff]  }
  0xa6   :  { %2752 = vmatprep.mubr.bf16.mxu0 %v698_v20  ;;  %3663 = vmatprep.subr.bf16.mxu1 %v4054_v19  ;;  %v710_v19 = vrot.slane %v32_v18, %v4282_v35  ;;  %v4114_v20 = vld [vmem:[%s5110_s1 + $0x740] sm:$0xff]  }
  0xa7   :  { %2792 = vmatprep.mubr.bf16.mxu1 %v702_v23 }
  0xa8   :  { %3642 = vmatpush3.bf16.msra.mxu0 %v4055_v21  ;;  %v703_v21 = vcombine.high %v32_v18, %v32_v18  ;;  %v718_v23 = vcombine.high %v710_v19, %v710_v19 }
  0xa9   :  { %3643 = vmatprep.subr.bf16.mxu0 %v4057_v24  ;;  %3664 = vmatpush3.bf16.msra.mxu1 %v4056_v22  ;;  %v4113_v22 = vld [vmem:[%s5110_s1 + $0x6b8] sm:$0xff]   ;;  %v726_v24 = vrot.slane %v710_v19, %v4282_v35 }
  0xaa   :  { %3665 = vmatprep.subr.bf16.mxu1 %v4058_v25  ;;  %v4115_v25 = vld [vmem:[%s5110_s1 + $0x7c0] sm:$0xff]  }
  0xac   :  { %3644 = vmatpush3.bf16.msra.mxu0 %v4059_v26  ;;  %v4920_v26 = vrot.slane %v703_v21, %v4282_v35 }
  0xad   :  { %3645 = vmatprep.subr.bf16.mxu0 %v4061_v28  ;;  %3666 = vmatpush3.bf16.msra.mxu1 %v4060_v27  ;;  %v740_v27 = vrot.slane %v718_v23, %v4282_v35  ;;  %v4116_v28 = vld [vmem:[%s5110_s1 + $0x700] sm:$0xff]  }
  0xae   :  { %3667 = vmatprep.subr.bf16.mxu1 %v4062_v29  ;;  %v719_v29 = vcombine.high %v4920_v26, %v4920_v26 }
  0xb0   :  { %3646 = vmatpush3.bf16.msra.mxu0 %v4063_v30  ;;  %v748_v30 = vcombine.high %v726_v24, %v726_v24 }
  0xb1   :  { %3647 = vmatprep.subr.bf16.mxu0 %v4065_v32  ;;  %3668 = vmatpush3.bf16.msra.mxu1 %v4064_v31  ;;  %v4118_v31 = vld [vmem:[%s5110_s1 + $0x748] sm:$0xff]   ;;  %v750_v32 = vcombine.high %v740_v27, %v740_v27 }
  0xb2   :  { %3669 = vmatprep.subr.bf16.mxu1 %v4066_v33  ;;  %v4117_v33 = vld [vmem:[%s5110_s1 + $0x780] sm:$0xff]  }
  0xb4   :  { %3648 = vmatpush3.bf16.msra.mxu0 %v4067_v34  ;;  %v747_v34 = vrot.slane %v719_v29, %v4282_v35 }
  0xb5   :  { %3649 = vmatprep.subr.bf16.mxu0 %v4069_v37  ;;  %3670 = vmatpush3.bf16.msra.mxu1 %v4068_v36  ;;  %v4119_v36 = vld [vmem:[%s5110_s1 + $0x7c8] sm:$0xff]  }
  0xb6   :  { %3671 = vmatprep.subr.bf16.mxu1 %v4070_v38  ;;  %v4120_v37 = vld [vmem:[%s5110_s1 + $0x708] sm:$0xff]   ;;  %v751_v38 = vcombine.high %v747_v34, %v747_v34 }
  0xb8   :  { %3650 = vmatpush3.bf16.msra.mxu0 %v4071_v39  ;;  %v4122_v39 = vld [vmem:[%s5110_s1 + $0x750] sm:$0xff]  }
  0xb9   :  { %3651 = vmatprep.subr.bf16.mxu0 %v4073_v41  ;;  %3672 = vmatpush3.bf16.msra.mxu1 %v4072_v40  ;;  %v4121_v40 = vld [vmem:[%s5110_s1 + $0x788] sm:$0xff]   ;;  %v4123_v41 = vld [vmem:[%s5110_s1 + $0x7d0] sm:$0xff]  }
  0xba   :  { %3673 = vmatprep.subr.bf16.mxu1 %v4074_v42  ;;  %v4124_v42 = vld [vmem:[%s5110_s1 + $0x710] sm:$0xff]  }
  0xbc   :  { %3652 = vmatpush3.bf16.msra.mxu0 %v4075_v43  ;;  %v4126_v43 = vld [vmem:[%s5110_s1 + $0x758] sm:$0xff]  }
  0xbd   :  { %3653 = vmatprep.subr.bf16.mxu0 %v4077_v45  ;;  %3674 = vmatpush3.bf16.msra.mxu1 %v4076_v44  ;;  %v4125_v44 = vld [vmem:[%s5110_s1 + $0x790] sm:$0xff]   ;;  %v4127_v45 = vld [vmem:[%s5110_s1 + $0x7d8] sm:$0xff]  }
  0xbe   :  { %3675 = vmatprep.subr.bf16.mxu1 %v4078_v46  ;;  %v4128_v46 = vld [vmem:[%s5110_s1 + $0x718] sm:$0xff]  }
  0xc0   :  { %3654 = vmatpush3.bf16.msra.mxu0 %v4079_v47  ;;  %v4130_v47 = vld [vmem:[%s5110_s1 + $0x760] sm:$0xff]  }
  0xc1   :  { %3683 = vmatprep.subr.bf16.mxu0 %v4082_v50  ;;  %3676 = vmatpush3.bf16.msra.mxu1 %v4080_v48  ;;  %v4129_v48 = vld [vmem:[%s5110_s1 + $0x798] sm:$0xff]   ;;  %v4132_v50 = vld [vmem:[%s5110_s1 + $0x720] sm:$0xff]  }
  0xc2   :  { %3705 = vmatprep.subr.bf16.mxu1 %v4083_v51  ;;  %v4134_v51 = vld [vmem:[%s5110_s1 + $0x768] sm:$0xff]  }
  0xc3   :  { %2753 = vmatmul.mubr.bf16.vlgmr.msra.gmra.mrb[20].mxu0 %v684_v49  ;;  %v4131_v49 = vld [vmem:[%s5110_s1 + $0x7e0] sm:$0xff]  }
  0xc4   :  { %3684 = vmatpush3.bf16.msra.mxu0 %v4084_v52  ;;  %2793 = vmatmul.mubr.bf16.vlgmr.msra.gmra.mrb[20].mxu1 %v700_v54  ;;  %v4133_v52 = vld [vmem:[%s5110_s1 + $0x7a0] sm:$0xff]  }
  0xc5   :  { %3685 = vmatprep.subr.bf16.mxu0 %v4086_v55  ;;  %3706 = vmatpush3.bf16.msra.mxu1 %v4085_v53  ;;  %v4135_v53 = vld [vmem:[%s5110_s1 + $0x7e8] sm:$0xff]   ;;  %v3157_v54 = vld [vmem:[%s5112_s2] ss:$0 sm:$0xff] }
  0xc6   :  { %3707 = vmatprep.subr.bf16.mxu1 %v4087_v56  ;;  %2832 = vmatprep.mubr.bf16.mxu0 %v740_v27  ;;  %v4136_v55 = vld [vmem:[%s5110_s1 + $0x728] sm:$0xff]  }
  0xc7   :  { %2872 = vmatprep.mubr.bf16.mxu1 %v750_v32 }
  0xc8   :  { %3686 = vmatpush3.bf16.msra.mxu0 %v4088_v57  ;;  %v4138_v57 = vld [vmem:[%s5110_s1 + $0x770] sm:$0xff]  }
  0xc9   :  { %3687 = vmatprep.subr.bf16.mxu0 %v4090_v59  ;;  %3708 = vmatpush3.bf16.msra.mxu1 %v4089_v58  ;;  %v4137_v59 = vld [vmem:[%s5110_s1 + $0x7a8] sm:$0xff]  }
  0xca   :  { %3709 = vmatprep.subr.bf16.mxu1 %v4091_v60 }
  0xcc   :  { %3688 = vmatpush3.bf16.msra.mxu0 %v4092_v61 }
  0xcd   :  { %3689 = vmatprep.subr.bf16.mxu0 %v4094_v63  ;;  %3710 = vmatpush3.bf16.msra.mxu1 %v4093_v62  ;;  %v4139_v63 = vld [vmem:[%s5110_s1 + $0x7f0] sm:$0xff]  }
  0xce   :  { %3711 = vmatprep.subr.bf16.mxu1 %v4095_v0  ;;  %v4140_v0 = vld [vmem:[%s5110_s1 + $0x730] sm:$0xff]  }
  0xd0   :  { %3690 = vmatpush3.bf16.msra.mxu0 %v4096_v1 }
  0xd1   :  { %3691 = vmatprep.subr.bf16.mxu0 %v4098_v3  ;;  %3712 = vmatpush3.bf16.msra.mxu1 %v4097_v2 }
  0xd2   :  { %3713 = vmatprep.subr.bf16.mxu1 %v4099_v4 }
  0xd4   :  { %3692 = vmatpush3.bf16.msra.mxu0 %v4100_v5 }
  0xd5   :  { %3693 = vmatprep.subr.bf16.mxu0 %v4102_v7  ;;  %3714 = vmatpush3.bf16.msra.mxu1 %v4101_v6  ;;  %v4142_v6 = vld [vmem:[%s5110_s1 + $0x778] sm:$0xff]  }
  0xd6   :  { %3715 = vmatprep.subr.bf16.mxu1 %v4103_v8  ;;  %v4141_v8 = vld [vmem:[%s5110_s1 + $0x7b0] sm:$0xff]  }
  0xd8   :  { %3694 = vmatpush3.bf16.msra.mxu0 %v4104_v9 }
  0xd9   :  { %3695 = vmatprep.subr.bf16.mxu0 %v4106_v11  ;;  %3716 = vmatpush3.bf16.msra.mxu1 %v4105_v10  ;;  %v4143_v10 = vld [vmem:[%s5110_s1 + $0x7f8] sm:$0xff]  }
  0xda   :  { %3717 = vmatprep.subr.bf16.mxu1 %v4107_v12  ;;  %v4144_v11 = vld [vmem:[%s5110_s1 + $0x738] sm:$0xff]   ;;  %v733_v12 = vrot.slane %v4920_v26, %v4282_v35 }
  0xdc   :  { %3696 = vmatpush3.bf16.msra.mxu0 %v4108_v13  ;;  %v4145_v13 = vld [vmem:[%s5110_s1 + $0x7b8] sm:$0xff]  }
  0xdd   :  { %3697 = vmatprep.subr.bf16.mxu0 %v4110_v15  ;;  %3718 = vmatpush3.bf16.msra.mxu1 %v4109_v14  ;;  %v749_v14 = vcombine.high %v733_v12, %v733_v12 }
  0xde   :  { %3719 = vmatprep.subr.bf16.mxu1 %v4111_v16 }
  0xe0   :  { %3698 = vmatpush3.bf16.msra.mxu0 %v4112_v17 }
  0xe1   :  { %3727 = vmatprep.subr.bf16.mxu0 %v4114_v20  ;;  %3720 = vmatpush3.bf16.msra.mxu1 %v4113_v22 }
  0xe2   :  { %3749 = vmatprep.subr.bf16.mxu1 %v4115_v25 }
  0xe3   :  { %2833 = vmatmul.mubr.bf16.vlgmr.msra.gmra.mrb[24].mxu0 %v726_v24 }
  0xe4   :  { %3728 = vmatpush3.bf16.msra.mxu0 %v4116_v28  ;;  %2873 = vmatmul.mubr.bf16.vlgmr.msra.gmra.mrb[24].mxu1 %v748_v30 }
  0xe5   :  { %3729 = vmatprep.subr.bf16.mxu0 %v4118_v31  ;;  %3750 = vmatpush3.bf16.msra.mxu1 %v4117_v33 }
  0xe6   :  { %2912 = vmatprep.mubr.bf16.mxu0 %v747_v34  ;;  %3751 = vmatprep.subr.bf16.mxu1 %v4119_v36 }
  0xe7   :  { %2952 = vmatprep.mubr.bf16.mxu1 %v751_v38 }
  0xe8   :  { %3730 = vmatpush3.bf16.msra.mxu0 %v4120_v37 }
  0xe9   :  { %3731 = vmatprep.subr.bf16.mxu0 %v4122_v39  ;;  %3752 = vmatpush3.bf16.msra.mxu1 %v4121_v40  ;;  %v4148_v39 = vmov 0.0|0.0   ;;  %v2961_v40 = vld [vmem:[%s5113_s3] sm:$0xff] }
  0xea   :  { %3753 = vmatprep.subr.bf16.mxu1 %v4123_v41  ;;  %v2962_v41 = vld [vmem:[%s5113_s3 + $0x8] sm:$0xff] }
  0xec   :  { %3732 = vmatpush3.bf16.msra.mxu0 %v4124_v42  ;;  %v2963_v42 = vld [vmem:[%s5113_s3 + $0x10] sm:$0xff] }
  0xed   :  { %3733 = vmatprep.subr.bf16.mxu0 %v4126_v43  ;;  %3754 = vmatpush3.bf16.msra.mxu1 %v4125_v44  ;;  %v3849_v43 = vpack.c.bf16 %v2962_v41, %v2961_v40  ;;  %v2964_v44 = vld [vmem:[%s5113_s3 + $0x18] sm:$0xff] }
  0xee   :  { %3755 = vmatprep.subr.bf16.mxu1 %v4127_v45  ;;  %v3852_v45 = vpack.c.bf16 %v2964_v44, %v2963_v42 }
  0xf0   :  { %3734 = vmatpush3.bf16.msra.mxu0 %v4128_v46  ;;  %v2965_v46 = vld [vmem:[%s5113_s3 + $0x20] sm:$0xff] }
  0xf1   :  { %3735 = vmatprep.subr.bf16.mxu0 %v4130_v47  ;;  %3756 = vmatpush3.bf16.msra.mxu1 %v4129_v48  ;;  %v2966_v47 = vld [vmem:[%s5113_s3 + $0x28] sm:$0xff] }
  0xf2   :  { %3757 = vmatprep.subr.bf16.mxu1 %v4131_v49  ;;  %v3855_v48 = vpack.c.bf16 %v2966_v47, %v2965_v46  ;;  %v2967_v49 = vld [vmem:[%s5113_s3 + $0x30] sm:$0xff] }
  0xf4   :  { %3736 = vmatpush3.bf16.msra.mxu0 %v4132_v50  ;;  %v2968_v50 = vld [vmem:[%s5113_s3 + $0x38] sm:$0xff] }
  0xf5   :  { %3737 = vmatprep.subr.bf16.mxu0 %v4134_v51  ;;  %3758 = vmatpush3.bf16.msra.mxu1 %v4133_v52  ;;  %v3858_v51 = vpack.c.bf16 %v2968_v50, %v2967_v49  ;;  %v2969_v52 = vld [vmem:[%s5113_s3 + $0x40] sm:$0xff] }
  0xf6   :  { %v3435_v56 = vpop.f32.mrb[0].mxu0  ;;  %3759 = vmatprep.subr.bf16.mxu1 %v4135_v53  ;;  %v2970_v53 = vld [vmem:[%s5113_s3 + $0x48] sm:$0xff] }
  0xf7   :  { %v3436_v58 = vpop.f32.mrb[1].mxu0  ;;  %v3457_v60 = vpop.f32.mrb[0].mxu1 }
  0xf8   :  { %v3437_v61 = vadd.f32 %v3436_v58, %v3435_v56  ;;  %v3438_v62 = vpop.f32.mrb[2].mxu0  ;;  %v3458_v1 = vpop.f32.mrb[1].mxu1  ;;  %3738 = vmatpush3.bf16.msra.mxu0 %v4136_v55  ;;  %v2972_v58 = vld [vmem:[%s5113_s3 + $0x58] sm:$0xff] }
  0xf9   :  { %v3439_v2 = vpop.f32.mrb[3].mxu0  ;;  %v3459_v4 = vadd.f32 %v3458_v1, %v3457_v60  ;;  %v3460_v5 = vpop.f32.mrb[2].mxu1  ;;  %3739 = vmatprep.subr.bf16.mxu0 %v4138_v57  ;;  %3760 = vmatpush3.bf16.msra.mxu1 %v4137_v59  ;;  %v2971_v57 = vld [vmem:[%s5113_s3 + $0x50] sm:$0xff] }
  0xfa   :  { %v2355_v3 = vadd.f32 %v3437_v61, %v3157_v54  ;;  %v3461_v7 = vpop.f32.mrb[3].mxu1  ;;  %3761 = vmatprep.subr.bf16.mxu1 %v4139_v63  ;;  %v3861_v54 = vpack.c.bf16 %v2970_v53, %v2969_v52  ;;  %v3864_v62 = vpack.c.bf16 %v2972_v58, %v2971_v57  ;;  %v2973_v5 = vld [vmem:[%s5113_s3 + $0x60] sm:$0xff] }
  0xfc   :  { %v2395_v9 = vadd.f32 %v3459_v4, %v2355_v3  ;;  %3740 = vmatpush3.bf16.msra.mxu0 %v4140_v0 }
  0xfd   :  { %3741 = vmatprep.subr.bf16.mxu0 %v4142_v6  ;;  %3762 = vmatpush3.bf16.msra.mxu1 %v4141_v8  ;;  %v2974_v6 = vld [vmem:[%s5113_s3 + $0x68] sm:$0xff] }
  0xfe   :  { %3763 = vmatprep.subr.bf16.mxu1 %v4143_v10  ;;  %v3867_v8 = vpack.c.bf16 %v2974_v6, %v2973_v5  ;;  %v4149_v10 = vmov 0.0   ;;  %v3064_v5 = vld [vmem:[%s5114_s5 + $0x30] sm:$0xff]  ;;  %v3065_v6 = vld [vmem:[%s5114_s5 + $0x38] sm:$0xf] }
 0x100   :  { %3742 = vmatpush3.bf16.msra.mxu0 %v4144_v11  ;;  %v3058_v11 = vld [vmem:[%s5114_s5] sm:$0xff] }
 0x101   :  { %3764 = vmatpush3.bf16.msra.mxu1 %v4145_v13  ;;  %3848 = vmatprep.subr.bf16.mxu0 %v4148_v39  ;;  %v3060_v13 = vld [vmem:[%s5114_s5 + $0x10] sm:$0xff] }
 0x102   :  { %3869 = vmatprep.subr.bf16.mxu1 %v4148_v39 }
 0x103   :  { %2913 = vmatmul.mubr.bf16.vlgmr.msra.gmra.mrb[28].mxu0 %v733_v12  ;;  %v3059_v12 = vld [vmem:[%s5114_s5 + $0x8] sm:$0xff] }
 0x104   :  { %2953 = vmatmul.mubr.bf16.vlgmr.msra.gmra.mrb[28].mxu1 %v749_v14  ;;  %3850 = vmatpush3.bf16.msra.mxu0 %v3849_v43  ;;  %v3870_v14 = vpack.c.bf16 %v3059_v12, %v3058_v11 }
 0x105   :  { %3851 = vmatprep.subr.bf16.mxu0 %v4148_v39  ;;  %3826 = vmatprep.mubr.msk.f32.mxu0 %vm4150_vm0, %v4149_v10 }
 0x106   :  { %3845 = vmatprep.mubr.msk.f32.mxu1 %vm4150_vm0, %v4149_v10  ;;  %3871 = vmatpush3.bf16.msra.mxu1 %v3870_v14 }
 0x107   :  { %3872 = vmatprep.subr.bf16.mxu1 %v4148_v39 }
 0x108   :  { %3853 = vmatpush3.bf16.msra.mxu0 %v3852_v45 }
 0x109   :  { %3854 = vmatprep.subr.bf16.mxu0 %v4148_v39 }
 0x10c   :  { %3856 = vmatpush3.bf16.msra.mxu0 %v3855_v48 }
 0x10d   :  { %3857 = vmatprep.subr.bf16.mxu0 %v4148_v39 }
 0x110   :  { %3859 = vmatpush3.bf16.msra.mxu0 %v3858_v51 }
 0x111   :  { %3860 = vmatprep.subr.bf16.mxu0 %v4148_v39 }
 0x114   :  { %3862 = vmatpush3.bf16.msra.mxu0 %v3861_v54 }
 0x115   :  { %3863 = vmatprep.subr.bf16.mxu0 %v4148_v39 }
 0x116   :  { %v3479_v15 = vpop.f32.mrb[4].mxu0 }
 0x117   :  { %v3480_v16 = vpop.f32.mrb[5].mxu0  ;;  %v3501_v17 = vpop.f32.mrb[4].mxu1 }
 0x118   :  { %v3481_v18 = vadd.f32 %v3480_v16, %v3479_v15  ;;  %v3482_v19 = vpop.f32.mrb[6].mxu0  ;;  %v3502_v20 = vpop.f32.mrb[5].mxu1  ;;  %3865 = vmatpush3.bf16.msra.mxu0 %v3864_v62  ;;  %v3061_v15 = vld [vmem:[%s5114_s5 + $0x18] sm:$0xff] }
 0x119   :  { %v3483_v21 = vpop.f32.mrb[7].mxu0  ;;  %v3503_v35 = vadd.f32 %v3502_v20, %v3501_v17  ;;  %v3504_v23 = vpop.f32.mrb[6].mxu1  ;;  %3866 = vmatprep.subr.bf16.mxu0 %v4148_v39  ;;  %v3873_v16 = vpack.c.bf16 %v3061_v15, %v3060_v13  ;;  %v3062_v17 = vld [vmem:[%s5114_s5 + $0x20] sm:$0xff] }
 0x11a   :  { %v2435_v22 = vadd.f32 %v3481_v18, %v2395_v9  ;;  %v3505_v24 = vpop.f32.mrb[7].mxu1  ;;  %v2975_v9 = vld [vmem:[%s5113_s3 + $0x70] sm:$0xff]  ;;  %v3063_v18 = vld [vmem:[%s5114_s5 + $0x28] sm:$0xff] }
 0x11b   :  { %3874 = vmatpush3.bf16.msra.mxu1 %v3873_v16  ;;  %v3876_v19 = vpack.c.bf16 %v3063_v18, %v3062_v17 }
 0x11c   :  { %v2475_v25 = vadd.f32 %v3503_v35, %v2435_v22  ;;  %3868 = vmatpush3.bf16.msra.mxu0 %v3867_v8  ;;  %3875 = vmatprep.subr.bf16.mxu1 %v4148_v39  ;;  %v12_v8 = vstv %s5115_s6 }
 0x11d   :  { %3824 = vmatprep.subr.mxu0 %v4149_v10  ;;  %13 = vst [vmem:[#allocation2] sm:$0x1] %v12_v8 }
 0x11f   :  { %3877 = vmatpush3.bf16.msra.mxu1 %v3876_v19 }
 0x120   :  { %3825 = vmatpush3.msra.mxu0 %v2975_v9  ;;  %3878 = vmatprep.subr.bf16.mxu1 %v4148_v39  ;;  %v3414_v9 = vld [vmem:[%s5116_s4] ss:$0 sm:$0xff] }
 0x124   :  { %v3416_v14 = vld [vmem:[#allocation2] ss:$0 sm:$0xff] }
 0x136   :  { %v3523_v26 = vpop.f32.mrb[8].mxu0 }
 0x137   :  { %v3524_v27 = vpop.f32.mrb[9].mxu0  ;;  %v3545_v28 = vpop.f32.mrb[8].mxu1 }
 0x138   :  { %v3525_v29 = vadd.f32 %v3524_v27, %v3523_v26  ;;  %v3526_v30 = vpop.f32.mrb[10].mxu0  ;;  %v3546_v31 = vpop.f32.mrb[9].mxu1 }
 0x139   :  { %v3527_v32 = vpop.f32.mrb[11].mxu0  ;;  %v3547_v34 = vadd.f32 %v3546_v31, %v3545_v28  ;;  %v3548_v36 = vpop.f32.mrb[10].mxu1 }
 0x13a   :  { %v2515_v33 = vadd.f32 %v3525_v29, %v2475_v25  ;;  %v3549_v37 = vpop.f32.mrb[11].mxu1 }
 0x13c   :  { %v2555_v38 = vadd.f32 %v3547_v34, %v2515_v33 }
 0x156   :  { %v3567_v55 = vpop.f32.mrb[12].mxu0 }
 0x157   :  { %v3568_v56 = vpop.f32.mrb[13].mxu0  ;;  %v3589_v59 = vpop.f32.mrb[12].mxu1 }
 0x158   :  { %v3569_v60 = vadd.f32 %v3568_v56, %v3567_v55  ;;  %v3570_v61 = vpop.f32.mrb[14].mxu0  ;;  %v3590_v63 = vpop.f32.mrb[13].mxu1 }
 0x159   :  { %v3571_v0 = vpop.f32.mrb[15].mxu0  ;;  %v3591_v2 = vadd.f32 %v3590_v63, %v3589_v59  ;;  %v3592_v3 = vpop.f32.mrb[14].mxu1 }
 0x15a   :  { %v2595_v1 = vadd.f32 %v3569_v60, %v2555_v38  ;;  %v3593_v4 = vpop.f32.mrb[15].mxu1 }
 0x15c   :  { %v2635_v7 = vadd.f32 %v3591_v2, %v2595_v1 }
 0x176   :  { %v3611_v20 = vpop.f32.mrb[16].mxu0 }
 0x177   :  { %v3612_v21 = vpop.f32.mrb[17].mxu0  ;;  %v3633_v22 = vpop.f32.mrb[16].mxu1 }
 0x178   :  { %v3613_v35 = vadd.f32 %v3612_v21, %v3611_v20  ;;  %v3614_v23 = vpop.f32.mrb[18].mxu0  ;;  %v3634_v24 = vpop.f32.mrb[17].mxu1 }
 0x179   :  { %v3615_v25 = vpop.f32.mrb[19].mxu0  ;;  %v3635_v27 = vadd.f32 %v3634_v24, %v3633_v22  ;;  %v3636_v28 = vpop.f32.mrb[18].mxu1 }
 0x17a   :  { %v2675_v26 = vadd.f32 %v3613_v35, %v2635_v7  ;;  %v3637_v29 = vpop.f32.mrb[19].mxu1  ;;  %v3879_v7 = vpack.c.bf16 %v3065_v6, %v3064_v5 }
 0x17c   :  { %v2715_v30 = vadd.f32 %v3635_v27, %v2675_v26  ;;  %3881 = vmatpush3.bf16.msk.msra.mxu1 %vm3880_vm4, %v3879_v7 }
 0x196   :  { %v3655_v31 = vpop.f32.mrb[20].mxu0 }
 0x197   :  { %v3656_v32 = vpop.f32.mrb[21].mxu0  ;;  %v3677_v33 = vpop.f32.mrb[20].mxu1 }
 0x198   :  { %v3657_v34 = vadd.f32 %v3656_v32, %v3655_v31  ;;  %v3658_v36 = vpop.f32.mrb[22].mxu0  ;;  %v3678_v37 = vpop.f32.mrb[21].mxu1 }
 0x199   :  { %v3659_v38 = vpop.f32.mrb[23].mxu0  ;;  %v3679_v40 = vadd.f32 %v3678_v37, %v3677_v33  ;;  %v3680_v41 = vpop.f32.mrb[22].mxu1 }
 0x19a   :  { %v2755_v39 = vadd.f32 %v3657_v34, %v2715_v30  ;;  %v3681_v42 = vpop.f32.mrb[23].mxu1 }
 0x19c   :  { %v2795_v43 = vadd.f32 %v3679_v40, %v2755_v39 }
 0x1b6   :  { %v3699_v44 = vpop.f32.mrb[24].mxu0 }
 0x1b7   :  { %v3700_v45 = vpop.f32.mrb[25].mxu0  ;;  %v3721_v46 = vpop.f32.mrb[24].mxu1 }
 0x1b8   :  { %v3701_v47 = vadd.f32 %v3700_v45, %v3699_v44  ;;  %v3702_v48 = vpop.f32.mrb[26].mxu0  ;;  %v3722_v49 = vpop.f32.mrb[25].mxu1 }
 0x1b9   :  { %v3703_v50 = vpop.f32.mrb[27].mxu0  ;;  %v3723_v52 = vadd.f32 %v3722_v49, %v3721_v46  ;;  %v3724_v53 = vpop.f32.mrb[26].mxu1 }
 0x1ba   :  { %v2835_v51 = vadd.f32 %v3701_v47, %v2795_v43  ;;  %v3725_v54 = vpop.f32.mrb[27].mxu1 }
 0x1bc   :  { %v2875_v55 = vadd.f32 %v3723_v52, %v2835_v51 }
 0x1d6   :  { %v3743_v56 = vpop.f32.mrb[28].mxu0 }
 0x1d7   :  { %v3744_v57 = vpop.f32.mrb[29].mxu0  ;;  %v3765_v58 = vpop.f32.mrb[28].mxu1 }
 0x1d8   :  { %v3745_v59 = vadd.f32 %v3744_v57, %v3743_v56  ;;  %v3746_v60 = vpop.f32.mrb[30].mxu0  ;;  %v3766_v61 = vpop.f32.mrb[29].mxu1 }
 0x1d9   :  { %v3747_v62 = vpop.f32.mrb[31].mxu0  ;;  %v3767_v0 = vadd.f32 %v3766_v61, %v3765_v58  ;;  %v3768_v1 = vpop.f32.mrb[30].mxu1 }
 0x1da   :  { %v2915_v63 = vadd.f32 %v3745_v59, %v2875_v55  ;;  %v3769_v2 = vpop.f32.mrb[31].mxu1 }
 0x1dc   :  { %v2955_v3 = vadd.f32 %v3767_v0, %v2915_v63 }
 0x1de   :  { %v2960_v4 = vmax.f32 %v2955_v3, 0.0 }
 0x1e0   :  { %3827 = vmatmul.mubr.msk.f32.vlgmr.msra.gmra.mrb[32].mxu0 %vm2983_vm1, %v2960_v4 }
 0x2b3   :  { %v3053_v10 = vpop.f32.mrb[32].mxu0 }
 0x2b4   :  { %v3054_v11 = vadd.f32 %v3414_v9, %v3053_v10  ;;  %v3828_v12 = vpop.f32.mrb[33].mxu0 }
 0x2b6   :  { %v3057_v13 = vmax.f32 %v3054_v11, 0.0 }
 0x2b8   :  { %3846 = vmatmul.mubr.msk.f32.vlgmr.msra.gmra.mrb[32].mxu1 %vm3073_vm5, %v3057_v13 }
 0x38b   :  { %v3147_v15 = vpop.f32.mrb[32].mxu1 }
 0x38c   :  { %v3148_v16 = vadd.f32 %v3416_v14, %v3147_v15  ;;  %v3847_v17 = vpop.f32.mrb[33].mxu1 }
 0x38e   :  { %3152 = vst.msk [vmem:[%s5117_s7] sm:$0x3] %vm3151_vm6, %v3148_v16 }

</bundles_post_ra>
